<compile_context>
chip_gen: v7x
topology: tpu7x:2x2x1
jax: 0.10.0
libtpu: 0.0.40
codegen_flags: <defaults>
</compile_context>

<pallas_src>
import functools

import jax
import jax.numpy as jnp
from jax.experimental import pallas as pl
from jax.experimental.pallas import tpu as pltpu

NEG_SLOPE = 0.2   # DGL GATv2Conv default negative_slope
NUM_HEADS = 4
HID = 8           # hid_size (per-head out_feats)
IN_SIZE = 8
N_NODES = 16
N_EDGES = 8
HD = NUM_HEADS * HID  # 32


def _leaky_relu(x):
    return jnp.where(x >= 0, x, NEG_SLOPE * x)


def _elu(x):
    # exp only ever sees clamped (<= 0) inputs -> no inf on the dead branch.
    return jnp.where(x > 0, x, jnp.exp(jnp.minimum(x, 0.0)) - 1.0)


# ------------------------- one GATv2Conv layer (in-kernel) -------------------
def _gat_layer(hT, adj_ref, wT_ref, bT_ref, attn_ref, *, num_heads, out_feats):
    """One GATv2Conv layer on transposed features.

    hT       : [F_in, N]   node features, nodes on lanes
    adj_ref  : [N, N] int8 adj[i, j] = 1 iff edge j -> i
    wT_ref   : [2*H*D, F_in]  (Wsrc | Wdst) fused, pre-transposed
    bT_ref   : [2*H*D, 1]
    attn_ref : [H, D] in SMEM (scalar reads)
    returns  : [H*D, N]  ELU(concat_heads(GATv2(h)))  transposed
    """
    hd = num_heads * out_feats

    # fused src/dst projection: featT = ([Wsrc|Wdst]^T) @ hT + b  -> [2HD, N]
    featT = jnp.dot(wT_ref[...], hT, preferred_element_type=jnp.float32) + bT_ref[...]
    fsT = featT[:hd, :]                       # [HD, N]  src feats, nodes on lanes
    fd = jnp.transpose(featT[hd:, :])         # [N, HD]  dst feats, nodes on sublanes

    # attention logits e[h, i, j] = sum_d a[h,d] * leaky_relu(fd[i, hD+d] + fs[j, hD+d])
    # built as lane-dense [N_dst, N_src] slabs; D-reduction = scalar FMA chain.
    z = []
    for f in range(hd):
        pair = fd[:, f:f + 1] + fsT[f:f + 1, :]          # [N, N] (col + row bcast)
        z.append(_leaky_relu(pair))
    e_heads = []
    for h in range(num_heads):
        acc = attn_ref[h, 0] * z[h * out_feats]
        for d in range(1, out_feats):
            acc = acc + attn_ref[h, d] * z[h * out_feats + d]
        e_heads.append(acc)
    e = jnp.stack(e_heads, axis=0)                        # [H, N, N]

    # masked edge_softmax over incoming edges (src axis = lanes), all heads at once
    mask = (adj_ref[...] != 0)[None, :, :]                # [1, N, N]
    e = jnp.where(mask, e, -1e30)
    m = jnp.max(e, axis=-1, keepdims=True)                # [H, N, 1]
    p = jnp.where(mask, jnp.exp(e - m), 0.0)
    denom = jnp.sum(p, axis=-1, keepdims=True)
    alpha = p / jnp.maximum(denom, 1e-30)                 # zero in-degree -> all zeros

    # aggregation (all heads, one batched MXU op):
    #   rstT[h*D+d, i] = sum_j alpha[h, i, j] * fsT[h*D+d, j]
    fsT3 = jnp.stack([fsT[h * out_feats:(h + 1) * out_feats, :]
                      for h in range(num_heads)], axis=0)               # [H, D, N]
    rstT3 = jnp.einsum('hdj,hij->hdi', fsT3, alpha,
                       preferred_element_type=jnp.float32)              # [H, D, N]
    rstT = jnp.concatenate([rstT3[h] for h in range(num_heads)], axis=0)  # [HD, N]
    return _elu(rstT)                                     # == elu(heads flattened).T


# ------------------------------ fused forward kernel -------------------------
def gatv2_fused_kernel(
        adj1_ref, adj2_ref, adj3_ref,            # [N, N] int8
        attn1_ref, attn2_ref, attn3_ref,         # [H, D] f32 (SMEM)
        xT_ref,                                  # [F_in, N]
        w1_ref, b1_ref, w2_ref, b2_ref, w3_ref, b3_ref,   # per-layer fused W/b (transposed)
        pw_ref, pb_ref,                          # projection  [HID, HD], [HID, 1]
        mw1_ref, mb1_ref, mw2_ref, mb2_ref, mw3_ref, mb3_ref,  # predictor MLP (transposed)
        src_ref, dst_ref,                        # [1, 2E] int32 (pos ++ neg)
        out_ref,                                 # [1, 2E]
        *, num_heads, out_feats):
    hT = xT_ref[...]
    hT = _gat_layer(hT, adj1_ref, w1_ref, b1_ref, attn1_ref,
                    num_heads=num_heads, out_feats=out_feats)
    hT = _gat_layer(hT, adj2_ref, w2_ref, b2_ref, attn2_ref,
                    num_heads=num_heads, out_feats=out_feats)
    hT = _gat_layer(hT, adj3_ref, w3_ref, b3_ref, attn3_ref,
                    num_heads=num_heads, out_feats=out_feats)

    # projection -> [HID, N]
    hT = jnp.dot(pw_ref[...], hT, preferred_element_type=jnp.float32) + pb_ref[...]

    # gather h[:, src] and h[:, dst] for all (pos ++ neg) edges via one-hot matmul
    n = hT.shape[1]
    ne = src_ref.shape[1]
    node_iota = jax.lax.broadcasted_iota(jnp.int32, (n, ne), 0)          # [N, 2E]
    sel_src = (node_iota == src_ref[...]).astype(jnp.float32)
    sel_dst = (node_iota == dst_ref[...]).astype(jnp.float32)
    hs = jnp.dot(hT, sel_src, preferred_element_type=jnp.float32)        # [HID, 2E]
    hd_ = jnp.dot(hT, sel_dst, preferred_element_type=jnp.float32)       # [HID, 2E]
    x = hs * hd_

    # predictor MLP (both pos and neg batches in one pass)
    x = jnp.maximum(
        jnp.dot(mw1_ref[...], x, preferred_element_type=jnp.float32) + mb1_ref[...], 0.0)
    x = jnp.maximum(
        jnp.dot(mw2_ref[...], x, preferred_element_type=jnp.float32) + mb2_ref[...], 0.0)
    out_ref[...] = (
        jnp.dot(mw3_ref[...], x, preferred_element_type=jnp.float32) + mb3_ref[...])


# --------------------------------- wrapper -----------------------------------
def _vmem():
    return pl.BlockSpec(memory_space=pltpu.MemorySpace.VMEM)


def _smem():
    return pl.BlockSpec(memory_space=pltpu.MemorySpace.SMEM)


def gatv2_forward(params, adjs, x, pos_src, pos_dst, neg_src, neg_dst):
    e = pos_src.shape[0]

    # one-time layout plumbing (tiny XLA ops outside the kernel): fuse Wsrc|Wdst,
    # pre-transpose everything so the kernel works in [feat, node] orientation.
    layer_args = []
    attn_args = []
    for lp in params["layers"]:
        wcatT = jnp.concatenate([lp["wsrc"], lp["wdst"]], axis=1).T      # [2HD, Fin]
        bcatT = jnp.concatenate([lp["bsrc"], lp["bdst"]], axis=1).T      # [2HD, 1]
        layer_args += [wcatT, bcatT]
        attn_args.append(lp["attn"])
    projwT = params["proj_w"].T
    projbT = params["proj_b"].T
    predT = [params["w1"].T, params["b1"].T, params["w2"].T, params["b2"].T,
             params["w3"].T, params["b3"].T]

    adjs8 = [a.astype(jnp.int8) for a in adjs]
    src = jnp.concatenate([pos_src, neg_src]).astype(jnp.int32).reshape(1, 2 * e)
    dst = jnp.concatenate([pos_dst, neg_dst]).astype(jnp.int32).reshape(1, 2 * e)

    kern = functools.partial(gatv2_fused_kernel,
                             num_heads=NUM_HEADS, out_feats=HID)
    in_specs = [_vmem()] * 3 + [_smem()] * 3 + [_vmem()] * 17

    scores = pl.pallas_call(
        kern,
        out_shape=jax.ShapeDtypeStruct((1, 2 * e), jnp.float32),
        in_specs=in_specs,
        out_specs=_vmem(),
    )(adjs8[0], adjs8[1], adjs8[2],
      attn_args[0], attn_args[1], attn_args[2],
      x.T,
      *layer_args, projwT, projbT, *predT,
      src, dst)

    h_pos = scores[0, :e].reshape(e, 1)
    h_neg = scores[0, e:].reshape(e, 1)
    return h_pos, h_neg


# ----------------------------------- main ------------------------------------
def _init_params(key):
    hd = NUM_HEADS * HID
    ks = list(jax.random.split(key, 24))
    nxt = iter(ks).__next__

    def lin(fan_in, fan_out):
        w = 0.1 * jax.random.normal(nxt(), (fan_in, fan_out), jnp.float32)
        b = 0.1 * jax.random.normal(nxt(), (1, fan_out), jnp.float32)
        return w, b

    layers = []
    in_dims = [IN_SIZE, hd, hd]
    for fin in in_dims:
        wsrc, bsrc = lin(fin, hd)
        wdst, bdst = lin(fin, hd)
        attn = 0.1 * jax.random.normal(nxt(), (NUM_HEADS, HID), jnp.float32)
        layers.append(dict(wsrc=wsrc, bsrc=bsrc, wdst=wdst, bdst=bdst, attn=attn))

    proj_w, proj_b = lin(hd, HID)
    w1, b1 = lin(HID, HID)
    w2, b2 = lin(HID, HID)
    w3, b3 = lin(HID, 1)
    return dict(layers=layers, proj_w=proj_w, proj_b=proj_b,
                w1=w1, b1=b1, w2=w2, b2=b2, w3=w3, b3=b3)


if __name__ == "__main__":
    key = jax.random.PRNGKey(0)
    kp, kx, ka, ke = jax.random.split(key, 4)

    params = _init_params(kp)
    x = jax.random.normal(kx, (N_NODES, IN_SIZE), jnp.float32)

    # three message-flow blocks (dense adjacency masks, dst x src)
    adj_keys = jax.random.split(ka, 3)
    adjs = [jax.random.bernoulli(k, 0.3, (N_NODES, N_NODES)).astype(jnp.float32)
            for k in adj_keys]

    k1, k2, k3, k4 = jax.random.split(ke, 4)
    pos_src = jax.random.randint(k1, (N_EDGES,), 0, N_NODES)
    pos_dst = jax.random.randint(k2, (N_EDGES,), 0, N_NODES)
    neg_src = jax.random.randint(k3, (N_EDGES,), 0, N_NODES)
    neg_dst = jax.random.randint(k4, (N_EDGES,), 0, N_NODES)

    h_pos, h_neg = jax.jit(gatv2_forward)(params, adjs, x,
                                          pos_src, pos_dst, neg_src, neg_dst)
    jax.block_until_ready((h_pos, h_neg))
    assert h_pos.shape == (N_EDGES, 1) and h_neg.shape == (N_EDGES, 1)
    assert bool(jnp.all(jnp.isfinite(h_pos))) and bool(jnp.all(jnp.isfinite(h_neg)))
    print("KERNEL_OK")
</pallas_src>

<mosaic_0001>
module attributes {stable_mosaic.version = 11 : i64} {
  func.func @gatv2_fused_kernel(%arg0: memref<16x16xi8, #tpu.memory_space<vmem>>, %arg1: memref<16x16xi8, #tpu.memory_space<vmem>>, %arg2: memref<16x16xi8, #tpu.memory_space<vmem>>, %arg3: memref<4x8xf32, #tpu.memory_space<smem>>, %arg4: memref<4x8xf32, #tpu.memory_space<smem>>, %arg5: memref<4x8xf32, #tpu.memory_space<smem>>, %arg6: memref<8x16xf32, #tpu.memory_space<vmem>>, %arg7: memref<64x8xf32, #tpu.memory_space<vmem>>, %arg8: memref<64x1xf32, #tpu.memory_space<vmem>>, %arg9: memref<64x32xf32, #tpu.memory_space<vmem>>, %arg10: memref<64x1xf32, #tpu.memory_space<vmem>>, %arg11: memref<64x32xf32, #tpu.memory_space<vmem>>, %arg12: memref<64x1xf32, #tpu.memory_space<vmem>>, %arg13: memref<8x32xf32, #tpu.memory_space<vmem>>, %arg14: memref<8x1xf32, #tpu.memory_space<vmem>>, %arg15: memref<8x8xf32, #tpu.memory_space<vmem>>, %arg16: memref<8x1xf32, #tpu.memory_space<vmem>>, %arg17: memref<8x8xf32, #tpu.memory_space<vmem>>, %arg18: memref<8x1xf32, #tpu.memory_space<vmem>>, %arg19: memref<1x8xf32, #tpu.memory_space<vmem>>, %arg20: memref<1x1xf32, #tpu.memory_space<vmem>>, %arg21: memref<1x16xi32, #tpu.memory_space<vmem>>, %arg22: memref<1x16xi32, #tpu.memory_space<vmem>>, %arg23: memref<1x16xf32, #tpu.memory_space<vmem>>) attributes {dimension_semantics = [], scalar_prefetch = 0 : i64, scratch_operands = 0 : i64, tpu.core_type = #tpu.core_type<tc>} {
    %c0 = arith.constant 0 : index
    %c0_0 = arith.constant 0 : index
    %0 = vector.load %arg6[%c0, %c0_0] : memref<8x16xf32, #tpu.memory_space<vmem>>, vector<8x16xf32>
    %c0_1 = arith.constant 0 : index
    %c0_2 = arith.constant 0 : index
    %1 = vector.load %arg7[%c0_1, %c0_2] : memref<64x8xf32, #tpu.memory_space<vmem>>, vector<64x8xf32>
    %cst = arith.constant dense<0.000000e+00> : vector<64x16xf32>
    %2 = tpu.matmul %1, %0, %cst {dimension_numbers = #tpu.dot_dimension_numbers<[1], [0], [0], [1], [0, 0, 1, 1], [], []>} : vector<64x8xf32>, vector<8x16xf32>, vector<64x16xf32> -> vector<64x16xf32>
    %c0_3 = arith.constant 0 : index
    %c0_4 = arith.constant 0 : index
    %3 = vector.load %arg8[%c0_3, %c0_4] : memref<64x1xf32, #tpu.memory_space<vmem>>, vector<64x1xf32>
    %4 = vector.broadcast %3 : vector<64x1xf32> to vector<64x16xf32>
    %5 = arith.addf %2, %4 : vector<64x16xf32>
    %6 = vector.extract_strided_slice %5 {offsets = [0, 0], sizes = [32, 16], strides = [1, 1]} : vector<64x16xf32> to vector<32x16xf32>
    %7 = vector.extract_strided_slice %5 {offsets = [32, 0], sizes = [32, 16], strides = [1, 1]} : vector<64x16xf32> to vector<32x16xf32>
    %8 = tpu.transpose %7, [1, 0] : vector<32x16xf32> -> vector<16x32xf32>
    %9 = vector.extract_strided_slice %8 {offsets = [0, 0], sizes = [16, 1], strides = [1, 1]} : vector<16x32xf32> to vector<16x1xf32>
    %10 = vector.extract_strided_slice %6 {offsets = [0, 0], sizes = [1, 16], strides = [1, 1]} : vector<32x16xf32> to vector<1x16xf32>
    %11 = vector.broadcast %9 : vector<16x1xf32> to vector<16x16xf32>
    %12 = vector.broadcast %10 : vector<1x16xf32> to vector<16x16xf32>
    %13 = arith.addf %11, %12 : vector<16x16xf32>
    %cst_5 = arith.constant 0.000000e+00 : f32
    %14 = vector.broadcast %cst_5 : f32 to vector<16x16xf32>
    %15 = arith.cmpf oge, %13, %14 : vector<16x16xf32>
    %cst_6 = arith.constant 2.000000e-01 : f32
    %16 = vector.broadcast %cst_6 : f32 to vector<16x16xf32>
    %17 = arith.mulf %16, %13 : vector<16x16xf32>
    %18 = arith.select %15, %13, %17 : vector<16x16xi1>, vector<16x16xf32>
    %19 = vector.extract_strided_slice %8 {offsets = [0, 1], sizes = [16, 1], strides = [1, 1]} : vector<16x32xf32> to vector<16x1xf32>
    %20 = vector.extract_strided_slice %6 {offsets = [1, 0], sizes = [1, 16], strides = [1, 1]} : vector<32x16xf32> to vector<1x16xf32>
    %21 = vector.broadcast %19 : vector<16x1xf32> to vector<16x16xf32>
    %22 = vector.broadcast %20 : vector<1x16xf32> to vector<16x16xf32>
    %23 = arith.addf %21, %22 : vector<16x16xf32>
    %cst_7 = arith.constant 0.000000e+00 : f32
    %24 = vector.broadcast %cst_7 : f32 to vector<16x16xf32>
    %25 = arith.cmpf oge, %23, %24 : vector<16x16xf32>
    %cst_8 = arith.constant 2.000000e-01 : f32
    %26 = vector.broadcast %cst_8 : f32 to vector<16x16xf32>
    %27 = arith.mulf %26, %23 : vector<16x16xf32>
    %28 = arith.select %25, %23, %27 : vector<16x16xi1>, vector<16x16xf32>
    %29 = vector.extract_strided_slice %8 {offsets = [0, 2], sizes = [16, 1], strides = [1, 1]} : vector<16x32xf32> to vector<16x1xf32>
    %30 = vector.extract_strided_slice %6 {offsets = [2, 0], sizes = [1, 16], strides = [1, 1]} : vector<32x16xf32> to vector<1x16xf32>
    %31 = vector.broadcast %29 : vector<16x1xf32> to vector<16x16xf32>
    %32 = vector.broadcast %30 : vector<1x16xf32> to vector<16x16xf32>
    %33 = arith.addf %31, %32 : vector<16x16xf32>
    %cst_9 = arith.constant 0.000000e+00 : f32
    %34 = vector.broadcast %cst_9 : f32 to vector<16x16xf32>
    %35 = arith.cmpf oge, %33, %34 : vector<16x16xf32>
    %cst_10 = arith.constant 2.000000e-01 : f32
    %36 = vector.broadcast %cst_10 : f32 to vector<16x16xf32>
    %37 = arith.mulf %36, %33 : vector<16x16xf32>
    %38 = arith.select %35, %33, %37 : vector<16x16xi1>, vector<16x16xf32>
    %39 = vector.extract_strided_slice %8 {offsets = [0, 3], sizes = [16, 1], strides = [1, 1]} : vector<16x32xf32> to vector<16x1xf32>
    %40 = vector.extract_strided_slice %6 {offsets = [3, 0], sizes = [1, 16], strides = [1, 1]} : vector<32x16xf32> to vector<1x16xf32>
    %41 = vector.broadcast %39 : vector<16x1xf32> to vector<16x16xf32>
    %42 = vector.broadcast %40 : vector<1x16xf32> to vector<16x16xf32>
    %43 = arith.addf %41, %42 : vector<16x16xf32>
    %cst_11 = arith.constant 0.000000e+00 : f32
    %44 = vector.broadcast %cst_11 : f32 to vector<16x16xf32>
    %45 = arith.cmpf oge, %43, %44 : vector<16x16xf32>
    %cst_12 = arith.constant 2.000000e-01 : f32
    %46 = vector.broadcast %cst_12 : f32 to vector<16x16xf32>
    %47 = arith.mulf %46, %43 : vector<16x16xf32>
    %48 = arith.select %45, %43, %47 : vector<16x16xi1>, vector<16x16xf32>
    %49 = vector.extract_strided_slice %8 {offsets = [0, 4], sizes = [16, 1], strides = [1, 1]} : vector<16x32xf32> to vector<16x1xf32>
    %50 = vector.extract_strided_slice %6 {offsets = [4, 0], sizes = [1, 16], strides = [1, 1]} : vector<32x16xf32> to vector<1x16xf32>
    %51 = vector.broadcast %49 : vector<16x1xf32> to vector<16x16xf32>
    %52 = vector.broadcast %50 : vector<1x16xf32> to vector<16x16xf32>
    %53 = arith.addf %51, %52 : vector<16x16xf32>
    %cst_13 = arith.constant 0.000000e+00 : f32
    %54 = vector.broadcast %cst_13 : f32 to vector<16x16xf32>
    %55 = arith.cmpf oge, %53, %54 : vector<16x16xf32>
    %cst_14 = arith.constant 2.000000e-01 : f32
    %56 = vector.broadcast %cst_14 : f32 to vector<16x16xf32>
    %57 = arith.mulf %56, %53 : vector<16x16xf32>
    %58 = arith.select %55, %53, %57 : vector<16x16xi1>, vector<16x16xf32>
    %59 = vector.extract_strided_slice %8 {offsets = [0, 5], sizes = [16, 1], strides = [1, 1]} : vector<16x32xf32> to vector<16x1xf32>
    %60 = vector.extract_strided_slice %6 {offsets = [5, 0], sizes = [1, 16], strides = [1, 1]} : vector<32x16xf32> to vector<1x16xf32>
    %61 = vector.broadcast %59 : vector<16x1xf32> to vector<16x16xf32>
    %62 = vector.broadcast %60 : vector<1x16xf32> to vector<16x16xf32>
    %63 = arith.addf %61, %62 : vector<16x16xf32>
    %cst_15 = arith.constant 0.000000e+00 : f32
    %64 = vector.broadcast %cst_15 : f32 to vector<16x16xf32>
    %65 = arith.cmpf oge, %63, %64 : vector<16x16xf32>
    %cst_16 = arith.constant 2.000000e-01 : f32
    %66 = vector.broadcast %cst_16 : f32 to vector<16x16xf32>
    %67 = arith.mulf %66, %63 : vector<16x16xf32>
    %68 = arith.select %65, %63, %67 : vector<16x16xi1>, vector<16x16xf32>
    %69 = vector.extract_strided_slice %8 {offsets = [0, 6], sizes = [16, 1], strides = [1, 1]} : vector<16x32xf32> to vector<16x1xf32>
    %70 = vector.extract_strided_slice %6 {offsets = [6, 0], sizes = [1, 16], strides = [1, 1]} : vector<32x16xf32> to vector<1x16xf32>
    %71 = vector.broadcast %69 : vector<16x1xf32> to vector<16x16xf32>
    %72 = vector.broadcast %70 : vector<1x16xf32> to vector<16x16xf32>
    %73 = arith.addf %71, %72 : vector<16x16xf32>
    %cst_17 = arith.constant 0.000000e+00 : f32
    %74 = vector.broadcast %cst_17 : f32 to vector<16x16xf32>
    %75 = arith.cmpf oge, %73, %74 : vector<16x16xf32>
    %cst_18 = arith.constant 2.000000e-01 : f32
    %76 = vector.broadcast %cst_18 : f32 to vector<16x16xf32>
    %77 = arith.mulf %76, %73 : vector<16x16xf32>
    %78 = arith.select %75, %73, %77 : vector<16x16xi1>, vector<16x16xf32>
    %79 = vector.extract_strided_slice %8 {offsets = [0, 7], sizes = [16, 1], strides = [1, 1]} : vector<16x32xf32> to vector<16x1xf32>
    %80 = vector.extract_strided_slice %6 {offsets = [7, 0], sizes = [1, 16], strides = [1, 1]} : vector<32x16xf32> to vector<1x16xf32>
    %81 = vector.broadcast %79 : vector<16x1xf32> to vector<16x16xf32>
    %82 = vector.broadcast %80 : vector<1x16xf32> to vector<16x16xf32>
    %83 = arith.addf %81, %82 : vector<16x16xf32>
    %cst_19 = arith.constant 0.000000e+00 : f32
    %84 = vector.broadcast %cst_19 : f32 to vector<16x16xf32>
    %85 = arith.cmpf oge, %83, %84 : vector<16x16xf32>
    %cst_20 = arith.constant 2.000000e-01 : f32
    %86 = vector.broadcast %cst_20 : f32 to vector<16x16xf32>
    %87 = arith.mulf %86, %83 : vector<16x16xf32>
    %88 = arith.select %85, %83, %87 : vector<16x16xi1>, vector<16x16xf32>
    %89 = vector.extract_strided_slice %8 {offsets = [0, 8], sizes = [16, 1], strides = [1, 1]} : vector<16x32xf32> to vector<16x1xf32>
    %90 = vector.extract_strided_slice %6 {offsets = [8, 0], sizes = [1, 16], strides = [1, 1]} : vector<32x16xf32> to vector<1x16xf32>
    %91 = vector.broadcast %89 : vector<16x1xf32> to vector<16x16xf32>
    %92 = vector.broadcast %90 : vector<1x16xf32> to vector<16x16xf32>
    %93 = arith.addf %91, %92 : vector<16x16xf32>
    %cst_21 = arith.constant 0.000000e+00 : f32
    %94 = vector.broadcast %cst_21 : f32 to vector<16x16xf32>
    %95 = arith.cmpf oge, %93, %94 : vector<16x16xf32>
    %cst_22 = arith.constant 2.000000e-01 : f32
    %96 = vector.broadcast %cst_22 : f32 to vector<16x16xf32>
    %97 = arith.mulf %96, %93 : vector<16x16xf32>
    %98 = arith.select %95, %93, %97 : vector<16x16xi1>, vector<16x16xf32>
    %99 = vector.extract_strided_slice %8 {offsets = [0, 9], sizes = [16, 1], strides = [1, 1]} : vector<16x32xf32> to vector<16x1xf32>
    %100 = vector.extract_strided_slice %6 {offsets = [9, 0], sizes = [1, 16], strides = [1, 1]} : vector<32x16xf32> to vector<1x16xf32>
    %101 = vector.broadcast %99 : vector<16x1xf32> to vector<16x16xf32>
    %102 = vector.broadcast %100 : vector<1x16xf32> to vector<16x16xf32>
    %103 = arith.addf %101, %102 : vector<16x16xf32>
    %cst_23 = arith.constant 0.000000e+00 : f32
    %104 = vector.broadcast %cst_23 : f32 to vector<16x16xf32>
    %105 = arith.cmpf oge, %103, %104 : vector<16x16xf32>
    %cst_24 = arith.constant 2.000000e-01 : f32
    %106 = vector.broadcast %cst_24 : f32 to vector<16x16xf32>
    %107 = arith.mulf %106, %103 : vector<16x16xf32>
    %108 = arith.select %105, %103, %107 : vector<16x16xi1>, vector<16x16xf32>
    %109 = vector.extract_strided_slice %8 {offsets = [0, 10], sizes = [16, 1], strides = [1, 1]} : vector<16x32xf32> to vector<16x1xf32>
    %110 = vector.extract_strided_slice %6 {offsets = [10, 0], sizes = [1, 16], strides = [1, 1]} : vector<32x16xf32> to vector<1x16xf32>
    %111 = vector.broadcast %109 : vector<16x1xf32> to vector<16x16xf32>
    %112 = vector.broadcast %110 : vector<1x16xf32> to vector<16x16xf32>
    %113 = arith.addf %111, %112 : vector<16x16xf32>
    %cst_25 = arith.constant 0.000000e+00 : f32
    %114 = vector.broadcast %cst_25 : f32 to vector<16x16xf32>
    %115 = arith.cmpf oge, %113, %114 : vector<16x16xf32>
    %cst_26 = arith.constant 2.000000e-01 : f32
    %116 = vector.broadcast %cst_26 : f32 to vector<16x16xf32>
    %117 = arith.mulf %116, %113 : vector<16x16xf32>
    %118 = arith.select %115, %113, %117 : vector<16x16xi1>, vector<16x16xf32>
    %119 = vector.extract_strided_slice %8 {offsets = [0, 11], sizes = [16, 1], strides = [1, 1]} : vector<16x32xf32> to vector<16x1xf32>
    %120 = vector.extract_strided_slice %6 {offsets = [11, 0], sizes = [1, 16], strides = [1, 1]} : vector<32x16xf32> to vector<1x16xf32>
    %121 = vector.broadcast %119 : vector<16x1xf32> to vector<16x16xf32>
    %122 = vector.broadcast %120 : vector<1x16xf32> to vector<16x16xf32>
    %123 = arith.addf %121, %122 : vector<16x16xf32>
    %cst_27 = arith.constant 0.000000e+00 : f32
    %124 = vector.broadcast %cst_27 : f32 to vector<16x16xf32>
    %125 = arith.cmpf oge, %123, %124 : vector<16x16xf32>
    %cst_28 = arith.constant 2.000000e-01 : f32
    %126 = vector.broadcast %cst_28 : f32 to vector<16x16xf32>
    %127 = arith.mulf %126, %123 : vector<16x16xf32>
    %128 = arith.select %125, %123, %127 : vector<16x16xi1>, vector<16x16xf32>
    %129 = vector.extract_strided_slice %8 {offsets = [0, 12], sizes = [16, 1], strides = [1, 1]} : vector<16x32xf32> to vector<16x1xf32>
    %130 = vector.extract_strided_slice %6 {offsets = [12, 0], sizes = [1, 16], strides = [1, 1]} : vector<32x16xf32> to vector<1x16xf32>
    %131 = vector.broadcast %129 : vector<16x1xf32> to vector<16x16xf32>
    %132 = vector.broadcast %130 : vector<1x16xf32> to vector<16x16xf32>
    %133 = arith.addf %131, %132 : vector<16x16xf32>
    %cst_29 = arith.constant 0.000000e+00 : f32
    %134 = vector.broadcast %cst_29 : f32 to vector<16x16xf32>
    %135 = arith.cmpf oge, %133, %134 : vector<16x16xf32>
    %cst_30 = arith.constant 2.000000e-01 : f32
    %136 = vector.broadcast %cst_30 : f32 to vector<16x16xf32>
    %137 = arith.mulf %136, %133 : vector<16x16xf32>
    %138 = arith.select %135, %133, %137 : vector<16x16xi1>, vector<16x16xf32>
    %139 = vector.extract_strided_slice %8 {offsets = [0, 13], sizes = [16, 1], strides = [1, 1]} : vector<16x32xf32> to vector<16x1xf32>
    %140 = vector.extract_strided_slice %6 {offsets = [13, 0], sizes = [1, 16], strides = [1, 1]} : vector<32x16xf32> to vector<1x16xf32>
    %141 = vector.broadcast %139 : vector<16x1xf32> to vector<16x16xf32>
    %142 = vector.broadcast %140 : vector<1x16xf32> to vector<16x16xf32>
    %143 = arith.addf %141, %142 : vector<16x16xf32>
    %cst_31 = arith.constant 0.000000e+00 : f32
    %144 = vector.broadcast %cst_31 : f32 to vector<16x16xf32>
    %145 = arith.cmpf oge, %143, %144 : vector<16x16xf32>
    %cst_32 = arith.constant 2.000000e-01 : f32
    %146 = vector.broadcast %cst_32 : f32 to vector<16x16xf32>
    %147 = arith.mulf %146, %143 : vector<16x16xf32>
    %148 = arith.select %145, %143, %147 : vector<16x16xi1>, vector<16x16xf32>
    %149 = vector.extract_strided_slice %8 {offsets = [0, 14], sizes = [16, 1], strides = [1, 1]} : vector<16x32xf32> to vector<16x1xf32>
    %150 = vector.extract_strided_slice %6 {offsets = [14, 0], sizes = [1, 16], strides = [1, 1]} : vector<32x16xf32> to vector<1x16xf32>
    %151 = vector.broadcast %149 : vector<16x1xf32> to vector<16x16xf32>
    %152 = vector.broadcast %150 : vector<1x16xf32> to vector<16x16xf32>
    %153 = arith.addf %151, %152 : vector<16x16xf32>
    %cst_33 = arith.constant 0.000000e+00 : f32
    %154 = vector.broadcast %cst_33 : f32 to vector<16x16xf32>
    %155 = arith.cmpf oge, %153, %154 : vector<16x16xf32>
    %cst_34 = arith.constant 2.000000e-01 : f32
    %156 = vector.broadcast %cst_34 : f32 to vector<16x16xf32>
    %157 = arith.mulf %156, %153 : vector<16x16xf32>
    %158 = arith.select %155, %153, %157 : vector<16x16xi1>, vector<16x16xf32>
    %159 = vector.extract_strided_slice %8 {offsets = [0, 15], sizes = [16, 1], strides = [1, 1]} : vector<16x32xf32> to vector<16x1xf32>
    %160 = vector.extract_strided_slice %6 {offsets = [15, 0], sizes = [1, 16], strides = [1, 1]} : vector<32x16xf32> to vector<1x16xf32>
    %161 = vector.broadcast %159 : vector<16x1xf32> to vector<16x16xf32>
    %162 = vector.broadcast %160 : vector<1x16xf32> to vector<16x16xf32>
    %163 = arith.addf %161, %162 : vector<16x16xf32>
    %cst_35 = arith.constant 0.000000e+00 : f32
    %164 = vector.broadcast %cst_35 : f32 to vector<16x16xf32>
    %165 = arith.cmpf oge, %163, %164 : vector<16x16xf32>
    %cst_36 = arith.constant 2.000000e-01 : f32
    %166 = vector.broadcast %cst_36 : f32 to vector<16x16xf32>
    %167 = arith.mulf %166, %163 : vector<16x16xf32>
    %168 = arith.select %165, %163, %167 : vector<16x16xi1>, vector<16x16xf32>
    %169 = vector.extract_strided_slice %8 {offsets = [0, 16], sizes = [16, 1], strides = [1, 1]} : vector<16x32xf32> to vector<16x1xf32>
    %170 = vector.extract_strided_slice %6 {offsets = [16, 0], sizes = [1, 16], strides = [1, 1]} : vector<32x16xf32> to vector<1x16xf32>
    %171 = vector.broadcast %169 : vector<16x1xf32> to vector<16x16xf32>
    %172 = vector.broadcast %170 : vector<1x16xf32> to vector<16x16xf32>
    %173 = arith.addf %171, %172 : vector<16x16xf32>
    %cst_37 = arith.constant 0.000000e+00 : f32
    %174 = vector.broadcast %cst_37 : f32 to vector<16x16xf32>
    %175 = arith.cmpf oge, %173, %174 : vector<16x16xf32>
    %cst_38 = arith.constant 2.000000e-01 : f32
    %176 = vector.broadcast %cst_38 : f32 to vector<16x16xf32>
    %177 = arith.mulf %176, %173 : vector<16x16xf32>
    %178 = arith.select %175, %173, %177 : vector<16x16xi1>, vector<16x16xf32>
    %179 = vector.extract_strided_slice %8 {offsets = [0, 17], sizes = [16, 1], strides = [1, 1]} : vector<16x32xf32> to vector<16x1xf32>
    %180 = vector.extract_strided_slice %6 {offsets = [17, 0], sizes = [1, 16], strides = [1, 1]} : vector<32x16xf32> to vector<1x16xf32>
    %181 = vector.broadcast %179 : vector<16x1xf32> to vector<16x16xf32>
    %182 = vector.broadcast %180 : vector<1x16xf32> to vector<16x16xf32>
    %183 = arith.addf %181, %182 : vector<16x16xf32>
    %cst_39 = arith.constant 0.000000e+00 : f32
    %184 = vector.broadcast %cst_39 : f32 to vector<16x16xf32>
    %185 = arith.cmpf oge, %183, %184 : vector<16x16xf32>
    %cst_40 = arith.constant 2.000000e-01 : f32
    %186 = vector.broadcast %cst_40 : f32 to vector<16x16xf32>
    %187 = arith.mulf %186, %183 : vector<16x16xf32>
    %188 = arith.select %185, %183, %187 : vector<16x16xi1>, vector<16x16xf32>
    %189 = vector.extract_strided_slice %8 {offsets = [0, 18], sizes = [16, 1], strides = [1, 1]} : vector<16x32xf32> to vector<16x1xf32>
    %190 = vector.extract_strided_slice %6 {offsets = [18, 0], sizes = [1, 16], strides = [1, 1]} : vector<32x16xf32> to vector<1x16xf32>
    %191 = vector.broadcast %189 : vector<16x1xf32> to vector<16x16xf32>
    %192 = vector.broadcast %190 : vector<1x16xf32> to vector<16x16xf32>
    %193 = arith.addf %191, %192 : vector<16x16xf32>
    %cst_41 = arith.constant 0.000000e+00 : f32
    %194 = vector.broadcast %cst_41 : f32 to vector<16x16xf32>
    %195 = arith.cmpf oge, %193, %194 : vector<16x16xf32>
    %cst_42 = arith.constant 2.000000e-01 : f32
    %196 = vector.broadcast %cst_42 : f32 to vector<16x16xf32>
    %197 = arith.mulf %196, %193 : vector<16x16xf32>
    %198 = arith.select %195, %193, %197 : vector<16x16xi1>, vector<16x16xf32>
    %199 = vector.extract_strided_slice %8 {offsets = [0, 19], sizes = [16, 1], strides = [1, 1]} : vector<16x32xf32> to vector<16x1xf32>
    %200 = vector.extract_strided_slice %6 {offsets = [19, 0], sizes = [1, 16], strides = [1, 1]} : vector<32x16xf32> to vector<1x16xf32>
    %201 = vector.broadcast %199 : vector<16x1xf32> to vector<16x16xf32>
    %202 = vector.broadcast %200 : vector<1x16xf32> to vector<16x16xf32>
    %203 = arith.addf %201, %202 : vector<16x16xf32>
    %cst_43 = arith.constant 0.000000e+00 : f32
    %204 = vector.broadcast %cst_43 : f32 to vector<16x16xf32>
    %205 = arith.cmpf oge, %203, %204 : vector<16x16xf32>
    %cst_44 = arith.constant 2.000000e-01 : f32
    %206 = vector.broadcast %cst_44 : f32 to vector<16x16xf32>
    %207 = arith.mulf %206, %203 : vector<16x16xf32>
    %208 = arith.select %205, %203, %207 : vector<16x16xi1>, vector<16x16xf32>
    %209 = vector.extract_strided_slice %8 {offsets = [0, 20], sizes = [16, 1], strides = [1, 1]} : vector<16x32xf32> to vector<16x1xf32>
    %210 = vector.extract_strided_slice %6 {offsets = [20, 0], sizes = [1, 16], strides = [1, 1]} : vector<32x16xf32> to vector<1x16xf32>
    %211 = vector.broadcast %209 : vector<16x1xf32> to vector<16x16xf32>
    %212 = vector.broadcast %210 : vector<1x16xf32> to vector<16x16xf32>
    %213 = arith.addf %211, %212 : vector<16x16xf32>
    %cst_45 = arith.constant 0.000000e+00 : f32
    %214 = vector.broadcast %cst_45 : f32 to vector<16x16xf32>
    %215 = arith.cmpf oge, %213, %214 : vector<16x16xf32>
    %cst_46 = arith.constant 2.000000e-01 : f32
    %216 = vector.broadcast %cst_46 : f32 to vector<16x16xf32>
    %217 = arith.mulf %216, %213 : vector<16x16xf32>
    %218 = arith.select %215, %213, %217 : vector<16x16xi1>, vector<16x16xf32>
    %219 = vector.extract_strided_slice %8 {offsets = [0, 21], sizes = [16, 1], strides = [1, 1]} : vector<16x32xf32> to vector<16x1xf32>
    %220 = vector.extract_strided_slice %6 {offsets = [21, 0], sizes = [1, 16], strides = [1, 1]} : vector<32x16xf32> to vector<1x16xf32>
    %221 = vector.broadcast %219 : vector<16x1xf32> to vector<16x16xf32>
    %222 = vector.broadcast %220 : vector<1x16xf32> to vector<16x16xf32>
    %223 = arith.addf %221, %222 : vector<16x16xf32>
    %cst_47 = arith.constant 0.000000e+00 : f32
    %224 = vector.broadcast %cst_47 : f32 to vector<16x16xf32>
    %225 = arith.cmpf oge, %223, %224 : vector<16x16xf32>
    %cst_48 = arith.constant 2.000000e-01 : f32
    %226 = vector.broadcast %cst_48 : f32 to vector<16x16xf32>
    %227 = arith.mulf %226, %223 : vector<16x16xf32>
    %228 = arith.select %225, %223, %227 : vector<16x16xi1>, vector<16x16xf32>
    %229 = vector.extract_strided_slice %8 {offsets = [0, 22], sizes = [16, 1], strides = [1, 1]} : vector<16x32xf32> to vector<16x1xf32>
    %230 = vector.extract_strided_slice %6 {offsets = [22, 0], sizes = [1, 16], strides = [1, 1]} : vector<32x16xf32> to vector<1x16xf32>
    %231 = vector.broadcast %229 : vector<16x1xf32> to vector<16x16xf32>
    %232 = vector.broadcast %230 : vector<1x16xf32> to vector<16x16xf32>
    %233 = arith.addf %231, %232 : vector<16x16xf32>
    %cst_49 = arith.constant 0.000000e+00 : f32
    %234 = vector.broadcast %cst_49 : f32 to vector<16x16xf32>
    %235 = arith.cmpf oge, %233, %234 : vector<16x16xf32>
    %cst_50 = arith.constant 2.000000e-01 : f32
    %236 = vector.broadcast %cst_50 : f32 to vector<16x16xf32>
    %237 = arith.mulf %236, %233 : vector<16x16xf32>
    %238 = arith.select %235, %233, %237 : vector<16x16xi1>, vector<16x16xf32>
    %239 = vector.extract_strided_slice %8 {offsets = [0, 23], sizes = [16, 1], strides = [1, 1]} : vector<16x32xf32> to vector<16x1xf32>
    %240 = vector.extract_strided_slice %6 {offsets = [23, 0], sizes = [1, 16], strides = [1, 1]} : vector<32x16xf32> to vector<1x16xf32>
    %241 = vector.broadcast %239 : vector<16x1xf32> to vector<16x16xf32>
    %242 = vector.broadcast %240 : vector<1x16xf32> to vector<16x16xf32>
    %243 = arith.addf %241, %242 : vector<16x16xf32>
    %cst_51 = arith.constant 0.000000e+00 : f32
    %244 = vector.broadcast %cst_51 : f32 to vector<16x16xf32>
    %245 = arith.cmpf oge, %243, %244 : vector<16x16xf32>
    %cst_52 = arith.constant 2.000000e-01 : f32
    %246 = vector.broadcast %cst_52 : f32 to vector<16x16xf32>
    %247 = arith.mulf %246, %243 : vector<16x16xf32>
    %248 = arith.select %245, %243, %247 : vector<16x16xi1>, vector<16x16xf32>
    %249 = vector.extract_strided_slice %8 {offsets = [0, 24], sizes = [16, 1], strides = [1, 1]} : vector<16x32xf32> to vector<16x1xf32>
    %250 = vector.extract_strided_slice %6 {offsets = [24, 0], sizes = [1, 16], strides = [1, 1]} : vector<32x16xf32> to vector<1x16xf32>
    %251 = vector.broadcast %249 : vector<16x1xf32> to vector<16x16xf32>
    %252 = vector.broadcast %250 : vector<1x16xf32> to vector<16x16xf32>
    %253 = arith.addf %251, %252 : vector<16x16xf32>
    %cst_53 = arith.constant 0.000000e+00 : f32
    %254 = vector.broadcast %cst_53 : f32 to vector<16x16xf32>
    %255 = arith.cmpf oge, %253, %254 : vector<16x16xf32>
    %cst_54 = arith.constant 2.000000e-01 : f32
    %256 = vector.broadcast %cst_54 : f32 to vector<16x16xf32>
    %257 = arith.mulf %256, %253 : vector<16x16xf32>
    %258 = arith.select %255, %253, %257 : vector<16x16xi1>, vector<16x16xf32>
    %259 = vector.extract_strided_slice %8 {offsets = [0, 25], sizes = [16, 1], strides = [1, 1]} : vector<16x32xf32> to vector<16x1xf32>
    %260 = vector.extract_strided_slice %6 {offsets = [25, 0], sizes = [1, 16], strides = [1, 1]} : vector<32x16xf32> to vector<1x16xf32>
    %261 = vector.broadcast %259 : vector<16x1xf32> to vector<16x16xf32>
    %262 = vector.broadcast %260 : vector<1x16xf32> to vector<16x16xf32>
    %263 = arith.addf %261, %262 : vector<16x16xf32>
    %cst_55 = arith.constant 0.000000e+00 : f32
    %264 = vector.broadcast %cst_55 : f32 to vector<16x16xf32>
    %265 = arith.cmpf oge, %263, %264 : vector<16x16xf32>
    %cst_56 = arith.constant 2.000000e-01 : f32
    %266 = vector.broadcast %cst_56 : f32 to vector<16x16xf32>
    %267 = arith.mulf %266, %263 : vector<16x16xf32>
    %268 = arith.select %265, %263, %267 : vector<16x16xi1>, vector<16x16xf32>
    %269 = vector.extract_strided_slice %8 {offsets = [0, 26], sizes = [16, 1], strides = [1, 1]} : vector<16x32xf32> to vector<16x1xf32>
    %270 = vector.extract_strided_slice %6 {offsets = [26, 0], sizes = [1, 16], strides = [1, 1]} : vector<32x16xf32> to vector<1x16xf32>
    %271 = vector.broadcast %269 : vector<16x1xf32> to vector<16x16xf32>
    %272 = vector.broadcast %270 : vector<1x16xf32> to vector<16x16xf32>
    %273 = arith.addf %271, %272 : vector<16x16xf32>
    %cst_57 = arith.constant 0.000000e+00 : f32
    %274 = vector.broadcast %cst_57 : f32 to vector<16x16xf32>
    %275 = arith.cmpf oge, %273, %274 : vector<16x16xf32>
    %cst_58 = arith.constant 2.000000e-01 : f32
    %276 = vector.broadcast %cst_58 : f32 to vector<16x16xf32>
    %277 = arith.mulf %276, %273 : vector<16x16xf32>
    %278 = arith.select %275, %273, %277 : vector<16x16xi1>, vector<16x16xf32>
    %279 = vector.extract_strided_slice %8 {offsets = [0, 27], sizes = [16, 1], strides = [1, 1]} : vector<16x32xf32> to vector<16x1xf32>
    %280 = vector.extract_strided_slice %6 {offsets = [27, 0], sizes = [1, 16], strides = [1, 1]} : vector<32x16xf32> to vector<1x16xf32>
    %281 = vector.broadcast %279 : vector<16x1xf32> to vector<16x16xf32>
    %282 = vector.broadcast %280 : vector<1x16xf32> to vector<16x16xf32>
    %283 = arith.addf %281, %282 : vector<16x16xf32>
    %cst_59 = arith.constant 0.000000e+00 : f32
    %284 = vector.broadcast %cst_59 : f32 to vector<16x16xf32>
    %285 = arith.cmpf oge, %283, %284 : vector<16x16xf32>
    %cst_60 = arith.constant 2.000000e-01 : f32
    %286 = vector.broadcast %cst_60 : f32 to vector<16x16xf32>
    %287 = arith.mulf %286, %283 : vector<16x16xf32>
    %288 = arith.select %285, %283, %287 : vector<16x16xi1>, vector<16x16xf32>
    %289 = vector.extract_strided_slice %8 {offsets = [0, 28], sizes = [16, 1], strides = [1, 1]} : vector<16x32xf32> to vector<16x1xf32>
    %290 = vector.extract_strided_slice %6 {offsets = [28, 0], sizes = [1, 16], strides = [1, 1]} : vector<32x16xf32> to vector<1x16xf32>
    %291 = vector.broadcast %289 : vector<16x1xf32> to vector<16x16xf32>
    %292 = vector.broadcast %290 : vector<1x16xf32> to vector<16x16xf32>
    %293 = arith.addf %291, %292 : vector<16x16xf32>
    %cst_61 = arith.constant 0.000000e+00 : f32
    %294 = vector.broadcast %cst_61 : f32 to vector<16x16xf32>
    %295 = arith.cmpf oge, %293, %294 : vector<16x16xf32>
    %cst_62 = arith.constant 2.000000e-01 : f32
    %296 = vector.broadcast %cst_62 : f32 to vector<16x16xf32>
    %297 = arith.mulf %296, %293 : vector<16x16xf32>
    %298 = arith.select %295, %293, %297 : vector<16x16xi1>, vector<16x16xf32>
    %299 = vector.extract_strided_slice %8 {offsets = [0, 29], sizes = [16, 1], strides = [1, 1]} : vector<16x32xf32> to vector<16x1xf32>
    %300 = vector.extract_strided_slice %6 {offsets = [29, 0], sizes = [1, 16], strides = [1, 1]} : vector<32x16xf32> to vector<1x16xf32>
    %301 = vector.broadcast %299 : vector<16x1xf32> to vector<16x16xf32>
    %302 = vector.broadcast %300 : vector<1x16xf32> to vector<16x16xf32>
    %303 = arith.addf %301, %302 : vector<16x16xf32>
    %cst_63 = arith.constant 0.000000e+00 : f32
    %304 = vector.broadcast %cst_63 : f32 to vector<16x16xf32>
    %305 = arith.cmpf oge, %303, %304 : vector<16x16xf32>
    %cst_64 = arith.constant 2.000000e-01 : f32
    %306 = vector.broadcast %cst_64 : f32 to vector<16x16xf32>
    %307 = arith.mulf %306, %303 : vector<16x16xf32>
    %308 = arith.select %305, %303, %307 : vector<16x16xi1>, vector<16x16xf32>
    %309 = vector.extract_strided_slice %8 {offsets = [0, 30], sizes = [16, 1], strides = [1, 1]} : vector<16x32xf32> to vector<16x1xf32>
    %310 = vector.extract_strided_slice %6 {offsets = [30, 0], sizes = [1, 16], strides = [1, 1]} : vector<32x16xf32> to vector<1x16xf32>
    %311 = vector.broadcast %309 : vector<16x1xf32> to vector<16x16xf32>
    %312 = vector.broadcast %310 : vector<1x16xf32> to vector<16x16xf32>
    %313 = arith.addf %311, %312 : vector<16x16xf32>
    %cst_65 = arith.constant 0.000000e+00 : f32
    %314 = vector.broadcast %cst_65 : f32 to vector<16x16xf32>
    %315 = arith.cmpf oge, %313, %314 : vector<16x16xf32>
    %cst_66 = arith.constant 2.000000e-01 : f32
    %316 = vector.broadcast %cst_66 : f32 to vector<16x16xf32>
    %317 = arith.mulf %316, %313 : vector<16x16xf32>
    %318 = arith.select %315, %313, %317 : vector<16x16xi1>, vector<16x16xf32>
    %319 = vector.extract_strided_slice %8 {offsets = [0, 31], sizes = [16, 1], strides = [1, 1]} : vector<16x32xf32> to vector<16x1xf32>
    %320 = vector.extract_strided_slice %6 {offsets = [31, 0], sizes = [1, 16], strides = [1, 1]} : vector<32x16xf32> to vector<1x16xf32>
    %321 = vector.broadcast %319 : vector<16x1xf32> to vector<16x16xf32>
    %322 = vector.broadcast %320 : vector<1x16xf32> to vector<16x16xf32>
    %323 = arith.addf %321, %322 : vector<16x16xf32>
    %cst_67 = arith.constant 0.000000e+00 : f32
    %324 = vector.broadcast %cst_67 : f32 to vector<16x16xf32>
    %325 = arith.cmpf oge, %323, %324 : vector<16x16xf32>
    %cst_68 = arith.constant 2.000000e-01 : f32
    %326 = vector.broadcast %cst_68 : f32 to vector<16x16xf32>
    %327 = arith.mulf %326, %323 : vector<16x16xf32>
    %328 = arith.select %325, %323, %327 : vector<16x16xi1>, vector<16x16xf32>
    %c0_69 = arith.constant 0 : index
    %c0_70 = arith.constant 0 : index
    %329 = memref.load %arg3[%c0_69, %c0_70] : memref<4x8xf32, #tpu.memory_space<smem>>
    %330 = vector.broadcast %329 : f32 to vector<16x16xf32>
    %331 = arith.mulf %330, %18 : vector<16x16xf32>
    %c0_71 = arith.constant 0 : index
    %c1 = arith.constant 1 : index
    %332 = memref.load %arg3[%c0_71, %c1] : memref<4x8xf32, #tpu.memory_space<smem>>
    %333 = vector.broadcast %332 : f32 to vector<16x16xf32>
    %334 = arith.mulf %333, %28 : vector<16x16xf32>
    %335 = arith.addf %331, %334 : vector<16x16xf32>
    %c0_72 = arith.constant 0 : index
    %c2 = arith.constant 2 : index
    %336 = memref.load %arg3[%c0_72, %c2] : memref<4x8xf32, #tpu.memory_space<smem>>
    %337 = vector.broadcast %336 : f32 to vector<16x16xf32>
    %338 = arith.mulf %337, %38 : vector<16x16xf32>
    %339 = arith.addf %335, %338 : vector<16x16xf32>
    %c0_73 = arith.constant 0 : index
    %c3 = arith.constant 3 : index
    %340 = memref.load %arg3[%c0_73, %c3] : memref<4x8xf32, #tpu.memory_space<smem>>
    %341 = vector.broadcast %340 : f32 to vector<16x16xf32>
    %342 = arith.mulf %341, %48 : vector<16x16xf32>
    %343 = arith.addf %339, %342 : vector<16x16xf32>
    %c0_74 = arith.constant 0 : index
    %c4 = arith.constant 4 : index
    %344 = memref.load %arg3[%c0_74, %c4] : memref<4x8xf32, #tpu.memory_space<smem>>
    %345 = vector.broadcast %344 : f32 to vector<16x16xf32>
    %346 = arith.mulf %345, %58 : vector<16x16xf32>
    %347 = arith.addf %343, %346 : vector<16x16xf32>
    %c0_75 = arith.constant 0 : index
    %c5 = arith.constant 5 : index
    %348 = memref.load %arg3[%c0_75, %c5] : memref<4x8xf32, #tpu.memory_space<smem>>
    %349 = vector.broadcast %348 : f32 to vector<16x16xf32>
    %350 = arith.mulf %349, %68 : vector<16x16xf32>
    %351 = arith.addf %347, %350 : vector<16x16xf32>
    %c0_76 = arith.constant 0 : index
    %c6 = arith.constant 6 : index
    %352 = memref.load %arg3[%c0_76, %c6] : memref<4x8xf32, #tpu.memory_space<smem>>
    %353 = vector.broadcast %352 : f32 to vector<16x16xf32>
    %354 = arith.mulf %353, %78 : vector<16x16xf32>
    %355 = arith.addf %351, %354 : vector<16x16xf32>
    %c0_77 = arith.constant 0 : index
    %c7 = arith.constant 7 : index
    %356 = memref.load %arg3[%c0_77, %c7] : memref<4x8xf32, #tpu.memory_space<smem>>
    %357 = vector.broadcast %356 : f32 to vector<16x16xf32>
    %358 = arith.mulf %357, %88 : vector<16x16xf32>
    %359 = arith.addf %355, %358 : vector<16x16xf32>
    %c1_78 = arith.constant 1 : index
    %c0_79 = arith.constant 0 : index
    %360 = memref.load %arg3[%c1_78, %c0_79] : memref<4x8xf32, #tpu.memory_space<smem>>
    %361 = vector.broadcast %360 : f32 to vector<16x16xf32>
    %362 = arith.mulf %361, %98 : vector<16x16xf32>
    %c1_80 = arith.constant 1 : index
    %c1_81 = arith.constant 1 : index
    %363 = memref.load %arg3[%c1_80, %c1_81] : memref<4x8xf32, #tpu.memory_space<smem>>
    %364 = vector.broadcast %363 : f32 to vector<16x16xf32>
    %365 = arith.mulf %364, %108 : vector<16x16xf32>
    %366 = arith.addf %362, %365 : vector<16x16xf32>
    %c1_82 = arith.constant 1 : index
    %c2_83 = arith.constant 2 : index
    %367 = memref.load %arg3[%c1_82, %c2_83] : memref<4x8xf32, #tpu.memory_space<smem>>
    %368 = vector.broadcast %367 : f32 to vector<16x16xf32>
    %369 = arith.mulf %368, %118 : vector<16x16xf32>
    %370 = arith.addf %366, %369 : vector<16x16xf32>
    %c1_84 = arith.constant 1 : index
    %c3_85 = arith.constant 3 : index
    %371 = memref.load %arg3[%c1_84, %c3_85] : memref<4x8xf32, #tpu.memory_space<smem>>
    %372 = vector.broadcast %371 : f32 to vector<16x16xf32>
    %373 = arith.mulf %372, %128 : vector<16x16xf32>
    %374 = arith.addf %370, %373 : vector<16x16xf32>
    %c1_86 = arith.constant 1 : index
    %c4_87 = arith.constant 4 : index
    %375 = memref.load %arg3[%c1_86, %c4_87] : memref<4x8xf32, #tpu.memory_space<smem>>
    %376 = vector.broadcast %375 : f32 to vector<16x16xf32>
    %377 = arith.mulf %376, %138 : vector<16x16xf32>
    %378 = arith.addf %374, %377 : vector<16x16xf32>
    %c1_88 = arith.constant 1 : index
    %c5_89 = arith.constant 5 : index
    %379 = memref.load %arg3[%c1_88, %c5_89] : memref<4x8xf32, #tpu.memory_space<smem>>
    %380 = vector.broadcast %379 : f32 to vector<16x16xf32>
    %381 = arith.mulf %380, %148 : vector<16x16xf32>
    %382 = arith.addf %378, %381 : vector<16x16xf32>
    %c1_90 = arith.constant 1 : index
    %c6_91 = arith.constant 6 : index
    %383 = memref.load %arg3[%c1_90, %c6_91] : memref<4x8xf32, #tpu.memory_space<smem>>
    %384 = vector.broadcast %383 : f32 to vector<16x16xf32>
    %385 = arith.mulf %384, %158 : vector<16x16xf32>
    %386 = arith.addf %382, %385 : vector<16x16xf32>
    %c1_92 = arith.constant 1 : index
    %c7_93 = arith.constant 7 : index
    %387 = memref.load %arg3[%c1_92, %c7_93] : memref<4x8xf32, #tpu.memory_space<smem>>
    %388 = vector.broadcast %387 : f32 to vector<16x16xf32>
    %389 = arith.mulf %388, %168 : vector<16x16xf32>
    %390 = arith.addf %386, %389 : vector<16x16xf32>
    %c2_94 = arith.constant 2 : index
    %c0_95 = arith.constant 0 : index
    %391 = memref.load %arg3[%c2_94, %c0_95] : memref<4x8xf32, #tpu.memory_space<smem>>
    %392 = vector.broadcast %391 : f32 to vector<16x16xf32>
    %393 = arith.mulf %392, %178 : vector<16x16xf32>
    %c2_96 = arith.constant 2 : index
    %c1_97 = arith.constant 1 : index
    %394 = memref.load %arg3[%c2_96, %c1_97] : memref<4x8xf32, #tpu.memory_space<smem>>
    %395 = vector.broadcast %394 : f32 to vector<16x16xf32>
    %396 = arith.mulf %395, %188 : vector<16x16xf32>
    %397 = arith.addf %393, %396 : vector<16x16xf32>
    %c2_98 = arith.constant 2 : index
    %c2_99 = arith.constant 2 : index
    %398 = memref.load %arg3[%c2_98, %c2_99] : memref<4x8xf32, #tpu.memory_space<smem>>
    %399 = vector.broadcast %398 : f32 to vector<16x16xf32>
    %400 = arith.mulf %399, %198 : vector<16x16xf32>
    %401 = arith.addf %397, %400 : vector<16x16xf32>
    %c2_100 = arith.constant 2 : index
    %c3_101 = arith.constant 3 : index
    %402 = memref.load %arg3[%c2_100, %c3_101] : memref<4x8xf32, #tpu.memory_space<smem>>
    %403 = vector.broadcast %402 : f32 to vector<16x16xf32>
    %404 = arith.mulf %403, %208 : vector<16x16xf32>
    %405 = arith.addf %401, %404 : vector<16x16xf32>
    %c2_102 = arith.constant 2 : index
    %c4_103 = arith.constant 4 : index
    %406 = memref.load %arg3[%c2_102, %c4_103] : memref<4x8xf32, #tpu.memory_space<smem>>
    %407 = vector.broadcast %406 : f32 to vector<16x16xf32>
    %408 = arith.mulf %407, %218 : vector<16x16xf32>
    %409 = arith.addf %405, %408 : vector<16x16xf32>
    %c2_104 = arith.constant 2 : index
    %c5_105 = arith.constant 5 : index
    %410 = memref.load %arg3[%c2_104, %c5_105] : memref<4x8xf32, #tpu.memory_space<smem>>
    %411 = vector.broadcast %410 : f32 to vector<16x16xf32>
    %412 = arith.mulf %411, %228 : vector<16x16xf32>
    %413 = arith.addf %409, %412 : vector<16x16xf32>
    %c2_106 = arith.constant 2 : index
    %c6_107 = arith.constant 6 : index
    %414 = memref.load %arg3[%c2_106, %c6_107] : memref<4x8xf32, #tpu.memory_space<smem>>
    %415 = vector.broadcast %414 : f32 to vector<16x16xf32>
    %416 = arith.mulf %415, %238 : vector<16x16xf32>
    %417 = arith.addf %413, %416 : vector<16x16xf32>
    %c2_108 = arith.constant 2 : index
    %c7_109 = arith.constant 7 : index
    %418 = memref.load %arg3[%c2_108, %c7_109] : memref<4x8xf32, #tpu.memory_space<smem>>
    %419 = vector.broadcast %418 : f32 to vector<16x16xf32>
    %420 = arith.mulf %419, %248 : vector<16x16xf32>
    %421 = arith.addf %417, %420 : vector<16x16xf32>
    %c3_110 = arith.constant 3 : index
    %c0_111 = arith.constant 0 : index
    %422 = memref.load %arg3[%c3_110, %c0_111] : memref<4x8xf32, #tpu.memory_space<smem>>
    %423 = vector.broadcast %422 : f32 to vector<16x16xf32>
    %424 = arith.mulf %423, %258 : vector<16x16xf32>
    %c3_112 = arith.constant 3 : index
    %c1_113 = arith.constant 1 : index
    %425 = memref.load %arg3[%c3_112, %c1_113] : memref<4x8xf32, #tpu.memory_space<smem>>
    %426 = vector.broadcast %425 : f32 to vector<16x16xf32>
    %427 = arith.mulf %426, %268 : vector<16x16xf32>
    %428 = arith.addf %424, %427 : vector<16x16xf32>
    %c3_114 = arith.constant 3 : index
    %c2_115 = arith.constant 2 : index
    %429 = memref.load %arg3[%c3_114, %c2_115] : memref<4x8xf32, #tpu.memory_space<smem>>
    %430 = vector.broadcast %429 : f32 to vector<16x16xf32>
    %431 = arith.mulf %430, %278 : vector<16x16xf32>
    %432 = arith.addf %428, %431 : vector<16x16xf32>
    %c3_116 = arith.constant 3 : index
    %c3_117 = arith.constant 3 : index
    %433 = memref.load %arg3[%c3_116, %c3_117] : memref<4x8xf32, #tpu.memory_space<smem>>
    %434 = vector.broadcast %433 : f32 to vector<16x16xf32>
    %435 = arith.mulf %434, %288 : vector<16x16xf32>
    %436 = arith.addf %432, %435 : vector<16x16xf32>
    %c3_118 = arith.constant 3 : index
    %c4_119 = arith.constant 4 : index
    %437 = memref.load %arg3[%c3_118, %c4_119] : memref<4x8xf32, #tpu.memory_space<smem>>
    %438 = vector.broadcast %437 : f32 to vector<16x16xf32>
    %439 = arith.mulf %438, %298 : vector<16x16xf32>
    %440 = arith.addf %436, %439 : vector<16x16xf32>
    %c3_120 = arith.constant 3 : index
    %c5_121 = arith.constant 5 : index
    %441 = memref.load %arg3[%c3_120, %c5_121] : memref<4x8xf32, #tpu.memory_space<smem>>
    %442 = vector.broadcast %441 : f32 to vector<16x16xf32>
    %443 = arith.mulf %442, %308 : vector<16x16xf32>
    %444 = arith.addf %440, %443 : vector<16x16xf32>
    %c3_122 = arith.constant 3 : index
    %c6_123 = arith.constant 6 : index
    %445 = memref.load %arg3[%c3_122, %c6_123] : memref<4x8xf32, #tpu.memory_space<smem>>
    %446 = vector.broadcast %445 : f32 to vector<16x16xf32>
    %447 = arith.mulf %446, %318 : vector<16x16xf32>
    %448 = arith.addf %444, %447 : vector<16x16xf32>
    %c3_124 = arith.constant 3 : index
    %c7_125 = arith.constant 7 : index
    %449 = memref.load %arg3[%c3_124, %c7_125] : memref<4x8xf32, #tpu.memory_space<smem>>
    %450 = vector.broadcast %449 : f32 to vector<16x16xf32>
    %451 = arith.mulf %450, %328 : vector<16x16xf32>
    %452 = arith.addf %448, %451 : vector<16x16xf32>
    %453 = vector.shape_cast %359 : vector<16x16xf32> to vector<1x16x16xf32>
    %454 = vector.shape_cast %390 : vector<16x16xf32> to vector<1x16x16xf32>
    %455 = vector.shape_cast %421 : vector<16x16xf32> to vector<1x16x16xf32>
    %456 = vector.shape_cast %452 : vector<16x16xf32> to vector<1x16x16xf32>
    %457 = tpu.concatenate %453, %454, %455, %456 in 0 : vector<1x16x16xf32>, vector<1x16x16xf32>, vector<1x16x16xf32>, vector<1x16x16xf32> -> vector<4x16x16xf32>
    %c0_126 = arith.constant 0 : index
    %c0_127 = arith.constant 0 : index
    %458 = vector.load %arg0[%c0_126, %c0_127] : memref<16x16xi8, #tpu.memory_space<vmem>>, vector<16x16xi8>
    %c0_i8 = arith.constant 0 : i8
    %459 = vector.broadcast %c0_i8 : i8 to vector<16x16xi8>
    %460 = arith.cmpi ne, %458, %459 : vector<16x16xi8>
    %461 = vector.shape_cast %460 : vector<16x16xi1> to vector<1x16x16xi1>
    %cst_128 = arith.constant -1.000000e+30 : f32
    %462 = vector.shape_cast %461 : vector<1x16x16xi1> to vector<1x16x16xi1>
    %463 = vector.broadcast %462 : vector<1x16x16xi1> to vector<4x16x16xi1>
    %464 = vector.broadcast %cst_128 : f32 to vector<4x16x16xf32>
    %465 = arith.select %463, %457, %464 : vector<4x16x16xi1>, vector<4x16x16xf32>
    %cst_129 = arith.constant dense<0xFF800000> : vector<4x16xf32>
    %466 = vector.multi_reduction <maximumf>, %465, %cst_129 [2] : vector<4x16x16xf32> to vector<4x16xf32>
    %467 = vector.shape_cast %466 : vector<4x16xf32> to vector<4x16x1xf32>
    %468 = vector.broadcast %467 : vector<4x16x1xf32> to vector<4x16x16xf32>
    %469 = arith.subf %465, %468 : vector<4x16x16xf32>
    %470 = math.exp %469 : vector<4x16x16xf32>
    %cst_130 = arith.constant 0.000000e+00 : f32
    %471 = vector.shape_cast %461 : vector<1x16x16xi1> to vector<1x16x16xi1>
    %472 = vector.broadcast %471 : vector<1x16x16xi1> to vector<4x16x16xi1>
    %473 = vector.broadcast %cst_130 : f32 to vector<4x16x16xf32>
    %474 = arith.select %472, %470, %473 : vector<4x16x16xi1>, vector<4x16x16xf32>
    %cst_131 = arith.constant dense<0.000000e+00> : vector<4x16xf32>
    %475 = vector.multi_reduction <add>, %474, %cst_131 [2] : vector<4x16x16xf32> to vector<4x16xf32>
    %476 = vector.shape_cast %475 : vector<4x16xf32> to vector<4x16x1xf32>
    %cst_132 = arith.constant 1.000000e-30 : f32
    %477 = vector.broadcast %cst_132 : f32 to vector<4x16x1xf32>
    %478 = arith.maximumf %476, %477 : vector<4x16x1xf32>
    %479 = vector.broadcast %478 : vector<4x16x1xf32> to vector<4x16x16xf32>
    %480 = arith.divf %474, %479 : vector<4x16x16xf32>
    %481 = vector.extract_strided_slice %6 {offsets = [0, 0], sizes = [8, 16], strides = [1, 1]} : vector<32x16xf32> to vector<8x16xf32>
    %482 = vector.extract_strided_slice %6 {offsets = [8, 0], sizes = [8, 16], strides = [1, 1]} : vector<32x16xf32> to vector<8x16xf32>
    %483 = vector.extract_strided_slice %6 {offsets = [16, 0], sizes = [8, 16], strides = [1, 1]} : vector<32x16xf32> to vector<8x16xf32>
    %484 = vector.extract_strided_slice %6 {offsets = [24, 0], sizes = [8, 16], strides = [1, 1]} : vector<32x16xf32> to vector<8x16xf32>
    %485 = vector.shape_cast %481 : vector<8x16xf32> to vector<1x8x16xf32>
    %486 = vector.shape_cast %482 : vector<8x16xf32> to vector<1x8x16xf32>
    %487 = vector.shape_cast %483 : vector<8x16xf32> to vector<1x8x16xf32>
    %488 = vector.shape_cast %484 : vector<8x16xf32> to vector<1x8x16xf32>
    %489 = tpu.concatenate %485, %486, %487, %488 in 0 : vector<1x8x16xf32>, vector<1x8x16xf32>, vector<1x8x16xf32>, vector<1x8x16xf32> -> vector<4x8x16xf32>
    "tpu.trace_start"() <{level = 10 : i32, message = "hdj,hij->hdi"}> : () -> ()
    %cst_133 = arith.constant dense<0.000000e+00> : vector<4x8x16xf32>
    %490 = tpu.matmul %489, %480, %cst_133 {dimension_numbers = #tpu.dot_dimension_numbers<[2], [2], [1], [1], [0, 0, 0, 1, 1, 1], [0], [0]>} : vector<4x8x16xf32>, vector<4x16x16xf32>, vector<4x8x16xf32> -> vector<4x8x16xf32>
    "tpu.trace_stop"() : () -> ()
    %491 = vector.extract_strided_slice %490 {offsets = [0, 0, 0], sizes = [1, 8, 16], strides = [1, 1, 1]} : vector<4x8x16xf32> to vector<1x8x16xf32>
    %492 = vector.shape_cast %491 : vector<1x8x16xf32> to vector<8x16xf32>
    %493 = vector.extract_strided_slice %490 {offsets = [1, 0, 0], sizes = [1, 8, 16], strides = [1, 1, 1]} : vector<4x8x16xf32> to vector<1x8x16xf32>
    %494 = vector.shape_cast %493 : vector<1x8x16xf32> to vector<8x16xf32>
    %495 = vector.extract_strided_slice %490 {offsets = [2, 0, 0], sizes = [1, 8, 16], strides = [1, 1, 1]} : vector<4x8x16xf32> to vector<1x8x16xf32>
    %496 = vector.shape_cast %495 : vector<1x8x16xf32> to vector<8x16xf32>
    %497 = vector.extract_strided_slice %490 {offsets = [3, 0, 0], sizes = [1, 8, 16], strides = [1, 1, 1]} : vector<4x8x16xf32> to vector<1x8x16xf32>
    %498 = vector.shape_cast %497 : vector<1x8x16xf32> to vector<8x16xf32>
    %499 = tpu.concatenate %492, %494, %496, %498 in 0 : vector<8x16xf32>, vector<8x16xf32>, vector<8x16xf32>, vector<8x16xf32> -> vector<32x16xf32>
    %cst_134 = arith.constant 0.000000e+00 : f32
    %500 = vector.broadcast %cst_134 : f32 to vector<32x16xf32>
    %501 = arith.cmpf ogt, %499, %500 : vector<32x16xf32>
    %cst_135 = arith.constant 0.000000e+00 : f32
    %502 = vector.broadcast %cst_135 : f32 to vector<32x16xf32>
    %503 = arith.minimumf %499, %502 : vector<32x16xf32>
    %504 = math.exp %503 : vector<32x16xf32>
    %cst_136 = arith.constant 1.000000e+00 : f32
    %505 = vector.broadcast %cst_136 : f32 to vector<32x16xf32>
    %506 = arith.subf %504, %505 : vector<32x16xf32>
    %507 = arith.select %501, %499, %506 : vector<32x16xi1>, vector<32x16xf32>
    %c0_137 = arith.constant 0 : index
    %c0_138 = arith.constant 0 : index
    %508 = vector.load %arg9[%c0_137, %c0_138] : memref<64x32xf32, #tpu.memory_space<vmem>>, vector<64x32xf32>
    %cst_139 = arith.constant dense<0.000000e+00> : vector<64x16xf32>
    %509 = tpu.matmul %508, %507, %cst_139 {dimension_numbers = #tpu.dot_dimension_numbers<[1], [0], [0], [1], [0, 0, 1, 1], [], []>} : vector<64x32xf32>, vector<32x16xf32>, vector<64x16xf32> -> vector<64x16xf32>
    %c0_140 = arith.constant 0 : index
    %c0_141 = arith.constant 0 : index
    %510 = vector.load %arg10[%c0_140, %c0_141] : memref<64x1xf32, #tpu.memory_space<vmem>>, vector<64x1xf32>
    %511 = vector.broadcast %510 : vector<64x1xf32> to vector<64x16xf32>
    %512 = arith.addf %509, %511 : vector<64x16xf32>
    %513 = vector.extract_strided_slice %512 {offsets = [0, 0], sizes = [32, 16], strides = [1, 1]} : vector<64x16xf32> to vector<32x16xf32>
    %514 = vector.extract_strided_slice %512 {offsets = [32, 0], sizes = [32, 16], strides = [1, 1]} : vector<64x16xf32> to vector<32x16xf32>
    %515 = tpu.transpose %514, [1, 0] : vector<32x16xf32> -> vector<16x32xf32>
    %516 = vector.extract_strided_slice %515 {offsets = [0, 0], sizes = [16, 1], strides = [1, 1]} : vector<16x32xf32> to vector<16x1xf32>
    %517 = vector.extract_strided_slice %513 {offsets = [0, 0], sizes = [1, 16], strides = [1, 1]} : vector<32x16xf32> to vector<1x16xf32>
    %518 = vector.broadcast %516 : vector<16x1xf32> to vector<16x16xf32>
    %519 = vector.broadcast %517 : vector<1x16xf32> to vector<16x16xf32>
    %520 = arith.addf %518, %519 : vector<16x16xf32>
    %cst_142 = arith.constant 0.000000e+00 : f32
    %521 = vector.broadcast %cst_142 : f32 to vector<16x16xf32>
    %522 = arith.cmpf oge, %520, %521 : vector<16x16xf32>
    %cst_143 = arith.constant 2.000000e-01 : f32
    %523 = vector.broadcast %cst_143 : f32 to vector<16x16xf32>
    %524 = arith.mulf %523, %520 : vector<16x16xf32>
    %525 = arith.select %522, %520, %524 : vector<16x16xi1>, vector<16x16xf32>
    %526 = vector.extract_strided_slice %515 {offsets = [0, 1], sizes = [16, 1], strides = [1, 1]} : vector<16x32xf32> to vector<16x1xf32>
    %527 = vector.extract_strided_slice %513 {offsets = [1, 0], sizes = [1, 16], strides = [1, 1]} : vector<32x16xf32> to vector<1x16xf32>
    %528 = vector.broadcast %526 : vector<16x1xf32> to vector<16x16xf32>
    %529 = vector.broadcast %527 : vector<1x16xf32> to vector<16x16xf32>
    %530 = arith.addf %528, %529 : vector<16x16xf32>
    %cst_144 = arith.constant 0.000000e+00 : f32
    %531 = vector.broadcast %cst_144 : f32 to vector<16x16xf32>
    %532 = arith.cmpf oge, %530, %531 : vector<16x16xf32>
    %cst_145 = arith.constant 2.000000e-01 : f32
    %533 = vector.broadcast %cst_145 : f32 to vector<16x16xf32>
    %534 = arith.mulf %533, %530 : vector<16x16xf32>
    %535 = arith.select %532, %530, %534 : vector<16x16xi1>, vector<16x16xf32>
    %536 = vector.extract_strided_slice %515 {offsets = [0, 2], sizes = [16, 1], strides = [1, 1]} : vector<16x32xf32> to vector<16x1xf32>
    %537 = vector.extract_strided_slice %513 {offsets = [2, 0], sizes = [1, 16], strides = [1, 1]} : vector<32x16xf32> to vector<1x16xf32>
    %538 = vector.broadcast %536 : vector<16x1xf32> to vector<16x16xf32>
    %539 = vector.broadcast %537 : vector<1x16xf32> to vector<16x16xf32>
    %540 = arith.addf %538, %539 : vector<16x16xf32>
    %cst_146 = arith.constant 0.000000e+00 : f32
    %541 = vector.broadcast %cst_146 : f32 to vector<16x16xf32>
    %542 = arith.cmpf oge, %540, %541 : vector<16x16xf32>
    %cst_147 = arith.constant 2.000000e-01 : f32
    %543 = vector.broadcast %cst_147 : f32 to vector<16x16xf32>
    %544 = arith.mulf %543, %540 : vector<16x16xf32>
    %545 = arith.select %542, %540, %544 : vector<16x16xi1>, vector<16x16xf32>
    %546 = vector.extract_strided_slice %515 {offsets = [0, 3], sizes = [16, 1], strides = [1, 1]} : vector<16x32xf32> to vector<16x1xf32>
    %547 = vector.extract_strided_slice %513 {offsets = [3, 0], sizes = [1, 16], strides = [1, 1]} : vector<32x16xf32> to vector<1x16xf32>
    %548 = vector.broadcast %546 : vector<16x1xf32> to vector<16x16xf32>
    %549 = vector.broadcast %547 : vector<1x16xf32> to vector<16x16xf32>
    %550 = arith.addf %548, %549 : vector<16x16xf32>
    %cst_148 = arith.constant 0.000000e+00 : f32
    %551 = vector.broadcast %cst_148 : f32 to vector<16x16xf32>
    %552 = arith.cmpf oge, %550, %551 : vector<16x16xf32>
    %cst_149 = arith.constant 2.000000e-01 : f32
    %553 = vector.broadcast %cst_149 : f32 to vector<16x16xf32>
    %554 = arith.mulf %553, %550 : vector<16x16xf32>
    %555 = arith.select %552, %550, %554 : vector<16x16xi1>, vector<16x16xf32>
    %556 = vector.extract_strided_slice %515 {offsets = [0, 4], sizes = [16, 1], strides = [1, 1]} : vector<16x32xf32> to vector<16x1xf32>
    %557 = vector.extract_strided_slice %513 {offsets = [4, 0], sizes = [1, 16], strides = [1, 1]} : vector<32x16xf32> to vector<1x16xf32>
    %558 = vector.broadcast %556 : vector<16x1xf32> to vector<16x16xf32>
    %559 = vector.broadcast %557 : vector<1x16xf32> to vector<16x16xf32>
    %560 = arith.addf %558, %559 : vector<16x16xf32>
    %cst_150 = arith.constant 0.000000e+00 : f32
    %561 = vector.broadcast %cst_150 : f32 to vector<16x16xf32>
    %562 = arith.cmpf oge, %560, %561 : vector<16x16xf32>
    %cst_151 = arith.constant 2.000000e-01 : f32
    %563 = vector.broadcast %cst_151 : f32 to vector<16x16xf32>
    %564 = arith.mulf %563, %560 : vector<16x16xf32>
    %565 = arith.select %562, %560, %564 : vector<16x16xi1>, vector<16x16xf32>
    %566 = vector.extract_strided_slice %515 {offsets = [0, 5], sizes = [16, 1], strides = [1, 1]} : vector<16x32xf32> to vector<16x1xf32>
    %567 = vector.extract_strided_slice %513 {offsets = [5, 0], sizes = [1, 16], strides = [1, 1]} : vector<32x16xf32> to vector<1x16xf32>
    %568 = vector.broadcast %566 : vector<16x1xf32> to vector<16x16xf32>
    %569 = vector.broadcast %567 : vector<1x16xf32> to vector<16x16xf32>
    %570 = arith.addf %568, %569 : vector<16x16xf32>
    %cst_152 = arith.constant 0.000000e+00 : f32
    %571 = vector.broadcast %cst_152 : f32 to vector<16x16xf32>
    %572 = arith.cmpf oge, %570, %571 : vector<16x16xf32>
    %cst_153 = arith.constant 2.000000e-01 : f32
    %573 = vector.broadcast %cst_153 : f32 to vector<16x16xf32>
    %574 = arith.mulf %573, %570 : vector<16x16xf32>
    %575 = arith.select %572, %570, %574 : vector<16x16xi1>, vector<16x16xf32>
    %576 = vector.extract_strided_slice %515 {offsets = [0, 6], sizes = [16, 1], strides = [1, 1]} : vector<16x32xf32> to vector<16x1xf32>
    %577 = vector.extract_strided_slice %513 {offsets = [6, 0], sizes = [1, 16], strides = [1, 1]} : vector<32x16xf32> to vector<1x16xf32>
    %578 = vector.broadcast %576 : vector<16x1xf32> to vector<16x16xf32>
    %579 = vector.broadcast %577 : vector<1x16xf32> to vector<16x16xf32>
    %580 = arith.addf %578, %579 : vector<16x16xf32>
    %cst_154 = arith.constant 0.000000e+00 : f32
    %581 = vector.broadcast %cst_154 : f32 to vector<16x16xf32>
    %582 = arith.cmpf oge, %580, %581 : vector<16x16xf32>
    %cst_155 = arith.constant 2.000000e-01 : f32
    %583 = vector.broadcast %cst_155 : f32 to vector<16x16xf32>
    %584 = arith.mulf %583, %580 : vector<16x16xf32>
    %585 = arith.select %582, %580, %584 : vector<16x16xi1>, vector<16x16xf32>
    %586 = vector.extract_strided_slice %515 {offsets = [0, 7], sizes = [16, 1], strides = [1, 1]} : vector<16x32xf32> to vector<16x1xf32>
    %587 = vector.extract_strided_slice %513 {offsets = [7, 0], sizes = [1, 16], strides = [1, 1]} : vector<32x16xf32> to vector<1x16xf32>
    %588 = vector.broadcast %586 : vector<16x1xf32> to vector<16x16xf32>
    %589 = vector.broadcast %587 : vector<1x16xf32> to vector<16x16xf32>
    %590 = arith.addf %588, %589 : vector<16x16xf32>
    %cst_156 = arith.constant 0.000000e+00 : f32
    %591 = vector.broadcast %cst_156 : f32 to vector<16x16xf32>
    %592 = arith.cmpf oge, %590, %591 : vector<16x16xf32>
    %cst_157 = arith.constant 2.000000e-01 : f32
    %593 = vector.broadcast %cst_157 : f32 to vector<16x16xf32>
    %594 = arith.mulf %593, %590 : vector<16x16xf32>
    %595 = arith.select %592, %590, %594 : vector<16x16xi1>, vector<16x16xf32>
    %596 = vector.extract_strided_slice %515 {offsets = [0, 8], sizes = [16, 1], strides = [1, 1]} : vector<16x32xf32> to vector<16x1xf32>
    %597 = vector.extract_strided_slice %513 {offsets = [8, 0], sizes = [1, 16], strides = [1, 1]} : vector<32x16xf32> to vector<1x16xf32>
    %598 = vector.broadcast %596 : vector<16x1xf32> to vector<16x16xf32>
    %599 = vector.broadcast %597 : vector<1x16xf32> to vector<16x16xf32>
    %600 = arith.addf %598, %599 : vector<16x16xf32>
    %cst_158 = arith.constant 0.000000e+00 : f32
    %601 = vector.broadcast %cst_158 : f32 to vector<16x16xf32>
    %602 = arith.cmpf oge, %600, %601 : vector<16x16xf32>
    %cst_159 = arith.constant 2.000000e-01 : f32
    %603 = vector.broadcast %cst_159 : f32 to vector<16x16xf32>
    %604 = arith.mulf %603, %600 : vector<16x16xf32>
    %605 = arith.select %602, %600, %604 : vector<16x16xi1>, vector<16x16xf32>
    %606 = vector.extract_strided_slice %515 {offsets = [0, 9], sizes = [16, 1], strides = [1, 1]} : vector<16x32xf32> to vector<16x1xf32>
    %607 = vector.extract_strided_slice %513 {offsets = [9, 0], sizes = [1, 16], strides = [1, 1]} : vector<32x16xf32> to vector<1x16xf32>
    %608 = vector.broadcast %606 : vector<16x1xf32> to vector<16x16xf32>
    %609 = vector.broadcast %607 : vector<1x16xf32> to vector<16x16xf32>
    %610 = arith.addf %608, %609 : vector<16x16xf32>
    %cst_160 = arith.constant 0.000000e+00 : f32
    %611 = vector.broadcast %cst_160 : f32 to vector<16x16xf32>
    %612 = arith.cmpf oge, %610, %611 : vector<16x16xf32>
    %cst_161 = arith.constant 2.000000e-01 : f32
    %613 = vector.broadcast %cst_161 : f32 to vector<16x16xf32>
    %614 = arith.mulf %613, %610 : vector<16x16xf32>
    %615 = arith.select %612, %610, %614 : vector<16x16xi1>, vector<16x16xf32>
    %616 = vector.extract_strided_slice %515 {offsets = [0, 10], sizes = [16, 1], strides = [1, 1]} : vector<16x32xf32> to vector<16x1xf32>
    %617 = vector.extract_strided_slice %513 {offsets = [10, 0], sizes = [1, 16], strides = [1, 1]} : vector<32x16xf32> to vector<1x16xf32>
    %618 = vector.broadcast %616 : vector<16x1xf32> to vector<16x16xf32>
    %619 = vector.broadcast %617 : vector<1x16xf32> to vector<16x16xf32>
    %620 = arith.addf %618, %619 : vector<16x16xf32>
    %cst_162 = arith.constant 0.000000e+00 : f32
    %621 = vector.broadcast %cst_162 : f32 to vector<16x16xf32>
    %622 = arith.cmpf oge, %620, %621 : vector<16x16xf32>
    %cst_163 = arith.constant 2.000000e-01 : f32
    %623 = vector.broadcast %cst_163 : f32 to vector<16x16xf32>
    %624 = arith.mulf %623, %620 : vector<16x16xf32>
    %625 = arith.select %622, %620, %624 : vector<16x16xi1>, vector<16x16xf32>
    %626 = vector.extract_strided_slice %515 {offsets = [0, 11], sizes = [16, 1], strides = [1, 1]} : vector<16x32xf32> to vector<16x1xf32>
    %627 = vector.extract_strided_slice %513 {offsets = [11, 0], sizes = [1, 16], strides = [1, 1]} : vector<32x16xf32> to vector<1x16xf32>
    %628 = vector.broadcast %626 : vector<16x1xf32> to vector<16x16xf32>
    %629 = vector.broadcast %627 : vector<1x16xf32> to vector<16x16xf32>
    %630 = arith.addf %628, %629 : vector<16x16xf32>
    %cst_164 = arith.constant 0.000000e+00 : f32
    %631 = vector.broadcast %cst_164 : f32 to vector<16x16xf32>
    %632 = arith.cmpf oge, %630, %631 : vector<16x16xf32>
    %cst_165 = arith.constant 2.000000e-01 : f32
    %633 = vector.broadcast %cst_165 : f32 to vector<16x16xf32>
    %634 = arith.mulf %633, %630 : vector<16x16xf32>
    %635 = arith.select %632, %630, %634 : vector<16x16xi1>, vector<16x16xf32>
    %636 = vector.extract_strided_slice %515 {offsets = [0, 12], sizes = [16, 1], strides = [1, 1]} : vector<16x32xf32> to vector<16x1xf32>
    %637 = vector.extract_strided_slice %513 {offsets = [12, 0], sizes = [1, 16], strides = [1, 1]} : vector<32x16xf32> to vector<1x16xf32>
    %638 = vector.broadcast %636 : vector<16x1xf32> to vector<16x16xf32>
    %639 = vector.broadcast %637 : vector<1x16xf32> to vector<16x16xf32>
    %640 = arith.addf %638, %639 : vector<16x16xf32>
    %cst_166 = arith.constant 0.000000e+00 : f32
    %641 = vector.broadcast %cst_166 : f32 to vector<16x16xf32>
    %642 = arith.cmpf oge, %640, %641 : vector<16x16xf32>
    %cst_167 = arith.constant 2.000000e-01 : f32
    %643 = vector.broadcast %cst_167 : f32 to vector<16x16xf32>
    %644 = arith.mulf %643, %640 : vector<16x16xf32>
    %645 = arith.select %642, %640, %644 : vector<16x16xi1>, vector<16x16xf32>
    %646 = vector.extract_strided_slice %515 {offsets = [0, 13], sizes = [16, 1], strides = [1, 1]} : vector<16x32xf32> to vector<16x1xf32>
    %647 = vector.extract_strided_slice %513 {offsets = [13, 0], sizes = [1, 16], strides = [1, 1]} : vector<32x16xf32> to vector<1x16xf32>
    %648 = vector.broadcast %646 : vector<16x1xf32> to vector<16x16xf32>
    %649 = vector.broadcast %647 : vector<1x16xf32> to vector<16x16xf32>
    %650 = arith.addf %648, %649 : vector<16x16xf32>
    %cst_168 = arith.constant 0.000000e+00 : f32
    %651 = vector.broadcast %cst_168 : f32 to vector<16x16xf32>
    %652 = arith.cmpf oge, %650, %651 : vector<16x16xf32>
    %cst_169 = arith.constant 2.000000e-01 : f32
    %653 = vector.broadcast %cst_169 : f32 to vector<16x16xf32>
    %654 = arith.mulf %653, %650 : vector<16x16xf32>
    %655 = arith.select %652, %650, %654 : vector<16x16xi1>, vector<16x16xf32>
    %656 = vector.extract_strided_slice %515 {offsets = [0, 14], sizes = [16, 1], strides = [1, 1]} : vector<16x32xf32> to vector<16x1xf32>
    %657 = vector.extract_strided_slice %513 {offsets = [14, 0], sizes = [1, 16], strides = [1, 1]} : vector<32x16xf32> to vector<1x16xf32>
    %658 = vector.broadcast %656 : vector<16x1xf32> to vector<16x16xf32>
    %659 = vector.broadcast %657 : vector<1x16xf32> to vector<16x16xf32>
    %660 = arith.addf %658, %659 : vector<16x16xf32>
    %cst_170 = arith.constant 0.000000e+00 : f32
    %661 = vector.broadcast %cst_170 : f32 to vector<16x16xf32>
    %662 = arith.cmpf oge, %660, %661 : vector<16x16xf32>
    %cst_171 = arith.constant 2.000000e-01 : f32
    %663 = vector.broadcast %cst_171 : f32 to vector<16x16xf32>
    %664 = arith.mulf %663, %660 : vector<16x16xf32>
    %665 = arith.select %662, %660, %664 : vector<16x16xi1>, vector<16x16xf32>
    %666 = vector.extract_strided_slice %515 {offsets = [0, 15], sizes = [16, 1], strides = [1, 1]} : vector<16x32xf32> to vector<16x1xf32>
    %667 = vector.extract_strided_slice %513 {offsets = [15, 0], sizes = [1, 16], strides = [1, 1]} : vector<32x16xf32> to vector<1x16xf32>
    %668 = vector.broadcast %666 : vector<16x1xf32> to vector<16x16xf32>
    %669 = vector.broadcast %667 : vector<1x16xf32> to vector<16x16xf32>
    %670 = arith.addf %668, %669 : vector<16x16xf32>
    %cst_172 = arith.constant 0.000000e+00 : f32
    %671 = vector.broadcast %cst_172 : f32 to vector<16x16xf32>
    %672 = arith.cmpf oge, %670, %671 : vector<16x16xf32>
    %cst_173 = arith.constant 2.000000e-01 : f32
    %673 = vector.broadcast %cst_173 : f32 to vector<16x16xf32>
    %674 = arith.mulf %673, %670 : vector<16x16xf32>
    %675 = arith.select %672, %670, %674 : vector<16x16xi1>, vector<16x16xf32>
    %676 = vector.extract_strided_slice %515 {offsets = [0, 16], sizes = [16, 1], strides = [1, 1]} : vector<16x32xf32> to vector<16x1xf32>
    %677 = vector.extract_strided_slice %513 {offsets = [16, 0], sizes = [1, 16], strides = [1, 1]} : vector<32x16xf32> to vector<1x16xf32>
    %678 = vector.broadcast %676 : vector<16x1xf32> to vector<16x16xf32>
    %679 = vector.broadcast %677 : vector<1x16xf32> to vector<16x16xf32>
    %680 = arith.addf %678, %679 : vector<16x16xf32>
    %cst_174 = arith.constant 0.000000e+00 : f32
    %681 = vector.broadcast %cst_174 : f32 to vector<16x16xf32>
    %682 = arith.cmpf oge, %680, %681 : vector<16x16xf32>
    %cst_175 = arith.constant 2.000000e-01 : f32
    %683 = vector.broadcast %cst_175 : f32 to vector<16x16xf32>
    %684 = arith.mulf %683, %680 : vector<16x16xf32>
    %685 = arith.select %682, %680, %684 : vector<16x16xi1>, vector<16x16xf32>
    %686 = vector.extract_strided_slice %515 {offsets = [0, 17], sizes = [16, 1], strides = [1, 1]} : vector<16x32xf32> to vector<16x1xf32>
    %687 = vector.extract_strided_slice %513 {offsets = [17, 0], sizes = [1, 16], strides = [1, 1]} : vector<32x16xf32> to vector<1x16xf32>
    %688 = vector.broadcast %686 : vector<16x1xf32> to vector<16x16xf32>
    %689 = vector.broadcast %687 : vector<1x16xf32> to vector<16x16xf32>
    %690 = arith.addf %688, %689 : vector<16x16xf32>
    %cst_176 = arith.constant 0.000000e+00 : f32
    %691 = vector.broadcast %cst_176 : f32 to vector<16x16xf32>
    %692 = arith.cmpf oge, %690, %691 : vector<16x16xf32>
    %cst_177 = arith.constant 2.000000e-01 : f32
    %693 = vector.broadcast %cst_177 : f32 to vector<16x16xf32>
    %694 = arith.mulf %693, %690 : vector<16x16xf32>
    %695 = arith.select %692, %690, %694 : vector<16x16xi1>, vector<16x16xf32>
    %696 = vector.extract_strided_slice %515 {offsets = [0, 18], sizes = [16, 1], strides = [1, 1]} : vector<16x32xf32> to vector<16x1xf32>
    %697 = vector.extract_strided_slice %513 {offsets = [18, 0], sizes = [1, 16], strides = [1, 1]} : vector<32x16xf32> to vector<1x16xf32>
    %698 = vector.broadcast %696 : vector<16x1xf32> to vector<16x16xf32>
    %699 = vector.broadcast %697 : vector<1x16xf32> to vector<16x16xf32>
    %700 = arith.addf %698, %699 : vector<16x16xf32>
    %cst_178 = arith.constant 0.000000e+00 : f32
    %701 = vector.broadcast %cst_178 : f32 to vector<16x16xf32>
    %702 = arith.cmpf oge, %700, %701 : vector<16x16xf32>
    %cst_179 = arith.constant 2.000000e-01 : f32
    %703 = vector.broadcast %cst_179 : f32 to vector<16x16xf32>
    %704 = arith.mulf %703, %700 : vector<16x16xf32>
    %705 = arith.select %702, %700, %704 : vector<16x16xi1>, vector<16x16xf32>
    %706 = vector.extract_strided_slice %515 {offsets = [0, 19], sizes = [16, 1], strides = [1, 1]} : vector<16x32xf32> to vector<16x1xf32>
    %707 = vector.extract_strided_slice %513 {offsets = [19, 0], sizes = [1, 16], strides = [1, 1]} : vector<32x16xf32> to vector<1x16xf32>
    %708 = vector.broadcast %706 : vector<16x1xf32> to vector<16x16xf32>
    %709 = vector.broadcast %707 : vector<1x16xf32> to vector<16x16xf32>
    %710 = arith.addf %708, %709 : vector<16x16xf32>
    %cst_180 = arith.constant 0.000000e+00 : f32
    %711 = vector.broadcast %cst_180 : f32 to vector<16x16xf32>
    %712 = arith.cmpf oge, %710, %711 : vector<16x16xf32>
    %cst_181 = arith.constant 2.000000e-01 : f32
    %713 = vector.broadcast %cst_181 : f32 to vector<16x16xf32>
    %714 = arith.mulf %713, %710 : vector<16x16xf32>
    %715 = arith.select %712, %710, %714 : vector<16x16xi1>, vector<16x16xf32>
    %716 = vector.extract_strided_slice %515 {offsets = [0, 20], sizes = [16, 1], strides = [1, 1]} : vector<16x32xf32> to vector<16x1xf32>
    %717 = vector.extract_strided_slice %513 {offsets = [20, 0], sizes = [1, 16], strides = [1, 1]} : vector<32x16xf32> to vector<1x16xf32>
    %718 = vector.broadcast %716 : vector<16x1xf32> to vector<16x16xf32>
    %719 = vector.broadcast %717 : vector<1x16xf32> to vector<16x16xf32>
    %720 = arith.addf %718, %719 : vector<16x16xf32>
    %cst_182 = arith.constant 0.000000e+00 : f32
    %721 = vector.broadcast %cst_182 : f32 to vector<16x16xf32>
    %722 = arith.cmpf oge, %720, %721 : vector<16x16xf32>
    %cst_183 = arith.constant 2.000000e-01 : f32
    %723 = vector.broadcast %cst_183 : f32 to vector<16x16xf32>
    %724 = arith.mulf %723, %720 : vector<16x16xf32>
    %725 = arith.select %722, %720, %724 : vector<16x16xi1>, vector<16x16xf32>
    %726 = vector.extract_strided_slice %515 {offsets = [0, 21], sizes = [16, 1], strides = [1, 1]} : vector<16x32xf32> to vector<16x1xf32>
    %727 = vector.extract_strided_slice %513 {offsets = [21, 0], sizes = [1, 16], strides = [1, 1]} : vector<32x16xf32> to vector<1x16xf32>
    %728 = vector.broadcast %726 : vector<16x1xf32> to vector<16x16xf32>
    %729 = vector.broadcast %727 : vector<1x16xf32> to vector<16x16xf32>
    %730 = arith.addf %728, %729 : vector<16x16xf32>
    %cst_184 = arith.constant 0.000000e+00 : f32
    %731 = vector.broadcast %cst_184 : f32 to vector<16x16xf32>
    %732 = arith.cmpf oge, %730, %731 : vector<16x16xf32>
    %cst_185 = arith.constant 2.000000e-01 : f32
    %733 = vector.broadcast %cst_185 : f32 to vector<16x16xf32>
    %734 = arith.mulf %733, %730 : vector<16x16xf32>
    %735 = arith.select %732, %730, %734 : vector<16x16xi1>, vector<16x16xf32>
    %736 = vector.extract_strided_slice %515 {offsets = [0, 22], sizes = [16, 1], strides = [1, 1]} : vector<16x32xf32> to vector<16x1xf32>
    %737 = vector.extract_strided_slice %513 {offsets = [22, 0], sizes = [1, 16], strides = [1, 1]} : vector<32x16xf32> to vector<1x16xf32>
    %738 = vector.broadcast %736 : vector<16x1xf32> to vector<16x16xf32>
    %739 = vector.broadcast %737 : vector<1x16xf32> to vector<16x16xf32>
    %740 = arith.addf %738, %739 : vector<16x16xf32>
    %cst_186 = arith.constant 0.000000e+00 : f32
    %741 = vector.broadcast %cst_186 : f32 to vector<16x16xf32>
    %742 = arith.cmpf oge, %740, %741 : vector<16x16xf32>
    %cst_187 = arith.constant 2.000000e-01 : f32
    %743 = vector.broadcast %cst_187 : f32 to vector<16x16xf32>
    %744 = arith.mulf %743, %740 : vector<16x16xf32>
    %745 = arith.select %742, %740, %744 : vector<16x16xi1>, vector<16x16xf32>
    %746 = vector.extract_strided_slice %515 {offsets = [0, 23], sizes = [16, 1], strides = [1, 1]} : vector<16x32xf32> to vector<16x1xf32>
    %747 = vector.extract_strided_slice %513 {offsets = [23, 0], sizes = [1, 16], strides = [1, 1]} : vector<32x16xf32> to vector<1x16xf32>
    %748 = vector.broadcast %746 : vector<16x1xf32> to vector<16x16xf32>
    %749 = vector.broadcast %747 : vector<1x16xf32> to vector<16x16xf32>
    %750 = arith.addf %748, %749 : vector<16x16xf32>
    %cst_188 = arith.constant 0.000000e+00 : f32
    %751 = vector.broadcast %cst_188 : f32 to vector<16x16xf32>
    %752 = arith.cmpf oge, %750, %751 : vector<16x16xf32>
    %cst_189 = arith.constant 2.000000e-01 : f32
    %753 = vector.broadcast %cst_189 : f32 to vector<16x16xf32>
    %754 = arith.mulf %753, %750 : vector<16x16xf32>
    %755 = arith.select %752, %750, %754 : vector<16x16xi1>, vector<16x16xf32>
    %756 = vector.extract_strided_slice %515 {offsets = [0, 24], sizes = [16, 1], strides = [1, 1]} : vector<16x32xf32> to vector<16x1xf32>
    %757 = vector.extract_strided_slice %513 {offsets = [24, 0], sizes = [1, 16], strides = [1, 1]} : vector<32x16xf32> to vector<1x16xf32>
    %758 = vector.broadcast %756 : vector<16x1xf32> to vector<16x16xf32>
    %759 = vector.broadcast %757 : vector<1x16xf32> to vector<16x16xf32>
    %760 = arith.addf %758, %759 : vector<16x16xf32>
    %cst_190 = arith.constant 0.000000e+00 : f32
    %761 = vector.broadcast %cst_190 : f32 to vector<16x16xf32>
    %762 = arith.cmpf oge, %760, %761 : vector<16x16xf32>
    %cst_191 = arith.constant 2.000000e-01 : f32
    %763 = vector.broadcast %cst_191 : f32 to vector<16x16xf32>
    %764 = arith.mulf %763, %760 : vector<16x16xf32>
    %765 = arith.select %762, %760, %764 : vector<16x16xi1>, vector<16x16xf32>
    %766 = vector.extract_strided_slice %515 {offsets = [0, 25], sizes = [16, 1], strides = [1, 1]} : vector<16x32xf32> to vector<16x1xf32>
    %767 = vector.extract_strided_slice %513 {offsets = [25, 0], sizes = [1, 16], strides = [1, 1]} : vector<32x16xf32> to vector<1x16xf32>
    %768 = vector.broadcast %766 : vector<16x1xf32> to vector<16x16xf32>
    %769 = vector.broadcast %767 : vector<1x16xf32> to vector<16x16xf32>
    %770 = arith.addf %768, %769 : vector<16x16xf32>
    %cst_192 = arith.constant 0.000000e+00 : f32
    %771 = vector.broadcast %cst_192 : f32 to vector<16x16xf32>
    %772 = arith.cmpf oge, %770, %771 : vector<16x16xf32>
    %cst_193 = arith.constant 2.000000e-01 : f32
    %773 = vector.broadcast %cst_193 : f32 to vector<16x16xf32>
    %774 = arith.mulf %773, %770 : vector<16x16xf32>
    %775 = arith.select %772, %770, %774 : vector<16x16xi1>, vector<16x16xf32>
    %776 = vector.extract_strided_slice %515 {offsets = [0, 26], sizes = [16, 1], strides = [1, 1]} : vector<16x32xf32> to vector<16x1xf32>
    %777 = vector.extract_strided_slice %513 {offsets = [26, 0], sizes = [1, 16], strides = [1, 1]} : vector<32x16xf32> to vector<1x16xf32>
    %778 = vector.broadcast %776 : vector<16x1xf32> to vector<16x16xf32>
    %779 = vector.broadcast %777 : vector<1x16xf32> to vector<16x16xf32>
    %780 = arith.addf %778, %779 : vector<16x16xf32>
    %cst_194 = arith.constant 0.000000e+00 : f32
    %781 = vector.broadcast %cst_194 : f32 to vector<16x16xf32>
    %782 = arith.cmpf oge, %780, %781 : vector<16x16xf32>
    %cst_195 = arith.constant 2.000000e-01 : f32
    %783 = vector.broadcast %cst_195 : f32 to vector<16x16xf32>
    %784 = arith.mulf %783, %780 : vector<16x16xf32>
    %785 = arith.select %782, %780, %784 : vector<16x16xi1>, vector<16x16xf32>
    %786 = vector.extract_strided_slice %515 {offsets = [0, 27], sizes = [16, 1], strides = [1, 1]} : vector<16x32xf32> to vector<16x1xf32>
    %787 = vector.extract_strided_slice %513 {offsets = [27, 0], sizes = [1, 16], strides = [1, 1]} : vector<32x16xf32> to vector<1x16xf32>
    %788 = vector.broadcast %786 : vector<16x1xf32> to vector<16x16xf32>
    %789 = vector.broadcast %787 : vector<1x16xf32> to vector<16x16xf32>
    %790 = arith.addf %788, %789 : vector<16x16xf32>
    %cst_196 = arith.constant 0.000000e+00 : f32
    %791 = vector.broadcast %cst_196 : f32 to vector<16x16xf32>
    %792 = arith.cmpf oge, %790, %791 : vector<16x16xf32>
    %cst_197 = arith.constant 2.000000e-01 : f32
    %793 = vector.broadcast %cst_197 : f32 to vector<16x16xf32>
    %794 = arith.mulf %793, %790 : vector<16x16xf32>
    %795 = arith.select %792, %790, %794 : vector<16x16xi1>, vector<16x16xf32>
    %796 = vector.extract_strided_slice %515 {offsets = [0, 28], sizes = [16, 1], strides = [1, 1]} : vector<16x32xf32> to vector<16x1xf32>
    %797 = vector.extract_strided_slice %513 {offsets = [28, 0], sizes = [1, 16], strides = [1, 1]} : vector<32x16xf32> to vector<1x16xf32>
    %798 = vector.broadcast %796 : vector<16x1xf32> to vector<16x16xf32>
    %799 = vector.broadcast %797 : vector<1x16xf32> to vector<16x16xf32>
    %800 = arith.addf %798, %799 : vector<16x16xf32>
    %cst_198 = arith.constant 0.000000e+00 : f32
    %801 = vector.broadcast %cst_198 : f32 to vector<16x16xf32>
    %802 = arith.cmpf oge, %800, %801 : vector<16x16xf32>
    %cst_199 = arith.constant 2.000000e-01 : f32
    %803 = vector.broadcast %cst_199 : f32 to vector<16x16xf32>
    %804 = arith.mulf %803, %800 : vector<16x16xf32>
    %805 = arith.select %802, %800, %804 : vector<16x16xi1>, vector<16x16xf32>
    %806 = vector.extract_strided_slice %515 {offsets = [0, 29], sizes = [16, 1], strides = [1, 1]} : vector<16x32xf32> to vector<16x1xf32>
    %807 = vector.extract_strided_slice %513 {offsets = [29, 0], sizes = [1, 16], strides = [1, 1]} : vector<32x16xf32> to vector<1x16xf32>
    %808 = vector.broadcast %806 : vector<16x1xf32> to vector<16x16xf32>
    %809 = vector.broadcast %807 : vector<1x16xf32> to vector<16x16xf32>
    %810 = arith.addf %808, %809 : vector<16x16xf32>
    %cst_200 = arith.constant 0.000000e+00 : f32
    %811 = vector.broadcast %cst_200 : f32 to vector<16x16xf32>
    %812 = arith.cmpf oge, %810, %811 : vector<16x16xf32>
    %cst_201 = arith.constant 2.000000e-01 : f32
    %813 = vector.broadcast %cst_201 : f32 to vector<16x16xf32>
    %814 = arith.mulf %813, %810 : vector<16x16xf32>
    %815 = arith.select %812, %810, %814 : vector<16x16xi1>, vector<16x16xf32>
    %816 = vector.extract_strided_slice %515 {offsets = [0, 30], sizes = [16, 1], strides = [1, 1]} : vector<16x32xf32> to vector<16x1xf32>
    %817 = vector.extract_strided_slice %513 {offsets = [30, 0], sizes = [1, 16], strides = [1, 1]} : vector<32x16xf32> to vector<1x16xf32>
    %818 = vector.broadcast %816 : vector<16x1xf32> to vector<16x16xf32>
    %819 = vector.broadcast %817 : vector<1x16xf32> to vector<16x16xf32>
    %820 = arith.addf %818, %819 : vector<16x16xf32>
    %cst_202 = arith.constant 0.000000e+00 : f32
    %821 = vector.broadcast %cst_202 : f32 to vector<16x16xf32>
    %822 = arith.cmpf oge, %820, %821 : vector<16x16xf32>
    %cst_203 = arith.constant 2.000000e-01 : f32
    %823 = vector.broadcast %cst_203 : f32 to vector<16x16xf32>
    %824 = arith.mulf %823, %820 : vector<16x16xf32>
    %825 = arith.select %822, %820, %824 : vector<16x16xi1>, vector<16x16xf32>
    %826 = vector.extract_strided_slice %515 {offsets = [0, 31], sizes = [16, 1], strides = [1, 1]} : vector<16x32xf32> to vector<16x1xf32>
    %827 = vector.extract_strided_slice %513 {offsets = [31, 0], sizes = [1, 16], strides = [1, 1]} : vector<32x16xf32> to vector<1x16xf32>
    %828 = vector.broadcast %826 : vector<16x1xf32> to vector<16x16xf32>
    %829 = vector.broadcast %827 : vector<1x16xf32> to vector<16x16xf32>
    %830 = arith.addf %828, %829 : vector<16x16xf32>
    %cst_204 = arith.constant 0.000000e+00 : f32
    %831 = vector.broadcast %cst_204 : f32 to vector<16x16xf32>
    %832 = arith.cmpf oge, %830, %831 : vector<16x16xf32>
    %cst_205 = arith.constant 2.000000e-01 : f32
    %833 = vector.broadcast %cst_205 : f32 to vector<16x16xf32>
    %834 = arith.mulf %833, %830 : vector<16x16xf32>
    %835 = arith.select %832, %830, %834 : vector<16x16xi1>, vector<16x16xf32>
    %c0_206 = arith.constant 0 : index
    %c0_207 = arith.constant 0 : index
    %836 = memref.load %arg4[%c0_206, %c0_207] : memref<4x8xf32, #tpu.memory_space<smem>>
    %837 = vector.broadcast %836 : f32 to vector<16x16xf32>
    %838 = arith.mulf %837, %525 : vector<16x16xf32>
    %c0_208 = arith.constant 0 : index
    %c1_209 = arith.constant 1 : index
    %839 = memref.load %arg4[%c0_208, %c1_209] : memref<4x8xf32, #tpu.memory_space<smem>>
    %840 = vector.broadcast %839 : f32 to vector<16x16xf32>
    %841 = arith.mulf %840, %535 : vector<16x16xf32>
    %842 = arith.addf %838, %841 : vector<16x16xf32>
    %c0_210 = arith.constant 0 : index
    %c2_211 = arith.constant 2 : index
    %843 = memref.load %arg4[%c0_210, %c2_211] : memref<4x8xf32, #tpu.memory_space<smem>>
    %844 = vector.broadcast %843 : f32 to vector<16x16xf32>
    %845 = arith.mulf %844, %545 : vector<16x16xf32>
    %846 = arith.addf %842, %845 : vector<16x16xf32>
    %c0_212 = arith.constant 0 : index
    %c3_213 = arith.constant 3 : index
    %847 = memref.load %arg4[%c0_212, %c3_213] : memref<4x8xf32, #tpu.memory_space<smem>>
    %848 = vector.broadcast %847 : f32 to vector<16x16xf32>
    %849 = arith.mulf %848, %555 : vector<16x16xf32>
    %850 = arith.addf %846, %849 : vector<16x16xf32>
    %c0_214 = arith.constant 0 : index
    %c4_215 = arith.constant 4 : index
    %851 = memref.load %arg4[%c0_214, %c4_215] : memref<4x8xf32, #tpu.memory_space<smem>>
    %852 = vector.broadcast %851 : f32 to vector<16x16xf32>
    %853 = arith.mulf %852, %565 : vector<16x16xf32>
    %854 = arith.addf %850, %853 : vector<16x16xf32>
    %c0_216 = arith.constant 0 : index
    %c5_217 = arith.constant 5 : index
    %855 = memref.load %arg4[%c0_216, %c5_217] : memref<4x8xf32, #tpu.memory_space<smem>>
    %856 = vector.broadcast %855 : f32 to vector<16x16xf32>
    %857 = arith.mulf %856, %575 : vector<16x16xf32>
    %858 = arith.addf %854, %857 : vector<16x16xf32>
    %c0_218 = arith.constant 0 : index
    %c6_219 = arith.constant 6 : index
    %859 = memref.load %arg4[%c0_218, %c6_219] : memref<4x8xf32, #tpu.memory_space<smem>>
    %860 = vector.broadcast %859 : f32 to vector<16x16xf32>
    %861 = arith.mulf %860, %585 : vector<16x16xf32>
    %862 = arith.addf %858, %861 : vector<16x16xf32>
    %c0_220 = arith.constant 0 : index
    %c7_221 = arith.constant 7 : index
    %863 = memref.load %arg4[%c0_220, %c7_221] : memref<4x8xf32, #tpu.memory_space<smem>>
    %864 = vector.broadcast %863 : f32 to vector<16x16xf32>
    %865 = arith.mulf %864, %595 : vector<16x16xf32>
    %866 = arith.addf %862, %865 : vector<16x16xf32>
    %c1_222 = arith.constant 1 : index
    %c0_223 = arith.constant 0 : index
    %867 = memref.load %arg4[%c1_222, %c0_223] : memref<4x8xf32, #tpu.memory_space<smem>>
    %868 = vector.broadcast %867 : f32 to vector<16x16xf32>
    %869 = arith.mulf %868, %605 : vector<16x16xf32>
    %c1_224 = arith.constant 1 : index
    %c1_225 = arith.constant 1 : index
    %870 = memref.load %arg4[%c1_224, %c1_225] : memref<4x8xf32, #tpu.memory_space<smem>>
    %871 = vector.broadcast %870 : f32 to vector<16x16xf32>
    %872 = arith.mulf %871, %615 : vector<16x16xf32>
    %873 = arith.addf %869, %872 : vector<16x16xf32>
    %c1_226 = arith.constant 1 : index
    %c2_227 = arith.constant 2 : index
    %874 = memref.load %arg4[%c1_226, %c2_227] : memref<4x8xf32, #tpu.memory_space<smem>>
    %875 = vector.broadcast %874 : f32 to vector<16x16xf32>
    %876 = arith.mulf %875, %625 : vector<16x16xf32>
    %877 = arith.addf %873, %876 : vector<16x16xf32>
    %c1_228 = arith.constant 1 : index
    %c3_229 = arith.constant 3 : index
    %878 = memref.load %arg4[%c1_228, %c3_229] : memref<4x8xf32, #tpu.memory_space<smem>>
    %879 = vector.broadcast %878 : f32 to vector<16x16xf32>
    %880 = arith.mulf %879, %635 : vector<16x16xf32>
    %881 = arith.addf %877, %880 : vector<16x16xf32>
    %c1_230 = arith.constant 1 : index
    %c4_231 = arith.constant 4 : index
    %882 = memref.load %arg4[%c1_230, %c4_231] : memref<4x8xf32, #tpu.memory_space<smem>>
    %883 = vector.broadcast %882 : f32 to vector<16x16xf32>
    %884 = arith.mulf %883, %645 : vector<16x16xf32>
    %885 = arith.addf %881, %884 : vector<16x16xf32>
    %c1_232 = arith.constant 1 : index
    %c5_233 = arith.constant 5 : index
    %886 = memref.load %arg4[%c1_232, %c5_233] : memref<4x8xf32, #tpu.memory_space<smem>>
    %887 = vector.broadcast %886 : f32 to vector<16x16xf32>
    %888 = arith.mulf %887, %655 : vector<16x16xf32>
    %889 = arith.addf %885, %888 : vector<16x16xf32>
    %c1_234 = arith.constant 1 : index
    %c6_235 = arith.constant 6 : index
    %890 = memref.load %arg4[%c1_234, %c6_235] : memref<4x8xf32, #tpu.memory_space<smem>>
    %891 = vector.broadcast %890 : f32 to vector<16x16xf32>
    %892 = arith.mulf %891, %665 : vector<16x16xf32>
    %893 = arith.addf %889, %892 : vector<16x16xf32>
    %c1_236 = arith.constant 1 : index
    %c7_237 = arith.constant 7 : index
    %894 = memref.load %arg4[%c1_236, %c7_237] : memref<4x8xf32, #tpu.memory_space<smem>>
    %895 = vector.broadcast %894 : f32 to vector<16x16xf32>
    %896 = arith.mulf %895, %675 : vector<16x16xf32>
    %897 = arith.addf %893, %896 : vector<16x16xf32>
    %c2_238 = arith.constant 2 : index
    %c0_239 = arith.constant 0 : index
    %898 = memref.load %arg4[%c2_238, %c0_239] : memref<4x8xf32, #tpu.memory_space<smem>>
    %899 = vector.broadcast %898 : f32 to vector<16x16xf32>
    %900 = arith.mulf %899, %685 : vector<16x16xf32>
    %c2_240 = arith.constant 2 : index
    %c1_241 = arith.constant 1 : index
    %901 = memref.load %arg4[%c2_240, %c1_241] : memref<4x8xf32, #tpu.memory_space<smem>>
    %902 = vector.broadcast %901 : f32 to vector<16x16xf32>
    %903 = arith.mulf %902, %695 : vector<16x16xf32>
    %904 = arith.addf %900, %903 : vector<16x16xf32>
    %c2_242 = arith.constant 2 : index
    %c2_243 = arith.constant 2 : index
    %905 = memref.load %arg4[%c2_242, %c2_243] : memref<4x8xf32, #tpu.memory_space<smem>>
    %906 = vector.broadcast %905 : f32 to vector<16x16xf32>
    %907 = arith.mulf %906, %705 : vector<16x16xf32>
    %908 = arith.addf %904, %907 : vector<16x16xf32>
    %c2_244 = arith.constant 2 : index
    %c3_245 = arith.constant 3 : index
    %909 = memref.load %arg4[%c2_244, %c3_245] : memref<4x8xf32, #tpu.memory_space<smem>>
    %910 = vector.broadcast %909 : f32 to vector<16x16xf32>
    %911 = arith.mulf %910, %715 : vector<16x16xf32>
    %912 = arith.addf %908, %911 : vector<16x16xf32>
    %c2_246 = arith.constant 2 : index
    %c4_247 = arith.constant 4 : index
    %913 = memref.load %arg4[%c2_246, %c4_247] : memref<4x8xf32, #tpu.memory_space<smem>>
    %914 = vector.broadcast %913 : f32 to vector<16x16xf32>
    %915 = arith.mulf %914, %725 : vector<16x16xf32>
    %916 = arith.addf %912, %915 : vector<16x16xf32>
    %c2_248 = arith.constant 2 : index
    %c5_249 = arith.constant 5 : index
    %917 = memref.load %arg4[%c2_248, %c5_249] : memref<4x8xf32, #tpu.memory_space<smem>>
    %918 = vector.broadcast %917 : f32 to vector<16x16xf32>
    %919 = arith.mulf %918, %735 : vector<16x16xf32>
    %920 = arith.addf %916, %919 : vector<16x16xf32>
    %c2_250 = arith.constant 2 : index
    %c6_251 = arith.constant 6 : index
    %921 = memref.load %arg4[%c2_250, %c6_251] : memref<4x8xf32, #tpu.memory_space<smem>>
    %922 = vector.broadcast %921 : f32 to vector<16x16xf32>
    %923 = arith.mulf %922, %745 : vector<16x16xf32>
    %924 = arith.addf %920, %923 : vector<16x16xf32>
    %c2_252 = arith.constant 2 : index
    %c7_253 = arith.constant 7 : index
    %925 = memref.load %arg4[%c2_252, %c7_253] : memref<4x8xf32, #tpu.memory_space<smem>>
    %926 = vector.broadcast %925 : f32 to vector<16x16xf32>
    %927 = arith.mulf %926, %755 : vector<16x16xf32>
    %928 = arith.addf %924, %927 : vector<16x16xf32>
    %c3_254 = arith.constant 3 : index
    %c0_255 = arith.constant 0 : index
    %929 = memref.load %arg4[%c3_254, %c0_255] : memref<4x8xf32, #tpu.memory_space<smem>>
    %930 = vector.broadcast %929 : f32 to vector<16x16xf32>
    %931 = arith.mulf %930, %765 : vector<16x16xf32>
    %c3_256 = arith.constant 3 : index
    %c1_257 = arith.constant 1 : index
    %932 = memref.load %arg4[%c3_256, %c1_257] : memref<4x8xf32, #tpu.memory_space<smem>>
    %933 = vector.broadcast %932 : f32 to vector<16x16xf32>
    %934 = arith.mulf %933, %775 : vector<16x16xf32>
    %935 = arith.addf %931, %934 : vector<16x16xf32>
    %c3_258 = arith.constant 3 : index
    %c2_259 = arith.constant 2 : index
    %936 = memref.load %arg4[%c3_258, %c2_259] : memref<4x8xf32, #tpu.memory_space<smem>>
    %937 = vector.broadcast %936 : f32 to vector<16x16xf32>
    %938 = arith.mulf %937, %785 : vector<16x16xf32>
    %939 = arith.addf %935, %938 : vector<16x16xf32>
    %c3_260 = arith.constant 3 : index
    %c3_261 = arith.constant 3 : index
    %940 = memref.load %arg4[%c3_260, %c3_261] : memref<4x8xf32, #tpu.memory_space<smem>>
    %941 = vector.broadcast %940 : f32 to vector<16x16xf32>
    %942 = arith.mulf %941, %795 : vector<16x16xf32>
    %943 = arith.addf %939, %942 : vector<16x16xf32>
    %c3_262 = arith.constant 3 : index
    %c4_263 = arith.constant 4 : index
    %944 = memref.load %arg4[%c3_262, %c4_263] : memref<4x8xf32, #tpu.memory_space<smem>>
    %945 = vector.broadcast %944 : f32 to vector<16x16xf32>
    %946 = arith.mulf %945, %805 : vector<16x16xf32>
    %947 = arith.addf %943, %946 : vector<16x16xf32>
    %c3_264 = arith.constant 3 : index
    %c5_265 = arith.constant 5 : index
    %948 = memref.load %arg4[%c3_264, %c5_265] : memref<4x8xf32, #tpu.memory_space<smem>>
    %949 = vector.broadcast %948 : f32 to vector<16x16xf32>
    %950 = arith.mulf %949, %815 : vector<16x16xf32>
    %951 = arith.addf %947, %950 : vector<16x16xf32>
    %c3_266 = arith.constant 3 : index
    %c6_267 = arith.constant 6 : index
    %952 = memref.load %arg4[%c3_266, %c6_267] : memref<4x8xf32, #tpu.memory_space<smem>>
    %953 = vector.broadcast %952 : f32 to vector<16x16xf32>
    %954 = arith.mulf %953, %825 : vector<16x16xf32>
    %955 = arith.addf %951, %954 : vector<16x16xf32>
    %c3_268 = arith.constant 3 : index
    %c7_269 = arith.constant 7 : index
    %956 = memref.load %arg4[%c3_268, %c7_269] : memref<4x8xf32, #tpu.memory_space<smem>>
    %957 = vector.broadcast %956 : f32 to vector<16x16xf32>
    %958 = arith.mulf %957, %835 : vector<16x16xf32>
    %959 = arith.addf %955, %958 : vector<16x16xf32>
    %960 = vector.shape_cast %866 : vector<16x16xf32> to vector<1x16x16xf32>
    %961 = vector.shape_cast %897 : vector<16x16xf32> to vector<1x16x16xf32>
    %962 = vector.shape_cast %928 : vector<16x16xf32> to vector<1x16x16xf32>
    %963 = vector.shape_cast %959 : vector<16x16xf32> to vector<1x16x16xf32>
    %964 = tpu.concatenate %960, %961, %962, %963 in 0 : vector<1x16x16xf32>, vector<1x16x16xf32>, vector<1x16x16xf32>, vector<1x16x16xf32> -> vector<4x16x16xf32>
    %c0_270 = arith.constant 0 : index
    %c0_271 = arith.constant 0 : index
    %965 = vector.load %arg1[%c0_270, %c0_271] : memref<16x16xi8, #tpu.memory_space<vmem>>, vector<16x16xi8>
    %c0_i8_272 = arith.constant 0 : i8
    %966 = vector.broadcast %c0_i8_272 : i8 to vector<16x16xi8>
    %967 = arith.cmpi ne, %965, %966 : vector<16x16xi8>
    %968 = vector.shape_cast %967 : vector<16x16xi1> to vector<1x16x16xi1>
    %cst_273 = arith.constant -1.000000e+30 : f32
    %969 = vector.shape_cast %968 : vector<1x16x16xi1> to vector<1x16x16xi1>
    %970 = vector.broadcast %969 : vector<1x16x16xi1> to vector<4x16x16xi1>
    %971 = vector.broadcast %cst_273 : f32 to vector<4x16x16xf32>
    %972 = arith.select %970, %964, %971 : vector<4x16x16xi1>, vector<4x16x16xf32>
    %cst_274 = arith.constant dense<0xFF800000> : vector<4x16xf32>
    %973 = vector.multi_reduction <maximumf>, %972, %cst_274 [2] : vector<4x16x16xf32> to vector<4x16xf32>
    %974 = vector.shape_cast %973 : vector<4x16xf32> to vector<4x16x1xf32>
    %975 = vector.broadcast %974 : vector<4x16x1xf32> to vector<4x16x16xf32>
    %976 = arith.subf %972, %975 : vector<4x16x16xf32>
    %977 = math.exp %976 : vector<4x16x16xf32>
    %cst_275 = arith.constant 0.000000e+00 : f32
    %978 = vector.shape_cast %968 : vector<1x16x16xi1> to vector<1x16x16xi1>
    %979 = vector.broadcast %978 : vector<1x16x16xi1> to vector<4x16x16xi1>
    %980 = vector.broadcast %cst_275 : f32 to vector<4x16x16xf32>
    %981 = arith.select %979, %977, %980 : vector<4x16x16xi1>, vector<4x16x16xf32>
    %cst_276 = arith.constant dense<0.000000e+00> : vector<4x16xf32>
    %982 = vector.multi_reduction <add>, %981, %cst_276 [2] : vector<4x16x16xf32> to vector<4x16xf32>
    %983 = vector.shape_cast %982 : vector<4x16xf32> to vector<4x16x1xf32>
    %cst_277 = arith.constant 1.000000e-30 : f32
    %984 = vector.broadcast %cst_277 : f32 to vector<4x16x1xf32>
    %985 = arith.maximumf %983, %984 : vector<4x16x1xf32>
    %986 = vector.broadcast %985 : vector<4x16x1xf32> to vector<4x16x16xf32>
    %987 = arith.divf %981, %986 : vector<4x16x16xf32>
    %988 = vector.extract_strided_slice %513 {offsets = [0, 0], sizes = [8, 16], strides = [1, 1]} : vector<32x16xf32> to vector<8x16xf32>
    %989 = vector.extract_strided_slice %513 {offsets = [8, 0], sizes = [8, 16], strides = [1, 1]} : vector<32x16xf32> to vector<8x16xf32>
    %990 = vector.extract_strided_slice %513 {offsets = [16, 0], sizes = [8, 16], strides = [1, 1]} : vector<32x16xf32> to vector<8x16xf32>
    %991 = vector.extract_strided_slice %513 {offsets = [24, 0], sizes = [8, 16], strides = [1, 1]} : vector<32x16xf32> to vector<8x16xf32>
    %992 = vector.shape_cast %988 : vector<8x16xf32> to vector<1x8x16xf32>
    %993 = vector.shape_cast %989 : vector<8x16xf32> to vector<1x8x16xf32>
    %994 = vector.shape_cast %990 : vector<8x16xf32> to vector<1x8x16xf32>
    %995 = vector.shape_cast %991 : vector<8x16xf32> to vector<1x8x16xf32>
    %996 = tpu.concatenate %992, %993, %994, %995 in 0 : vector<1x8x16xf32>, vector<1x8x16xf32>, vector<1x8x16xf32>, vector<1x8x16xf32> -> vector<4x8x16xf32>
    "tpu.trace_start"() <{level = 10 : i32, message = "hdj,hij->hdi"}> : () -> ()
    %cst_278 = arith.constant dense<0.000000e+00> : vector<4x8x16xf32>
    %997 = tpu.matmul %996, %987, %cst_278 {dimension_numbers = #tpu.dot_dimension_numbers<[2], [2], [1], [1], [0, 0, 0, 1, 1, 1], [0], [0]>} : vector<4x8x16xf32>, vector<4x16x16xf32>, vector<4x8x16xf32> -> vector<4x8x16xf32>
    "tpu.trace_stop"() : () -> ()
    %998 = vector.extract_strided_slice %997 {offsets = [0, 0, 0], sizes = [1, 8, 16], strides = [1, 1, 1]} : vector<4x8x16xf32> to vector<1x8x16xf32>
    %999 = vector.shape_cast %998 : vector<1x8x16xf32> to vector<8x16xf32>
    %1000 = vector.extract_strided_slice %997 {offsets = [1, 0, 0], sizes = [1, 8, 16], strides = [1, 1, 1]} : vector<4x8x16xf32> to vector<1x8x16xf32>
    %1001 = vector.shape_cast %1000 : vector<1x8x16xf32> to vector<8x16xf32>
    %1002 = vector.extract_strided_slice %997 {offsets = [2, 0, 0], sizes = [1, 8, 16], strides = [1, 1, 1]} : vector<4x8x16xf32> to vector<1x8x16xf32>
    %1003 = vector.shape_cast %1002 : vector<1x8x16xf32> to vector<8x16xf32>
    %1004 = vector.extract_strided_slice %997 {offsets = [3, 0, 0], sizes = [1, 8, 16], strides = [1, 1, 1]} : vector<4x8x16xf32> to vector<1x8x16xf32>
    %1005 = vector.shape_cast %1004 : vector<1x8x16xf32> to vector<8x16xf32>
    %1006 = tpu.concatenate %999, %1001, %1003, %1005 in 0 : vector<8x16xf32>, vector<8x16xf32>, vector<8x16xf32>, vector<8x16xf32> -> vector<32x16xf32>
    %cst_279 = arith.constant 0.000000e+00 : f32
    %1007 = vector.broadcast %cst_279 : f32 to vector<32x16xf32>
    %1008 = arith.cmpf ogt, %1006, %1007 : vector<32x16xf32>
    %cst_280 = arith.constant 0.000000e+00 : f32
    %1009 = vector.broadcast %cst_280 : f32 to vector<32x16xf32>
    %1010 = arith.minimumf %1006, %1009 : vector<32x16xf32>
    %1011 = math.exp %1010 : vector<32x16xf32>
    %cst_281 = arith.constant 1.000000e+00 : f32
    %1012 = vector.broadcast %cst_281 : f32 to vector<32x16xf32>
    %1013 = arith.subf %1011, %1012 : vector<32x16xf32>
    %1014 = arith.select %1008, %1006, %1013 : vector<32x16xi1>, vector<32x16xf32>
    %c0_282 = arith.constant 0 : index
    %c0_283 = arith.constant 0 : index
    %1015 = vector.load %arg11[%c0_282, %c0_283] : memref<64x32xf32, #tpu.memory_space<vmem>>, vector<64x32xf32>
    %cst_284 = arith.constant dense<0.000000e+00> : vector<64x16xf32>
    %1016 = tpu.matmul %1015, %1014, %cst_284 {dimension_numbers = #tpu.dot_dimension_numbers<[1], [0], [0], [1], [0, 0, 1, 1], [], []>} : vector<64x32xf32>, vector<32x16xf32>, vector<64x16xf32> -> vector<64x16xf32>
    %c0_285 = arith.constant 0 : index
    %c0_286 = arith.constant 0 : index
    %1017 = vector.load %arg12[%c0_285, %c0_286] : memref<64x1xf32, #tpu.memory_space<vmem>>, vector<64x1xf32>
    %1018 = vector.broadcast %1017 : vector<64x1xf32> to vector<64x16xf32>
    %1019 = arith.addf %1016, %1018 : vector<64x16xf32>
    %1020 = vector.extract_strided_slice %1019 {offsets = [0, 0], sizes = [32, 16], strides = [1, 1]} : vector<64x16xf32> to vector<32x16xf32>
    %1021 = vector.extract_strided_slice %1019 {offsets = [32, 0], sizes = [32, 16], strides = [1, 1]} : vector<64x16xf32> to vector<32x16xf32>
    %1022 = tpu.transpose %1021, [1, 0] : vector<32x16xf32> -> vector<16x32xf32>
    %1023 = vector.extract_strided_slice %1022 {offsets = [0, 0], sizes = [16, 1], strides = [1, 1]} : vector<16x32xf32> to vector<16x1xf32>
    %1024 = vector.extract_strided_slice %1020 {offsets = [0, 0], sizes = [1, 16], strides = [1, 1]} : vector<32x16xf32> to vector<1x16xf32>
    %1025 = vector.broadcast %1023 : vector<16x1xf32> to vector<16x16xf32>
    %1026 = vector.broadcast %1024 : vector<1x16xf32> to vector<16x16xf32>
    %1027 = arith.addf %1025, %1026 : vector<16x16xf32>
    %cst_287 = arith.constant 0.000000e+00 : f32
    %1028 = vector.broadcast %cst_287 : f32 to vector<16x16xf32>
    %1029 = arith.cmpf oge, %1027, %1028 : vector<16x16xf32>
    %cst_288 = arith.constant 2.000000e-01 : f32
    %1030 = vector.broadcast %cst_288 : f32 to vector<16x16xf32>
    %1031 = arith.mulf %1030, %1027 : vector<16x16xf32>
    %1032 = arith.select %1029, %1027, %1031 : vector<16x16xi1>, vector<16x16xf32>
    %1033 = vector.extract_strided_slice %1022 {offsets = [0, 1], sizes = [16, 1], strides = [1, 1]} : vector<16x32xf32> to vector<16x1xf32>
    %1034 = vector.extract_strided_slice %1020 {offsets = [1, 0], sizes = [1, 16], strides = [1, 1]} : vector<32x16xf32> to vector<1x16xf32>
    %1035 = vector.broadcast %1033 : vector<16x1xf32> to vector<16x16xf32>
    %1036 = vector.broadcast %1034 : vector<1x16xf32> to vector<16x16xf32>
    %1037 = arith.addf %1035, %1036 : vector<16x16xf32>
    %cst_289 = arith.constant 0.000000e+00 : f32
    %1038 = vector.broadcast %cst_289 : f32 to vector<16x16xf32>
    %1039 = arith.cmpf oge, %1037, %1038 : vector<16x16xf32>
    %cst_290 = arith.constant 2.000000e-01 : f32
    %1040 = vector.broadcast %cst_290 : f32 to vector<16x16xf32>
    %1041 = arith.mulf %1040, %1037 : vector<16x16xf32>
    %1042 = arith.select %1039, %1037, %1041 : vector<16x16xi1>, vector<16x16xf32>
    %1043 = vector.extract_strided_slice %1022 {offsets = [0, 2], sizes = [16, 1], strides = [1, 1]} : vector<16x32xf32> to vector<16x1xf32>
    %1044 = vector.extract_strided_slice %1020 {offsets = [2, 0], sizes = [1, 16], strides = [1, 1]} : vector<32x16xf32> to vector<1x16xf32>
    %1045 = vector.broadcast %1043 : vector<16x1xf32> to vector<16x16xf32>
    %1046 = vector.broadcast %1044 : vector<1x16xf32> to vector<16x16xf32>
    %1047 = arith.addf %1045, %1046 : vector<16x16xf32>
    %cst_291 = arith.constant 0.000000e+00 : f32
    %1048 = vector.broadcast %cst_291 : f32 to vector<16x16xf32>
    %1049 = arith.cmpf oge, %1047, %1048 : vector<16x16xf32>
    %cst_292 = arith.constant 2.000000e-01 : f32
    %1050 = vector.broadcast %cst_292 : f32 to vector<16x16xf32>
    %1051 = arith.mulf %1050, %1047 : vector<16x16xf32>
    %1052 = arith.select %1049, %1047, %1051 : vector<16x16xi1>, vector<16x16xf32>
    %1053 = vector.extract_strided_slice %1022 {offsets = [0, 3], sizes = [16, 1], strides = [1, 1]} : vector<16x32xf32> to vector<16x1xf32>
    %1054 = vector.extract_strided_slice %1020 {offsets = [3, 0], sizes = [1, 16], strides = [1, 1]} : vector<32x16xf32> to vector<1x16xf32>
    %1055 = vector.broadcast %1053 : vector<16x1xf32> to vector<16x16xf32>
    %1056 = vector.broadcast %1054 : vector<1x16xf32> to vector<16x16xf32>
    %1057 = arith.addf %1055, %1056 : vector<16x16xf32>
    %cst_293 = arith.constant 0.000000e+00 : f32
    %1058 = vector.broadcast %cst_293 : f32 to vector<16x16xf32>
    %1059 = arith.cmpf oge, %1057, %1058 : vector<16x16xf32>
    %cst_294 = arith.constant 2.000000e-01 : f32
    %1060 = vector.broadcast %cst_294 : f32 to vector<16x16xf32>
    %1061 = arith.mulf %1060, %1057 : vector<16x16xf32>
    %1062 = arith.select %1059, %1057, %1061 : vector<16x16xi1>, vector<16x16xf32>
    %1063 = vector.extract_strided_slice %1022 {offsets = [0, 4], sizes = [16, 1], strides = [1, 1]} : vector<16x32xf32> to vector<16x1xf32>
    %1064 = vector.extract_strided_slice %1020 {offsets = [4, 0], sizes = [1, 16], strides = [1, 1]} : vector<32x16xf32> to vector<1x16xf32>
    %1065 = vector.broadcast %1063 : vector<16x1xf32> to vector<16x16xf32>
    %1066 = vector.broadcast %1064 : vector<1x16xf32> to vector<16x16xf32>
    %1067 = arith.addf %1065, %1066 : vector<16x16xf32>
    %cst_295 = arith.constant 0.000000e+00 : f32
    %1068 = vector.broadcast %cst_295 : f32 to vector<16x16xf32>
    %1069 = arith.cmpf oge, %1067, %1068 : vector<16x16xf32>
    %cst_296 = arith.constant 2.000000e-01 : f32
    %1070 = vector.broadcast %cst_296 : f32 to vector<16x16xf32>
    %1071 = arith.mulf %1070, %1067 : vector<16x16xf32>
    %1072 = arith.select %1069, %1067, %1071 : vector<16x16xi1>, vector<16x16xf32>
    %1073 = vector.extract_strided_slice %1022 {offsets = [0, 5], sizes = [16, 1], strides = [1, 1]} : vector<16x32xf32> to vector<16x1xf32>
    %1074 = vector.extract_strided_slice %1020 {offsets = [5, 0], sizes = [1, 16], strides = [1, 1]} : vector<32x16xf32> to vector<1x16xf32>
    %1075 = vector.broadcast %1073 : vector<16x1xf32> to vector<16x16xf32>
    %1076 = vector.broadcast %1074 : vector<1x16xf32> to vector<16x16xf32>
    %1077 = arith.addf %1075, %1076 : vector<16x16xf32>
    %cst_297 = arith.constant 0.000000e+00 : f32
    %1078 = vector.broadcast %cst_297 : f32 to vector<16x16xf32>
    %1079 = arith.cmpf oge, %1077, %1078 : vector<16x16xf32>
    %cst_298 = arith.constant 2.000000e-01 : f32
    %1080 = vector.broadcast %cst_298 : f32 to vector<16x16xf32>
    %1081 = arith.mulf %1080, %1077 : vector<16x16xf32>
    %1082 = arith.select %1079, %1077, %1081 : vector<16x16xi1>, vector<16x16xf32>
    %1083 = vector.extract_strided_slice %1022 {offsets = [0, 6], sizes = [16, 1], strides = [1, 1]} : vector<16x32xf32> to vector<16x1xf32>
    %1084 = vector.extract_strided_slice %1020 {offsets = [6, 0], sizes = [1, 16], strides = [1, 1]} : vector<32x16xf32> to vector<1x16xf32>
    %1085 = vector.broadcast %1083 : vector<16x1xf32> to vector<16x16xf32>
    %1086 = vector.broadcast %1084 : vector<1x16xf32> to vector<16x16xf32>
    %1087 = arith.addf %1085, %1086 : vector<16x16xf32>
    %cst_299 = arith.constant 0.000000e+00 : f32
    %1088 = vector.broadcast %cst_299 : f32 to vector<16x16xf32>
    %1089 = arith.cmpf oge, %1087, %1088 : vector<16x16xf32>
    %cst_300 = arith.constant 2.000000e-01 : f32
    %1090 = vector.broadcast %cst_300 : f32 to vector<16x16xf32>
    %1091 = arith.mulf %1090, %1087 : vector<16x16xf32>
    %1092 = arith.select %1089, %1087, %1091 : vector<16x16xi1>, vector<16x16xf32>
    %1093 = vector.extract_strided_slice %1022 {offsets = [0, 7], sizes = [16, 1], strides = [1, 1]} : vector<16x32xf32> to vector<16x1xf32>
    %1094 = vector.extract_strided_slice %1020 {offsets = [7, 0], sizes = [1, 16], strides = [1, 1]} : vector<32x16xf32> to vector<1x16xf32>
    %1095 = vector.broadcast %1093 : vector<16x1xf32> to vector<16x16xf32>
    %1096 = vector.broadcast %1094 : vector<1x16xf32> to vector<16x16xf32>
    %1097 = arith.addf %1095, %1096 : vector<16x16xf32>
    %cst_301 = arith.constant 0.000000e+00 : f32
    %1098 = vector.broadcast %cst_301 : f32 to vector<16x16xf32>
    %1099 = arith.cmpf oge, %1097, %1098 : vector<16x16xf32>
    %cst_302 = arith.constant 2.000000e-01 : f32
    %1100 = vector.broadcast %cst_302 : f32 to vector<16x16xf32>
    %1101 = arith.mulf %1100, %1097 : vector<16x16xf32>
    %1102 = arith.select %1099, %1097, %1101 : vector<16x16xi1>, vector<16x16xf32>
    %1103 = vector.extract_strided_slice %1022 {offsets = [0, 8], sizes = [16, 1], strides = [1, 1]} : vector<16x32xf32> to vector<16x1xf32>
    %1104 = vector.extract_strided_slice %1020 {offsets = [8, 0], sizes = [1, 16], strides = [1, 1]} : vector<32x16xf32> to vector<1x16xf32>
    %1105 = vector.broadcast %1103 : vector<16x1xf32> to vector<16x16xf32>
    %1106 = vector.broadcast %1104 : vector<1x16xf32> to vector<16x16xf32>
    %1107 = arith.addf %1105, %1106 : vector<16x16xf32>
    %cst_303 = arith.constant 0.000000e+00 : f32
    %1108 = vector.broadcast %cst_303 : f32 to vector<16x16xf32>
    %1109 = arith.cmpf oge, %1107, %1108 : vector<16x16xf32>
    %cst_304 = arith.constant 2.000000e-01 : f32
    %1110 = vector.broadcast %cst_304 : f32 to vector<16x16xf32>
    %1111 = arith.mulf %1110, %1107 : vector<16x16xf32>
    %1112 = arith.select %1109, %1107, %1111 : vector<16x16xi1>, vector<16x16xf32>
    %1113 = vector.extract_strided_slice %1022 {offsets = [0, 9], sizes = [16, 1], strides = [1, 1]} : vector<16x32xf32> to vector<16x1xf32>
    %1114 = vector.extract_strided_slice %1020 {offsets = [9, 0], sizes = [1, 16], strides = [1, 1]} : vector<32x16xf32> to vector<1x16xf32>
    %1115 = vector.broadcast %1113 : vector<16x1xf32> to vector<16x16xf32>
    %1116 = vector.broadcast %1114 : vector<1x16xf32> to vector<16x16xf32>
    %1117 = arith.addf %1115, %1116 : vector<16x16xf32>
    %cst_305 = arith.constant 0.000000e+00 : f32
    %1118 = vector.broadcast %cst_305 : f32 to vector<16x16xf32>
    %1119 = arith.cmpf oge, %1117, %1118 : vector<16x16xf32>
    %cst_306 = arith.constant 2.000000e-01 : f32
    %1120 = vector.broadcast %cst_306 : f32 to vector<16x16xf32>
    %1121 = arith.mulf %1120, %1117 : vector<16x16xf32>
    %1122 = arith.select %1119, %1117, %1121 : vector<16x16xi1>, vector<16x16xf32>
    %1123 = vector.extract_strided_slice %1022 {offsets = [0, 10], sizes = [16, 1], strides = [1, 1]} : vector<16x32xf32> to vector<16x1xf32>
    %1124 = vector.extract_strided_slice %1020 {offsets = [10, 0], sizes = [1, 16], strides = [1, 1]} : vector<32x16xf32> to vector<1x16xf32>
    %1125 = vector.broadcast %1123 : vector<16x1xf32> to vector<16x16xf32>
    %1126 = vector.broadcast %1124 : vector<1x16xf32> to vector<16x16xf32>
    %1127 = arith.addf %1125, %1126 : vector<16x16xf32>
    %cst_307 = arith.constant 0.000000e+00 : f32
    %1128 = vector.broadcast %cst_307 : f32 to vector<16x16xf32>
    %1129 = arith.cmpf oge, %1127, %1128 : vector<16x16xf32>
    %cst_308 = arith.constant 2.000000e-01 : f32
    %1130 = vector.broadcast %cst_308 : f32 to vector<16x16xf32>
    %1131 = arith.mulf %1130, %1127 : vector<16x16xf32>
    %1132 = arith.select %1129, %1127, %1131 : vector<16x16xi1>, vector<16x16xf32>
    %1133 = vector.extract_strided_slice %1022 {offsets = [0, 11], sizes = [16, 1], strides = [1, 1]} : vector<16x32xf32> to vector<16x1xf32>
    %1134 = vector.extract_strided_slice %1020 {offsets = [11, 0], sizes = [1, 16], strides = [1, 1]} : vector<32x16xf32> to vector<1x16xf32>
    %1135 = vector.broadcast %1133 : vector<16x1xf32> to vector<16x16xf32>
    %1136 = vector.broadcast %1134 : vector<1x16xf32> to vector<16x16xf32>
    %1137 = arith.addf %1135, %1136 : vector<16x16xf32>
    %cst_309 = arith.constant 0.000000e+00 : f32
    %1138 = vector.broadcast %cst_309 : f32 to vector<16x16xf32>
    %1139 = arith.cmpf oge, %1137, %1138 : vector<16x16xf32>
    %cst_310 = arith.constant 2.000000e-01 : f32
    %1140 = vector.broadcast %cst_310 : f32 to vector<16x16xf32>
    %1141 = arith.mulf %1140, %1137 : vector<16x16xf32>
    %1142 = arith.select %1139, %1137, %1141 : vector<16x16xi1>, vector<16x16xf32>
    %1143 = vector.extract_strided_slice %1022 {offsets = [0, 12], sizes = [16, 1], strides = [1, 1]} : vector<16x32xf32> to vector<16x1xf32>
    %1144 = vector.extract_strided_slice %1020 {offsets = [12, 0], sizes = [1, 16], strides = [1, 1]} : vector<32x16xf32> to vector<1x16xf32>
    %1145 = vector.broadcast %1143 : vector<16x1xf32> to vector<16x16xf32>
    %1146 = vector.broadcast %1144 : vector<1x16xf32> to vector<16x16xf32>
    %1147 = arith.addf %1145, %1146 : vector<16x16xf32>
    %cst_311 = arith.constant 0.000000e+00 : f32
    %1148 = vector.broadcast %cst_311 : f32 to vector<16x16xf32>
    %1149 = arith.cmpf oge, %1147, %1148 : vector<16x16xf32>
    %cst_312 = arith.constant 2.000000e-01 : f32
    %1150 = vector.broadcast %cst_312 : f32 to vector<16x16xf32>
    %1151 = arith.mulf %1150, %1147 : vector<16x16xf32>
    %1152 = arith.select %1149, %1147, %1151 : vector<16x16xi1>, vector<16x16xf32>
    %1153 = vector.extract_strided_slice %1022 {offsets = [0, 13], sizes = [16, 1], strides = [1, 1]} : vector<16x32xf32> to vector<16x1xf32>
    %1154 = vector.extract_strided_slice %1020 {offsets = [13, 0], sizes = [1, 16], strides = [1, 1]} : vector<32x16xf32> to vector<1x16xf32>
    %1155 = vector.broadcast %1153 : vector<16x1xf32> to vector<16x16xf32>
    %1156 = vector.broadcast %1154 : vector<1x16xf32> to vector<16x16xf32>
    %1157 = arith.addf %1155, %1156 : vector<16x16xf32>
    %cst_313 = arith.constant 0.000000e+00 : f32
    %1158 = vector.broadcast %cst_313 : f32 to vector<16x16xf32>
    %1159 = arith.cmpf oge, %1157, %1158 : vector<16x16xf32>
    %cst_314 = arith.constant 2.000000e-01 : f32
    %1160 = vector.broadcast %cst_314 : f32 to vector<16x16xf32>
    %1161 = arith.mulf %1160, %1157 : vector<16x16xf32>
    %1162 = arith.select %1159, %1157, %1161 : vector<16x16xi1>, vector<16x16xf32>
    %1163 = vector.extract_strided_slice %1022 {offsets = [0, 14], sizes = [16, 1], strides = [1, 1]} : vector<16x32xf32> to vector<16x1xf32>
    %1164 = vector.extract_strided_slice %1020 {offsets = [14, 0], sizes = [1, 16], strides = [1, 1]} : vector<32x16xf32> to vector<1x16xf32>
    %1165 = vector.broadcast %1163 : vector<16x1xf32> to vector<16x16xf32>
    %1166 = vector.broadcast %1164 : vector<1x16xf32> to vector<16x16xf32>
    %1167 = arith.addf %1165, %1166 : vector<16x16xf32>
    %cst_315 = arith.constant 0.000000e+00 : f32
    %1168 = vector.broadcast %cst_315 : f32 to vector<16x16xf32>
    %1169 = arith.cmpf oge, %1167, %1168 : vector<16x16xf32>
    %cst_316 = arith.constant 2.000000e-01 : f32
    %1170 = vector.broadcast %cst_316 : f32 to vector<16x16xf32>
    %1171 = arith.mulf %1170, %1167 : vector<16x16xf32>
    %1172 = arith.select %1169, %1167, %1171 : vector<16x16xi1>, vector<16x16xf32>
    %1173 = vector.extract_strided_slice %1022 {offsets = [0, 15], sizes = [16, 1], strides = [1, 1]} : vector<16x32xf32> to vector<16x1xf32>
    %1174 = vector.extract_strided_slice %1020 {offsets = [15, 0], sizes = [1, 16], strides = [1, 1]} : vector<32x16xf32> to vector<1x16xf32>
    %1175 = vector.broadcast %1173 : vector<16x1xf32> to vector<16x16xf32>
    %1176 = vector.broadcast %1174 : vector<1x16xf32> to vector<16x16xf32>
    %1177 = arith.addf %1175, %1176 : vector<16x16xf32>
    %cst_317 = arith.constant 0.000000e+00 : f32
    %1178 = vector.broadcast %cst_317 : f32 to vector<16x16xf32>
    %1179 = arith.cmpf oge, %1177, %1178 : vector<16x16xf32>
    %cst_318 = arith.constant 2.000000e-01 : f32
    %1180 = vector.broadcast %cst_318 : f32 to vector<16x16xf32>
    %1181 = arith.mulf %1180, %1177 : vector<16x16xf32>
    %1182 = arith.select %1179, %1177, %1181 : vector<16x16xi1>, vector<16x16xf32>
    %1183 = vector.extract_strided_slice %1022 {offsets = [0, 16], sizes = [16, 1], strides = [1, 1]} : vector<16x32xf32> to vector<16x1xf32>
    %1184 = vector.extract_strided_slice %1020 {offsets = [16, 0], sizes = [1, 16], strides = [1, 1]} : vector<32x16xf32> to vector<1x16xf32>
    %1185 = vector.broadcast %1183 : vector<16x1xf32> to vector<16x16xf32>
    %1186 = vector.broadcast %1184 : vector<1x16xf32> to vector<16x16xf32>
    %1187 = arith.addf %1185, %1186 : vector<16x16xf32>
    %cst_319 = arith.constant 0.000000e+00 : f32
    %1188 = vector.broadcast %cst_319 : f32 to vector<16x16xf32>
    %1189 = arith.cmpf oge, %1187, %1188 : vector<16x16xf32>
    %cst_320 = arith.constant 2.000000e-01 : f32
    %1190 = vector.broadcast %cst_320 : f32 to vector<16x16xf32>
    %1191 = arith.mulf %1190, %1187 : vector<16x16xf32>
    %1192 = arith.select %1189, %1187, %1191 : vector<16x16xi1>, vector<16x16xf32>
    %1193 = vector.extract_strided_slice %1022 {offsets = [0, 17], sizes = [16, 1], strides = [1, 1]} : vector<16x32xf32> to vector<16x1xf32>
    %1194 = vector.extract_strided_slice %1020 {offsets = [17, 0], sizes = [1, 16], strides = [1, 1]} : vector<32x16xf32> to vector<1x16xf32>
    %1195 = vector.broadcast %1193 : vector<16x1xf32> to vector<16x16xf32>
    %1196 = vector.broadcast %1194 : vector<1x16xf32> to vector<16x16xf32>
    %1197 = arith.addf %1195, %1196 : vector<16x16xf32>
    %cst_321 = arith.constant 0.000000e+00 : f32
    %1198 = vector.broadcast %cst_321 : f32 to vector<16x16xf32>
    %1199 = arith.cmpf oge, %1197, %1198 : vector<16x16xf32>
    %cst_322 = arith.constant 2.000000e-01 : f32
    %1200 = vector.broadcast %cst_322 : f32 to vector<16x16xf32>
    %1201 = arith.mulf %1200, %1197 : vector<16x16xf32>
    %1202 = arith.select %1199, %1197, %1201 : vector<16x16xi1>, vector<16x16xf32>
    %1203 = vector.extract_strided_slice %1022 {offsets = [0, 18], sizes = [16, 1], strides = [1, 1]} : vector<16x32xf32> to vector<16x1xf32>
    %1204 = vector.extract_strided_slice %1020 {offsets = [18, 0], sizes = [1, 16], strides = [1, 1]} : vector<32x16xf32> to vector<1x16xf32>
    %1205 = vector.broadcast %1203 : vector<16x1xf32> to vector<16x16xf32>
    %1206 = vector.broadcast %1204 : vector<1x16xf32> to vector<16x16xf32>
    %1207 = arith.addf %1205, %1206 : vector<16x16xf32>
    %cst_323 = arith.constant 0.000000e+00 : f32
    %1208 = vector.broadcast %cst_323 : f32 to vector<16x16xf32>
    %1209 = arith.cmpf oge, %1207, %1208 : vector<16x16xf32>
    %cst_324 = arith.constant 2.000000e-01 : f32
    %1210 = vector.broadcast %cst_324 : f32 to vector<16x16xf32>
    %1211 = arith.mulf %1210, %1207 : vector<16x16xf32>
    %1212 = arith.select %1209, %1207, %1211 : vector<16x16xi1>, vector<16x16xf32>
    %1213 = vector.extract_strided_slice %1022 {offsets = [0, 19], sizes = [16, 1], strides = [1, 1]} : vector<16x32xf32> to vector<16x1xf32>
    %1214 = vector.extract_strided_slice %1020 {offsets = [19, 0], sizes = [1, 16], strides = [1, 1]} : vector<32x16xf32> to vector<1x16xf32>
    %1215 = vector.broadcast %1213 : vector<16x1xf32> to vector<16x16xf32>
    %1216 = vector.broadcast %1214 : vector<1x16xf32> to vector<16x16xf32>
    %1217 = arith.addf %1215, %1216 : vector<16x16xf32>
    %cst_325 = arith.constant 0.000000e+00 : f32
    %1218 = vector.broadcast %cst_325 : f32 to vector<16x16xf32>
    %1219 = arith.cmpf oge, %1217, %1218 : vector<16x16xf32>
    %cst_326 = arith.constant 2.000000e-01 : f32
    %1220 = vector.broadcast %cst_326 : f32 to vector<16x16xf32>
    %1221 = arith.mulf %1220, %1217 : vector<16x16xf32>
    %1222 = arith.select %1219, %1217, %1221 : vector<16x16xi1>, vector<16x16xf32>
    %1223 = vector.extract_strided_slice %1022 {offsets = [0, 20], sizes = [16, 1], strides = [1, 1]} : vector<16x32xf32> to vector<16x1xf32>
    %1224 = vector.extract_strided_slice %1020 {offsets = [20, 0], sizes = [1, 16], strides = [1, 1]} : vector<32x16xf32> to vector<1x16xf32>
    %1225 = vector.broadcast %1223 : vector<16x1xf32> to vector<16x16xf32>
    %1226 = vector.broadcast %1224 : vector<1x16xf32> to vector<16x16xf32>
    %1227 = arith.addf %1225, %1226 : vector<16x16xf32>
    %cst_327 = arith.constant 0.000000e+00 : f32
    %1228 = vector.broadcast %cst_327 : f32 to vector<16x16xf32>
    %1229 = arith.cmpf oge, %1227, %1228 : vector<16x16xf32>
    %cst_328 = arith.constant 2.000000e-01 : f32
    %1230 = vector.broadcast %cst_328 : f32 to vector<16x16xf32>
    %1231 = arith.mulf %1230, %1227 : vector<16x16xf32>
    %1232 = arith.select %1229, %1227, %1231 : vector<16x16xi1>, vector<16x16xf32>
    %1233 = vector.extract_strided_slice %1022 {offsets = [0, 21], sizes = [16, 1], strides = [1, 1]} : vector<16x32xf32> to vector<16x1xf32>
    %1234 = vector.extract_strided_slice %1020 {offsets = [21, 0], sizes = [1, 16], strides = [1, 1]} : vector<32x16xf32> to vector<1x16xf32>
    %1235 = vector.broadcast %1233 : vector<16x1xf32> to vector<16x16xf32>
    %1236 = vector.broadcast %1234 : vector<1x16xf32> to vector<16x16xf32>
    %1237 = arith.addf %1235, %1236 : vector<16x16xf32>
    %cst_329 = arith.constant 0.000000e+00 : f32
    %1238 = vector.broadcast %cst_329 : f32 to vector<16x16xf32>
    %1239 = arith.cmpf oge, %1237, %1238 : vector<16x16xf32>
    %cst_330 = arith.constant 2.000000e-01 : f32
    %1240 = vector.broadcast %cst_330 : f32 to vector<16x16xf32>
    %1241 = arith.mulf %1240, %1237 : vector<16x16xf32>
    %1242 = arith.select %1239, %1237, %1241 : vector<16x16xi1>, vector<16x16xf32>
    %1243 = vector.extract_strided_slice %1022 {offsets = [0, 22], sizes = [16, 1], strides = [1, 1]} : vector<16x32xf32> to vector<16x1xf32>
    %1244 = vector.extract_strided_slice %1020 {offsets = [22, 0], sizes = [1, 16], strides = [1, 1]} : vector<32x16xf32> to vector<1x16xf32>
    %1245 = vector.broadcast %1243 : vector<16x1xf32> to vector<16x16xf32>
    %1246 = vector.broadcast %1244 : vector<1x16xf32> to vector<16x16xf32>
    %1247 = arith.addf %1245, %1246 : vector<16x16xf32>
    %cst_331 = arith.constant 0.000000e+00 : f32
    %1248 = vector.broadcast %cst_331 : f32 to vector<16x16xf32>
    %1249 = arith.cmpf oge, %1247, %1248 : vector<16x16xf32>
    %cst_332 = arith.constant 2.000000e-01 : f32
    %1250 = vector.broadcast %cst_332 : f32 to vector<16x16xf32>
    %1251 = arith.mulf %1250, %1247 : vector<16x16xf32>
    %1252 = arith.select %1249, %1247, %1251 : vector<16x16xi1>, vector<16x16xf32>
    %1253 = vector.extract_strided_slice %1022 {offsets = [0, 23], sizes = [16, 1], strides = [1, 1]} : vector<16x32xf32> to vector<16x1xf32>
    %1254 = vector.extract_strided_slice %1020 {offsets = [23, 0], sizes = [1, 16], strides = [1, 1]} : vector<32x16xf32> to vector<1x16xf32>
    %1255 = vector.broadcast %1253 : vector<16x1xf32> to vector<16x16xf32>
    %1256 = vector.broadcast %1254 : vector<1x16xf32> to vector<16x16xf32>
    %1257 = arith.addf %1255, %1256 : vector<16x16xf32>
    %cst_333 = arith.constant 0.000000e+00 : f32
    %1258 = vector.broadcast %cst_333 : f32 to vector<16x16xf32>
    %1259 = arith.cmpf oge, %1257, %1258 : vector<16x16xf32>
    %cst_334 = arith.constant 2.000000e-01 : f32
    %1260 = vector.broadcast %cst_334 : f32 to vector<16x16xf32>
    %1261 = arith.mulf %1260, %1257 : vector<16x16xf32>
    %1262 = arith.select %1259, %1257, %1261 : vector<16x16xi1>, vector<16x16xf32>
    %1263 = vector.extract_strided_slice %1022 {offsets = [0, 24], sizes = [16, 1], strides = [1, 1]} : vector<16x32xf32> to vector<16x1xf32>
    %1264 = vector.extract_strided_slice %1020 {offsets = [24, 0], sizes = [1, 16], strides = [1, 1]} : vector<32x16xf32> to vector<1x16xf32>
    %1265 = vector.broadcast %1263 : vector<16x1xf32> to vector<16x16xf32>
    %1266 = vector.broadcast %1264 : vector<1x16xf32> to vector<16x16xf32>
    %1267 = arith.addf %1265, %1266 : vector<16x16xf32>
    %cst_335 = arith.constant 0.000000e+00 : f32
    %1268 = vector.broadcast %cst_335 : f32 to vector<16x16xf32>
    %1269 = arith.cmpf oge, %1267, %1268 : vector<16x16xf32>
    %cst_336 = arith.constant 2.000000e-01 : f32
    %1270 = vector.broadcast %cst_336 : f32 to vector<16x16xf32>
    %1271 = arith.mulf %1270, %1267 : vector<16x16xf32>
    %1272 = arith.select %1269, %1267, %1271 : vector<16x16xi1>, vector<16x16xf32>
    %1273 = vector.extract_strided_slice %1022 {offsets = [0, 25], sizes = [16, 1], strides = [1, 1]} : vector<16x32xf32> to vector<16x1xf32>
    %1274 = vector.extract_strided_slice %1020 {offsets = [25, 0], sizes = [1, 16], strides = [1, 1]} : vector<32x16xf32> to vector<1x16xf32>
    %1275 = vector.broadcast %1273 : vector<16x1xf32> to vector<16x16xf32>
    %1276 = vector.broadcast %1274 : vector<1x16xf32> to vector<16x16xf32>
    %1277 = arith.addf %1275, %1276 : vector<16x16xf32>
    %cst_337 = arith.constant 0.000000e+00 : f32
    %1278 = vector.broadcast %cst_337 : f32 to vector<16x16xf32>
    %1279 = arith.cmpf oge, %1277, %1278 : vector<16x16xf32>
    %cst_338 = arith.constant 2.000000e-01 : f32
    %1280 = vector.broadcast %cst_338 : f32 to vector<16x16xf32>
    %1281 = arith.mulf %1280, %1277 : vector<16x16xf32>
    %1282 = arith.select %1279, %1277, %1281 : vector<16x16xi1>, vector<16x16xf32>
    %1283 = vector.extract_strided_slice %1022 {offsets = [0, 26], sizes = [16, 1], strides = [1, 1]} : vector<16x32xf32> to vector<16x1xf32>
    %1284 = vector.extract_strided_slice %1020 {offsets = [26, 0], sizes = [1, 16], strides = [1, 1]} : vector<32x16xf32> to vector<1x16xf32>
    %1285 = vector.broadcast %1283 : vector<16x1xf32> to vector<16x16xf32>
    %1286 = vector.broadcast %1284 : vector<1x16xf32> to vector<16x16xf32>
    %1287 = arith.addf %1285, %1286 : vector<16x16xf32>
    %cst_339 = arith.constant 0.000000e+00 : f32
    %1288 = vector.broadcast %cst_339 : f32 to vector<16x16xf32>
    %1289 = arith.cmpf oge, %1287, %1288 : vector<16x16xf32>
    %cst_340 = arith.constant 2.000000e-01 : f32
    %1290 = vector.broadcast %cst_340 : f32 to vector<16x16xf32>
    %1291 = arith.mulf %1290, %1287 : vector<16x16xf32>
    %1292 = arith.select %1289, %1287, %1291 : vector<16x16xi1>, vector<16x16xf32>
    %1293 = vector.extract_strided_slice %1022 {offsets = [0, 27], sizes = [16, 1], strides = [1, 1]} : vector<16x32xf32> to vector<16x1xf32>
    %1294 = vector.extract_strided_slice %1020 {offsets = [27, 0], sizes = [1, 16], strides = [1, 1]} : vector<32x16xf32> to vector<1x16xf32>
    %1295 = vector.broadcast %1293 : vector<16x1xf32> to vector<16x16xf32>
    %1296 = vector.broadcast %1294 : vector<1x16xf32> to vector<16x16xf32>
    %1297 = arith.addf %1295, %1296 : vector<16x16xf32>
    %cst_341 = arith.constant 0.000000e+00 : f32
    %1298 = vector.broadcast %cst_341 : f32 to vector<16x16xf32>
    %1299 = arith.cmpf oge, %1297, %1298 : vector<16x16xf32>
    %cst_342 = arith.constant 2.000000e-01 : f32
    %1300 = vector.broadcast %cst_342 : f32 to vector<16x16xf32>
    %1301 = arith.mulf %1300, %1297 : vector<16x16xf32>
    %1302 = arith.select %1299, %1297, %1301 : vector<16x16xi1>, vector<16x16xf32>
    %1303 = vector.extract_strided_slice %1022 {offsets = [0, 28], sizes = [16, 1], strides = [1, 1]} : vector<16x32xf32> to vector<16x1xf32>
    %1304 = vector.extract_strided_slice %1020 {offsets = [28, 0], sizes = [1, 16], strides = [1, 1]} : vector<32x16xf32> to vector<1x16xf32>
    %1305 = vector.broadcast %1303 : vector<16x1xf32> to vector<16x16xf32>
    %1306 = vector.broadcast %1304 : vector<1x16xf32> to vector<16x16xf32>
    %1307 = arith.addf %1305, %1306 : vector<16x16xf32>
    %cst_343 = arith.constant 0.000000e+00 : f32
    %1308 = vector.broadcast %cst_343 : f32 to vector<16x16xf32>
    %1309 = arith.cmpf oge, %1307, %1308 : vector<16x16xf32>
    %cst_344 = arith.constant 2.000000e-01 : f32
    %1310 = vector.broadcast %cst_344 : f32 to vector<16x16xf32>
    %1311 = arith.mulf %1310, %1307 : vector<16x16xf32>
    %1312 = arith.select %1309, %1307, %1311 : vector<16x16xi1>, vector<16x16xf32>
    %1313 = vector.extract_strided_slice %1022 {offsets = [0, 29], sizes = [16, 1], strides = [1, 1]} : vector<16x32xf32> to vector<16x1xf32>
    %1314 = vector.extract_strided_slice %1020 {offsets = [29, 0], sizes = [1, 16], strides = [1, 1]} : vector<32x16xf32> to vector<1x16xf32>
    %1315 = vector.broadcast %1313 : vector<16x1xf32> to vector<16x16xf32>
    %1316 = vector.broadcast %1314 : vector<1x16xf32> to vector<16x16xf32>
    %1317 = arith.addf %1315, %1316 : vector<16x16xf32>
    %cst_345 = arith.constant 0.000000e+00 : f32
    %1318 = vector.broadcast %cst_345 : f32 to vector<16x16xf32>
    %1319 = arith.cmpf oge, %1317, %1318 : vector<16x16xf32>
    %cst_346 = arith.constant 2.000000e-01 : f32
    %1320 = vector.broadcast %cst_346 : f32 to vector<16x16xf32>
    %1321 = arith.mulf %1320, %1317 : vector<16x16xf32>
    %1322 = arith.select %1319, %1317, %1321 : vector<16x16xi1>, vector<16x16xf32>
    %1323 = vector.extract_strided_slice %1022 {offsets = [0, 30], sizes = [16, 1], strides = [1, 1]} : vector<16x32xf32> to vector<16x1xf32>
    %1324 = vector.extract_strided_slice %1020 {offsets = [30, 0], sizes = [1, 16], strides = [1, 1]} : vector<32x16xf32> to vector<1x16xf32>
    %1325 = vector.broadcast %1323 : vector<16x1xf32> to vector<16x16xf32>
    %1326 = vector.broadcast %1324 : vector<1x16xf32> to vector<16x16xf32>
    %1327 = arith.addf %1325, %1326 : vector<16x16xf32>
    %cst_347 = arith.constant 0.000000e+00 : f32
    %1328 = vector.broadcast %cst_347 : f32 to vector<16x16xf32>
    %1329 = arith.cmpf oge, %1327, %1328 : vector<16x16xf32>
    %cst_348 = arith.constant 2.000000e-01 : f32
    %1330 = vector.broadcast %cst_348 : f32 to vector<16x16xf32>
    %1331 = arith.mulf %1330, %1327 : vector<16x16xf32>
    %1332 = arith.select %1329, %1327, %1331 : vector<16x16xi1>, vector<16x16xf32>
    %1333 = vector.extract_strided_slice %1022 {offsets = [0, 31], sizes = [16, 1], strides = [1, 1]} : vector<16x32xf32> to vector<16x1xf32>
    %1334 = vector.extract_strided_slice %1020 {offsets = [31, 0], sizes = [1, 16], strides = [1, 1]} : vector<32x16xf32> to vector<1x16xf32>
    %1335 = vector.broadcast %1333 : vector<16x1xf32> to vector<16x16xf32>
    %1336 = vector.broadcast %1334 : vector<1x16xf32> to vector<16x16xf32>
    %1337 = arith.addf %1335, %1336 : vector<16x16xf32>
    %cst_349 = arith.constant 0.000000e+00 : f32
    %1338 = vector.broadcast %cst_349 : f32 to vector<16x16xf32>
    %1339 = arith.cmpf oge, %1337, %1338 : vector<16x16xf32>
    %cst_350 = arith.constant 2.000000e-01 : f32
    %1340 = vector.broadcast %cst_350 : f32 to vector<16x16xf32>
    %1341 = arith.mulf %1340, %1337 : vector<16x16xf32>
    %1342 = arith.select %1339, %1337, %1341 : vector<16x16xi1>, vector<16x16xf32>
    %c0_351 = arith.constant 0 : index
    %c0_352 = arith.constant 0 : index
    %1343 = memref.load %arg5[%c0_351, %c0_352] : memref<4x8xf32, #tpu.memory_space<smem>>
    %1344 = vector.broadcast %1343 : f32 to vector<16x16xf32>
    %1345 = arith.mulf %1344, %1032 : vector<16x16xf32>
    %c0_353 = arith.constant 0 : index
    %c1_354 = arith.constant 1 : index
    %1346 = memref.load %arg5[%c0_353, %c1_354] : memref<4x8xf32, #tpu.memory_space<smem>>
    %1347 = vector.broadcast %1346 : f32 to vector<16x16xf32>
    %1348 = arith.mulf %1347, %1042 : vector<16x16xf32>
    %1349 = arith.addf %1345, %1348 : vector<16x16xf32>
    %c0_355 = arith.constant 0 : index
    %c2_356 = arith.constant 2 : index
    %1350 = memref.load %arg5[%c0_355, %c2_356] : memref<4x8xf32, #tpu.memory_space<smem>>
    %1351 = vector.broadcast %1350 : f32 to vector<16x16xf32>
    %1352 = arith.mulf %1351, %1052 : vector<16x16xf32>
    %1353 = arith.addf %1349, %1352 : vector<16x16xf32>
    %c0_357 = arith.constant 0 : index
    %c3_358 = arith.constant 3 : index
    %1354 = memref.load %arg5[%c0_357, %c3_358] : memref<4x8xf32, #tpu.memory_space<smem>>
    %1355 = vector.broadcast %1354 : f32 to vector<16x16xf32>
    %1356 = arith.mulf %1355, %1062 : vector<16x16xf32>
    %1357 = arith.addf %1353, %1356 : vector<16x16xf32>
    %c0_359 = arith.constant 0 : index
    %c4_360 = arith.constant 4 : index
    %1358 = memref.load %arg5[%c0_359, %c4_360] : memref<4x8xf32, #tpu.memory_space<smem>>
    %1359 = vector.broadcast %1358 : f32 to vector<16x16xf32>
    %1360 = arith.mulf %1359, %1072 : vector<16x16xf32>
    %1361 = arith.addf %1357, %1360 : vector<16x16xf32>
    %c0_361 = arith.constant 0 : index
    %c5_362 = arith.constant 5 : index
    %1362 = memref.load %arg5[%c0_361, %c5_362] : memref<4x8xf32, #tpu.memory_space<smem>>
    %1363 = vector.broadcast %1362 : f32 to vector<16x16xf32>
    %1364 = arith.mulf %1363, %1082 : vector<16x16xf32>
    %1365 = arith.addf %1361, %1364 : vector<16x16xf32>
    %c0_363 = arith.constant 0 : index
    %c6_364 = arith.constant 6 : index
    %1366 = memref.load %arg5[%c0_363, %c6_364] : memref<4x8xf32, #tpu.memory_space<smem>>
    %1367 = vector.broadcast %1366 : f32 to vector<16x16xf32>
    %1368 = arith.mulf %1367, %1092 : vector<16x16xf32>
    %1369 = arith.addf %1365, %1368 : vector<16x16xf32>
    %c0_365 = arith.constant 0 : index
    %c7_366 = arith.constant 7 : index
    %1370 = memref.load %arg5[%c0_365, %c7_366] : memref<4x8xf32, #tpu.memory_space<smem>>
    %1371 = vector.broadcast %1370 : f32 to vector<16x16xf32>
    %1372 = arith.mulf %1371, %1102 : vector<16x16xf32>
    %1373 = arith.addf %1369, %1372 : vector<16x16xf32>
    %c1_367 = arith.constant 1 : index
    %c0_368 = arith.constant 0 : index
    %1374 = memref.load %arg5[%c1_367, %c0_368] : memref<4x8xf32, #tpu.memory_space<smem>>
    %1375 = vector.broadcast %1374 : f32 to vector<16x16xf32>
    %1376 = arith.mulf %1375, %1112 : vector<16x16xf32>
    %c1_369 = arith.constant 1 : index
    %c1_370 = arith.constant 1 : index
    %1377 = memref.load %arg5[%c1_369, %c1_370] : memref<4x8xf32, #tpu.memory_space<smem>>
    %1378 = vector.broadcast %1377 : f32 to vector<16x16xf32>
    %1379 = arith.mulf %1378, %1122 : vector<16x16xf32>
    %1380 = arith.addf %1376, %1379 : vector<16x16xf32>
    %c1_371 = arith.constant 1 : index
    %c2_372 = arith.constant 2 : index
    %1381 = memref.load %arg5[%c1_371, %c2_372] : memref<4x8xf32, #tpu.memory_space<smem>>
    %1382 = vector.broadcast %1381 : f32 to vector<16x16xf32>
    %1383 = arith.mulf %1382, %1132 : vector<16x16xf32>
    %1384 = arith.addf %1380, %1383 : vector<16x16xf32>
    %c1_373 = arith.constant 1 : index
    %c3_374 = arith.constant 3 : index
    %1385 = memref.load %arg5[%c1_373, %c3_374] : memref<4x8xf32, #tpu.memory_space<smem>>
    %1386 = vector.broadcast %1385 : f32 to vector<16x16xf32>
    %1387 = arith.mulf %1386, %1142 : vector<16x16xf32>
    %1388 = arith.addf %1384, %1387 : vector<16x16xf32>
    %c1_375 = arith.constant 1 : index
    %c4_376 = arith.constant 4 : index
    %1389 = memref.load %arg5[%c1_375, %c4_376] : memref<4x8xf32, #tpu.memory_space<smem>>
    %1390 = vector.broadcast %1389 : f32 to vector<16x16xf32>
    %1391 = arith.mulf %1390, %1152 : vector<16x16xf32>
    %1392 = arith.addf %1388, %1391 : vector<16x16xf32>
    %c1_377 = arith.constant 1 : index
    %c5_378 = arith.constant 5 : index
    %1393 = memref.load %arg5[%c1_377, %c5_378] : memref<4x8xf32, #tpu.memory_space<smem>>
    %1394 = vector.broadcast %1393 : f32 to vector<16x16xf32>
    %1395 = arith.mulf %1394, %1162 : vector<16x16xf32>
    %1396 = arith.addf %1392, %1395 : vector<16x16xf32>
    %c1_379 = arith.constant 1 : index
    %c6_380 = arith.constant 6 : index
    %1397 = memref.load %arg5[%c1_379, %c6_380] : memref<4x8xf32, #tpu.memory_space<smem>>
    %1398 = vector.broadcast %1397 : f32 to vector<16x16xf32>
    %1399 = arith.mulf %1398, %1172 : vector<16x16xf32>
    %1400 = arith.addf %1396, %1399 : vector<16x16xf32>
    %c1_381 = arith.constant 1 : index
    %c7_382 = arith.constant 7 : index
    %1401 = memref.load %arg5[%c1_381, %c7_382] : memref<4x8xf32, #tpu.memory_space<smem>>
    %1402 = vector.broadcast %1401 : f32 to vector<16x16xf32>
    %1403 = arith.mulf %1402, %1182 : vector<16x16xf32>
    %1404 = arith.addf %1400, %1403 : vector<16x16xf32>
    %c2_383 = arith.constant 2 : index
    %c0_384 = arith.constant 0 : index
    %1405 = memref.load %arg5[%c2_383, %c0_384] : memref<4x8xf32, #tpu.memory_space<smem>>
    %1406 = vector.broadcast %1405 : f32 to vector<16x16xf32>
    %1407 = arith.mulf %1406, %1192 : vector<16x16xf32>
    %c2_385 = arith.constant 2 : index
    %c1_386 = arith.constant 1 : index
    %1408 = memref.load %arg5[%c2_385, %c1_386] : memref<4x8xf32, #tpu.memory_space<smem>>
    %1409 = vector.broadcast %1408 : f32 to vector<16x16xf32>
    %1410 = arith.mulf %1409, %1202 : vector<16x16xf32>
    %1411 = arith.addf %1407, %1410 : vector<16x16xf32>
    %c2_387 = arith.constant 2 : index
    %c2_388 = arith.constant 2 : index
    %1412 = memref.load %arg5[%c2_387, %c2_388] : memref<4x8xf32, #tpu.memory_space<smem>>
    %1413 = vector.broadcast %1412 : f32 to vector<16x16xf32>
    %1414 = arith.mulf %1413, %1212 : vector<16x16xf32>
    %1415 = arith.addf %1411, %1414 : vector<16x16xf32>
    %c2_389 = arith.constant 2 : index
    %c3_390 = arith.constant 3 : index
    %1416 = memref.load %arg5[%c2_389, %c3_390] : memref<4x8xf32, #tpu.memory_space<smem>>
    %1417 = vector.broadcast %1416 : f32 to vector<16x16xf32>
    %1418 = arith.mulf %1417, %1222 : vector<16x16xf32>
    %1419 = arith.addf %1415, %1418 : vector<16x16xf32>
    %c2_391 = arith.constant 2 : index
    %c4_392 = arith.constant 4 : index
    %1420 = memref.load %arg5[%c2_391, %c4_392] : memref<4x8xf32, #tpu.memory_space<smem>>
    %1421 = vector.broadcast %1420 : f32 to vector<16x16xf32>
    %1422 = arith.mulf %1421, %1232 : vector<16x16xf32>
    %1423 = arith.addf %1419, %1422 : vector<16x16xf32>
    %c2_393 = arith.constant 2 : index
    %c5_394 = arith.constant 5 : index
    %1424 = memref.load %arg5[%c2_393, %c5_394] : memref<4x8xf32, #tpu.memory_space<smem>>
    %1425 = vector.broadcast %1424 : f32 to vector<16x16xf32>
    %1426 = arith.mulf %1425, %1242 : vector<16x16xf32>
    %1427 = arith.addf %1423, %1426 : vector<16x16xf32>
    %c2_395 = arith.constant 2 : index
    %c6_396 = arith.constant 6 : index
    %1428 = memref.load %arg5[%c2_395, %c6_396] : memref<4x8xf32, #tpu.memory_space<smem>>
    %1429 = vector.broadcast %1428 : f32 to vector<16x16xf32>
    %1430 = arith.mulf %1429, %1252 : vector<16x16xf32>
    %1431 = arith.addf %1427, %1430 : vector<16x16xf32>
    %c2_397 = arith.constant 2 : index
    %c7_398 = arith.constant 7 : index
    %1432 = memref.load %arg5[%c2_397, %c7_398] : memref<4x8xf32, #tpu.memory_space<smem>>
    %1433 = vector.broadcast %1432 : f32 to vector<16x16xf32>
    %1434 = arith.mulf %1433, %1262 : vector<16x16xf32>
    %1435 = arith.addf %1431, %1434 : vector<16x16xf32>
    %c3_399 = arith.constant 3 : index
    %c0_400 = arith.constant 0 : index
    %1436 = memref.load %arg5[%c3_399, %c0_400] : memref<4x8xf32, #tpu.memory_space<smem>>
    %1437 = vector.broadcast %1436 : f32 to vector<16x16xf32>
    %1438 = arith.mulf %1437, %1272 : vector<16x16xf32>
    %c3_401 = arith.constant 3 : index
    %c1_402 = arith.constant 1 : index
    %1439 = memref.load %arg5[%c3_401, %c1_402] : memref<4x8xf32, #tpu.memory_space<smem>>
    %1440 = vector.broadcast %1439 : f32 to vector<16x16xf32>
    %1441 = arith.mulf %1440, %1282 : vector<16x16xf32>
    %1442 = arith.addf %1438, %1441 : vector<16x16xf32>
    %c3_403 = arith.constant 3 : index
    %c2_404 = arith.constant 2 : index
    %1443 = memref.load %arg5[%c3_403, %c2_404] : memref<4x8xf32, #tpu.memory_space<smem>>
    %1444 = vector.broadcast %1443 : f32 to vector<16x16xf32>
    %1445 = arith.mulf %1444, %1292 : vector<16x16xf32>
    %1446 = arith.addf %1442, %1445 : vector<16x16xf32>
    %c3_405 = arith.constant 3 : index
    %c3_406 = arith.constant 3 : index
    %1447 = memref.load %arg5[%c3_405, %c3_406] : memref<4x8xf32, #tpu.memory_space<smem>>
    %1448 = vector.broadcast %1447 : f32 to vector<16x16xf32>
    %1449 = arith.mulf %1448, %1302 : vector<16x16xf32>
    %1450 = arith.addf %1446, %1449 : vector<16x16xf32>
    %c3_407 = arith.constant 3 : index
    %c4_408 = arith.constant 4 : index
    %1451 = memref.load %arg5[%c3_407, %c4_408] : memref<4x8xf32, #tpu.memory_space<smem>>
    %1452 = vector.broadcast %1451 : f32 to vector<16x16xf32>
    %1453 = arith.mulf %1452, %1312 : vector<16x16xf32>
    %1454 = arith.addf %1450, %1453 : vector<16x16xf32>
    %c3_409 = arith.constant 3 : index
    %c5_410 = arith.constant 5 : index
    %1455 = memref.load %arg5[%c3_409, %c5_410] : memref<4x8xf32, #tpu.memory_space<smem>>
    %1456 = vector.broadcast %1455 : f32 to vector<16x16xf32>
    %1457 = arith.mulf %1456, %1322 : vector<16x16xf32>
    %1458 = arith.addf %1454, %1457 : vector<16x16xf32>
    %c3_411 = arith.constant 3 : index
    %c6_412 = arith.constant 6 : index
    %1459 = memref.load %arg5[%c3_411, %c6_412] : memref<4x8xf32, #tpu.memory_space<smem>>
    %1460 = vector.broadcast %1459 : f32 to vector<16x16xf32>
    %1461 = arith.mulf %1460, %1332 : vector<16x16xf32>
    %1462 = arith.addf %1458, %1461 : vector<16x16xf32>
    %c3_413 = arith.constant 3 : index
    %c7_414 = arith.constant 7 : index
    %1463 = memref.load %arg5[%c3_413, %c7_414] : memref<4x8xf32, #tpu.memory_space<smem>>
    %1464 = vector.broadcast %1463 : f32 to vector<16x16xf32>
    %1465 = arith.mulf %1464, %1342 : vector<16x16xf32>
    %1466 = arith.addf %1462, %1465 : vector<16x16xf32>
    %1467 = vector.shape_cast %1373 : vector<16x16xf32> to vector<1x16x16xf32>
    %1468 = vector.shape_cast %1404 : vector<16x16xf32> to vector<1x16x16xf32>
    %1469 = vector.shape_cast %1435 : vector<16x16xf32> to vector<1x16x16xf32>
    %1470 = vector.shape_cast %1466 : vector<16x16xf32> to vector<1x16x16xf32>
    %1471 = tpu.concatenate %1467, %1468, %1469, %1470 in 0 : vector<1x16x16xf32>, vector<1x16x16xf32>, vector<1x16x16xf32>, vector<1x16x16xf32> -> vector<4x16x16xf32>
    %c0_415 = arith.constant 0 : index
    %c0_416 = arith.constant 0 : index
    %1472 = vector.load %arg2[%c0_415, %c0_416] : memref<16x16xi8, #tpu.memory_space<vmem>>, vector<16x16xi8>
    %c0_i8_417 = arith.constant 0 : i8
    %1473 = vector.broadcast %c0_i8_417 : i8 to vector<16x16xi8>
    %1474 = arith.cmpi ne, %1472, %1473 : vector<16x16xi8>
    %1475 = vector.shape_cast %1474 : vector<16x16xi1> to vector<1x16x16xi1>
    %cst_418 = arith.constant -1.000000e+30 : f32
    %1476 = vector.shape_cast %1475 : vector<1x16x16xi1> to vector<1x16x16xi1>
    %1477 = vector.broadcast %1476 : vector<1x16x16xi1> to vector<4x16x16xi1>
    %1478 = vector.broadcast %cst_418 : f32 to vector<4x16x16xf32>
    %1479 = arith.select %1477, %1471, %1478 : vector<4x16x16xi1>, vector<4x16x16xf32>
    %cst_419 = arith.constant dense<0xFF800000> : vector<4x16xf32>
    %1480 = vector.multi_reduction <maximumf>, %1479, %cst_419 [2] : vector<4x16x16xf32> to vector<4x16xf32>
    %1481 = vector.shape_cast %1480 : vector<4x16xf32> to vector<4x16x1xf32>
    %1482 = vector.broadcast %1481 : vector<4x16x1xf32> to vector<4x16x16xf32>
    %1483 = arith.subf %1479, %1482 : vector<4x16x16xf32>
    %1484 = math.exp %1483 : vector<4x16x16xf32>
    %cst_420 = arith.constant 0.000000e+00 : f32
    %1485 = vector.shape_cast %1475 : vector<1x16x16xi1> to vector<1x16x16xi1>
    %1486 = vector.broadcast %1485 : vector<1x16x16xi1> to vector<4x16x16xi1>
    %1487 = vector.broadcast %cst_420 : f32 to vector<4x16x16xf32>
    %1488 = arith.select %1486, %1484, %1487 : vector<4x16x16xi1>, vector<4x16x16xf32>
    %cst_421 = arith.constant dense<0.000000e+00> : vector<4x16xf32>
    %1489 = vector.multi_reduction <add>, %1488, %cst_421 [2] : vector<4x16x16xf32> to vector<4x16xf32>
    %1490 = vector.shape_cast %1489 : vector<4x16xf32> to vector<4x16x1xf32>
    %cst_422 = arith.constant 1.000000e-30 : f32
    %1491 = vector.broadcast %cst_422 : f32 to vector<4x16x1xf32>
    %1492 = arith.maximumf %1490, %1491 : vector<4x16x1xf32>
    %1493 = vector.broadcast %1492 : vector<4x16x1xf32> to vector<4x16x16xf32>
    %1494 = arith.divf %1488, %1493 : vector<4x16x16xf32>
    %1495 = vector.extract_strided_slice %1020 {offsets = [0, 0], sizes = [8, 16], strides = [1, 1]} : vector<32x16xf32> to vector<8x16xf32>
    %1496 = vector.extract_strided_slice %1020 {offsets = [8, 0], sizes = [8, 16], strides = [1, 1]} : vector<32x16xf32> to vector<8x16xf32>
    %1497 = vector.extract_strided_slice %1020 {offsets = [16, 0], sizes = [8, 16], strides = [1, 1]} : vector<32x16xf32> to vector<8x16xf32>
    %1498 = vector.extract_strided_slice %1020 {offsets = [24, 0], sizes = [8, 16], strides = [1, 1]} : vector<32x16xf32> to vector<8x16xf32>
    %1499 = vector.shape_cast %1495 : vector<8x16xf32> to vector<1x8x16xf32>
    %1500 = vector.shape_cast %1496 : vector<8x16xf32> to vector<1x8x16xf32>
    %1501 = vector.shape_cast %1497 : vector<8x16xf32> to vector<1x8x16xf32>
    %1502 = vector.shape_cast %1498 : vector<8x16xf32> to vector<1x8x16xf32>
    %1503 = tpu.concatenate %1499, %1500, %1501, %1502 in 0 : vector<1x8x16xf32>, vector<1x8x16xf32>, vector<1x8x16xf32>, vector<1x8x16xf32> -> vector<4x8x16xf32>
    "tpu.trace_start"() <{level = 10 : i32, message = "hdj,hij->hdi"}> : () -> ()
    %cst_423 = arith.constant dense<0.000000e+00> : vector<4x8x16xf32>
    %1504 = tpu.matmul %1503, %1494, %cst_423 {dimension_numbers = #tpu.dot_dimension_numbers<[2], [2], [1], [1], [0, 0, 0, 1, 1, 1], [0], [0]>} : vector<4x8x16xf32>, vector<4x16x16xf32>, vector<4x8x16xf32> -> vector<4x8x16xf32>
    "tpu.trace_stop"() : () -> ()
    %1505 = vector.extract_strided_slice %1504 {offsets = [0, 0, 0], sizes = [1, 8, 16], strides = [1, 1, 1]} : vector<4x8x16xf32> to vector<1x8x16xf32>
    %1506 = vector.shape_cast %1505 : vector<1x8x16xf32> to vector<8x16xf32>
    %1507 = vector.extract_strided_slice %1504 {offsets = [1, 0, 0], sizes = [1, 8, 16], strides = [1, 1, 1]} : vector<4x8x16xf32> to vector<1x8x16xf32>
    %1508 = vector.shape_cast %1507 : vector<1x8x16xf32> to vector<8x16xf32>
    %1509 = vector.extract_strided_slice %1504 {offsets = [2, 0, 0], sizes = [1, 8, 16], strides = [1, 1, 1]} : vector<4x8x16xf32> to vector<1x8x16xf32>
    %1510 = vector.shape_cast %1509 : vector<1x8x16xf32> to vector<8x16xf32>
    %1511 = vector.extract_strided_slice %1504 {offsets = [3, 0, 0], sizes = [1, 8, 16], strides = [1, 1, 1]} : vector<4x8x16xf32> to vector<1x8x16xf32>
    %1512 = vector.shape_cast %1511 : vector<1x8x16xf32> to vector<8x16xf32>
    %1513 = tpu.concatenate %1506, %1508, %1510, %1512 in 0 : vector<8x16xf32>, vector<8x16xf32>, vector<8x16xf32>, vector<8x16xf32> -> vector<32x16xf32>
    %cst_424 = arith.constant 0.000000e+00 : f32
    %1514 = vector.broadcast %cst_424 : f32 to vector<32x16xf32>
    %1515 = arith.cmpf ogt, %1513, %1514 : vector<32x16xf32>
    %cst_425 = arith.constant 0.000000e+00 : f32
    %1516 = vector.broadcast %cst_425 : f32 to vector<32x16xf32>
    %1517 = arith.minimumf %1513, %1516 : vector<32x16xf32>
    %1518 = math.exp %1517 : vector<32x16xf32>
    %cst_426 = arith.constant 1.000000e+00 : f32
    %1519 = vector.broadcast %cst_426 : f32 to vector<32x16xf32>
    %1520 = arith.subf %1518, %1519 : vector<32x16xf32>
    %1521 = arith.select %1515, %1513, %1520 : vector<32x16xi1>, vector<32x16xf32>
    %c0_427 = arith.constant 0 : index
    %c0_428 = arith.constant 0 : index
    %1522 = vector.load %arg13[%c0_427, %c0_428] : memref<8x32xf32, #tpu.memory_space<vmem>>, vector<8x32xf32>
    %cst_429 = arith.constant dense<0.000000e+00> : vector<8x16xf32>
    %1523 = tpu.matmul %1522, %1521, %cst_429 {dimension_numbers = #tpu.dot_dimension_numbers<[1], [0], [0], [1], [0, 0, 1, 1], [], []>} : vector<8x32xf32>, vector<32x16xf32>, vector<8x16xf32> -> vector<8x16xf32>
    %c0_430 = arith.constant 0 : index
    %c0_431 = arith.constant 0 : index
    %1524 = vector.load %arg14[%c0_430, %c0_431] : memref<8x1xf32, #tpu.memory_space<vmem>>, vector<8x1xf32>
    %1525 = vector.broadcast %1524 : vector<8x1xf32> to vector<8x16xf32>
    %1526 = arith.addf %1523, %1525 : vector<8x16xf32>
    %1527 = tpu.iota {dimensions = array<i32: 0>} : vector<16x16xi32>
    %c0_432 = arith.constant 0 : index
    %c0_433 = arith.constant 0 : index
    %1528 = vector.load %arg21[%c0_432, %c0_433] : memref<1x16xi32, #tpu.memory_space<vmem>>, vector<1x16xi32>
    %1529 = vector.broadcast %1528 : vector<1x16xi32> to vector<16x16xi32>
    %1530 = arith.cmpi eq, %1527, %1529 : vector<16x16xi32>
    %1531 = arith.extui %1530 : vector<16x16xi1> to vector<16x16xi32>
    %1532 = arith.sitofp %1531 : vector<16x16xi32> to vector<16x16xf32>
    %c0_434 = arith.constant 0 : index
    %c0_435 = arith.constant 0 : index
    %1533 = vector.load %arg22[%c0_434, %c0_435] : memref<1x16xi32, #tpu.memory_space<vmem>>, vector<1x16xi32>
    %1534 = vector.broadcast %1533 : vector<1x16xi32> to vector<16x16xi32>
    %1535 = arith.cmpi eq, %1527, %1534 : vector<16x16xi32>
    %1536 = arith.extui %1535 : vector<16x16xi1> to vector<16x16xi32>
    %1537 = arith.sitofp %1536 : vector<16x16xi32> to vector<16x16xf32>
    %cst_436 = arith.constant dense<0.000000e+00> : vector<8x16xf32>
    %1538 = tpu.matmul %1526, %1532, %cst_436 {dimension_numbers = #tpu.dot_dimension_numbers<[1], [0], [0], [1], [0, 0, 1, 1], [], []>} : vector<8x16xf32>, vector<16x16xf32>, vector<8x16xf32> -> vector<8x16xf32>
    %cst_437 = arith.constant dense<0.000000e+00> : vector<8x16xf32>
    %1539 = tpu.matmul %1526, %1537, %cst_437 {dimension_numbers = #tpu.dot_dimension_numbers<[1], [0], [0], [1], [0, 0, 1, 1], [], []>} : vector<8x16xf32>, vector<16x16xf32>, vector<8x16xf32> -> vector<8x16xf32>
    %1540 = arith.mulf %1538, %1539 : vector<8x16xf32>
    %c0_438 = arith.constant 0 : index
    %c0_439 = arith.constant 0 : index
    %1541 = vector.load %arg15[%c0_438, %c0_439] : memref<8x8xf32, #tpu.memory_space<vmem>>, vector<8x8xf32>
    %cst_440 = arith.constant dense<0.000000e+00> : vector<8x16xf32>
    %1542 = tpu.matmul %1541, %1540, %cst_440 {dimension_numbers = #tpu.dot_dimension_numbers<[1], [0], [0], [1], [0, 0, 1, 1], [], []>} : vector<8x8xf32>, vector<8x16xf32>, vector<8x16xf32> -> vector<8x16xf32>
    %c0_441 = arith.constant 0 : index
    %c0_442 = arith.constant 0 : index
    %1543 = vector.load %arg16[%c0_441, %c0_442] : memref<8x1xf32, #tpu.memory_space<vmem>>, vector<8x1xf32>
    %1544 = vector.broadcast %1543 : vector<8x1xf32> to vector<8x16xf32>
    %1545 = arith.addf %1542, %1544 : vector<8x16xf32>
    %cst_443 = arith.constant 0.000000e+00 : f32
    %1546 = vector.broadcast %cst_443 : f32 to vector<8x16xf32>
    %1547 = arith.maximumf %1545, %1546 : vector<8x16xf32>
    %c0_444 = arith.constant 0 : index
    %c0_445 = arith.constant 0 : index
    %1548 = vector.load %arg17[%c0_444, %c0_445] : memref<8x8xf32, #tpu.memory_space<vmem>>, vector<8x8xf32>
    %cst_446 = arith.constant dense<0.000000e+00> : vector<8x16xf32>
    %1549 = tpu.matmul %1548, %1547, %cst_446 {dimension_numbers = #tpu.dot_dimension_numbers<[1], [0], [0], [1], [0, 0, 1, 1], [], []>} : vector<8x8xf32>, vector<8x16xf32>, vector<8x16xf32> -> vector<8x16xf32>
    %c0_447 = arith.constant 0 : index
    %c0_448 = arith.constant 0 : index
    %1550 = vector.load %arg18[%c0_447, %c0_448] : memref<8x1xf32, #tpu.memory_space<vmem>>, vector<8x1xf32>
    %1551 = vector.broadcast %1550 : vector<8x1xf32> to vector<8x16xf32>
    %1552 = arith.addf %1549, %1551 : vector<8x16xf32>
    %cst_449 = arith.constant 0.000000e+00 : f32
    %1553 = vector.broadcast %cst_449 : f32 to vector<8x16xf32>
    %1554 = arith.maximumf %1552, %1553 : vector<8x16xf32>
    %c0_450 = arith.constant 0 : index
    %c0_451 = arith.constant 0 : index
    %1555 = vector.load %arg19[%c0_450, %c0_451] : memref<1x8xf32, #tpu.memory_space<vmem>>, vector<1x8xf32>
    %cst_452 = arith.constant dense<0.000000e+00> : vector<1x16xf32>
    %1556 = tpu.matmul %1555, %1554, %cst_452 {dimension_numbers = #tpu.dot_dimension_numbers<[1], [0], [0], [1], [0, 0, 1, 1], [], []>} : vector<1x8xf32>, vector<8x16xf32>, vector<1x16xf32> -> vector<1x16xf32>
    %c0_453 = arith.constant 0 : index
    %c0_454 = arith.constant 0 : index
    %1557 = vector.load %arg20[%c0_453, %c0_454] : memref<1x1xf32, #tpu.memory_space<vmem>>, vector<1x1xf32>
    %1558 = vector.broadcast %1557 : vector<1x1xf32> to vector<1x16xf32>
    %1559 = arith.addf %1556, %1558 : vector<1x16xf32>
    %c0_455 = arith.constant 0 : index
    %c0_456 = arith.constant 0 : index
    %1560 = vector.load %arg23[%c0_455, %c0_456] : memref<1x16xf32, #tpu.memory_space<vmem>>, vector<1x16xf32>
    tpu.vector_store %arg23[%c0_455, %c0_456], %1559 {strides = array<i32>} : memref<1x16xf32, #tpu.memory_space<vmem>>, vector<1x16xf32>,
    return
  }
}

</mosaic_0001>

<bundles_post_ra>
// kernel: gatv2_forward.1
= control target key start
LH: loop header
LB: loop body
LE: loop exit
PB: predicated region body
PF: predicated region fallthrough
CT: control target
= control target key end

     0   :  { %s8982_s0 = inlined_call_operand.vmem [shape: s8[16,16], index: 0, kind: input, shape index: {}]   ;;  %s8983_s1 = inlined_call_operand.vmem [shape: s8[16,16], index: 1, kind: input, shape index: {}]   ;;  %s8984_s2 = inlined_call_operand.vmem [shape: s8[16,16], index: 2, kind: input, shape index: {}]   ;;  %s8985_s3 = inlined_call_operand.vmem [shape: f32[4,8], index: 3, kind: input, shape index: {}]   ;;  %s8986_s4 = inlined_call_operand.vmem [shape: f32[4,8], index: 4, kind: input, shape index: {}]   ;;  %s8987_s5 = inlined_call_operand.vmem [shape: f32[4,8], index: 5, kind: input, shape index: {}]   ;;  %s8988_s6 = inlined_call_operand.vmem [shape: f32[8,16], index: 6, kind: input, shape index: {}]   ;;  %s8989_s7 = inlined_call_operand.vmem [shape: f32[64,8], index: 7, kind: input, shape index: {}]   ;;  %s8990_s8 = inlined_call_operand.vmem [shape: f32[64,1], index: 8, kind: input, shape index: {}]   ;;  %s8991_s9 = inlined_call_operand.vmem [shape: f32[64,32], index: 9, kind: input, shape index: {}]   ;;  %s8992_s10 = inlined_call_operand.vmem [shape: f32[64,1], index: 10, kind: input, shape index: {}]   ;;  %s8993_s11 = inlined_call_operand.vmem [shape: f32[64,32], index: 11, kind: input, shape index: {}]   ;;  %s8994_s12 = inlined_call_operand.vmem [shape: f32[64,1], index: 12, kind: input, shape index: {}]   ;;  %s8995_s13 = inlined_call_operand.vmem [shape: f32[8,32], index: 13, kind: input, shape index: {}]   ;;  %s8996_s14 = inlined_call_operand.vmem [shape: f32[8,1], index: 14, kind: input, shape index: {}]   ;;  %s8997_s15 = inlined_call_operand.vmem [shape: f32[8,8], index: 15, kind: input, shape index: {}]   ;;  %s8998_s16 = inlined_call_operand.vmem [shape: f32[8,1], index: 16, kind: input, shape index: {}]   ;;  %s8999_s17 = inlined_call_operand.vmem [shape: f32[8,8], index: 17, kind: input, shape index: {}]   ;;  %s9000_s18 = inlined_call_operand.vmem [shape: f32[8,1], index: 18, kind: input, shape index: {}]   ;;  %s9001_s19 = inlined_call_operand.vmem [shape: f32[1,8], index: 19, kind: input, shape index: {}]   ;;  %s9002_s20 = inlined_call_operand.<no memory space> [shape: f32[1,1], index: 20, kind: input, shape index: {}]   ;;  %s9003_s21 = inlined_call_operand.vmem [shape: s32[1,16], index: 21, kind: input, shape index: {}]   ;;  %s9004_s22 = inlined_call_operand.vmem [shape: s32[1,16], index: 22, kind: input, shape index: {}]   ;;  %s9005_s23 = inlined_call_operand.vmem [shape: f32[1,16], index: 23, kind: output, shape index: {}]  }
   0x1   :  { %9196 = sst [smem:[#allocation40_spill]] %s8982_s0  ;;  %v28_v0 = vstv %s9002_s20 }
   0x2   :  { %9197 = sst [smem:[#allocation41_spill]] %s8983_s1  ;;  %29 = vst [vmem:[#allocation2] sm:$0x1] %v28_v0 }
   0x3   :  { %9198 = sst [smem:[#allocation42_spill]] %s8984_s2 }
   0x4   :  { %9199 = sst [smem:[#allocation43_spill]] %s8985_s3 }
   0x5   :  { %9200 = sst [smem:[#allocation44_spill]] %s8986_s4 }
   0x6   :  { %9201 = sst [smem:[#allocation45_spill]] %s8987_s5 }
   0x7   :  { %9202 = sst [smem:[#allocation46_spill]] %s8988_s6 }
   0x8   :  { %9203 = sst [smem:[#allocation47_spill]] %s8989_s7 }
   0x9   :  { %9204 = sst [smem:[#allocation48_spill]] %s8995_s13 }
   0xa   :  { %9205 = sst [smem:[#allocation49_spill]] %s8997_s15 }
   0xb   :  { %9206 = sst [smem:[#allocation50_spill]] %s8998_s16 }
   0xc   :  { %9207 = sst [smem:[#allocation51_spill]] %s8999_s17 }
   0xd   :  { %9208 = sst [smem:[#allocation52_spill]] %s9001_s19 }
   0xe   :  { %9209 = sst [smem:[#allocation53_spill]] %s9003_s21 }
   0xf   :  { %9210 = sst [smem:[#allocation54_spill]] %s9004_s22 }
  0x10   :  { %9211 = sst [smem:[#allocation55_spill]] %s9005_s23 }
  0x11   :  { %30 = vsyncpa [#allocation4], 0 }
  0x12   :  { %31 = vsyncpa [#allocation6], 0  ;;  %s9212_s5 = sld [smem:[#allocation44_spill]]  ;;  %s9213_s6 = sld [smem:[#allocation43_spill]] }
  0x18   :  { %s54_s1 = sshll.u32 %s9212_s5, 4  ;;  %s44_s27 = sshll.u32 %s9213_s6, 4  ;;  %s55_s1 = int_to_ptr.vmem [resolvable:$true] %s54_s1  ;;  %s45_s27 = int_to_ptr.vmem [resolvable:$true] %s44_s27 }
  0x19   :  { %s6025_s7 = scalar_lea.vmem %s55_s1, 64  ;;  %p6030_p1 = scmp.lt.s32.totalorder %s55_s1, %s55_s1 }
  0x1a   :  { %p6026_p0 = scmp.ne.s32.totalorder %s55_s1, %s6025_s7  ;;  %p6031_p2 = scmp.lt.s32.totalorder %s6025_s7, %s6025_s7 }
  0x1c   :  { %p6032_p3 = por %p6031_p2, %p6030_p1 }
  0x1e   :  { %p6033_p4 = pnand %p6032_p3, %p6026_p0 }
  0x20   :  { %6036 = shalt.err (!%p6033_p4)
}
  0x21   :  { %s6065_s20 = smov [#allocation5]   ;;  %s6037_s28 = scalar_lea.vmem %s45_s27, 64 }
  0x22   :  { %57 = dma.vmem_to_smem %s55_s1, 64, %s6065_s20, [#allocation6]  }
  0x23   :  { %p6038_p5 = scmp.ne.s32.totalorder %s45_s27, %s6037_s28  ;;  %p6042_p6 = scmp.lt.s32.totalorder %s45_s27, %s45_s27 }
  0x24   :  { %p6043_p7 = scmp.lt.s32.totalorder %s6037_s28, %s6037_s28 }
  0x26   :  { %p6044_p8 = por %p6043_p7, %p6042_p6 }
  0x28   :  { %p6045_p9 = pnand %p6044_p8, %p6038_p5 }
  0x2a   :  { %6048 = shalt.err (!%p6045_p9)
}
  0x2b   :  { %s6066_s29 = smov [#allocation3]   ;;  %s9214_s4 = sld [smem:[#allocation45_spill]] }
  0x2c   :  { %47 = dma.vmem_to_smem %s45_s27, 64, %s6066_s29, [#allocation4]  }
  0x31   :  { %s64_s30 = sshll.u32 %s9214_s4, 4  ;;  %s65_s30 = int_to_ptr.vmem [resolvable:$true] %s64_s30 }
  0x32   :  { %s6049_s24 = scalar_lea.vmem %s65_s30, 64  ;;  %p6054_p11 = scmp.lt.s32.totalorder %s65_s30, %s65_s30 }
  0x33   :  { %p6050_p10 = scmp.ne.s32.totalorder %s65_s30, %s6049_s24  ;;  %p6055_p12 = scmp.lt.s32.totalorder %s6049_s24, %s6049_s24 }
  0x35   :  { %p6056_p13 = por %p6055_p12, %p6054_p11 }
  0x37   :  { %p6057_p0 = pnand %p6056_p13, %p6050_p10 }
  0x39   :  { %6060 = shalt.err (!%p6057_p0)
}
  0x3a   :  { %s6067_s25 = smov [#allocation7]  }
  0x3b   :  { %67 = dma.vmem_to_smem %s65_s30, 64, %s6067_s25, [#allocation6]  }
  0x3c   :  { %6061 = dma.done.wait [#allocation4], 64  }
  0x3d   :  { %6062 = vsyncadd [#allocation4], 4294967232 }
  0x3e   :  { %6063 = dma.done.wait [#allocation6], 128  }
  0x3f   :  { %6064 = vsyncadd [#allocation6], 4294967168 }
  0x40   :  { %111 = sfence }
  0x41   :  { %s9215_s26 = sld [smem:[#allocation46_spill]]  ;;  %s9216_s27 = sld [smem:[#allocation47_spill]]  ;;  %vm171_vm0 = vcmask 64512   ;;  %v9072_v5 = vmov 0   ;;  %v129_v6 = vld [vmem:[%s8990_s8 + $0x30] sm:$0xff]  ;;  %v127_v8 = vld [vmem:[%s8990_s8 + $0x20] sm:$0xff] }
  0x42   :  { %5709 = vset.pattern.permute.xlu1 %v9072_v5  ;;  %5708 = vset.pattern.permute.xlu0 %v9072_v5  ;;  %v130_v10 = vld [vmem:[%s8990_s8 + $0x38] sm:$0xff]  ;;  %v128_v11 = vld [vmem:[%s8990_s8 + $0x28] sm:$0xff]  ;;  %v123_v14 = vld [vmem:[%s8990_s8] sm:$0xff]  ;;  %v9034_v35 = vmov 12   ;;  %v9026_v38 = vmov 17   ;;  %v9046_v39 = vmov 1  }
  0x43   :  { %163 = vperm.xlu1 %5709, %v129_v6   ;;  %153 = vperm.xlu0 %5708, %v127_v8   ;;  %v125_v15 = vld [vmem:[%s8990_s8 + $0x10] sm:$0xff]  ;;  %v124_v17 = vld [vmem:[%s8990_s8 + $0x8] sm:$0xff]  ;;  %v126_v18 = vld [vmem:[%s8990_s8 + $0x18] sm:$0xff]  ;;  %v9048_v40 = vmov 14   ;;  %v9042_v41 = vmov 2   ;;  %v9058_v42 = vmov 15  }
  0x44   :  { %v9036_v43 = vmov 3   ;;  %v9062_v44 = vmov 20   ;;  %v9032_v45 = vmov 4   ;;  %v9070_v46 = vmov 29   ;;  %s6459_s8 = sld [smem:[#allocation3 + $0x85]]  ;;  %s6499_s7 = sld [smem:[#allocation3 + $0x103]] }
  0x45   :  { %v9028_v47 = vmov 5   ;;  %v9074_v48 = vmov 23   ;;  %v9052_v49 = vmov 8   ;;  %v9050_v51 = vmov 9   ;;  %s6525_s20 = sld [smem:[#allocation3 + $0x106]]  ;;  %s6564_s28 = sld [smem:[#allocation3]] }
  0x46   :  { %v9024_v52 = vmov 6   ;;  %v9022_v53 = vmov 7   ;;  %v9044_v54 = vmov 10   ;;  %v9020_v55 = vmov 13   ;;  %s6569_s29 = sld [smem:[#allocation3 + $0x84]]  ;;  %s6579_s3 = sld [smem:[#allocation3 + $0x1]] }
  0x47   :  { %v114_v1 = vld [vmem:[%s9215_s26] sm:$0xff]  ;;  %v116_v3 = vld [vmem:[%s9216_s27 + $0x8] sm:$0xff]  ;;  %v117_v4 = vld [vmem:[%s9216_s27 + $0x10] sm:$0xff]  ;;  %168 = vperm.xlu1 %5709, %v130_v10   ;;  %158 = vperm.xlu0 %5708, %v128_v11   ;;  %v9018_v56 = vmov 24   ;;  %v9038_v57 = vmov 11   ;;  %v9016_v58 = vmov 18  }
  0x48   :  { %v115_v2 = vld [vmem:[%s9216_s27] sm:$0xff]  ;;  %5415 = vmatprep.subr.mxu0 %v114_v1  ;;  %v118_v7 = vld [vmem:[%s9216_s27 + $0x18] sm:$0xff]  ;;  %v120_v12 = vld [vmem:[%s9216_s27 + $0x28] sm:$0xff]  ;;  %v9014_v59 = vmov 19   ;;  %v9030_v60 = vmov 16   ;;  %v9012_v61 = vmov 28  }
  0x49   :  { %5417 = vmatprep.mubr.msk.f32.mxu0 %vm171_vm0, %v115_v2  ;;  %5416 = vmatpush3.msra.mxu0 %v114_v1  ;;  %v119_v9 = vld [vmem:[%s9216_s27 + $0x20] sm:$0xff]  ;;  %v121_v13 = vld [vmem:[%s9216_s27 + $0x30] sm:$0xff]  ;;  %v122_v16 = vld [vmem:[%s9216_s27 + $0x38] sm:$0xff]  ;;  %v9010_v62 = vmov 22   ;;  %v9040_v63 = vmov 25   ;;  %v9068_v0 = vmov 31  }
  0x4a   :  { %5418 = vmatmul.mubr.msk.f32.vlgmr.msra.gmra.mrb[0].mxu0 %vm171_vm0, %v116_v3  ;;  %v9054_v1 = vmov 26   ;;  %v9064_v2 = vmov 27   ;;  %v9060_v3 = vmov 21   ;;  %v9076_v6 = vmov 30   ;;  %s6481_s27 = sld [smem:[#allocation3 + $0x102]]  ;;  %s6581_s0 = sld [smem:[#allocation3 + $0x101]] }
  0x4b   :  { %5420 = vmatprep.mubr.msk.f32.mxu0 %vm171_vm0, %v117_v4  ;;  %133 = vperm.xlu1 %5709, %v123_v14   ;;  %s6586_s4 = sld [smem:[#allocation3 + $0x2]]  ;;  %s6588_s30 = sld [smem:[#allocation3 + $0x86]] }
  0x4c   :  { %143 = vperm.xlu0 %5708, %v125_v15   ;;  %s6592_s24 = sld [smem:[#allocation3 + $0x3]]  ;;  %s6594_s25 = sld [smem:[#allocation3 + $0x4]] }
  0x4d   :  { %s6604_s5 = sld [smem:[#allocation3 + $0x104]]  ;;  %s6606_s1 = sld [smem:[#allocation3 + $0x5]] }
  0x4e   :  { %5421 = vmatmul.mubr.msk.f32.gmra.mrb[2].mxu0 %vm171_vm0, %v118_v7  ;;  %s6625_s26 = sld [smem:[#allocation3 + $0x80]]  ;;  %s6627_s2 = sld [smem:[#allocation3 + $0x81]] }
  0x4f   :  { %5423 = vmatprep.mubr.msk.f32.mxu0 %vm171_vm0, %v119_v9  ;;  %138 = vperm.xlu1 %5709, %v124_v17   ;;  %s6646_s6 = sld [smem:[#allocation3 + $0x6]]  ;;  %s6666_s23 = sld [smem:[#allocation3 + $0x7]] }
  0x50   :  { %s6680_s19 = sld [smem:[#allocation3 + $0x82]]  ;;  %s6703_s17 = sld [smem:[#allocation3 + $0x83]] }
  0x51   :  { %s6717_s15 = sld [smem:[#allocation3 + $0x100]]  ;;  %s6727_s13 = sld [smem:[#allocation3 + $0x105]] }
  0x52   :  { %5424 = vmatmul.mubr.msk.f32.gmra.mrb[4].mxu0 %vm171_vm0, %v120_v12  ;;  %s9248_s21 = sld [smem:[#allocation40_spill]]  ;;  %s6822_s16 = sld [smem:[#allocation3 + $0x87]] }
  0x53   :  { %5426 = vmatprep.mubr.msk.f32.mxu0 %vm171_vm0, %v121_v13  ;;  %148 = vperm.xlu1 %5709, %v126_v18   ;;  %s6834_s22 = sld [smem:[#allocation3 + $0x107]] }
  0x56   :  { %5427 = vmatmul.mubr.msk.f32.gmra.mrb[6].mxu0 %vm171_vm0, %v122_v16 }
  0xc2   :  { %v154_v23 = vpop.permute.xlu0 %153  ;;  %v164_v31 = vpop.permute.xlu1 %163 }
  0xc6   :  { %v159_v28 = vpop.permute.xlu0 %158  ;;  %v169_v33 = vpop.permute.xlu1 %168 }
  0xca   :  { %v6389_v4 = vpop.permute.xlu1 %133 }
  0xcb   :  { %v6306_v36 = vpop.permute.xlu0 %143 }
  0xce   :  { %v139_v7 = vpop.permute.xlu1 %138 }
  0xd2   :  { %v6395_v8 = vpop.permute.xlu1 %148 }
  0xd3   :  { %9218 = vst [vmem:[#allocation11_spill] sm:$0xff] %v6395_v8  ;;  %v9250_v8 = vmov 0  }
 0x11d   :  { %v6297_v19 = vpop.f32.mrb[0].mxu0 }
 0x11e   :  { %v6299_v20 = vpop.f32.mrb[1].mxu0 }
 0x121   :  { %v6301_v21 = vpop.f32.mrb[2].mxu0 }
 0x122   :  { %9217 = vst [vmem:[#allocation10_spill] sm:$0xff] %v6301_v21  ;;  %v6303_v22 = vpop.f32.mrb[3].mxu0 }
 0x125   :  { %v5425_v24 = vpop.f32.mrb[4].mxu0 }
 0x126   :  { %v282_v25 = vpop.f32.mrb[5].mxu0  ;;  %v288_v30 = vadd.f32 %v5425_v24, %v159_v28 }
 0x127   :  { %v283_v26 = vadd.f32 %v282_v25, %v154_v23 }
 0x129   :  { %301 = vxpose.xlu0.b32.start [1/4] (short) (narrow) %v283_v26, 16  ;;  %v5428_v27 = vpop.f32.mrb[6].mxu0 }
 0x12a   :  { %v292_v29 = vpop.f32.mrb[7].mxu0  ;;  %v298_v34 = vadd.f32 %v5428_v27, %v169_v33  ;;  %v343_v27 = vlaneseq }
 0x12b   :  { %v293_v32 = vadd.f32 %v292_v29, %v164_v31  ;;  %v6450_v31 = vadd.f32 %v6297_v19, %v139_v7 }
 0x12d   :  { %302 = vxpose.xlu0.b32.cont [2/4] (short) (narrow) %v288_v30, 16  ;;  %v6445_v30 = vshrl.u32 %v343_v27, 7  ;;  %9221 = vst [vmem:[#allocation14_spill] sm:$0xff] %v6450_v31 }
 0x12f   :  { %9220 = vst [vmem:[#allocation13_spill] sm:$0xff] %v6445_v30 }
 0x131   :  { %303 = vxpose.xlu0.b32.cont [3/4] (short) (narrow) %v293_v32, 16  ;;  %v6453_v32 = vsub.s32 5, %v6445_v30 }
 0x133   :  { %9222 = vst [vmem:[#allocation15_spill] sm:$0xff] %v6453_v32  ;;  %v6465_v27 = vrot.slane %v6450_v31, %v6453_v32 }
 0x135   :  { %304 = vxpose.xlu0.b32.end [4/4] (short) (narrow) %v298_v34, 16 }
 0x15e   :  { %5721 = vset.pattern.permute.xlu0 %v9034_v35 }
 0x1a9   :  { %v6308_v37 = vpop.trf.xlu0 }
 0x1aa   :  { %576 = vperm.xlu0 %5721, %v6308_v37   ;;  %335 = vperm.xlu1 %5709, %v6308_v37  }
 0x1ad   :  { %v6336_v50 = vpop.trf.xlu0 }
 0x1ae   :  { %5724 = vset.pattern.permute.xlu0 %v9026_v38  ;;  %5710 = vset.pattern.permute.xlu1 %v9046_v39 }
 0x1af   :  { %676 = vperm.xlu0 %5724, %v6308_v37   ;;  %356 = vperm.xlu1 %5710, %v6308_v37  }
 0x1b3   :  { %5727 = vset.pattern.permute.xlu0 %v9048_v40  ;;  %5711 = vset.pattern.permute.xlu1 %v9042_v41 }
 0x1b4   :  { %616 = vperm.xlu0 %5727, %v6308_v37   ;;  %376 = vperm.xlu1 %5711, %v6308_v37  }
 0x1b8   :  { %5730 = vset.pattern.permute.xlu0 %v9058_v42  ;;  %5712 = vset.pattern.permute.xlu1 %v9036_v43 }
 0x1b9   :  { %636 = vperm.xlu0 %5730, %v6308_v37   ;;  %396 = vperm.xlu1 %5712, %v6308_v37  }
 0x1bd   :  { %5733 = vset.pattern.permute.xlu0 %v9062_v44  ;;  %5713 = vset.pattern.permute.xlu1 %v9032_v45 }
 0x1be   :  { %736 = vperm.xlu0 %5733, %v6308_v37   ;;  %416 = vperm.xlu1 %5713, %v6308_v37  }
 0x1c2   :  { %5736 = vset.pattern.permute.xlu0 %v9070_v46  ;;  %5714 = vset.pattern.permute.xlu1 %v9028_v47 }
 0x1c3   :  { %916 = vperm.xlu0 %5736, %v6308_v37   ;;  %436 = vperm.xlu1 %5714, %v6308_v37  }
 0x1c7   :  { %5739 = vset.pattern.permute.xlu0 %v9074_v48  ;;  %5715 = vset.pattern.permute.xlu1 %v9052_v49 }
 0x1c8   :  { %796 = vperm.xlu0 %5739, %v6308_v37   ;;  %496 = vperm.xlu1 %5715, %v6308_v37  }
 0x1cc   :  { %5744 = vset.pattern.permute.xlu0 %v9032_v45  ;;  %5716 = vset.pattern.permute.xlu1 %v9050_v51 }
 0x1cd   :  { %516 = vperm.xlu1 %5716, %v6308_v37   ;;  %420 = vperm.xlu0 %5744, %v6336_v50  }
 0x1d1   :  { %5717 = vset.pattern.permute.xlu1 %v9024_v52  ;;  %5750 = vset.pattern.permute.xlu0 %v9022_v53 }
 0x1d2   :  { %456 = vperm.xlu1 %5717, %v6308_v37   ;;  %480 = vperm.xlu0 %5750, %v6336_v50  }
 0x1d6   :  { %5718 = vset.pattern.permute.xlu1 %v9044_v54  ;;  %5753 = vset.pattern.permute.xlu0 %v9020_v55 }
 0x1d7   :  { %536 = vperm.xlu1 %5718, %v6308_v37   ;;  %600 = vperm.xlu0 %5753, %v6336_v50  }
 0x1db   :  { %5719 = vset.pattern.permute.xlu1 %v9022_v53  ;;  %5756 = vset.pattern.permute.xlu0 %v9018_v56 }
 0x1dc   :  { %476 = vperm.xlu1 %5719, %v6308_v37   ;;  %820 = vperm.xlu0 %5756, %v6336_v50  }
 0x1e0   :  { %5720 = vset.pattern.permute.xlu1 %v9038_v57  ;;  %5759 = vset.pattern.permute.xlu0 %v9016_v58 }
 0x1e1   :  { %556 = vperm.xlu1 %5720, %v6308_v37   ;;  %700 = vperm.xlu0 %5759, %v6336_v50  }
 0x1e5   :  { %5722 = vset.pattern.permute.xlu1 %v9020_v55  ;;  %5762 = vset.pattern.permute.xlu0 %v9014_v59 }
 0x1e6   :  { %596 = vperm.xlu1 %5722, %v6308_v37   ;;  %720 = vperm.xlu0 %5762, %v6336_v50  }
 0x1ea   :  { %5723 = vset.pattern.permute.xlu1 %v9030_v60  ;;  %5765 = vset.pattern.permute.xlu0 %v9012_v61 }
 0x1eb   :  { %656 = vperm.xlu1 %5723, %v6308_v37   ;;  %900 = vperm.xlu0 %5765, %v6336_v50  }
 0x1ef   :  { %5725 = vset.pattern.permute.xlu1 %v9018_v56  ;;  %5768 = vset.pattern.permute.xlu0 %v9010_v62 }
 0x1f0   :  { %816 = vperm.xlu1 %5725, %v6308_v37   ;;  %780 = vperm.xlu0 %5768, %v6336_v50  }
 0x1f4   :  { %5726 = vset.pattern.permute.xlu1 %v9040_v63  ;;  %5772 = vset.pattern.permute.xlu0 %v9068_v0 }
 0x1f5   :  { %836 = vperm.xlu1 %5726, %v6308_v37   ;;  %960 = vperm.xlu0 %5772, %v6336_v50  }
 0x1f9   :  { %5728 = vset.pattern.permute.xlu1 %v9016_v58  ;;  %5774 = vset.pattern.permute.xlu0 %v9072_v5  ;;  %v6475_v58 = vadd.f32 %v6303_v22, %v6306_v36 }
 0x1fa   :  { %696 = vperm.xlu1 %5728, %v6308_v37  }
 0x1fb   :  { %9224 = vst [vmem:[#allocation17_spill] sm:$0xff] %v6475_v58 }
 0x1fe   :  { %5729 = vset.pattern.permute.xlu1 %v9054_v1 }
 0x1ff   :  { %856 = vperm.xlu1 %5729, %v6308_v37  }
 0x203   :  { %5731 = vset.pattern.permute.xlu1 %v9014_v59 }
 0x204   :  { %716 = vperm.xlu1 %5731, %v6308_v37  }
 0x208   :  { %5732 = vset.pattern.permute.xlu1 %v9064_v2 }
 0x209   :  { %876 = vperm.xlu1 %5732, %v6308_v37  }
 0x20d   :  { %5734 = vset.pattern.permute.xlu1 %v9012_v61  ;;  %v9056_v61 = vstv %s6459_s8 }
 0x20e   :  { %896 = vperm.xlu1 %5734, %v6308_v37  }
 0x212   :  { %5735 = vset.pattern.permute.xlu1 %v9060_v3 }
 0x213   :  { %756 = vperm.xlu1 %5735, %v6308_v37  }
 0x217   :  { %5737 = vset.pattern.permute.xlu1 %v9010_v62 }
 0x218   :  { %776 = vperm.xlu1 %5737, %v6308_v37  }
 0x21c   :  { %5738 = vset.pattern.permute.xlu1 %v9076_v6 }
 0x21d   :  { %936 = vperm.xlu1 %5738, %v6308_v37  }
 0x221   :  { %5740 = vset.pattern.permute.xlu1 %v9072_v5 }
 0x222   :  { %340 = vperm.xlu1 %5740, %v6336_v50  }
 0x226   :  { %5741 = vset.pattern.permute.xlu1 %v9046_v39 }
 0x227   :  { %360 = vperm.xlu1 %5741, %v6336_v50  }
 0x229   :  { %v6399_v9 = vpop.permute.xlu1 %335  ;;  %v6401_v10 = vpop.permute.xlu0 %576 }
 0x22b   :  { %5742 = vset.pattern.permute.xlu1 %v9042_v41 }
 0x22c   :  { %380 = vperm.xlu1 %5742, %v6336_v50  }
 0x22e   :  { %v6405_v11 = vpop.permute.xlu1 %356  ;;  %v6407_v12 = vpop.permute.xlu0 %676 }
 0x230   :  { %5743 = vset.pattern.permute.xlu1 %v9036_v43 }
 0x231   :  { %400 = vperm.xlu1 %5743, %v6336_v50  }
 0x233   :  { %v6411_v13 = vpop.permute.xlu1 %376  ;;  %v6413_v14 = vpop.permute.xlu0 %616 }
 0x235   :  { %5745 = vset.pattern.permute.xlu1 %v9028_v47 }
 0x236   :  { %440 = vperm.xlu1 %5745, %v6336_v50  }
 0x238   :  { %v6417_v15 = vpop.permute.xlu1 %396  ;;  %v6419_v16 = vpop.permute.xlu0 %636 }
 0x23a   :  { %5746 = vset.pattern.permute.xlu1 %v9052_v49 }
 0x23b   :  { %500 = vperm.xlu1 %5746, %v6336_v50  }
 0x23d   :  { %v6423_v17 = vpop.permute.xlu1 %416  ;;  %v6425_v18 = vpop.permute.xlu0 %736 }
 0x23f   :  { %5747 = vset.pattern.permute.xlu1 %v9050_v51 }
 0x240   :  { %520 = vperm.xlu1 %5747, %v6336_v50  }
 0x242   :  { %v6429_v23 = vpop.permute.xlu1 %436  ;;  %v6431_v24 = vpop.permute.xlu0 %916 }
 0x243   :  { %9219 = vst [vmem:[#allocation12_spill] sm:$0xff] %v6431_v24 }
 0x244   :  { %5748 = vset.pattern.permute.xlu1 %v9024_v52  ;;  %v6488_v52 = vsub.s32 2, %v6445_v30 }
 0x245   :  { %460 = vperm.xlu1 %5748, %v6336_v50  }
 0x246   :  { %9227 = vst [vmem:[#allocation20_spill] sm:$0xff] %v6488_v52  ;;  %v6494_v22 = vrot.slane %v6475_v58, %v6488_v52 }
 0x247   :  { %v6435_v25 = vpop.permute.xlu1 %496  ;;  %v6437_v26 = vpop.permute.xlu0 %796 }
 0x249   :  { %5749 = vset.pattern.permute.xlu1 %v9044_v54 }
 0x24a   :  { %540 = vperm.xlu1 %5749, %v6336_v50  }
 0x24c   :  { %v6441_v28 = vpop.permute.xlu1 %516  ;;  %v6443_v29 = vpop.permute.xlu0 %420 }
 0x24e   :  { %5751 = vset.pattern.permute.xlu1 %v9038_v57 }
 0x24f   :  { %560 = vperm.xlu1 %5751, %v6336_v50  }
 0x251   :  { %v6455_v33 = vpop.permute.xlu1 %456  ;;  %v6457_v34 = vpop.permute.xlu0 %480 }
 0x252   :  { %9223 = vst [vmem:[#allocation16_spill] sm:$0xff] %v6457_v34 }
 0x253   :  { %5752 = vset.pattern.permute.xlu1 %v9034_v35 }
 0x254   :  { %580 = vperm.xlu1 %5752, %v6336_v50  }
 0x256   :  { %v6467_v19 = vpop.permute.xlu1 %536  ;;  %v601_v7 = vpop.permute.xlu0 %600 }
 0x257   :  { %v608_v62 = vadd.f32 %v6465_v27, %v601_v7 }
 0x258   :  { %5754 = vset.pattern.permute.xlu1 %v9030_v60 }
 0x259   :  { %vm610_vm1 = vcmp.ge.f32.partialorder %v608_v62, 0.0  ;;  %v612_v59 = vmul.f32 0.2, %v608_v62  ;;  %660 = vperm.xlu1 %5754, %v6336_v50  }
 0x25b   :  { %v614_v56 = vsel %vm610_vm1, %v608_v62, %v612_v59  ;;  %v6477_v55 = vpop.permute.xlu1 %476  ;;  %v6479_v53 = vpop.permute.xlu0 %820 }
 0x25c   :  { %9225 = vst [vmem:[#allocation18_spill] sm:$0xff] %v6479_v53  ;;  %v6485_v7 = vmul.f32 %v9056_v61, %v614_v56  ;;  %v6502_v56 = vsub.s32 3, %v6445_v30 }
 0x25d   :  { %5755 = vset.pattern.permute.xlu1 %v9026_v38  ;;  %v9067_v38 = vstv %s6481_s27 }
 0x25e   :  { %9226 = vst [vmem:[#allocation19_spill] sm:$0xff] %v6485_v7  ;;  %680 = vperm.xlu1 %5755, %v6336_v50   ;;  %9228 = vst [vmem:[#allocation21_spill] sm:$0xff] %v6502_v56  ;;  %v6509_v60 = vrot.slane %v6475_v58, %v6502_v56 }
 0x260   :  { %v6496_v36 = vpop.permute.xlu1 %556  ;;  %v701_v59 = vpop.permute.xlu0 %700 }
 0x261   :  { %v708_v62 = vadd.f32 %v6494_v22, %v701_v59 }
 0x262   :  { %5757 = vset.pattern.permute.xlu1 %v9040_v63  ;;  %v9057_v63 = vstv %s6499_s7 }
 0x263   :  { %vm710_vm2 = vcmp.ge.f32.partialorder %v708_v62, 0.0  ;;  %v712_v47 = vmul.f32 0.2, %v708_v62  ;;  %840 = vperm.xlu1 %5757, %v6336_v50  }
 0x265   :  { %v714_v45 = vsel %vm710_vm2, %v708_v62, %v712_v47  ;;  %v6511_v59 = vpop.permute.xlu1 %596  ;;  %v721_v35 = vpop.permute.xlu0 %720 }
 0x266   :  { %v6515_v43 = vmul.f32 %v9067_v38, %v714_v45  ;;  %v728_v57 = vadd.f32 %v6509_v60, %v721_v35  ;;  %v6528_v45 = vsub.s32 6, %v6445_v30 }
 0x267   :  { %5758 = vset.pattern.permute.xlu1 %v9048_v40 }
 0x268   :  { %9229 = vst [vmem:[#allocation22_spill] sm:$0xff] %v6515_v43  ;;  %vm730_vm3 = vcmp.ge.f32.partialorder %v728_v57, 0.0  ;;  %620 = vperm.xlu1 %5758, %v6336_v50   ;;  %v732_v41 = vmul.f32 0.2, %v728_v57  ;;  %9231 = vst [vmem:[#allocation24_spill] sm:$0xff] %v6528_v45  ;;  %v6538_v62 = vrot.slane %v6475_v58, %v6528_v45 }
 0x26a   :  { %v6521_v54 = vpop.permute.xlu1 %656  ;;  %v6523_v39 = vpop.permute.xlu0 %900  ;;  %v734_v47 = vsel %vm730_vm3, %v728_v57, %v732_v41 }
 0x26b   :  { %9230 = vst [vmem:[#allocation23_spill] sm:$0xff] %v6523_v39  ;;  %v6532_v35 = vmul.f32 %v9057_v63, %v734_v47  ;;  %v9066_v47 = vstv %s6525_s20 }
 0x26c   :  { %5760 = vset.pattern.permute.xlu1 %v9054_v1 }
 0x26d   :  { %9232 = vst [vmem:[#allocation25_spill] sm:$0xff] %v6532_v35  ;;  %860 = vperm.xlu1 %5760, %v6336_v50  }
 0x26f   :  { %v6540_v40 = vpop.permute.xlu1 %816  ;;  %v781_v41 = vpop.permute.xlu0 %780 }
 0x270   :  { %9233 = vst [vmem:[#allocation26_spill] sm:$0xff] %v6540_v40  ;;  %v788_v57 = vadd.f32 %v6538_v62, %v781_v41  ;;  %v6662_v40 = vrot.slane %v6450_v31, %v6488_v52 }
 0x271   :  { %5761 = vset.pattern.permute.xlu1 %v9058_v42  ;;  %v6562_v42 = vsub.s32 0, %v6445_v30 }
 0x272   :  { %vm790_vm4 = vcmp.ge.f32.partialorder %v788_v57, 0.0  ;;  %640 = vperm.xlu1 %5761, %v6336_v50   ;;  %v792_v51 = vmul.f32 0.2, %v788_v57  ;;  %9243 = vst [vmem:[#allocation36_spill] sm:$0xff] %v6662_v40 }
 0x273   :  { %9237 = vst [vmem:[#allocation30_spill] sm:$0xff] %v6562_v42  ;;  %v6623_v0 = vrot.slane %v6450_v31, %v6562_v42  ;;  %v6691_v53 = vrot.slane %v6475_v58, %v6562_v42 }
 0x274   :  { %v6546_v49 = vpop.permute.xlu1 %836  ;;  %v794_v1 = vsel %vm790_vm4, %v788_v57, %v792_v51  ;;  %v6567_v51 = vsub.s32 4, %v6445_v30  ;;  %v6577_v57 = vsub.s32 1, %v6445_v30 }
 0x275   :  { %9234 = vst [vmem:[#allocation27_spill] sm:$0xff] %v6546_v49  ;;  %v6550_v61 = vmul.f32 %v9066_v47, %v794_v1  ;;  %v6574_v1 = vadd.f32 %v6299_v20, %v6389_v4  ;;  %v6602_v4 = vrot.slane %v6450_v31, %v6528_v45 }
 0x276   :  { %5763 = vset.pattern.permute.xlu1 %v9064_v2  ;;  %9238 = vst [vmem:[#allocation31_spill] sm:$0xff] %v6567_v51  ;;  %9240 = vst [vmem:[#allocation33_spill] sm:$0xff] %v6577_v57  ;;  %v6598_v20 = vrot.slane %v6450_v31, %v6567_v51  ;;  %v6670_v39 = vrot.slane %v6475_v58, %v6577_v57  ;;  %v6674_v49 = vrot.slane %v6475_v58, %v6567_v51 }
 0x277   :  { %9235 = vst [vmem:[#allocation28_spill] sm:$0xff] %v6550_v61  ;;  %880 = vperm.xlu1 %5763, %v6336_v50   ;;  %9239 = vst [vmem:[#allocation32_spill] sm:$0xff] %v6574_v1  ;;  %v6611_v2 = vrot.slane %v6574_v1, %v6562_v42  ;;  %v6615_v47 = vrot.slane %v6574_v1, %v6577_v57  ;;  %v6636_v5 = vrot.slane %v6574_v1, %v6502_v56 }
 0x278   :  { %9242 = vst [vmem:[#allocation35_spill] sm:$0xff] %v6598_v20  ;;  %v6640_v48 = vrot.slane %v6574_v1, %v6567_v51  ;;  %v6644_v6 = vrot.slane %v6574_v1, %v6453_v32  ;;  %v6654_v61 = vrot.slane %v6574_v1, %v6528_v45  ;;  %9245 = vst [vmem:[#allocation38_spill] sm:$0xff] %v6670_v39  ;;  %v9249_v51 = vmov 23  }
 0x279   :  { %v6554_v63 = vpop.permute.xlu1 %696 }
 0x27b   :  { %5764 = vset.pattern.permute.xlu1 %v9062_v44 }
 0x27c   :  { %740 = vperm.xlu1 %5764, %v6336_v50  }
 0x27e   :  { %v6558_v41 = vpop.permute.xlu1 %856 }
 0x27f   :  { %9236 = vst [vmem:[#allocation29_spill] sm:$0xff] %v6558_v41 }
 0x280   :  { %5766 = vset.pattern.permute.xlu1 %v9060_v3  ;;  %v6584_v3 = vsub.s32 7, %v6445_v30  ;;  %v6650_v30 = vrot.slane %v6450_v31, %v6577_v57  ;;  %v9246_v57 = vmov 30  }
 0x281   :  { %760 = vperm.xlu1 %5766, %v6336_v50  }
 0x282   :  { %9241 = vst [vmem:[#allocation34_spill] sm:$0xff] %v6584_v3  ;;  %v6619_v38 = vrot.slane %v6450_v31, %v6584_v3  ;;  %v6658_v41 = vrot.slane %v6574_v1, %v6584_v3 }
 0x283   :  { %v6590_v44 = vpop.permute.xlu1 %716 }
 0x285   :  { %5767 = vset.pattern.permute.xlu1 %v9070_v46  ;;  %v6632_v46 = vrot.slane %v6574_v1, %v6488_v52  ;;  %v6678_v1 = vrot.slane %v6475_v58, %v6584_v3  ;;  %v367_v52 = vadd.f32 %v6615_v47, %v6405_v11  ;;  %v6696_v3 = vrot.slane %v6475_v58, %v6453_v32 }
 0x286   :  { %920 = vperm.xlu1 %5767, %v6336_v50   ;;  %v587_v11 = vadd.f32 %v6598_v20, %v6401_v10  ;;  %v1159_v10 = vld [vmem:[%s9248_s21] sm:$0x3]  ;;  %v9253_v20 = vstv %s6564_s28 }
 0x287   :  { %v371_v42 = vmul.f32 0.2, %v367_v52  ;;  %vm369_vm5 = vcmp.ge.f32.partialorder %v367_v52, 0.0  ;;  %vm1161_vm7 = vnez %v1159_v10 }
 0x288   :  { %v6664_v24 = vpop.permute.xlu1 %876  ;;  %vm589_vm8 = vcmp.ge.f32.partialorder %v587_v11, 0.0  ;;  %v6742_v10 = vsel %vm1161_vm7, 16843009, %v9250_v8 }
 0x289   :  { %9244 = vst [vmem:[#allocation37_spill] sm:$0xff] %v6664_v24  ;;  %v6684_v24 = vrot.slane %v6450_v31, %v6502_v56  ;;  %v347_v31 = vadd.f32 %v6611_v2, %v6399_v9  ;;  %v687_v9 = vadd.f32 %v6670_v39, %v6407_v12  ;;  %v387_v56 = vadd.f32 %v6632_v46, %v6411_v13 }
 0x28a   :  { %5769 = vset.pattern.permute.xlu1 %v9246_v57  ;;  %v407_v13 = vadd.f32 %v6636_v5, %v6417_v15  ;;  %v373_v35 = vsel %vm369_vm5, %v367_v52, %v371_v42  ;;  %v527_v15 = vadd.f32 %v6650_v30, %v6441_v28  ;;  %v507_v42 = vadd.f32 %v6623_v0, %v6435_v25 }
 0x28b   :  { %940 = vperm.xlu1 %5769, %v6336_v50   ;;  %v351_v12 = vmul.f32 0.2, %v347_v31  ;;  %vm349_vm6 = vcmp.ge.f32.partialorder %v347_v31, 0.0  ;;  %v691_v58 = vmul.f32 0.2, %v687_v9  ;;  %vm689_vm9 = vcmp.ge.f32.partialorder %v687_v9, 0.0 }
 0x28c   :  { %v391_v57 = vmul.f32 0.2, %v387_v56  ;;  %vm389_vm10 = vcmp.ge.f32.partialorder %v387_v56, 0.0  ;;  %v411_v43 = vmul.f32 0.2, %v407_v13  ;;  %vm409_vm11 = vcmp.ge.f32.partialorder %v407_v13, 0.0 }
 0x28d   :  { %v6719_v32 = vpop.permute.xlu1 %896  ;;  %v547_v52 = vadd.f32 %v6662_v40, %v6467_v19  ;;  %v9251_v28 = vmov 31   ;;  %v567_v25 = vadd.f32 %v6684_v24, %v6496_v36  ;;  %v1096_v19 = vstv %s6727_s13  ;;  %s7046_s13 = sld [smem:[#allocation3 + $0x187]] }
 0x28e   :  { %9247 = vst [vmem:[#allocation39_spill] sm:$0xff] %v6719_v32  ;;  %v591_v32 = vmul.f32 0.2, %v587_v11  ;;  %v393_v21 = vsel %vm389_vm10, %v387_v56, %v391_v57  ;;  %v9254_v40 = vstv %s6569_s29  ;;  %vm529_vm12 = vcmp.ge.f32.partialorder %v527_v15, 0.0 }
 0x28f   :  { %5770 = vset.pattern.permute.xlu1 %v9249_v51  ;;  %v353_v51 = vsel %vm349_vm6, %v347_v31, %v351_v12  ;;  %v9252_v31 = vstv %s6579_s3  ;;  %v9256_v57 = vstv %s6586_s4  ;;  %vm509_vm13 = vcmp.ge.f32.partialorder %v507_v42, 0.0 }
 0x290   :  { %800 = vperm.xlu1 %5770, %v6336_v50   ;;  %v593_v39 = vsel %vm589_vm8, %v587_v11, %v591_v32  ;;  %v981_v12 = vmul.f32 %v9252_v31, %v373_v35  ;;  %v693_v50 = vsel %vm689_vm9, %v687_v9, %v691_v58  ;;  %v6755_v32 = vadd.f32 %v6602_v4, %v6413_v14 }
 0x291   :  { %v531_v11 = vmul.f32 0.2, %v527_v15  ;;  %v6764_v34 = vmul.f32 %v9254_v40, %v593_v39  ;;  %v413_v58 = vsel %vm409_vm11, %v407_v13, %v411_v43  ;;  %v9255_v35 = vstv %s6581_s0 }
 0x292   :  { %v6738_v45 = vpop.permute.xlu1 %756  ;;  %v987_v14 = vmul.f32 %v9256_v57, %v393_v21  ;;  %v511_v9 = vmul.f32 0.2, %v507_v42  ;;  %v551_v31 = vmul.f32 0.2, %v547_v52  ;;  %vm549_vm14 = vcmp.ge.f32.partialorder %v547_v52, 0.0 }
 0x293   :  { %v667_v36 = vadd.f32 %v6691_v53, %v6521_v54  ;;  %v6776_v39 = vmul.f32 0.2, %v6755_v32  ;;  %v9257_v40 = vstv %s6592_s24  ;;  %v6782_v21 = vadd.f32 %v6619_v38, %v6419_v16 }
 0x294   :  { %5771 = vset.pattern.permute.xlu1 %v9251_v28  ;;  %v977_v28 = vmul.f32 %v9253_v20, %v353_v51  ;;  %v993_v43 = vmul.f32 %v9257_v40, %v413_v58  ;;  %v533_v51 = vsel %vm529_vm12, %v527_v15, %v531_v11  ;;  %v571_v20 = vmul.f32 0.2, %v567_v25 }
 0x295   :  { %956 = vperm.xlu1 %5771, %v6308_v37   ;;  %v6768_v37 = vmul.f32 %v9255_v35, %v693_v50  ;;  %v427_v13 = vadd.f32 %v6640_v48, %v6423_v17  ;;  %vm569_vm15 = vcmp.ge.f32.partialorder %v567_v25, 0.0  ;;  %v707_v54 = vadd.f32 %v6494_v22, %v6554_v63 }
 0x296   :  { %v983_v7 = vadd.f32 %v981_v12, %v977_v28  ;;  %v447_v28 = vadd.f32 %v6644_v6, %v6429_v23  ;;  %v513_v12 = vsel %vm509_vm13, %v507_v42, %v511_v9  ;;  %v553_v15 = vsel %vm549_vm14, %v547_v52, %v551_v31 }
 0x297   :  { %v777_v56 = vpop.permute.xlu1 %776  ;;  %v747_v16 = vadd.f32 %v6674_v49, %v6425_v18  ;;  %v9258_v58 = vstv %s6627_s2  ;;  %v671_v17 = vmul.f32 0.2, %v667_v36  ;;  %v727_v57 = vadd.f32 %v6509_v60, %v6590_v44 }
 0x298   :  { %v989_v50 = vadd.f32 %v987_v14, %v983_v7  ;;  %v1027_v35 = vmul.f32 %v9258_v58, %v533_v51  ;;  %v573_v22 = vsel %vm569_vm15, %v567_v25, %v571_v20  ;;  %v607_v7 = vadd.f32 %v6465_v27, %v6511_v59 }
 0x299   :  { %5773 = vset.pattern.permute.xlu1 %v9250_v8  ;;  %vm669_vm1 = vcmp.ge.f32.partialorder %v667_v36, 0.0  ;;  %vm429_vm2 = vcmp.ge.f32.partialorder %v427_v13, 0.0  ;;  %v9259_v23 = vstv %s6625_s26  ;;  %v9260_v52 = vstv %s6680_s19 }
 0x29a   :  { %v995_v63 = vadd.f32 %v993_v43, %v989_v50  ;;  %v1023_v42 = vmul.f32 %v9259_v23, %v513_v12  ;;  %v1033_v14 = vmul.f32 %v9260_v52, %v553_v15  ;;  %v711_v9 = vmul.f32 0.2, %v707_v54 }
 0x29b   :  { %v431_v18 = vmul.f32 0.2, %v427_v13  ;;  %vm449_vm3 = vcmp.ge.f32.partialorder %v447_v28, 0.0  ;;  %v467_v31 = vadd.f32 %v6654_v61, %v6455_v33  ;;  %vm709_vm4 = vcmp.ge.f32.partialorder %v707_v54, 0.0 }
 0x29c   :  { %v6790_v11 = vpop.permute.xlu1 %936  ;;  %vm629_vm5 = vcmp.ge.f32.partialorder %v6755_v32, 0.0  ;;  %v1029_v44 = vadd.f32 %v1027_v35, %v1023_v42  ;;  %v9261_v60 = vstv %s6703_s17  ;;  %v673_v27 = vsel %vm669_vm1, %v667_v36, %v671_v17 }
 0x29d   :  { %v1039_v25 = vmul.f32 %v9261_v60, %v573_v22  ;;  %v731_v59 = vmul.f32 0.2, %v727_v57  ;;  %v451_v43 = vmul.f32 0.2, %v447_v28  ;;  %v487_v51 = vadd.f32 %v6658_v41, %v6477_v55 }
 0x29e   :  { %v611_v20 = vmul.f32 0.2, %v607_v7  ;;  %vm729_vm6 = vcmp.ge.f32.partialorder %v727_v57, 0.0  ;;  %v1035_v50 = vadd.f32 %v1033_v14, %v1029_v44  ;;  %vm609_vm7 = vcmp.ge.f32.partialorder %v607_v7, 0.0 }
 0x29f   :  { %v713_v33 = vsel %vm709_vm4, %v707_v54, %v711_v9  ;;  %v767_v12 = vadd.f32 %v6696_v3, %v6738_v45  ;;  %v433_v15 = vsel %vm429_vm2, %v427_v13, %v431_v18  ;;  %v751_v36 = vmul.f32 0.2, %v747_v16 }
 0x2a0   :  { %v471_v58 = vmul.f32 0.2, %v467_v31  ;;  %v9262_v35 = vstv %s6717_s15  ;;  %vm469_vm8 = vcmp.ge.f32.partialorder %v467_v31, 0.0  ;;  %v1041_v22 = vadd.f32 %v1039_v25, %v1035_v50 }
 0x2a1   :  { %v6809_v40 = vpop.permute.xlu1 %340  ;;  %v1069_v17 = vmul.f32 %v9262_v35, %v673_v27  ;;  %v733_v55 = vsel %vm729_vm6, %v727_v57, %v731_v59  ;;  %v787_v23 = vadd.f32 %v6538_v62, %v777_v56  ;;  %v453_v54 = vsel %vm449_vm3, %v447_v28, %v451_v43 }
 0x2a2   :  { %v491_v42 = vmul.f32 0.2, %v487_v51  ;;  %v613_v52 = vsel %vm609_vm7, %v607_v7, %v611_v20  ;;  %v9263_v14 = vstv %s6481_s27  ;;  %v9264_v13 = vstv %s6594_s25  ;;  %s7494_s27 = sld [smem:[#allocation5 + $0x80]] }
 0x2a3   :  { %v1079_v45 = vmul.f32 %v9263_v14, %v713_v33  ;;  %v999_v18 = vmul.f32 %v9264_v13, %v433_v15  ;;  %vm749_vm9 = vcmp.ge.f32.partialorder %v747_v16, 0.0  ;;  %vm489_vm10 = vcmp.ge.f32.partialorder %v487_v51, 0.0 }
 0x2a4   :  { %v771_v44 = vmul.f32 0.2, %v767_v12  ;;  %v473_v57 = vsel %vm469_vm8, %v467_v31, %v471_v58  ;;  %v1075_v60 = vadd.f32 %v6768_v37, %v1069_v17  ;;  %v9265_v62 = vstv %s6499_s7  ;;  %s6970_s7 = sld [smem:[#allocation3 + $0x183]] }
 0x2a5   :  { %v1085_v56 = vmul.f32 %v9265_v62, %v733_v55  ;;  %vm769_vm11 = vcmp.ge.f32.partialorder %v767_v12, 0.0  ;;  %v9266_v28 = vstv %s6606_s1  ;;  %v9267_v7 = vstv %s6459_s8  ;;  %s9365_s8 = sld [smem:[#allocation41_spill]] }
 0x2a6   :  { %v361_v9 = vpop.permute.xlu1 %360  ;;  %v1005_v25 = vmul.f32 %v9266_v28, %v453_v54  ;;  %v1051_v27 = vmul.f32 %v9267_v7, %v613_v52  ;;  %v791_v59 = vmul.f32 0.2, %v787_v23  ;;  %v1047_v43 = vadd.f32 %v6764_v34, %v1041_v22 }
 0x2a7   :  { %v753_v20 = vsel %vm749_vm9, %v747_v16, %v751_v36  ;;  %v493_v50 = vsel %vm489_vm10, %v487_v51, %v491_v42  ;;  %v1081_v33 = vadd.f32 %v1079_v45, %v1075_v60  ;;  %vm789_vm12 = vcmp.ge.f32.partialorder %v787_v23, 0.0 }
 0x2a8   :  { %v1001_v37 = vadd.f32 %v999_v18, %v995_v63  ;;  %v807_v31 = vadd.f32 %v6678_v1, %v6437_v26  ;;  %v9268_v15 = vstv %s6646_s6  ;;  %v773_v35 = vsel %vm769_vm11, %v767_v12, %v771_v44 }
 0x2a9   :  { %v1011_v58 = vmul.f32 %v9268_v15, %v473_v57  ;;  %v633_v34 = vsel %vm629_vm5, %v6755_v32, %v6776_v39  ;;  %vm649_vm13 = vcmp.ge.f32.partialorder %v6782_v21, 0.0  ;;  %v651_v16 = vmul.f32 0.2, %v6782_v21 }
 0x2aa   :  { %v1087_v63 = vadd.f32 %v1085_v56, %v1081_v33  ;;  %v793_v51 = vsel %vm789_vm12, %v787_v23, %v791_v59  ;;  %v1007_v36 = vadd.f32 %v1005_v25, %v1001_v37  ;;  %v9269_v22 = vstv %s6666_s23 }
 0x2ab   :  { %v381_v17 = vpop.permute.xlu1 %380  ;;  %v1017_v26 = vmul.f32 %v9269_v22, %v493_v50  ;;  %v1053_v55 = vadd.f32 %v1051_v27, %v1047_v43  ;;  %v9270_v54 = vstv %s6604_s5  ;;  %v1097_v12 = vmul.f32 %v1096_v19, %v773_v35 }
 0x2ac   :  { %v1091_v42 = vmul.f32 %v9270_v54, %v753_v20  ;;  %v1165_v52 = vunpack.c.0.s8 %v6742_v10  ;;  %v1062_v14 = vstv %s6822_s16  ;;  %v9271_v45 = vstv %s6588_s30  ;;  %s7868_s16 = sld [smem:[#allocation5 + $0x186]] }
 0x2ad   :  { %v1057_v32 = vmul.f32 %v9271_v45, %v633_v34  ;;  %v811_v39 = vmul.f32 0.2, %v807_v31  ;;  %v368_v13 = vadd.f32 %v6615_v47, %v361_v9  ;;  %v1013_v18 = vadd.f32 %v1011_v58, %v1007_v36 }
 0x2ae   :  { %v653_v23 = vsel %vm649_vm13, %v6782_v21, %v651_v16  ;;  %vm809_vm14 = vcmp.ge.f32.partialorder %v807_v31, 0.0  ;;  %v9272_v44 = vstv %s6525_s20  ;;  %v1093_v62 = vadd.f32 %v1091_v42, %v1087_v63  ;;  %s7030_s20 = sld [smem:[#allocation3 + $0x186]] }
 0x2af   :  { %v1103_v57 = vmul.f32 %v9272_v44, %v793_v51  ;;  %v348_v56 = vadd.f32 %v6611_v2, %v6809_v40  ;;  %v388_v10 = vadd.f32 %v6632_v46, %v381_v17  ;;  %v1019_v28 = vadd.f32 %v1017_v26, %v1013_v18 }
 0x2b0   :  { %v401_v60 = vpop.permute.xlu1 %400  ;;  %v1059_v25 = vadd.f32 %v1057_v32, %v1053_v55  ;;  %vm6863_vm15 = vcmp.ne.s32.totalorder %v1165_v52, 0  ;;  %v1099_v47 = vadd.f32 %v1097_v12, %v1093_v62  ;;  %v1108_v9 = vstv %s6834_s22  ;;  %s7877_s22 = sld [smem:[#allocation5 + $0x187]] }
 0x2b1   :  { %v813_v21 = vsel %vm809_vm14, %v807_v31, %v811_v39  ;;  %v372_v27 = vmul.f32 0.2, %v368_v13  ;;  %v408_v59 = vadd.f32 %v6636_v5, %v401_v60  ;;  %v1063_v43 = vmul.f32 %v1062_v14, %v653_v23 }
 0x2b2   :  { %vm370_vm1 = vcmp.ge.f32.partialorder %v368_v13, 0.0  ;;  %vm1181_vm2 = vcmask 130048   ;;  %v1105_v2 = vadd.f32 %v1103_v57, %v1099_v47  ;;  %v352_v40 = vmul.f32 0.2, %v348_v56 }
 0x2b3   :  { %v392_v46 = vmul.f32 0.2, %v388_v10  ;;  %v6873_v50 = vsel %vm6863_vm15, %v1019_v28, -1e+30  ;;  %v1065_v33 = vadd.f32 %v1063_v43, %v1059_v25  ;;  %vm350_vm3 = vcmp.ge.f32.partialorder %v348_v56, 0.0  ;;  %v9280_v25 = vld [vmem:[#allocation16_spill] sm:$0xff] }
 0x2b4   :  { %vm390_vm4 = vcmp.ge.f32.partialorder %v388_v10, 0.0  ;;  %v1109_v37 = vmul.f32 %v1108_v9, %v813_v21  ;;  %v374_v5 = vsel %vm370_vm1, %v368_v13, %v372_v27  ;;  %v412_v31 = vmul.f32 0.2, %v408_v59 }
 0x2b5   :  { %v441_v20 = vpop.permute.xlu1 %440  ;;  %vm410_vm5 = vcmp.ge.f32.partialorder %v408_v59, 0.0  ;;  %v1182_v15 = vsel %vm1181_vm2, %v6873_v50, -inf  ;;  %v428_v35 = vadd.f32 %v6640_v48, %v6443_v29  ;;  %v354_v17 = vsel %vm350_vm3, %v348_v56, %v352_v40 }
 0x2b6   :  { %v1111_v58 = vadd.f32 %v1109_v37, %v1105_v2  ;;  %v394_v34 = vsel %vm390_vm4, %v388_v10, %v392_v46  ;;  %v6883_v16 = vsel %vm6863_vm15, %v1065_v33, -1e+30  ;;  %v9275_v63 = vstv %s6579_s3  ;;  %v1160_v10 = vld [vmem:[%s9248_s21 + $0x2] sm:$0x3]  ;;  %s6966_s21 = sld [smem:[#allocation3 + $0x181]]  ;;  %s7608_s3 = sld [smem:[#allocation5 + $0x104]] }
 0x2b7   :  { %v982_v51 = vmul.f32 %v9275_v63, %v374_v5  ;;  %v414_v22 = vsel %vm410_vm5, %v408_v59, %v412_v31  ;;  %v448_v26 = vadd.f32 %v6644_v6, %v441_v20  ;;  %v9276_v54 = vstv %s6564_s28  ;;  %s7581_s28 = sld [smem:[#allocation5 + $0x87]] }
 0x2b8   :  { %v978_v42 = vmul.f32 %v9276_v54, %v354_v17  ;;  %v9277_v12 = vstv %s6586_s4  ;;  %v1188_v29 = vsel %vm1181_vm2, %v6883_v16, -inf  ;;  %v6897_v52 = vsel %vm6863_vm15, %v1111_v58, -1e+30  ;;  %s8417_s4 = sld [smem:[#allocation7 + $0x4]] }
 0x2b9   :  { %1183 = vmax.xlane.f32.xlu1 %v1182_v15  ;;  %v988_v48 = vmul.f32 %v9277_v12, %v394_v34  ;;  %v432_v45 = vmul.f32 0.2, %v428_v35  ;;  %vm430_vm7 = vcmp.ge.f32.partialorder %v428_v35, 0.0  ;;  %v9278_v39 = vstv %s6592_s24  ;;  %s7405_s24 = sld [smem:[#allocation5]] }
 0x2ba   :  { %v501_v36 = vpop.permute.xlu1 %500  ;;  %v984_v6 = vadd.f32 %v982_v51, %v978_v42  ;;  %v452_v13 = vmul.f32 0.2, %v448_v26  ;;  %v1194_v44 = vsel %vm1181_vm2, %v6897_v52, -inf  ;;  %vm450_vm8 = vcmp.ge.f32.partialorder %v448_v26, 0.0 }
 0x2bb   :  { %v508_v55 = vadd.f32 %v6623_v0, %v501_v36  ;;  %v994_v0 = vmul.f32 %v9278_v39, %v414_v22  ;;  %v9279_v60 = vstv %s6625_s26  ;;  %v434_v28 = vsel %vm430_vm7, %v428_v35, %v432_v45  ;;  %s7443_s26 = sld [smem:[#allocation5 + $0x5]] }
 0x2bc   :  { %v990_v57 = vadd.f32 %v988_v48, %v984_v6  ;;  %v488_v47 = vadd.f32 %v6658_v41, %v9280_v25  ;;  %v454_v59 = vsel %vm450_vm8, %v448_v26, %v452_v13  ;;  %vm1162_vm10 = vnez %v1160_v10  ;;  %v9285_v26 = vld [vmem:[#allocation36_spill] sm:$0xff] }
 0x2bd   :  { %vm510_vm6 = vcmp.ge.f32.partialorder %v508_v55, 0.0  ;;  %v512_v32 = vmul.f32 0.2, %v508_v55  ;;  %1189 = vmax.xlane.f32.xlu1 %v1188_v29  ;;  %v9281_v43 = vstv %s6594_s25  ;;  %v9282_v20 = vstv %s6627_s2  ;;  %s7407_s25 = sld [smem:[#allocation5 + $0x2]]  ;;  %s7452_s2 = sld [smem:[#allocation5 + $0x6]] }
 0x2be   :  { %v996_v21 = vadd.f32 %v994_v0, %v990_v57  ;;  %v1000_v2 = vmul.f32 %v9281_v43, %v434_v28  ;;  %v492_v46 = vmul.f32 0.2, %v488_v47  ;;  %vm490_vm11 = vcmp.ge.f32.partialorder %v488_v47, 0.0  ;;  %v9291_v28 = vld [vmem:[#allocation35_spill] sm:$0xff] }
 0x2bf   :  { %v514_v18 = vsel %vm510_vm6, %v508_v55, %v512_v32  ;;  %v521_v23 = vpop.permute.xlu1 %520  ;;  %v9283_v5 = vstv %s6606_s1  ;;  %v1164_v15 = vsel %vm1162_vm10, 16843009, %v9250_v8  ;;  %v9284_v36 = vstv %s6646_s6  ;;  %s7427_s1 = sld [smem:[#allocation5 + $0x4]]  ;;  %s7463_s6 = sld [smem:[#allocation5 + $0x7]] }
 0x2c0   :  { %v1024_v62 = vmul.f32 %v9279_v60, %v514_v18  ;;  %v528_v56 = vadd.f32 %v6650_v30, %v521_v23  ;;  %v1006_v31 = vmul.f32 %v9283_v5, %v454_v59  ;;  %v1002_v41 = vadd.f32 %v1000_v2, %v996_v21 }
 0x2c1   :  { %1195 = vmax.xlane.f32.xlu1 %v1194_v44  ;;  %v494_v17 = vsel %vm490_vm11, %v488_v47, %v492_v46  ;;  %v1166_v51 = vunpack.c.0.s8 %v1164_v15  ;;  %v9286_v12 = vstv %s6666_s23  ;;  %v9289_v39 = vstv %s6680_s19  ;;  %s6964_s19 = sld [smem:[#allocation3 + $0x184]]  ;;  %s6968_s23 = sld [smem:[#allocation3 + $0x182]] }
 0x2c2   :  { %vm530_vm9 = vcmp.ge.f32.partialorder %v528_v56, 0.0  ;;  %v532_v27 = vmul.f32 0.2, %v528_v56  ;;  %v1018_v48 = vmul.f32 %v9286_v12, %v494_v17  ;;  %v9292_v59 = vstv %s6569_s29  ;;  %s7585_s29 = sld [smem:[#allocation5 + $0x103]] }
 0x2c3   :  { %vm6924_vm14 = vcmp.ne.s32.totalorder %v1166_v51, 0  ;;  %v9320_v7 = vmov 0 }
 0x2c4   :  { %v534_v40 = vsel %vm530_vm9, %v528_v56, %v532_v27  ;;  %v461_v30 = vpop.permute.xlu1 %460  ;;  %v9290_v56 = vstv %s6703_s17  ;;  %s6958_s17 = sld [smem:[#allocation3 + $0x180]] }
 0x2c5   :  { %v1028_v33 = vmul.f32 %v9282_v20, %v534_v40  ;;  %v468_v37 = vadd.f32 %v6654_v61, %v461_v30  ;;  %v1008_v61 = vadd.f32 %v1006_v31, %v1002_v41  ;;  %v9293_v20 = vld [vmem:[#allocation19_spill] sm:$0xff] }
 0x2c7   :  { %v1030_v58 = vadd.f32 %v1028_v33, %v1024_v62  ;;  %vm470_vm12 = vcmp.ge.f32.partialorder %v468_v37, 0.0  ;;  %v472_v35 = vmul.f32 0.2, %v468_v37 }
 0x2c9   :  { %v474_v34 = vsel %vm470_vm12, %v468_v37, %v472_v35  ;;  %v541_v63 = vpop.permute.xlu1 %540  ;;  %v9294_v37 = vld [vmem:[#allocation38_spill] sm:$0xff]  ;;  %v9295_v35 = vstv %s6717_s15  ;;  %s6956_s15 = sld [smem:[#allocation3 + $0x185]] }
 0x2ca   :  { %v1012_v22 = vmul.f32 %v9284_v36, %v474_v34  ;;  %v548_v55 = vadd.f32 %v9285_v26, %v541_v63  ;;  %v9296_v34 = vstv %s6581_s0  ;;  %s7616_s0 = sld [smem:[#allocation5 + $0x105]] }
 0x2cc   :  { %vm550_vm13 = vcmp.ge.f32.partialorder %v548_v55, 0.0  ;;  %v552_v54 = vmul.f32 0.2, %v548_v55  ;;  %v1014_v42 = vadd.f32 %v1012_v22, %v1008_v61 }
 0x2ce   :  { %v554_v45 = vsel %vm550_vm13, %v548_v55, %v552_v54  ;;  %v561_v32 = vpop.permute.xlu1 %560  ;;  %v1020_v6 = vadd.f32 %v1018_v48, %v1014_v42  ;;  %v9298_v55 = vld [vmem:[#allocation25_spill] sm:$0xff]  ;;  %v9299_v48 = vstv %s6588_s30  ;;  %s8427_s30 = sld [smem:[#allocation7 + $0x5]] }
 0x2cf   :  { %v1034_v0 = vmul.f32 %v9289_v39, %v554_v45  ;;  %v568_v13 = vadd.f32 %v6684_v24, %v561_v32  ;;  %v9301_v39 = vld [vmem:[#allocation10_spill] sm:$0xff] }
 0x2d0   :  { %v6933_v18 = vsel %vm6924_vm14, %v1020_v6, -1e+30  ;;  %v9300_v6 = vld [vmem:[#allocation11_spill] sm:$0xff] }
 0x2d1   :  { %v1036_v23 = vadd.f32 %v1034_v0, %v1030_v58  ;;  %vm570_vm1 = vcmp.ge.f32.partialorder %v568_v13, 0.0  ;;  %v572_v44 = vmul.f32 0.2, %v568_v13  ;;  %v1185_v57 = vsel %vm1181_vm2, %v6933_v18, -inf }
 0x2d2   :  { %1186 = vmax.xlane.f32.xlu0 %v1185_v57  ;;  %v6962_v0 = vadd.f32 %v9301_v39, %v9300_v6 }
 0x2d3   :  { %v574_v60 = vsel %vm570_vm1, %v568_v13, %v572_v44  ;;  %v581_v62 = vpop.permute.xlu1 %580  ;;  %v9302_v44 = vld [vmem:[#allocation30_spill] sm:$0xff] }
 0x2d4   :  { %v1040_v10 = vmul.f32 %v9290_v56, %v574_v60  ;;  %v588_v25 = vadd.f32 %v9291_v28, %v581_v62  ;;  %v826_v57 = vrot.slane %v6962_v0, %v9302_v44  ;;  %v9303_v60 = vld [vmem:[#allocation15_spill] sm:$0xff]  ;;  %v9305_v28 = vld [vmem:[#allocation33_spill] sm:$0xff] }
 0x2d5   :  { %v6977_v62 = vrot.slane %v6962_v0, %v9303_v60  ;;  %v9304_v56 = vld [vmem:[#allocation31_spill] sm:$0xff] }
 0x2d6   :  { %v1042_v47 = vadd.f32 %v1040_v10, %v1036_v23  ;;  %vm590_vm3 = vcmp.ge.f32.partialorder %v588_v25, 0.0  ;;  %v592_v24 = vmul.f32 0.2, %v588_v25  ;;  %v6981_v10 = vrot.slane %v6962_v0, %v9304_v56 }
 0x2d8   :  { %v594_v21 = vsel %vm590_vm3, %v588_v25, %v592_v24  ;;  %v661_v27 = vpop.permute.xlu1 %660  ;;  %v846_v25 = vrot.slane %v6962_v0, %v9305_v28  ;;  %v9306_v24 = vld [vmem:[#allocation18_spill] sm:$0xff] }
 0x2d9   :  { %v1046_v43 = vmul.f32 %v9292_v59, %v594_v21  ;;  %v668_v2 = vadd.f32 %v6691_v53, %v661_v27  ;;  %v9297_v53 = vld [vmem:[#allocation22_spill] sm:$0xff]  ;;  %v828_v21 = vadd.f32 %v826_v57, %v9306_v24 }
 0x2da   :  { %v9307_v27 = vld [vmem:[#allocation34_spill] sm:$0xff] }
 0x2db   :  { %v1048_v40 = vadd.f32 %v1046_v43, %v1042_v47  ;;  %v672_v30 = vmul.f32 0.2, %v668_v2  ;;  %vm670_vm4 = vcmp.ge.f32.partialorder %v668_v2, 0.0  ;;  %v6988_v59 = vrot.slane %v6962_v0, %v9307_v27  ;;  %v9308_v43 = vld [vmem:[#allocation20_spill] sm:$0xff] }
 0x2dc   :  { %vm830_vm8 = vcmp.ge.f32.partialorder %v828_v21, 0.0 }
 0x2dd   :  { %v681_v46 = vpop.permute.xlu1 %680  ;;  %v1054_v33 = vadd.f32 %v9293_v20, %v1048_v40  ;;  %v674_v31 = vsel %vm670_vm4, %v668_v2, %v672_v30  ;;  %v866_v2 = vrot.slane %v6962_v0, %v9308_v43  ;;  %v1142_v30 = vstv %s6956_s15  ;;  %s7496_s15 = sld [smem:[#allocation5 + $0x81]] }
 0x2de   :  { %v688_v5 = vadd.f32 %v9294_v37, %v681_v46  ;;  %v1070_v17 = vmul.f32 %v9295_v35, %v674_v31  ;;  %v9309_v46 = vld [vmem:[#allocation21_spill] sm:$0xff]  ;;  %v1114_v31 = vstv %s6958_s17  ;;  %s7509_s17 = sld [smem:[#allocation5 + $0x83]] }
 0x2df   :  { %v886_v20 = vrot.slane %v6962_v0, %v9309_v46 }
 0x2e0   :  { %vm690_vm5 = vcmp.ge.f32.partialorder %v688_v5, 0.0  ;;  %v692_v41 = vmul.f32 0.2, %v688_v5 }
 0x2e2   :  { %v694_v15 = vsel %vm690_vm5, %v688_v5, %v692_v41  ;;  %v841_v58 = vpop.permute.xlu1 %840  ;;  %v1136_v41 = vstv %s6964_s19  ;;  %s7521_s19 = sld [smem:[#allocation5 + $0x84]] }
 0x2e3   :  { %v1074_v63 = vmul.f32 %v9296_v34, %v694_v15  ;;  %v848_v5 = vadd.f32 %v846_v25, %v841_v58  ;;  %v9311_v15 = vld [vmem:[#allocation27_spill] sm:$0xff]  ;;  %v1118_v34 = vstv %s6966_s21  ;;  %s7525_s21 = sld [smem:[#allocation5 + $0x100]] }
 0x2e4   :  { %v847_v35 = vadd.f32 %v846_v25, %v9311_v15 }
 0x2e5   :  { %v1076_v51 = vadd.f32 %v1074_v63, %v1070_v17  ;;  %v1124_v63 = vstv %s6968_s23  ;;  %v852_v58 = vmul.f32 0.2, %v848_v5  ;;  %vm850_vm9 = vcmp.ge.f32.partialorder %v848_v5, 0.0  ;;  %s7529_s23 = sld [smem:[#allocation5 + $0x101]] }
 0x2e6   :  { %v851_v39 = vmul.f32 0.2, %v847_v35  ;;  %vm849_vm12 = vcmp.ge.f32.partialorder %v847_v35, 0.0 }
 0x2e7   :  { %v1082_v36 = vadd.f32 %v9297_v53, %v1076_v51  ;;  %v621_v22 = vpop.permute.xlu1 %620  ;;  %v1130_v51 = vstv %s6970_s7  ;;  %s7551_s7 = sld [smem:[#allocation5 + $0x85]] }
 0x2e8   :  { %v628_v26 = vadd.f32 %v6602_v4, %v621_v22 }
 0x2e9   :  { %v6952_v61 = vadd.f32 %v9298_v55, %v1082_v36  ;;  %v9312_v36 = vld [vmem:[#allocation23_spill] sm:$0xff] }
 0x2ea   :  { %vm630_vm6 = vcmp.ge.f32.partialorder %v628_v26, 0.0  ;;  %v632_v54 = vmul.f32 0.2, %v628_v26  ;;  %v908_v22 = vadd.f32 %v6981_v10, %v9312_v36 }
 0x2ec   :  { %v634_v42 = vsel %vm630_vm6, %v628_v26, %v632_v54  ;;  %v861_v12 = vpop.permute.xlu1 %860  ;;  %vm910_vm11 = vcmp.ge.f32.partialorder %v908_v22, 0.0 }
 0x2ed   :  { %v1058_v45 = vmul.f32 %v9299_v48, %v634_v42  ;;  %v868_v53 = vadd.f32 %v866_v2, %v861_v12 }
 0x2ef   :  { %v1060_v32 = vadd.f32 %v1058_v45, %v1054_v33  ;;  %v9310_v33 = vld [vmem:[#allocation24_spill] sm:$0xff]  ;;  %vm870_vm13 = vcmp.ge.f32.partialorder %v868_v53, 0.0 }
 0x2f0   :  { %v6999_v37 = vrot.slane %v6962_v0, %v9310_v33  ;;  %v9313_v45 = vld [vmem:[#allocation12_spill] sm:$0xff] }
 0x2f1   :  { %v641_v4 = vpop.permute.xlu1 %640  ;;  %v7018_v12 = vadd.f32 %v6977_v62, %v9313_v45 }
 0x2f2   :  { %v648_v13 = vadd.f32 %v6619_v38, %v641_v4  ;;  %v9315_v4 = vld [vmem:[#allocation29_spill] sm:$0xff] }
 0x2f4   :  { %vm650_vm7 = vcmp.ge.f32.partialorder %v648_v13, 0.0  ;;  %v652_v23 = vmul.f32 0.2, %v648_v13 }
 0x2f6   :  { %v654_v38 = vsel %vm650_vm7, %v648_v13, %v652_v23  ;;  %v881_v47 = vpop.permute.xlu1 %880  ;;  %v867_v13 = vadd.f32 %v866_v2, %v9315_v4  ;;  %v872_v23 = vmul.f32 0.2, %v868_v53 }
 0x2f7   :  { %v1064_v40 = vmul.f32 %v1062_v14, %v654_v38  ;;  %v832_v14 = vmul.f32 0.2, %v828_v21  ;;  %v888_v54 = vadd.f32 %v886_v20, %v881_v47  ;;  %v854_v47 = vsel %vm850_vm9, %v848_v5, %v852_v58 }
 0x2f8   :  { %v871_v36 = vmul.f32 0.2, %v867_v13  ;;  %vm869_vm5 = vcmp.ge.f32.partialorder %v867_v13, 0.0  ;;  %vm929_vm9 = vcmp.ge.f32.partialorder %v7018_v12, 0.0 }
 0x2f9   :  { %v1066_v17 = vadd.f32 %v1064_v40, %v1060_v32  ;;  %v9314_v32 = vld [vmem:[#allocation26_spill] sm:$0xff]  ;;  %v834_v38 = vsel %vm830_vm8, %v828_v21, %v832_v14  ;;  %v892_v24 = vmul.f32 0.2, %v888_v54  ;;  %vm890_vm3 = vcmp.ge.f32.partialorder %v888_v54, 0.0 }
 0x2fa   :  { %v827_v6 = vadd.f32 %v826_v57, %v9314_v32  ;;  %v9316_v21 = vstv %s6604_s5  ;;  %v1120_v32 = vmul.f32 %v1118_v34, %v854_v47  ;;  %v1116_v58 = vmul.f32 %v1114_v31, %v834_v38  ;;  %v961_v47 = vpop.permute.xlu0 %960  ;;  %s7420_s5 = sld [smem:[#allocation5 + $0x3]] }
 0x2fb   :  { %v741_v26 = vpop.permute.xlu1 %740  ;;  %v7011_v55 = vsel %vm6924_vm14, %v1066_v17, -1e+30  ;;  %v853_v17 = vsel %vm849_vm12, %v847_v35, %v851_v39 }
 0x2fc   :  { %v748_v42 = vadd.f32 %v6674_v49, %v741_v26  ;;  %v1191_v48 = vsel %vm1181_vm2, %v7011_v55, -inf  ;;  %v912_v49 = vmul.f32 0.2, %v908_v22  ;;  %vm829_vm1 = vcmp.ge.f32.partialorder %v827_v6, 0.0 }
 0x2fd   :  { %1192 = vmax.xlane.f32.xlu0 %v1191_v48  ;;  %v831_v15 = vmul.f32 0.2, %v827_v6  ;;  %v874_v26 = vsel %vm870_vm13, %v868_v53, %v872_v23  ;;  %v9317_v48 = vld [vmem:[#allocation37_spill] sm:$0xff]  ;;  %v9318_v53 = vld [vmem:[#allocation39_spill] sm:$0xff] }
 0x2fe   :  { %vm750_vm10 = vcmp.ge.f32.partialorder %v748_v42, 0.0  ;;  %v752_v25 = vmul.f32 0.2, %v748_v42  ;;  %v887_v45 = vadd.f32 %v886_v20, %v9317_v48  ;;  %v907_v39 = vadd.f32 %v6981_v10, %v9318_v53 }
 0x2ff   :  { %v833_v35 = vsel %vm829_vm1, %v827_v6, %v831_v15  ;;  %v1126_v20 = vmul.f32 %v1124_v63, %v874_v26  ;;  %v1122_v6 = vadd.f32 %v1120_v32, %v1116_v58  ;;  %v968_v15 = vadd.f32 %v6988_v59, %v961_v47 }
 0x300   :  { %v754_v40 = vsel %vm750_vm10, %v748_v42, %v752_v25  ;;  %v761_v57 = vpop.permute.xlu1 %760  ;;  %v914_v42 = vsel %vm910_vm11, %v908_v22, %v912_v49  ;;  %v1119_v25 = vmul.f32 %v1118_v34, %v853_v17  ;;  %vm889_vm6 = vcmp.ge.f32.partialorder %v887_v45, 0.0  ;;  %v9319_v17 = vld [vmem:[#allocation28_spill] sm:$0xff] }
 0x301   :  { %v768_v2 = vadd.f32 %v6696_v3, %v761_v57  ;;  %v1092_v14 = vmul.f32 %v9316_v21, %v754_v40  ;;  %v894_v3 = vsel %vm890_vm3, %v888_v54, %v892_v24  ;;  %v873_v54 = vsel %vm869_vm5, %v867_v13, %v871_v36 }
 0x302   :  { %v891_v24 = vmul.f32 0.2, %v887_v45  ;;  %v1132_v40 = vmul.f32 %v1130_v51, %v894_v3  ;;  %v1115_v34 = vmul.f32 %v1114_v31, %v833_v35  ;;  %vm909_vm8 = vcmp.ge.f32.partialorder %v907_v39, 0.0 }
 0x303   :  { %vm770_vm4 = vcmp.ge.f32.partialorder %v768_v2, 0.0  ;;  %v772_v5 = vmul.f32 0.2, %v768_v2  ;;  %v1094_v38 = vadd.f32 %v1092_v14, %v6952_v61  ;;  %v911_v61 = vmul.f32 0.2, %v907_v39 }
 0x304   :  { %v893_v26 = vsel %vm889_vm6, %v887_v45, %v891_v24  ;;  %v947_v31 = vadd.f32 %v6999_v37, %v6790_v11  ;;  %v1138_v48 = vmul.f32 %v1136_v41, %v914_v42  ;;  %v1121_v32 = vadd.f32 %v1119_v25, %v1115_v34 }
 0x305   :  { %v774_v4 = vsel %vm770_vm4, %v768_v2, %v772_v5  ;;  %v921_v23 = vpop.permute.xlu1 %920  ;;  %v1128_v2 = vadd.f32 %v1126_v20, %v1122_v6  ;;  %v913_v5 = vsel %vm909_vm8, %v907_v39, %v911_v61  ;;  %v931_v45 = vmul.f32 0.2, %v7018_v12 }
 0x306   :  { %v1098_v22 = vmul.f32 %v1096_v19, %v774_v4  ;;  %v928_v49 = vadd.f32 %v6977_v62, %v921_v23  ;;  %v1125_v19 = vmul.f32 %v1124_v63, %v873_v54  ;;  %v1148_v63 = vstv %s7030_s20  ;;  %s7557_s20 = sld [smem:[#allocation5 + $0x86]] }
 0x307   :  { %v1134_v21 = vadd.f32 %v1132_v40, %v1128_v2  ;;  %vm970_vm11 = vcmp.ge.f32.partialorder %v968_v15, 0.0  ;;  %v972_v11 = vmul.f32 0.2, %v968_v15  ;;  %v1131_v35 = vmul.f32 %v1130_v51, %v893_v26 }
 0x308   :  { %vm930_vm7 = vcmp.ge.f32.partialorder %v928_v49, 0.0  ;;  %v932_v10 = vmul.f32 0.2, %v928_v49  ;;  %v1100_v57 = vadd.f32 %v1098_v22, %v1094_v38  ;;  %v951_v53 = vmul.f32 0.2, %v947_v31 }
 0x309   :  { %v1140_v42 = vadd.f32 %v1138_v48, %v1134_v21  ;;  %v1137_v23 = vmul.f32 %v1136_v41, %v913_v5  ;;  %vm949_vm12 = vcmp.ge.f32.partialorder %v947_v31, 0.0  ;;  %v1154_v38 = vstv %s7046_s13  ;;  %s7563_s13 = sld [smem:[#allocation5 + $0x102]] }
 0x30a   :  { %v934_v62 = vsel %vm930_vm7, %v928_v49, %v932_v10  ;;  %v941_v13 = vpop.permute.xlu1 %940  ;;  %v1106_v36 = vadd.f32 %v9319_v17, %v1100_v57  ;;  %v974_v22 = vsel %vm970_vm11, %v968_v15, %v972_v11  ;;  %v933_v51 = vsel %vm929_vm9, %v7018_v12, %v931_v45 }
 0x30b   :  { %v948_v14 = vadd.f32 %v6999_v37, %v941_v13  ;;  %v1144_v58 = vmul.f32 %v1142_v30, %v934_v62  ;;  %v1127_v37 = vadd.f32 %v1125_v19, %v1121_v32  ;;  %v953_v24 = vsel %vm949_vm12, %v947_v31, %v951_v53 }
 0x30c   :  { %v1156_v34 = vmul.f32 %v1154_v38, %v974_v22  ;;  %v1143_v61 = vmul.f32 %v1142_v30, %v933_v51  ;;  %v1149_v15 = vmul.f32 %v1148_v63, %v953_v24  ;;  %vm6101_vm3 = vmmov 0  }
 0x30d   :  { %vm950_vm10 = vcmp.ge.f32.partialorder %v948_v14, 0.0  ;;  %v952_v3 = vmul.f32 0.2, %v948_v14  ;;  %v1146_v47 = vadd.f32 %v1144_v58, %v1140_v42  ;;  %v1133_v49 = vadd.f32 %v1131_v35, %v1127_v37 }
 0x30f   :  { %v954_v20 = vsel %vm950_vm10, %v948_v14, %v952_v3  ;;  %v801_v4 = vpop.permute.xlu1 %800  ;;  %v1139_v40 = vadd.f32 %v1137_v23, %v1133_v49 }
 0x310   :  { %v1150_v39 = vmul.f32 %v1148_v63, %v954_v20  ;;  %v808_v25 = vadd.f32 %v6678_v1, %v801_v4 }
 0x311   :  { %v1145_v13 = vadd.f32 %v1143_v61, %v1139_v40 }
 0x312   :  { %vm810_vm13 = vcmp.ge.f32.partialorder %v808_v25, 0.0  ;;  %v812_v54 = vmul.f32 0.2, %v808_v25  ;;  %v1152_v6 = vadd.f32 %v1150_v39, %v1146_v47 }
 0x313   :  { %v1151_v31 = vadd.f32 %v1149_v15, %v1145_v13 }
 0x314   :  { %v814_v41 = vsel %vm810_vm13, %v808_v25, %v812_v54  ;;  %v957_v10 = vpop.permute.xlu1 %956  ;;  %v1158_v62 = vadd.f32 %v1156_v34, %v1152_v6  ;;  %v9104_v54 = vmov 0.0|0.0  }
 0x315   :  { %v967_v57 = vadd.f32 %v6988_v59, %v957_v10  ;;  %v1110_v1 = vmul.f32 %v1108_v9, %v814_v41  ;;  %5593 = vmatprep.subr.bf16.mxu1 %v9104_v54  ;;  %5601 = vmatprep.subr.bf16.mxu0 %v9104_v54 }
 0x316   :  { %v1180_v9 = vsel %vm6924_vm14, %v1158_v62, -1e+30 }
 0x317   :  { %vm969_vm1 = vcmp.ge.f32.partialorder %v967_v57, 0.0  ;;  %v971_v2 = vmul.f32 0.2, %v967_v57  ;;  %v1112_v19 = vadd.f32 %v1110_v1, %v1106_v36  ;;  %v1203_v30 = vsel %vm1181_vm2, %v1180_v9, -inf }
 0x319   :  { %v973_v17 = vsel %vm969_vm1, %v967_v57, %v971_v2  ;;  %v1178_v12 = vsel %vm6924_vm14, %v1112_v19, -1e+30 }
 0x31a   :  { %v1197_v26 = vsel %vm1181_vm2, %v1178_v12, -inf  ;;  %v1155_v21 = vmul.f32 %v1154_v38, %v973_v17 }
 0x31b   :  { %1198 = vmax.xlane.f32.xlu0 %v1197_v26 }
 0x31c   :  { %v1157_v59 = vadd.f32 %v1155_v21, %v1151_v31 }
 0x31e   :  { %v1179_v36 = vsel %vm6863_vm15, %v1157_v59, -1e+30 }
 0x31f   :  { %1204 = vmax.xlane.f32.xlu0 %v1203_v30  ;;  %v1200_v14 = vsel %vm1181_vm2, %v1179_v36, -inf }
 0x320   :  { %1201 = vmax.xlane.f32.xlu1 %v1200_v14 }
 0x346   :  { %v1184_v48 = vpop.xlane.xlu1 %1183 }
 0x347   :  { %v1206_v32 = vsub.f32 %v6873_v50, %v1184_v48 }
 0x349   :  { %v1214_v63 = vmul.f32 1.442695, %v1206_v32 }
 0x34a   :  { %v1190_v5 = vpop.xlane.xlu1 %1189 }
 0x34b   :  { %5905 = vpow2.f32 %v1214_v63  ;;  %v1208_v58 = vsub.f32 %v6883_v16, %v1190_v5 }
 0x34d   :  { %v1218_v3 = vmul.f32 1.442695, %v1208_v58 }
 0x34e   :  { %v1196_v45 = vpop.xlane.xlu1 %1195 }
 0x34f   :  { %5907 = vpow2.f32 %v1218_v3  ;;  %v1210_v11 = vsub.f32 %v6897_v52, %v1196_v45  ;;  %v9323_v45 = vld [vmem:[#allocation32_spill] sm:$0xff] }
 0x351   :  { %v1222_v35 = vmul.f32 1.442695, %v1210_v11 }
 0x353   :  { %5909 = vpow2.f32 %v1222_v35 }
 0x355   :  { %v5906_v37 = vpop.eup %5905 }
 0x356   :  { %v7089_v53 = vsel %vm6863_vm15, %v5906_v37, 0.0 }
 0x357   :  { %v1238_v50 = vsel %vm1181_vm2, %v7089_v53, 0.0 }
 0x358   :  { %1239 = vadd.xlane.f32.xlu1 %v1238_v50 }
 0x359   :  { %v5908_v20 = vpop.eup %5907 }
 0x35a   :  { %v7095_v16 = vsel %vm6863_vm15, %v5908_v20, 0.0 }
 0x35b   :  { %v1244_v4 = vsel %vm1181_vm2, %v7095_v16, 0.0 }
 0x35c   :  { %1245 = vadd.xlane.f32.xlu1 %v1244_v4 }
 0x35d   :  { %v5910_v52 = vpop.eup %5909 }
 0x35e   :  { %v7101_v42 = vsel %vm6863_vm15, %v5910_v52, 0.0 }
 0x35f   :  { %v1187_v23 = vpop.xlane.xlu0 %1186  ;;  %v1250_v39 = vsel %vm1181_vm2, %v7101_v42, 0.0 }
 0x360   :  { %v1207_v25 = vsub.f32 %v6933_v18, %v1187_v23  ;;  %1251 = vadd.xlane.f32.xlu1 %v1250_v39  ;;  %v9102_v18 = vmov 0.0  }
 0x361   :  { %5433 = vmatprep.mubr.msk.f32.mxu1 %vm6101_vm3, %v9102_v18  ;;  %5447 = vmatprep.mubr.msk.f32.mxu0 %vm6101_vm3, %v9102_v18 }
 0x362   :  { %v1216_v47 = vmul.f32 1.442695, %v1207_v25  ;;  %v9324_v25 = vld [vmem:[#allocation14_spill] sm:$0xff] }
 0x364   :  { %5911 = vpow2.f32 %v1216_v47 }
 0x36e   :  { %v5912_v38 = vpop.eup %5911 }
 0x36f   :  { %v1231_v22 = vsel %vm6924_vm14, %v5912_v38, 0.0 }
 0x370   :  { %v1241_v49 = vsel %vm1181_vm2, %v1231_v22, 0.0 }
 0x371   :  { %1242 = vadd.xlane.f32.xlu0 %v1241_v49 }
 0x38a   :  { %v1193_v51 = vpop.xlane.xlu0 %1192 }
 0x38b   :  { %v1209_v24 = vsub.f32 %v7011_v55, %v1193_v51 }
 0x38d   :  { %v1220_v6 = vmul.f32 1.442695, %v1209_v24 }
 0x38f   :  { %5913 = vpow2.f32 %v1220_v6 }
 0x399   :  { %v5914_v40 = vpop.eup %5913 }
 0x39a   :  { %v1233_v41 = vsel %vm6924_vm14, %v5914_v40, 0.0 }
 0x39b   :  { %v1247_v10 = vsel %vm1181_vm2, %v1233_v41, 0.0 }
 0x39c   :  { %1248 = vadd.xlane.f32.xlu0 %v1247_v10 }
 0x3a8   :  { %v1199_v57 = vpop.xlane.xlu0 %1198 }
 0x3a9   :  { %v1211_v1 = vsub.f32 %v1178_v12, %v1199_v57 }
 0x3ab   :  { %v1224_v55 = vmul.f32 1.442695, %v1211_v1 }
 0x3ac   :  { %v1205_v34 = vpop.xlane.xlu0 %1204 }
 0x3ad   :  { %5915 = vpow2.f32 %v1224_v55  ;;  %v1213_v61 = vsub.f32 %v1180_v9, %v1205_v34  ;;  %v1202_v15 = vpop.xlane.xlu1 %1201 }
 0x3ae   :  { %v1212_v2 = vsub.f32 %v1179_v36, %v1202_v15 }
 0x3af   :  { %v1228_v19 = vmul.f32 1.442695, %v1213_v61 }
 0x3b0   :  { %v1226_v62 = vmul.f32 1.442695, %v1212_v2  ;;  %v9325_v2 = vld [vmem:[#allocation17_spill] sm:$0xff] }
 0x3b1   :  { %5917 = vpow2.f32 %v1228_v19  ;;  %v1638_v19 = vld [vmem:[%s8992_s10 + $0x20] sm:$0xff] }
 0x3b2   :  { %5919 = vpow2.f32 %v1226_v62  ;;  %v1639_v62 = vld [vmem:[%s8992_s10 + $0x28] sm:$0xff] }
 0x3b7   :  { %v5916_v13 = vpop.eup %5915 }
 0x3b8   :  { %v1235_v17 = vsel %vm6924_vm14, %v5916_v13, 0.0  ;;  %v1634_v13 = vld [vmem:[%s8992_s10] sm:$0xff] }
 0x3b9   :  { %v1253_v26 = vsel %vm1181_vm2, %v1235_v17, 0.0 }
 0x3ba   :  { %1254 = vadd.xlane.f32.xlu0 %v1253_v26  ;;  %v1635_v26 = vld [vmem:[%s8992_s10 + $0x8] sm:$0xff] }
 0x3bb   :  { %v5918_v31 = vpop.eup %5917 }
 0x3bc   :  { %v5920_v21 = vpop.eup %5919  ;;  %v1237_v12 = vsel %vm6924_vm14, %v5918_v31, 0.0  ;;  %vm7131_vm14 = vmpackc.low %vm1181_vm2, %vm1181_vm2 }
 0x3bd   :  { %v1259_v9 = vsel %vm1181_vm2, %v1237_v12, 0.0  ;;  %v1236_v59 = vsel %vm6863_vm15, %v5920_v21, 0.0  ;;  %v9321_v7 = vsel %vm7131_vm14, 4294967295, %v9320_v7  ;;  %vm1682_vm15 = vcmask 261120  }
 0x3be   :  { %1260 = vadd.xlane.f32.xlu0 %v1259_v9  ;;  %v1256_v30 = vsel %vm1181_vm2, %v1236_v59, 0.0  ;;  %9322 = vst [vmem:[#allocation16_spill] sm:$0xff] %v9321_v7  ;;  %v1637_v9 = vld [vmem:[%s8992_s10 + $0x18] sm:$0xff] }
 0x3bf   :  { %1257 = vadd.xlane.f32.xlu1 %v1256_v30 }
 0x3d0   :  { %1664 = vperm.xlu1 %5773, %v1638_v19  }
 0x3d4   :  { %1669 = vperm.xlu0 %5774, %v1639_v62  }
 0x3d8   :  { %1644 = vperm.xlu0 %5774, %v1634_v13  }
 0x3e5   :  { %v1240_v36 = vpop.xlane.xlu1 %1239 }
 0x3e6   :  { %v1262_v14 = vmax.f32 %v1240_v36, 1e-30 }
 0x3e8   :  { %5921 = vrcp.f32 %v1262_v14 }
 0x3e9   :  { %v1246_v11 = vpop.xlane.xlu1 %1245 }
 0x3ea   :  { %v1264_v35 = vmax.f32 %v1246_v11, 1e-30 }
 0x3ed   :  { %v1252_v39 = vpop.xlane.xlu1 %1251 }
 0x3ee   :  { %v1266_v47 = vmax.f32 %v1252_v39, 1e-30 }
 0x3f2   :  { %v5922_v63 = vpop.eup %5921 }
 0x3f3   :  { %v1271_v29 = vmul.f32 %v5922_v63, %v7089_v53 }
 0x3fe   :  { %v1243_v48 = vpop.xlane.xlu0 %1242 }
 0x3ff   :  { %v1263_v32 = vmax.f32 %v1243_v48, 1e-30 }
 0x401   :  { %5923 = vrcp.f32 %v1263_v32 }
 0x402   :  { %5925 = vrcp.f32 %v1264_v35 }
 0x40b   :  { %v5924_v5 = vpop.eup %5923 }
 0x40c   :  { %v1273_v58 = vmul.f32 %v5924_v5, %v1231_v22  ;;  %v5926_v50 = vpop.eup %5925 }
 0x40d   :  { %v1275_v4 = vmul.f32 %v5926_v50, %v7095_v16 }
 0x40e   :  { %v5594_v3 = vpack.c.bf16 %v1273_v58, %v1271_v29 }
 0x410   :  { %5596 = vmatpush3.bf16.xpose.msk.msra.mxu1 %vm7131_vm14, %v5594_v3 }
 0x411   :  { %5597 = vmatprep.subr.bf16.mxu1 %v9104_v54 }
 0x417   :  { %5434 = vmatmul.mubr.msk.f32.vlgmr.msra.gmra.mrb[0].mxu1 %vm1181_vm2, %v9323_v45 }
 0x418   :  { %5440 = vmatprep.mubr.msk.f32.mxu1 %vm6101_vm3, %v9102_v18 }
 0x429   :  { %v1249_v37 = vpop.xlane.xlu0 %1248 }
 0x42a   :  { %v1265_v53 = vmax.f32 %v1249_v37, 1e-30 }
 0x42c   :  { %5927 = vrcp.f32 %v1265_v53 }
 0x42d   :  { %5929 = vrcp.f32 %v1266_v47 }
 0x436   :  { %v5928_v20 = vpop.eup %5927 }
 0x437   :  { %v1277_v52 = vmul.f32 %v5928_v20, %v1233_v41  ;;  %v5930_v6 = vpop.eup %5929 }
 0x438   :  { %v1279_v41 = vmul.f32 %v5930_v6, %v7101_v42  ;;  %v1626_v42 = vld [vmem:[%s8991_s9] sm:$0xff]  ;;  %v1629_v6 = vld [vmem:[%s8991_s9 + $0x18] sm:$0xff] }
 0x439   :  { %v5598_v23 = vpack.c.bf16 %v1277_v52, %v1275_v4 }
 0x43b   :  { %5600 = vmatpush3.bf16.xpose.msk.msra.mxu1 %vm7131_vm14, %v5598_v23 }
 0x43c   :  { %5605 = vmatprep.subr.bf16.mxu1 %v9104_v54 }
 0x442   :  { %5441 = vmatmul.mubr.msk.f32.vlgmr.msra.gmra.mrb[2].mxu1 %vm1181_vm2, %v9324_v25 }
 0x443   :  { %5454 = vmatprep.mubr.msk.f32.mxu1 %vm6101_vm3, %v9102_v18 }
 0x447   :  { %v1255_v38 = vpop.xlane.xlu0 %1254 }
 0x448   :  { %v1267_v22 = vmax.f32 %v1255_v38, 1e-30 }
 0x44a   :  { %5931 = vrcp.f32 %v1267_v22 }
 0x44b   :  { %v1261_v16 = vpop.xlane.xlu0 %1260 }
 0x44c   :  { %v1269_v49 = vmax.f32 %v1261_v16, 1e-30  ;;  %v1258_v51 = vpop.xlane.xlu1 %1257 }
 0x44d   :  { %v1268_v24 = vmax.f32 %v1258_v51, 1e-30  ;;  %v1627_v51 = vld [vmem:[%s8991_s9 + $0x8] sm:$0xff] }
 0x44e   :  { %5933 = vrcp.f32 %v1269_v49 }
 0x44f   :  { %5935 = vrcp.f32 %v1268_v24  ;;  %v1628_v24 = vld [vmem:[%s8991_s9 + $0x10] sm:$0xff] }
 0x454   :  { %v5932_v40 = vpop.eup %5931 }
 0x455   :  { %v1281_v10 = vmul.f32 %v5932_v40, %v1235_v17  ;;  %v1641_v17 = vld [vmem:[%s8992_s10 + $0x38] sm:$0xff]  ;;  %v1630_v40 = vld [vmem:[%s8991_s9 + $0x20] sm:$0xff] }
 0x457   :  { %v5602_v57 = vpack.c.bf16 %v1281_v10, %v1279_v41  ;;  %v1631_v41 = vld [vmem:[%s8991_s9 + $0x28] sm:$0xff]  ;;  %v1632_v10 = vld [vmem:[%s8991_s9 + $0x30] sm:$0xff] }
 0x458   :  { %v5934_v1 = vpop.eup %5933 }
 0x459   :  { %v5936_v55 = vpop.eup %5935  ;;  %v1285_v34 = vmul.f32 %v5934_v1, %v1237_v12  ;;  %5604 = vmatpush3.bf16.xpose.msk.msra.mxu0 %vm7131_vm14, %v5602_v57  ;;  %v1636_v12 = vld [vmem:[%s8992_s10 + $0x10] sm:$0xff]  ;;  %v1633_v57 = vld [vmem:[%s8991_s9 + $0x38] sm:$0xff]  ;;  %s7398_s9 = sld [smem:[#allocation5 + $0x1]] }
 0x45a   :  { %v1283_v61 = vmul.f32 %v5936_v55, %v1236_v59 }
 0x45c   :  { %v5606_v15 = vpack.c.bf16 %v1285_v34, %v1283_v61 }
 0x45e   :  { %5608 = vmatpush3.bf16.xpose.msk.msra.mxu1 %vm7131_vm14, %v5606_v15 }
 0x45f   :  { %5617 = vmatprep.subr.bf16.mxu1 %v9104_v54 }
 0x460   :  { %5448 = vmatmul.mubr.msk.f32.vlgmr.msra.gmra.mrb[8].mxu0 %vm1181_vm2, %v9325_v2  ;;  %v1665_v2 = vpop.permute.xlu1 %1664 }
 0x461   :  { %5465 = vmatprep.mubr.msk.f32.mxu0 %vm1682_vm15, %v1626_v42 }
 0x465   :  { %5455 = vmatmul.mubr.msk.f32.vlgmr.msra.gmra.mrb[4].mxu1 %vm1181_vm2, %v6962_v0  ;;  %v1640_v0 = vld [vmem:[%s8992_s10 + $0x30] sm:$0xff]  ;;  %s7507_s10 = sld [smem:[#allocation5 + $0x82]] }
 0x466   :  { %5481 = vmatprep.mubr.msk.f32.mxu1 %vm6101_vm3, %v9102_v18  ;;  %1674 = vperm.xlu1 %5773, %v1640_v0   ;;  %v1670_v0 = vpop.permute.xlu0 %1669 }
 0x46a   :  { %1679 = vperm.xlu1 %5773, %v1641_v17  }
 0x46e   :  { %1649 = vperm.xlu1 %5773, %v1635_v26  }
 0x472   :  { %1654 = vperm.xlu1 %5773, %v1636_v12  }
 0x476   :  { %1659 = vperm.xlu1 %5773, %v1637_v9   ;;  %v9326_v9 = vmov 8  }
 0x4e5   :  { %v1675_v26 = vpop.permute.xlu1 %1674 }
 0x4ea   :  { %v1361_v31 = vpop.f32.mrb[0].mxu1 }
 0x4eb   :  { %v5435_v21 = vpop.f32.mrb[1].mxu1  ;;  %v1606_v59 = vmin.f32 %v1361_v31, 0.0  ;;  %vm1602_vm4 = vcmp.gt.f32.partialorder %v1361_v31, 0.0 }
 0x4ec   :  { %v1680_v21 = vpop.permute.xlu1 %1679 }
 0x4ed   :  { %v1610_v30 = vmul.f32 1.442695, %v1606_v59 }
 0x4ef   :  { %5937 = vpow2.f32 %v1610_v30 }
 0x4f0   :  { %v7230_v59 = vpop.permute.xlu1 %1649 }
 0x4f4   :  { %v7232_v30 = vpop.permute.xlu1 %1654 }
 0x4f9   :  { %v5938_v63 = vpop.eup %5937 }
 0x4fa   :  { %v5199_v5 = vadd.f32 -1.0, %v5938_v63  ;;  %v9329_v63 = vmov 10  }
 0x4fc   :  { %v1622_v3 = vsel %vm1602_vm4, %v1361_v31, %v5199_v5  ;;  %v9330_v5 = vmov 2  }
 0x515   :  { %v1440_v36 = vpop.f32.mrb[2].mxu1 }
 0x516   :  { %v1607_v14 = vmin.f32 %v1440_v36, 0.0  ;;  %v5442_v48 = vpop.f32.mrb[3].mxu1  ;;  %vm1603_vm5 = vcmp.gt.f32.partialorder %v1440_v36, 0.0 }
 0x517   :  { %v9327_v48 = vmov 9  }
 0x518   :  { %v1612_v32 = vmul.f32 1.442695, %v1607_v14 }
 0x51a   :  { %5939 = vpow2.f32 %v1612_v32  ;;  %v9328_v32 = vmov 1  }
 0x524   :  { %v5940_v29 = vpop.eup %5939 }
 0x525   :  { %v5200_v58 = vadd.f32 -1.0, %v5940_v29  ;;  %v9331_v29 = vmov 11  }
 0x527   :  { %v1623_v45 = vsel %vm1603_vm5, %v1440_v36, %v5200_v58  ;;  %v7234_v36 = vpop.permute.xlu1 %1659  ;;  %v9332_v58 = vmov 3  }
 0x528   :  { %v5609_v11 = vpack.c.bf16 %v1623_v45, %v1622_v3  ;;  %v9333_v3 = vmov 12   ;;  %v9334_v45 = vmov 4  }
 0x52a   :  { %5610 = vmatprep.subr.bf16.mxu0 %v5609_v11 }
 0x52b   :  { %5612 = vmatpush3.bf16.msra.mxu0 %v5609_v11  ;;  %v9335_v11 = vmov 16  }
 0x533   :  { %v1519_v35 = vpop.f32.mrb[8].mxu0 }
 0x534   :  { %v1608_v37 = vmin.f32 %v1519_v35, 0.0  ;;  %v5449_v53 = vpop.f32.mrb[9].mxu0  ;;  %vm1604_vm6 = vcmp.gt.f32.partialorder %v1519_v35, 0.0 }
 0x535   :  { %v9338_v53 = vmov 6  }
 0x536   :  { %v1614_v50 = vmul.f32 1.442695, %v1608_v37  ;;  %v9337_v37 = vmov 17  }
 0x538   :  { %v1598_v20 = vpop.f32.mrb[4].mxu1  ;;  %5941 = vpow2.f32 %v1614_v50  ;;  %v9339_v50 = vmov 25  }
 0x539   :  { %v1609_v4 = vmin.f32 %v1598_v20, 0.0  ;;  %v5456_v52 = vpop.f32.mrb[5].mxu1  ;;  %vm1605_vm7 = vcmp.gt.f32.partialorder %v1598_v20, 0.0 }
 0x53a   :  { %v9342_v52 = vmov 13  }
 0x53b   :  { %v1616_v23 = vmul.f32 1.442695, %v1609_v4  ;;  %v9341_v4 = vmov 14  }
 0x53d   :  { %5943 = vpow2.f32 %v1616_v23  ;;  %v9343_v23 = vmov 26  }
 0x542   :  { %v5942_v39 = vpop.eup %5941 }
 0x543   :  { %v5201_v25 = vadd.f32 -1.0, %v5942_v39  ;;  %v9344_v39 = vmov 24  }
 0x545   :  { %v1624_v22 = vsel %vm1604_vm6, %v1519_v35, %v5201_v25  ;;  %v9336_v35 = vmov 5   ;;  %v9345_v25 = vmov 15  }
 0x547   :  { %v5944_v47 = vpop.eup %5943 }
 0x548   :  { %v5202_v38 = vadd.f32 -1.0, %v5944_v47  ;;  %v9346_v47 = vmov 18  }
 0x54a   :  { %v1625_v16 = vsel %vm1605_vm7, %v1598_v20, %v5202_v38  ;;  %v9340_v20 = vmov 7   ;;  %v9347_v38 = vmov 27  }
 0x54b   :  { %v5613_v49 = vpack.c.bf16 %v1625_v16, %v1624_v22  ;;  %v9348_v22 = vmov 19   ;;  %v9349_v16 = vmov 20  }
 0x54d   :  { %5614 = vmatprep.subr.bf16.mxu0 %v5613_v49 }
 0x54e   :  { %5616 = vmatpush3.bf16.msra.mxu0 %v5613_v49  ;;  %v9350_v49 = vmov 28  }
 0x54f   :  { %5625 = vmatprep.subr.bf16.mxu0 %v9104_v54 }
 0x551   :  { %5466 = vmatmul.mubr.msk.f32.vlgmr.msra.gmra.mrb[10].mxu0 %vm1682_vm15, %v1627_v51  ;;  %v9351_v51 = vmov 21  }
 0x552   :  { %5468 = vmatprep.mubr.msk.f32.mxu0 %vm1682_vm15, %v1628_v24  ;;  %v9352_v24 = vmov 22  }
 0x555   :  { %5469 = vmatmul.mubr.msk.f32.gmra.mrb[12].mxu0 %vm1682_vm15, %v1629_v6 }
 0x556   :  { %5471 = vmatprep.mubr.msk.f32.mxu0 %vm1682_vm15, %v1630_v40  ;;  %v9353_v40 = vmov 29  }
 0x559   :  { %5472 = vmatmul.mubr.msk.f32.gmra.mrb[14].mxu0 %vm1682_vm15, %v1631_v41  ;;  %v9354_v41 = vmov 30  }
 0x55a   :  { %5474 = vmatprep.mubr.msk.f32.mxu0 %vm1682_vm15, %v1632_v10  ;;  %v9355_v10 = vmov 23  }
 0x55d   :  { %5475 = vmatmul.mubr.msk.f32.gmra.mrb[16].mxu0 %vm1682_vm15, %v1633_v57  ;;  %v1645_v57 = vpop.permute.xlu0 %1644 }
 0x55e   :  { %5495 = vmatprep.mubr.msk.f32.mxu0 %vm6101_vm3, %v9102_v18 }
 0x624   :  { %v7221_v1 = vpop.f32.mrb[10].mxu0 }
 0x625   :  { %v7223_v55 = vpop.f32.mrb[11].mxu0 }
 0x628   :  { %v7225_v34 = vpop.f32.mrb[12].mxu0 }
 0x629   :  { %v7227_v61 = vpop.f32.mrb[13].mxu0 }
 0x62c   :  { %v5473_v15 = vpop.f32.mrb[14].mxu0 }
 0x62d   :  { %v1793_v42 = vpop.f32.mrb[15].mxu0  ;;  %v1799_v17 = vadd.f32 %v5473_v15, %v1670_v0 }
 0x62e   :  { %v1794_v19 = vadd.f32 %v1793_v42, %v1665_v2 }
 0x630   :  { %v5476_v62 = vpop.f32.mrb[16].mxu0  ;;  %1812 = vxpose.xlu1.b32.start [1/4] (short) (narrow) %v1794_v19, 16 }
 0x631   :  { %v1803_v13 = vpop.f32.mrb[17].mxu0  ;;  %v1809_v12 = vadd.f32 %v5476_v62, %v1680_v21 }
 0x632   :  { %v1804_v31 = vadd.f32 %v1803_v13, %v1675_v26  ;;  %v9356_v13 = vmov 31  }
 0x634   :  { %1813 = vxpose.xlu1.b32.cont [2/4] (short) (narrow) %v1799_v17, 16 }
 0x638   :  { %1814 = vxpose.xlu1.b32.cont [3/4] (short) (narrow) %v1804_v31, 16 }
 0x63c   :  { %1815 = vxpose.xlu1.b32.end [4/4] (short) (narrow) %v1809_v12, 16 }
 0x65a   :  { %5780 = vset.pattern.permute.xlu1 %v9326_v9 }
 0x6b0   :  { %v7236_v14 = vpop.trf.xlu1 }
 0x6b1   :  { %2007 = vperm.xlu1 %5780, %v7236_v14   ;;  %1846 = vperm.xlu0 %5774, %v7236_v14  }
 0x6b4   :  { %v7292_v6 = vpop.trf.xlu1 }
 0x6b5   :  { %5781 = vset.pattern.permute.xlu1 %v9327_v48  ;;  %5775 = vset.pattern.permute.xlu0 %v9328_v32 }
 0x6b6   :  { %2027 = vperm.xlu1 %5781, %v7236_v14   ;;  %1867 = vperm.xlu0 %5775, %v7236_v14  }
 0x6ba   :  { %5783 = vset.pattern.permute.xlu1 %v9329_v63  ;;  %5776 = vset.pattern.permute.xlu0 %v9330_v5 }
 0x6bb   :  { %2047 = vperm.xlu1 %5783, %v7236_v14   ;;  %1887 = vperm.xlu0 %5776, %v7236_v14  }
 0x6bf   :  { %5785 = vset.pattern.permute.xlu1 %v9331_v29  ;;  %5777 = vset.pattern.permute.xlu0 %v9332_v58 }
 0x6c0   :  { %2067 = vperm.xlu1 %5785, %v7236_v14   ;;  %1907 = vperm.xlu0 %5777, %v7236_v14  }
 0x6c4   :  { %5786 = vset.pattern.permute.xlu1 %v9333_v3  ;;  %5778 = vset.pattern.permute.xlu0 %v9334_v45 }
 0x6c5   :  { %2087 = vperm.xlu1 %5786, %v7236_v14   ;;  %1927 = vperm.xlu0 %5778, %v7236_v14  }
 0x6c9   :  { %5788 = vset.pattern.permute.xlu1 %v9335_v11  ;;  %5779 = vset.pattern.permute.xlu0 %v9336_v35 }
 0x6ca   :  { %2167 = vperm.xlu1 %5788, %v7236_v14   ;;  %1947 = vperm.xlu0 %5779, %v7236_v14  }
 0x6ce   :  { %5789 = vset.pattern.permute.xlu1 %v9337_v37  ;;  %5782 = vset.pattern.permute.xlu0 %v9338_v53 }
 0x6cf   :  { %2187 = vperm.xlu1 %5789, %v7236_v14   ;;  %1967 = vperm.xlu0 %5782, %v7236_v14  }
 0x6d3   :  { %5791 = vset.pattern.permute.xlu1 %v9339_v50  ;;  %5784 = vset.pattern.permute.xlu0 %v9340_v20 }
 0x6d4   :  { %2347 = vperm.xlu1 %5791, %v7236_v14   ;;  %1987 = vperm.xlu0 %5784, %v7236_v14  }
 0x6d8   :  { %5792 = vset.pattern.permute.xlu1 %v9341_v4  ;;  %5787 = vset.pattern.permute.xlu0 %v9342_v52 }
 0x6d9   :  { %2127 = vperm.xlu1 %5792, %v7236_v14   ;;  %2107 = vperm.xlu0 %5787, %v7236_v14  }
 0x6dd   :  { %5794 = vset.pattern.permute.xlu1 %v9343_v23  ;;  %5790 = vset.pattern.permute.xlu0 %v9344_v39 }
 0x6de   :  { %2367 = vperm.xlu1 %5794, %v7236_v14   ;;  %2327 = vperm.xlu0 %5790, %v7236_v14  }
 0x6e2   :  { %5795 = vset.pattern.permute.xlu1 %v9345_v25  ;;  %5793 = vset.pattern.permute.xlu0 %v9346_v47 }
 0x6e3   :  { %2147 = vperm.xlu1 %5795, %v7236_v14   ;;  %2207 = vperm.xlu0 %5793, %v7236_v14  }
 0x6e7   :  { %5797 = vset.pattern.permute.xlu1 %v9347_v38  ;;  %5796 = vset.pattern.permute.xlu0 %v9348_v22 }
 0x6e8   :  { %2387 = vperm.xlu1 %5797, %v7236_v14   ;;  %2227 = vperm.xlu0 %5796, %v7236_v14  }
 0x6ec   :  { %5798 = vset.pattern.permute.xlu1 %v9349_v16  ;;  %5799 = vset.pattern.permute.xlu0 %v9350_v49 }
 0x6ed   :  { %2247 = vperm.xlu1 %5798, %v7236_v14   ;;  %2407 = vperm.xlu0 %5799, %v7236_v14  }
 0x6f1   :  { %5800 = vset.pattern.permute.xlu1 %v9351_v51  ;;  %5802 = vset.pattern.permute.xlu0 %v9352_v24 }
 0x6f2   :  { %2267 = vperm.xlu1 %5800, %v7236_v14   ;;  %2287 = vperm.xlu0 %5802, %v7236_v14  }
 0x6f6   :  { %5801 = vset.pattern.permute.xlu1 %v9353_v40  ;;  %5805 = vset.pattern.permute.xlu0 %v9250_v8 }
 0x6f7   :  { %2427 = vperm.xlu1 %5801, %v7236_v14   ;;  %1851 = vperm.xlu0 %5805, %v7292_v6  }
 0x6fb   :  { %5803 = vset.pattern.permute.xlu1 %v9354_v41  ;;  %5806 = vset.pattern.permute.xlu0 %v9328_v32 }
 0x6fc   :  { %2447 = vperm.xlu1 %5803, %v7236_v14   ;;  %1871 = vperm.xlu0 %5806, %v7292_v6  }
 0x700   :  { %5804 = vset.pattern.permute.xlu1 %v9355_v10  ;;  %5807 = vset.pattern.permute.xlu0 %v9330_v5 }
 0x701   :  { %2307 = vperm.xlu1 %5804, %v7236_v14   ;;  %1891 = vperm.xlu0 %5807, %v7292_v6  }
 0x705   :  { %5810 = vset.pattern.permute.xlu1 %v9336_v35  ;;  %5808 = vset.pattern.permute.xlu0 %v9332_v58 }
 0x706   :  { %1951 = vperm.xlu1 %5810, %v7292_v6   ;;  %1911 = vperm.xlu0 %5808, %v7292_v6  }
 0x70a   :  { %5812 = vset.pattern.permute.xlu1 %v9327_v48  ;;  %5809 = vset.pattern.permute.xlu0 %v9334_v45  ;;  %v9140_v48 = vstv %s7427_s1 }
 0x70b   :  { %2031 = vperm.xlu1 %5812, %v7292_v6   ;;  %1931 = vperm.xlu0 %5809, %v7292_v6  }
 0x70f   :  { %5813 = vset.pattern.permute.xlu1 %v9338_v53  ;;  %5811 = vset.pattern.permute.xlu0 %v9326_v9 }
 0x710   :  { %1971 = vperm.xlu1 %5813, %v7292_v6   ;;  %2011 = vperm.xlu0 %5811, %v7292_v6  }
 0x714   :  { %5815 = vset.pattern.permute.xlu1 %v9340_v20  ;;  %5814 = vset.pattern.permute.xlu0 %v9329_v63 }
 0x715   :  { %1991 = vperm.xlu1 %5815, %v7292_v6   ;;  %2051 = vperm.xlu0 %5814, %v7292_v6  }
 0x719   :  { %5817 = vset.pattern.permute.xlu1 %v9333_v3  ;;  %5816 = vset.pattern.permute.xlu0 %v9331_v29 }
 0x71a   :  { %2091 = vperm.xlu1 %5817, %v7292_v6   ;;  %2071 = vperm.xlu0 %5816, %v7292_v6  }
 0x71e   :  { %5818 = vset.pattern.permute.xlu1 %v9342_v52  ;;  %5819 = vset.pattern.permute.xlu0 %v9335_v11 }
 0x71f   :  { %2111 = vperm.xlu1 %5818, %v7292_v6   ;;  %2171 = vperm.xlu0 %5819, %v7292_v6  }
 0x723   :  { %5820 = vset.pattern.permute.xlu1 %v9337_v37  ;;  %5822 = vset.pattern.permute.xlu0 %v9339_v50  ;;  %v9133_v37 = vstv %s7398_s9 }
 0x724   :  { %2191 = vperm.xlu1 %5820, %v7292_v6   ;;  %2351 = vperm.xlu0 %5822, %v7292_v6  }
 0x728   :  { %5821 = vset.pattern.permute.xlu1 %v9344_v39  ;;  %5825 = vset.pattern.permute.xlu0 %v9343_v23 }
 0x729   :  { %2331 = vperm.xlu1 %5821, %v7292_v6   ;;  %2371 = vperm.xlu0 %5825, %v7292_v6  }
 0x72d   :  { %5823 = vset.pattern.permute.xlu1 %v9341_v4  ;;  %5828 = vset.pattern.permute.xlu0 %v9347_v38 }
 0x72e   :  { %2131 = vperm.xlu1 %5823, %v7292_v6   ;;  %2391 = vperm.xlu0 %5828, %v7292_v6  }
 0x730   :  { %v1847_v15 = vpop.permute.xlu0 %1846  ;;  %v7342_v2 = vpop.permute.xlu1 %2007 }
 0x732   :  { %5824 = vset.pattern.permute.xlu1 %v9346_v47  ;;  %5831 = vset.pattern.permute.xlu0 %v9351_v51 }
 0x733   :  { %2211 = vperm.xlu1 %5824, %v7292_v6   ;;  %2271 = vperm.xlu0 %5831, %v7292_v6  }
 0x735   :  { %v1868_v42 = vpop.permute.xlu0 %1867  ;;  %v7348_v19 = vpop.permute.xlu1 %2027 }
 0x737   :  { %5826 = vset.pattern.permute.xlu1 %v9345_v25  ;;  %5834 = vset.pattern.permute.xlu0 %v9354_v41 }
 0x738   :  { %2151 = vperm.xlu1 %5826, %v7292_v6   ;;  %2451 = vperm.xlu0 %5834, %v7292_v6  }
 0x73a   :  { %v1888_v62 = vpop.permute.xlu0 %1887  ;;  %v7354_v0 = vpop.permute.xlu1 %2047 }
 0x73c   :  { %5827 = vset.pattern.permute.xlu1 %v9348_v22  ;;  %5835 = vset.pattern.permute.xlu0 %v9356_v13 }
 0x73d   :  { %2231 = vperm.xlu1 %5827, %v7292_v6   ;;  %2467 = vperm.xlu0 %5835, %v7236_v14  }
 0x73f   :  { %v1908_v17 = vpop.permute.xlu0 %1907  ;;  %v7360_v26 = vpop.permute.xlu1 %2067 }
 0x741   :  { %5829 = vset.pattern.permute.xlu1 %v9349_v16  ;;  %5838 = vset.pattern.permute.xlu0 %v9250_v8  ;;  %v7381_v16 = vadd.f32 %v7223_v55, %v1645_v57 }
 0x742   :  { %2251 = vperm.xlu1 %5829, %v7292_v6  }
 0x743   :  { %9357 = vst [vmem:[#allocation36_spill] sm:$0xff] %v7381_v16  ;;  %v7403_v57 = vrot.slane %v7381_v16, %v9308_v43  ;;  %v7417_v22 = vrot.slane %v7381_v16, %v9309_v46  ;;  %v7425_v47 = vrot.slane %v7381_v16, %v9304_v56  ;;  %v7432_v39 = vrot.slane %v7381_v16, %v9303_v60 }
 0x744   :  { %v1928_v31 = vpop.permute.xlu0 %1927  ;;  %v7365_v21 = vpop.permute.xlu1 %2087  ;;  %v7440_v52 = vrot.slane %v7381_v16, %v9310_v33  ;;  %v7450_v35 = vrot.slane %v7381_v16, %v9307_v27 }
 0x745   :  { %v1898_v25 = vadd.f32 %v7403_v57, %v1888_v62  ;;  %v1918_v23 = vadd.f32 %v7417_v22, %v1908_v17  ;;  %v1938_v4 = vadd.f32 %v7425_v47, %v1928_v31 }
 0x746   :  { %5830 = vset.pattern.permute.xlu1 %v9350_v49  ;;  %v7390_v49 = vrot.slane %v7381_v16, %v9305_v28 }
 0x747   :  { %2411 = vperm.xlu1 %5830, %v7292_v6   ;;  %v1902_v62 = vmul.f32 0.2, %v1898_v25  ;;  %vm1900_vm10 = vcmp.ge.f32.partialorder %v1898_v25, 0.0  ;;  %v1922_v11 = vmul.f32 0.2, %v1918_v23  ;;  %vm1920_vm11 = vcmp.ge.f32.partialorder %v1918_v23, 0.0 }
 0x748   :  { %v1878_v55 = vadd.f32 %v7390_v49, %v1868_v42  ;;  %v1942_v63 = vmul.f32 0.2, %v1938_v4  ;;  %vm1940_vm12 = vcmp.ge.f32.partialorder %v1938_v4, 0.0 }
 0x749   :  { %v1948_v12 = vpop.permute.xlu0 %1947  ;;  %v7369_v18 = vpop.permute.xlu1 %2167  ;;  %v1904_v45 = vsel %vm1900_vm10, %v1898_v25, %v1902_v62  ;;  %v1924_v5 = vsel %vm1920_vm11, %v1918_v23, %v1922_v11  ;;  %v9363_v62 = vstv %s7407_s25  ;;  %v9364_v11 = vstv %s7420_s5 }
 0x74a   :  { %v1882_v42 = vmul.f32 0.2, %v1878_v55  ;;  %vm1880_vm8 = vcmp.ge.f32.partialorder %v1878_v55, 0.0  ;;  %v1958_v31 = vadd.f32 %v7432_v39, %v1948_v12  ;;  %v1944_v32 = vsel %vm1940_vm12, %v1938_v4, %v1942_v63 }
 0x74b   :  { %5832 = vset.pattern.permute.xlu1 %v9353_v40  ;;  %v2504_v23 = vmul.f32 %v9364_v11, %v1924_v5  ;;  %v2510_v5 = vmul.f32 %v9140_v48, %v1944_v32 }
 0x74c   :  { %2431 = vperm.xlu1 %5832, %v7292_v6   ;;  %v1884_v20 = vsel %vm1880_vm8, %v1878_v55, %v1882_v42  ;;  %vm1960_vm13 = vcmp.ge.f32.partialorder %v1958_v31, 0.0 }
 0x74d   :  { %v2492_v42 = vmul.f32 %v9133_v37, %v1884_v20  ;;  %v2498_v37 = vmul.f32 %v9363_v62, %v1904_v45 }
 0x74e   :  { %v1968_v14 = vpop.permute.xlu0 %1967  ;;  %v7373_v54 = vpop.permute.xlu1 %2187 }
 0x74f   :  { %v1978_v55 = vadd.f32 %v7440_v52, %v1968_v14  ;;  %v9362_v14 = vstv %s7405_s24 }
 0x750   :  { %5833 = vset.pattern.permute.xlu1 %v9352_v24 }
 0x751   :  { %2291 = vperm.xlu1 %5833, %v7292_v6   ;;  %v1982_v53 = vmul.f32 0.2, %v1978_v55  ;;  %vm1980_vm1 = vcmp.ge.f32.partialorder %v1978_v55, 0.0 }
 0x753   :  { %v1988_v41 = vpop.permute.xlu0 %1987  ;;  %v7377_v51 = vpop.permute.xlu1 %2347 }
 0x754   :  { %v1998_v25 = vadd.f32 %v7450_v35, %v1988_v41  ;;  %v2670_v41 = vld [vmem:[%s9365_s8] sm:$0x3] }
 0x755   :  { %5836 = vset.pattern.permute.xlu1 %v9355_v10  ;;  %v7396_v10 = vrot.slane %v7381_v16, %v9302_v44  ;;  %vm2672_vm5 = vnez %v2670_v41 }
 0x756   :  { %2311 = vperm.xlu1 %5836, %v7292_v6   ;;  %v2002_v58 = vmul.f32 0.2, %v1998_v25  ;;  %vm2000_vm4 = vcmp.ge.f32.partialorder %v1998_v25, 0.0 }
 0x758   :  { %v7384_v40 = vpop.permute.xlu0 %2107  ;;  %v7386_v38 = vpop.permute.xlu1 %2127 }
 0x75a   :  { %5837 = vset.pattern.permute.xlu1 %v9356_v13 }
 0x75b   :  { %2471 = vperm.xlu1 %5837, %v7292_v6   ;;  %v1858_v6 = vadd.f32 %v7396_v10, %v1847_v15 }
 0x75d   :  { %v7409_v24 = vpop.permute.xlu0 %2327  ;;  %v7411_v13 = vpop.permute.xlu1 %2367  ;;  %v1862_v15 = vmul.f32 0.2, %v1858_v6  ;;  %vm1860_vm9 = vcmp.ge.f32.partialorder %v1858_v6, 0.0 }
 0x75e   :  { %9358 = vst [vmem:[#allocation35_spill] sm:$0xff] %v7409_v24  ;;  %9359 = vst [vmem:[#allocation19_spill] sm:$0xff] %v7411_v13 }
 0x75f   :  { %5839 = vset.pattern.permute.xlu1 %v9250_v8  ;;  %v1864_v29 = vsel %vm1860_vm9, %v1858_v6, %v1862_v15  ;;  %v1962_v6 = vmul.f32 0.2, %v1958_v31  ;;  %v7467_v15 = vadd.f32 %v7221_v1, %v7230_v59  ;;  %v9139_v1 = vstv %s7443_s26 }
 0x760   :  { %v2488_v20 = vmul.f32 %v9362_v14, %v1864_v29 }
 0x761   :  { %9361 = vst [vmem:[#allocation22_spill] sm:$0xff] %v7467_v15  ;;  %v1964_v59 = vsel %vm1960_vm13, %v1958_v31, %v1962_v6  ;;  %v7486_v63 = vrot.slane %v7467_v15, %v9302_v44  ;;  %v9138_v31 = vstv %s7452_s2  ;;  %v1984_v6 = vsel %vm1980_vm1, %v1978_v55, %v1982_v53 }
 0x762   :  { %v7434_v50 = vpop.permute.xlu0 %2207  ;;  %v7436_v17 = vpop.permute.xlu1 %2147  ;;  %v2494_v9 = vadd.f32 %v2492_v42, %v2488_v20  ;;  %v7492_v42 = vadd.f32 %v7227_v61, %v7232_v30  ;;  %v7501_v14 = vrot.slane %v7467_v15, %v9305_v28  ;;  %v2516_v30 = vmul.f32 %v9139_v1, %v1964_v59 }
 0x763   :  { %v7515_v32 = vrot.slane %v7467_v15, %v9309_v46  ;;  %v2004_v53 = vsel %vm2000_vm4, %v1998_v25, %v2002_v58  ;;  %v9144_v55 = vstv %s7463_s6  ;;  %v2522_v62 = vmul.f32 %v9138_v31, %v1984_v6 }
 0x764   :  { %v2500_v4 = vadd.f32 %v2498_v37, %v2494_v9  ;;  %9367 = vst [vmem:[#allocation11_spill] sm:$0xff] %v7492_v42  ;;  %v7505_v9 = vrot.slane %v7467_v15, %v9308_v43  ;;  %v7519_v37 = vrot.slane %v7467_v15, %v9304_v56  ;;  %v7533_v11 = vrot.slane %v7467_v15, %v9303_v60 }
 0x765   :  { %9368 = vst [vmem:[#allocation10_spill] sm:$0xff] %v7515_v32  ;;  %v2674_v58 = vsel %vm2672_vm5, 16843009, %v9250_v8  ;;  %v2038_v25 = vadd.f32 %v7501_v14, %v7348_v19  ;;  %v7555_v6 = vrot.slane %v7467_v15, %v9310_v33  ;;  %v7561_v19 = vrot.slane %v7492_v42, %v9308_v43 }
 0x766   :  { %v2506_v61 = vadd.f32 %v2504_v23, %v2500_v4  ;;  %9369 = vst [vmem:[#allocation33_spill] sm:$0xff] %v7519_v37  ;;  %v7545_v4 = vrot.slane %v7492_v42, %v9302_v44  ;;  %v7567_v41 = vrot.slane %v7467_v15, %v9307_v27  ;;  %v2528_v31 = vmul.f32 %v9144_v55, %v2004_v53 }
 0x767   :  { %v7457_v12 = vpop.permute.xlu0 %2227  ;;  %v7459_v3 = vpop.permute.xlu1 %2387  ;;  %v2018_v1 = vadd.f32 %v7486_v63, %v7342_v2  ;;  %v7575_v48 = vrot.slane %v7492_v42, %v9309_v46  ;;  %v7579_v16 = vrot.slane %v7492_v42, %v9304_v56  ;;  %v2676_v7 = vunpack.c.0.s8 %v2674_v58 }
 0x768   :  { %9360 = vst [vmem:[#allocation38_spill] sm:$0xff] %v7459_v3  ;;  %v2512_v20 = vadd.f32 %v2510_v5, %v2506_v61  ;;  %9370 = vst [vmem:[#allocation18_spill] sm:$0xff] %v7545_v4  ;;  %v7549_v5 = vrot.slane %v7492_v42, %v9305_v28  ;;  %v7589_v2 = vrot.slane %v7492_v42, %v9310_v33  ;;  %v2042_v58 = vmul.f32 0.2, %v2038_v25 }
 0x769   :  { %v7593_v53 = vrot.slane %v7492_v42, %v9303_v60  ;;  %vm2040_vm6 = vcmp.ge.f32.partialorder %v2038_v25, 0.0  ;;  %v2022_v60 = vmul.f32 0.2, %v2018_v1  ;;  %vm7610_vm7 = vcmp.ne.s32.totalorder %v2676_v7, 0 }
 0x76a   :  { %9371 = vst [vmem:[#allocation20_spill] sm:$0xff] %v7549_v5  ;;  %v2518_v61 = vadd.f32 %v2516_v30, %v2512_v20  ;;  %v2058_v30 = vadd.f32 %v7505_v9, %v7354_v0  ;;  %v7601_v0 = vrot.slane %v7492_v42, %v9307_v27  ;;  %vm2020_vm8 = vcmp.ge.f32.partialorder %v2018_v1, 0.0 }
 0x76b   :  { %v2198_v7 = vadd.f32 %v7549_v5, %v7373_v54  ;;  %v2671_v54 = vld [vmem:[%s9365_s8 + $0x2] sm:$0x3]  ;;  %v9377_v33 = vstv %s7496_s15  ;;  %s8552_s8 = sld [smem:[#allocation7 + $0x106]] }
 0x76c   :  { %v7480_v29 = vpop.permute.xlu0 %2407  ;;  %v7482_v45 = vpop.permute.xlu1 %2247  ;;  %v2524_v20 = vadd.f32 %v2522_v62, %v2518_v61  ;;  %v2078_v62 = vadd.f32 %v7515_v32, %v7360_v26  ;;  %v2062_v15 = vmul.f32 0.2, %v2058_v30  ;;  %vm2060_vm9 = vcmp.ge.f32.partialorder %v2058_v30, 0.0 }
 0x76d   :  { %9366 = vst [vmem:[#allocation25_spill] sm:$0xff] %v7480_v29  ;;  %v2098_v26 = vadd.f32 %v7519_v37, %v7365_v21  ;;  %v2178_v21 = vadd.f32 %v7545_v4, %v7369_v18  ;;  %vm2200_vm12 = vcmp.ge.f32.partialorder %v2198_v7, 0.0  ;;  %vm2673_vm13 = vnez %v2671_v54 }
 0x76e   :  { %v2530_v56 = vadd.f32 %v2528_v31, %v2524_v20  ;;  %v2044_v31 = vsel %vm2040_vm6, %v2038_v25, %v2042_v58  ;;  %v2024_v25 = vsel %vm2020_vm8, %v2018_v1, %v2022_v60  ;;  %v2082_v58 = vmul.f32 0.2, %v2078_v62 }
 0x76f   :  { %v2538_v20 = vmul.f32 %v9377_v33, %v2044_v31  ;;  %v2064_v5 = vsel %vm2060_vm9, %v2058_v30, %v2062_v15  ;;  %vm2080_vm10 = vcmp.ge.f32.partialorder %v2078_v62, 0.0  ;;  %v9378_v1 = vstv %s7494_s27 }
 0x770   :  { %v7629_v13 = vsel %vm7610_vm7, %v2530_v56, -1e+30  ;;  %v2202_v56 = vmul.f32 0.2, %v2198_v7  ;;  %v2534_v4 = vmul.f32 %v9378_v1, %v2024_v25  ;;  %vm2100_vm11 = vcmp.ge.f32.partialorder %v2098_v26, 0.0 }
 0x771   :  { %v7535_v23 = vpop.permute.xlu0 %2287  ;;  %v7537_v59 = vpop.permute.xlu1 %2267  ;;  %9376 = vst [vmem:[#allocation23_spill] sm:$0xff] %v7629_v13  ;;  %v2692_v18 = vsel %vm1181_vm2, %v7629_v13, -inf  ;;  %v9379_v33 = vstv %s7507_s10  ;;  %v2084_v30 = vsel %vm2080_vm10, %v2078_v62, %v2082_v58  ;;  %v2182_v31 = vmul.f32 0.2, %v2178_v21 }
 0x772   :  { %v2544_v15 = vmul.f32 %v9379_v33, %v2064_v5  ;;  %vm2180_vm1 = vcmp.ge.f32.partialorder %v2178_v21, 0.0  ;;  %v2540_v1 = vadd.f32 %v2538_v20, %v2534_v4  ;;  %v2204_v13 = vsel %vm2200_vm12, %v2198_v7, %v2202_v56 }
 0x773   :  { %v9380_v32 = vstv %s7509_s17  ;;  %v2118_v62 = vadd.f32 %v7533_v11, %v7384_v40  ;;  %v2184_v58 = vsel %vm2180_vm1, %v2178_v21, %v2182_v31  ;;  %v2218_v40 = vadd.f32 %v7561_v19, %v7434_v50 }
 0x774   :  { %v2550_v5 = vmul.f32 %v9380_v32, %v2084_v30  ;;  %v9383_v56 = vstv %s7525_s21 }
 0x775   :  { %v2122_v30 = vmul.f32 0.2, %v2118_v62  ;;  %vm2120_vm9 = vcmp.ge.f32.partialorder %v2118_v62, 0.0  ;;  %vm2220_vm10 = vcmp.ge.f32.partialorder %v2218_v40, 0.0 }
 0x776   :  { %v1852_v29 = vpop.permute.xlu0 %1851  ;;  %v7597_v3 = vpop.permute.xlu1 %2427 }
 0x777   :  { %9372 = vst [vmem:[#allocation21_spill] sm:$0xff] %v7597_v3  ;;  %v2102_v3 = vmul.f32 0.2, %v2098_v26  ;;  %v1859_v61 = vadd.f32 %v7396_v10, %v1852_v29  ;;  %v7659_v10 = vsel %vm2673_vm13, 16843009, %v9250_v8  ;;  %v2546_v29 = vadd.f32 %v2544_v15, %v2540_v1 }
 0x778   :  { %v2677_v54 = vunpack.c.0.s8 %v7659_v10  ;;  %v2580_v15 = vmul.f32 %v9383_v56, %v2184_v58 }
 0x779   :  { %v1863_v33 = vmul.f32 0.2, %v1859_v61  ;;  %vm1861_vm5 = vcmp.ge.f32.partialorder %v1859_v61, 0.0  ;;  %v2552_v21 = vadd.f32 %v2550_v5, %v2546_v29  ;;  %v2222_v5 = vmul.f32 0.2, %v2218_v40 }
 0x77a   :  { %v2238_v29 = vadd.f32 %v7575_v48, %v7457_v12  ;;  %v2258_v12 = vadd.f32 %v7579_v16, %v7482_v45 }
 0x77b   :  { %v1872_v27 = vpop.permute.xlu0 %1871  ;;  %v7625_v42 = vpop.permute.xlu1 %2447  ;;  %v1865_v31 = vsel %vm1861_vm5, %v1859_v61, %v1863_v33  ;;  %v9386_v33 = vstv %s7407_s25  ;;  %s7759_s25 = sld [smem:[#allocation5 + $0x181]] }
 0x77c   :  { %9375 = vst [vmem:[#allocation27_spill] sm:$0xff] %v7625_v42  ;;  %v1879_v60 = vadd.f32 %v7390_v49, %v1872_v27  ;;  %v9158_v27 = vstv %s7608_s3  ;;  %v2242_v56 = vmul.f32 0.2, %v2238_v29  ;;  %vm2240_vm13 = vcmp.ge.f32.partialorder %v2238_v29, 0.0 }
 0x77e   :  { %v1883_v24 = vmul.f32 0.2, %v1879_v60  ;;  %vm1881_vm4 = vcmp.ge.f32.partialorder %v1879_v60, 0.0 }
 0x77f   :  { %2693 = vmax.xlane.f32.xlu1 %v2692_v18  ;;  %v2104_v18 = vsel %vm2100_vm11, %v2098_v26, %v2102_v3  ;;  %v9382_v3 = vstv %s7529_s23 }
 0x780   :  { %v1892_v42 = vpop.permute.xlu0 %1891  ;;  %v7648_v37 = vpop.permute.xlu1 %2307  ;;  %v2584_v4 = vmul.f32 %v9382_v3, %v2204_v13  ;;  %v1885_v7 = vsel %vm1881_vm4, %v1879_v60, %v1883_v24  ;;  %v7673_v13 = vadd.f32 %v7555_v6, %v7386_v38  ;;  %vm2260_vm4 = vcmp.ge.f32.partialorder %v2258_v12, 0.0 }
 0x781   :  { %v1899_v25 = vadd.f32 %v7403_v57, %v1892_v42  ;;  %v9381_v57 = vstv %s7521_s19 }
 0x782   :  { %v2556_v42 = vmul.f32 %v9381_v57, %v2104_v18  ;;  %v2586_v24 = vadd.f32 %v2584_v4, %v2580_v15  ;;  %v2124_v4 = vsel %vm2120_vm9, %v2118_v62, %v2122_v30  ;;  %vm2140_vm11 = vcmp.ge.f32.partialorder %v7673_v13, 0.0 }
 0x783   :  { %v1903_v49 = vmul.f32 0.2, %v1899_v25  ;;  %vm1901_vm6 = vcmp.ge.f32.partialorder %v1899_v25, 0.0 }
 0x784   :  { %v7675_v50 = vadd.f32 %v2556_v42, %v2552_v21  ;;  %v2224_v21 = vsel %vm2220_vm10, %v2218_v40, %v2222_v5  ;;  %v9389_v40 = vstv %s7551_s7 }
 0x785   :  { %v1912_v32 = vpop.permute.xlu0 %1911  ;;  %v1952_v26 = vpop.permute.xlu1 %1951  ;;  %v1905_v1 = vsel %vm1901_vm6, %v1899_v25, %v1903_v49  ;;  %v9385_v49 = vstv %s7405_s24  ;;  %v2562_v5 = vmul.f32 %v9389_v40, %v2124_v4  ;;  %s7714_s24 = sld [smem:[#allocation5 + $0x107]] }
 0x786   :  { %v1919_v20 = vadd.f32 %v7417_v22, %v1912_v32  ;;  %v9384_v22 = vstv %s7398_s9  ;;  %v1959_v38 = vadd.f32 %v7432_v39, %v1952_v26  ;;  %v2489_v25 = vmul.f32 %v9385_v49, %v1865_v31  ;;  %s7708_s9 = sld [smem:[#allocation5 + $0x106]] }
 0x787   :  { %v2493_v60 = vmul.f32 %v9384_v22, %v1885_v7  ;;  %v2499_v42 = vmul.f32 %v9386_v33, %v1905_v1  ;;  %v2158_v32 = vadd.f32 %v7567_v41, %v7436_v17  ;;  %v9387_v26 = vstv %s7420_s5  ;;  %s7788_s5 = sld [smem:[#allocation5 + $0x180]] }
 0x788   :  { %vm1921_vm8 = vcmp.ge.f32.partialorder %v1919_v20, 0.0  ;;  %v1923_v18 = vmul.f32 0.2, %v1919_v20  ;;  %v1963_v62 = vmul.f32 0.2, %v1959_v38  ;;  %vm1961_vm1 = vcmp.ge.f32.partialorder %v1959_v38, 0.0 }
 0x789   :  { %v2495_v39 = vadd.f32 %v2493_v60, %v2489_v25  ;;  %v2142_v31 = vmul.f32 0.2, %v7673_v13  ;;  %v2262_v1 = vmul.f32 0.2, %v2258_v12  ;;  %v2244_v49 = vsel %vm2240_vm13, %v2238_v29, %v2242_v56 }
 0x78a   :  { %v1925_v58 = vsel %vm1921_vm8, %v1919_v20, %v1923_v18  ;;  %v1932_v57 = vpop.permute.xlu0 %1931  ;;  %v7682_v61 = vpop.permute.xlu1 %2031  ;;  %v9388_v18 = vstv %s7427_s1  ;;  %v1965_v33 = vsel %vm1961_vm1, %v1959_v38, %v1963_v62  ;;  %vm2160_vm6 = vcmp.ge.f32.partialorder %v2158_v32, 0.0  ;;  %s7794_s1 = sld [smem:[#allocation5 + $0x182]] }
 0x78b   :  { %v1939_v3 = vadd.f32 %v7425_v47, %v1932_v57  ;;  %v2505_v7 = vmul.f32 %v9387_v26, %v1925_v58  ;;  %v2278_v47 = vadd.f32 %v7593_v53, %v7537_v59  ;;  %v2501_v15 = vadd.f32 %v2499_v42, %v2495_v39 }
 0x78c   :  { %v9390_v58 = vstv %s7563_s13  ;;  %v2162_v39 = vmul.f32 0.2, %v2158_v32  ;;  %v2264_v26 = vsel %vm2260_vm4, %v2258_v12, %v2262_v1  ;;  %v2318_v29 = vadd.f32 %v7601_v0, %v7648_v37 }
 0x78d   :  { %vm1941_vm12 = vcmp.ge.f32.partialorder %v1939_v3, 0.0  ;;  %v1943_v20 = vmul.f32 0.2, %v1939_v3  ;;  %v2590_v57 = vmul.f32 %v9390_v58, %v2224_v21  ;;  %v2507_v59 = vadd.f32 %v2505_v7, %v2501_v15 }
 0x78e   :  { %v2282_v25 = vmul.f32 0.2, %v2278_v47  ;;  %vm2280_vm8 = vcmp.ge.f32.partialorder %v2278_v47, 0.0  ;;  %v9391_v38 = vstv %s7585_s29  ;;  %v9392_v21 = vstv %s7443_s26  ;;  %s7802_s26 = sld [smem:[#allocation5 + $0x183]] }
 0x78f   :  { %v1945_v17 = vsel %vm1941_vm12, %v1939_v3, %v1943_v20  ;;  %v7698_v30 = vpop.permute.xlu0 %2011  ;;  %v1972_v45 = vpop.permute.xlu1 %1971  ;;  %v2596_v20 = vmul.f32 %v9391_v38, %v2244_v49  ;;  %v2517_v56 = vmul.f32 %v9392_v21, %v1965_v33  ;;  %v2144_v15 = vsel %vm2140_vm11, %v7673_v13, %v2142_v31 }
 0x790   :  { %v2511_v22 = vmul.f32 %v9388_v18, %v1945_v17  ;;  %v1979_v60 = vadd.f32 %v7440_v52, %v1972_v45  ;;  %v2298_v52 = vadd.f32 %v7589_v2, %v7535_v23  ;;  %v2592_v23 = vadd.f32 %v2590_v57, %v2586_v24 }
 0x791   :  { %v2284_v17 = vsel %vm2280_vm8, %v2278_v47, %v2282_v25  ;;  %v2564_v37 = vadd.f32 %v2562_v5, %v7675_v50  ;;  %v2602_v45 = vmul.f32 %v9158_v27, %v2264_v26  ;;  %v9393_v1 = vstv %s7452_s2  ;;  %s7847_s2 = sld [smem:[#allocation5 + $0x184]] }
 0x792   :  { %vm1981_vm5 = vcmp.ge.f32.partialorder %v1979_v60, 0.0  ;;  %v2513_v42 = vadd.f32 %v2511_v22, %v2507_v59  ;;  %v1983_v3 = vmul.f32 0.2, %v1979_v60  ;;  %v2322_v40 = vmul.f32 0.2, %v2318_v29 }
 0x793   :  { %v2598_v24 = vadd.f32 %v2596_v20, %v2592_v23  ;;  %vm2300_vm10 = vcmp.ge.f32.partialorder %v2298_v52, 0.0  ;;  %v9394_v47 = vstv %s7616_s0  ;;  %vm2320_vm11 = vcmp.ge.f32.partialorder %v2318_v29, 0.0 }
 0x794   :  { %v2052_v4 = vpop.permute.xlu0 %2051  ;;  %v1992_v7 = vpop.permute.xlu1 %1991  ;;  %v1985_v62 = vsel %vm1981_vm5, %v1979_v60, %v1983_v3  ;;  %v2519_v22 = vadd.f32 %v2517_v56, %v2513_v42  ;;  %v2302_v60 = vmul.f32 0.2, %v2298_v52  ;;  %v2608_v31 = vmul.f32 %v9394_v47, %v2284_v17  ;;  %v9402_v47 = vld [vmem:[#allocation31_spill] sm:$0xff] }
 0x795   :  { %v1999_v12 = vadd.f32 %v7450_v35, %v1992_v7  ;;  %v2523_v18 = vmul.f32 %v9393_v1, %v1985_v62  ;;  %v2164_v35 = vsel %vm2160_vm6, %v2158_v32, %v2162_v39  ;;  %v9395_v58 = vstv %s7557_s20 }
 0x796   :  { %v2568_v57 = vmul.f32 %v9395_v58, %v2144_v15  ;;  %v2604_v49 = vadd.f32 %v2602_v45, %v2598_v24  ;;  %v9396_v32 = vstv %s7463_s6  ;;  %v9397_v42 = vstv %s7581_s28  ;;  %v9403_v58 = vld [vmem:[#allocation15_spill] sm:$0xff]  ;;  %s7860_s6 = sld [smem:[#allocation5 + $0x185]] }
 0x797   :  { %vm2001_vm9 = vcmp.ge.f32.partialorder %v1999_v12, 0.0  ;;  %v2003_v13 = vmul.f32 0.2, %v1999_v12  ;;  %v2525_v25 = vadd.f32 %v2523_v18, %v2519_v22  ;;  %v2574_v3 = vmul.f32 %v9397_v42, %v2164_v35 }
 0x798   :  { %v9157_v39 = vstv %s7708_s9  ;;  %v2304_v26 = vsel %vm2300_vm10, %v2298_v52, %v2302_v60  ;;  %v2324_v7 = vsel %vm2320_vm11, %v2318_v29, %v2322_v40  ;;  %v9156_v38 = vstv %s7714_s24  ;;  %v9400_v60 = vld [vmem:[#allocation10_spill] sm:$0xff] }
 0x799   :  { %v2072_v50 = vpop.permute.xlu0 %2071  ;;  %v7733_v5 = vpop.permute.xlu1 %2091  ;;  %v2005_v59 = vsel %vm2001_vm9, %v1999_v12, %v2003_v13  ;;  %vm7745_vm12 = vcmp.ne.s32.totalorder %v2677_v54, 0  ;;  %v2570_v56 = vadd.f32 %v2568_v57, %v2564_v37  ;;  %v2610_v62 = vadd.f32 %v2608_v31, %v2604_v49  ;;  %v9401_v13 = vld [vmem:[#allocation35_spill] sm:$0xff] }
 0x79a   :  { %v2529_v33 = vmul.f32 %v9396_v32, %v2005_v59  ;;  %v7751_v12 = vadd.f32 %v7225_v34, %v7234_v36  ;;  %v2614_v52 = vmul.f32 %v9157_v39, %v2304_v26  ;;  %v2620_v17 = vmul.f32 %v9156_v38, %v2324_v7  ;;  %v9404_v32 = vld [vmem:[#allocation24_spill] sm:$0xff] }
 0x79b   :  { %v2576_v29 = vadd.f32 %v2574_v3, %v2570_v56  ;;  %v2019_v54 = vadd.f32 %v7486_v63, %v7698_v30  ;;  %v2039_v45 = vadd.f32 %v7501_v14, %v7682_v61  ;;  %v2059_v1 = vadd.f32 %v7505_v9, %v2052_v4 }
 0x79c   :  { %v2531_v20 = vadd.f32 %v2529_v33, %v2525_v25  ;;  %v2616_v37 = vadd.f32 %v2614_v52, %v2610_v62  ;;  %v7769_v34 = vrot.slane %v7751_v12, %v9305_v28  ;;  %v7786_v35 = vrot.slane %v7751_v12, %v9302_v44  ;;  %v9405_v62 = vld [vmem:[#allocation19_spill] sm:$0xff] }
 0x79d   :  { %v7782_v63 = vsel %vm7610_vm7, %v2576_v29, -1e+30  ;;  %v7792_v14 = vrot.slane %v7751_v12, %v9308_v43  ;;  %v7800_v61 = vrot.slane %v7751_v12, %v9309_v46  ;;  %v2023_v4 = vmul.f32 0.2, %v2019_v54 }
 0x79e   :  { %v7753_v15 = vpop.permute.xlu0 %2171  ;;  %v2112_v23 = vpop.permute.xlu1 %2111  ;;  %v7763_v10 = vsel %vm7745_vm12, %v2531_v20, -1e+30  ;;  %v2622_v30 = vadd.f32 %v2620_v17, %v2616_v37  ;;  %v2358_v9 = vadd.f32 %v7769_v34, %v7377_v51  ;;  %v2079_v40 = vadd.f32 %v9400_v60, %v2072_v50  ;;  %v9407_v60 = vld [vmem:[#allocation38_spill] sm:$0xff] }
 0x79f   :  { %v2695_v36 = vsel %vm1181_vm2, %v7763_v10, -inf  ;;  %v2338_v24 = vadd.f32 %v7786_v35, %v9401_v13  ;;  %v7809_v31 = vrot.slane %v7751_v12, %v9402_v47  ;;  %vm2021_vm13 = vcmp.ge.f32.partialorder %v2019_v54, 0.0 }
 0x7a0   :  { %2696 = vmax.xlane.f32.xlu0 %v2695_v36  ;;  %v2698_v51 = vsel %vm1181_vm2, %v7782_v63, -inf  ;;  %v7815_v57 = vrot.slane %v7751_v12, %v9403_v58  ;;  %v2043_v59 = vmul.f32 0.2, %v2039_v45  ;;  %v2063_v49 = vmul.f32 0.2, %v2059_v1  ;;  %v9406_v36 = vld [vmem:[#allocation33_spill] sm:$0xff] }
 0x7a1   :  { %v7819_v50 = vsel %vm7610_vm7, %v2622_v30, -1e+30  ;;  %v9159_v25 = vstv %s7759_s25  ;;  %v7824_v33 = vrot.slane %v7751_v12, %v9404_v32  ;;  %vm2041_vm1 = vcmp.ge.f32.partialorder %v2039_v45, 0.0 }
 0x7a2   :  { %vm2061_vm4 = vcmp.ge.f32.partialorder %v2059_v1, 0.0  ;;  %vm2360_vm5 = vcmp.ge.f32.partialorder %v2358_v9, 0.0  ;;  %v2362_v26 = vmul.f32 0.2, %v2358_v9  ;;  %v2025_v7 = vsel %vm2021_vm13, %v2019_v54, %v2023_v4 }
 0x7a3   :  { %v7776_v18 = vpop.permute.xlu0 %2351  ;;  %v7778_v22 = vpop.permute.xlu1 %2191  ;;  %v2083_v20 = vmul.f32 0.2, %v2079_v40  ;;  %v2342_v56 = vmul.f32 0.2, %v2338_v24  ;;  %v2378_v52 = vadd.f32 %v7792_v14, %v9405_v62  ;;  %vm2081_vm6 = vcmp.ge.f32.partialorder %v2079_v40, 0.0 }
 0x7a4   :  { %2699 = vmax.xlane.f32.xlu0 %v2698_v51  ;;  %v2704_v29 = vsel %vm1181_vm2, %v7819_v50, -inf  ;;  %vm2340_vm8 = vcmp.ge.f32.partialorder %v2338_v24, 0.0  ;;  %v2045_v17 = vsel %vm2041_vm1, %v2039_v45, %v2043_v59  ;;  %v2065_v37 = vsel %vm2061_vm4, %v2059_v1, %v2063_v49 }
 0x7a5   :  { %v2099_v30 = vadd.f32 %v9406_v36, %v7733_v5  ;;  %v9160_v54 = vstv %s7788_s5  ;;  %v9161_v4 = vstv %s7794_s1  ;;  %v2398_v13 = vadd.f32 %v7800_v61, %v9407_v60 }
 0x7a6   :  { %v9408_v51 = vstv %s7494_s27  ;;  %v2364_v38 = vsel %vm2360_vm5, %v2358_v9, %v2362_v26  ;;  %v2085_v27 = vsel %vm2081_vm6, %v2079_v40, %v2083_v20  ;;  %v2119_v45 = vadd.f32 %v7533_v11, %v2112_v23  ;;  %v9411_v9 = vld [vmem:[#allocation25_spill] sm:$0xff]  ;;  %s8566_s27 = sld [smem:[#allocation7 + $0x107]] }
 0x7a7   :  { %v2535_v62 = vmul.f32 %v9408_v51, %v2025_v7  ;;  %v2344_v59 = vsel %vm2340_vm8, %v2338_v24, %v2342_v56  ;;  %v2382_v49 = vmul.f32 0.2, %v2378_v52  ;;  %v9410_v60 = vstv %s7507_s10  ;;  %v9413_v56 = vld [vmem:[#allocation21_spill] sm:$0xff]  ;;  %s8621_s10 = sld [smem:[#allocation7 + $0x86]] }
 0x7a8   :  { %v7826_v42 = vpop.permute.xlu0 %2371  ;;  %v7828_v3 = vpop.permute.xlu1 %2331  ;;  %2705 = vmax.xlane.f32.xlu0 %v2704_v29  ;;  %v9409_v29 = vstv %s7496_s15  ;;  %v2545_v7 = vmul.f32 %v9410_v60, %v2065_v37  ;;  %vm2380_vm9 = vcmp.ge.f32.partialorder %v2378_v52, 0.0  ;;  %v2418_v26 = vadd.f32 %v7809_v31, %v9411_v9  ;;  %s8609_s15 = sld [smem:[#allocation7 + $0x85]] }
 0x7a9   :  { %v2539_v36 = vmul.f32 %v9409_v29, %v2045_v17  ;;  %v2103_v40 = vmul.f32 0.2, %v2099_v30  ;;  %v2402_v23 = vmul.f32 0.2, %v2398_v13  ;;  %v9412_v51 = vstv %s7509_s17  ;;  %s8249_s17 = sld [smem:[#allocation7 + $0x81]] }
 0x7aa   :  { %v2551_v39 = vmul.f32 %v9412_v51, %v2085_v27  ;;  %vm2101_vm10 = vcmp.ge.f32.partialorder %v2099_v30, 0.0  ;;  %v2626_v24 = vmul.f32 %v9160_v54, %v2344_v59  ;;  %vm2400_vm11 = vcmp.ge.f32.partialorder %v2398_v13, 0.0 }
 0x7ab   :  { %v2541_v20 = vadd.f32 %v2539_v36, %v2535_v62  ;;  %v2438_v17 = vadd.f32 %v7815_v57, %v9413_v56  ;;  %v2123_v37 = vmul.f32 0.2, %v2119_v45  ;;  %v2630_v29 = vmul.f32 %v9159_v25, %v2364_v38 }
 0x7ac   :  { %v2384_v60 = vsel %vm2380_vm9, %v2378_v52, %v2382_v49  ;;  %vm2121_vm13 = vcmp.ge.f32.partialorder %v2119_v45, 0.0  ;;  %v2422_v62 = vmul.f32 0.2, %v2418_v26  ;;  %v2105_v36 = vsel %vm2101_vm10, %v2099_v30, %v2103_v40 }
 0x7ad   :  { %v7845_v1 = vpop.permute.xlu0 %2391  ;;  %v2132_v5 = vpop.permute.xlu1 %2131  ;;  %v2547_v9 = vadd.f32 %v2545_v7, %v2541_v20  ;;  %v2404_v56 = vsel %vm2400_vm11, %v2398_v13, %v2402_v23  ;;  %vm2420_vm1 = vcmp.ge.f32.partialorder %v2418_v26, 0.0  ;;  %v2632_v52 = vadd.f32 %v2630_v29, %v2626_v24 }
 0x7ae   :  { %v2139_v11 = vadd.f32 %v7555_v6, %v2132_v5  ;;  %v9414_v5 = vld [vmem:[#allocation27_spill] sm:$0xff]  ;;  %v2442_v49 = vmul.f32 0.2, %v2438_v17  ;;  %v2125_v7 = vsel %vm2121_vm13, %v2119_v45, %v2123_v37  ;;  %v2636_v20 = vmul.f32 %v9161_v4, %v2384_v60  ;;  %v9419_v4 = vld [vmem:[#allocation34_spill] sm:$0xff] }
 0x7af   :  { %v2458_v59 = vadd.f32 %v7824_v33, %v9414_v5  ;;  %v2553_v38 = vadd.f32 %v2551_v39, %v2547_v9  ;;  %v9162_v25 = vstv %s7847_s2  ;;  %vm2440_vm5 = vcmp.ge.f32.partialorder %v2438_v17, 0.0 }
 0x7b0   :  { %v2143_v51 = vmul.f32 0.2, %v2139_v11  ;;  %vm2141_vm4 = vcmp.ge.f32.partialorder %v2139_v11, 0.0  ;;  %v9415_v54 = vstv %s7521_s19  ;;  %v9416_v30 = vstv %s7802_s26  ;;  %s8262_s19 = sld [smem:[#allocation7 + $0x82]] }
 0x7b1   :  { %v2557_v32 = vmul.f32 %v9415_v54, %v2105_v36  ;;  %v2642_v13 = vmul.f32 %v9416_v30, %v2404_v56  ;;  %v2424_v40 = vsel %vm2420_vm1, %v2418_v26, %v2422_v62  ;;  %v2462_v39 = vmul.f32 0.2, %v2458_v59 }
 0x7b2   :  { %v7866_v6 = vpop.permute.xlu0 %2271  ;;  %v2212_v27 = vpop.permute.xlu1 %2211  ;;  %v2145_v23 = vsel %vm2141_vm4, %v2139_v11, %v2143_v51  ;;  %vm2460_vm6 = vcmp.ge.f32.partialorder %v2458_v59, 0.0  ;;  %v9417_v29 = vstv %s7551_s7  ;;  %v2638_v54 = vadd.f32 %v2636_v20, %v2632_v52  ;;  %s8329_s7 = sld [smem:[#allocation7 + $0x180]] }
 0x7b3   :  { %v2559_v37 = vadd.f32 %v2557_v32, %v2553_v38  ;;  %v2563_v60 = vmul.f32 %v9417_v29, %v2125_v7  ;;  %v2653_v5 = vstv %s7860_s6  ;;  %v2444_v36 = vsel %vm2440_vm5, %v2438_v17, %v2442_v49  ;;  %s8512_s6 = sld [smem:[#allocation7 + $0x103]] }
 0x7b4   :  { %v2648_v56 = vmul.f32 %v9162_v25, %v2424_v40  ;;  %v9418_v26 = vstv %s7557_s20  ;;  %v2659_v51 = vstv %s7868_s16  ;;  %v2464_v30 = vsel %vm2460_vm6, %v2458_v59, %v2462_v39  ;;  %s8331_s20 = sld [smem:[#allocation7 + $0x181]]  ;;  %s8524_s16 = sld [smem:[#allocation7 + $0x104]] }
 0x7b5   :  { %v2569_v62 = vmul.f32 %v9418_v26, %v2145_v23  ;;  %v7894_v32 = vrot.slane %v7751_v12, %v9419_v4  ;;  %v2644_v38 = vadd.f32 %v2642_v13, %v2638_v54  ;;  %v2565_v49 = vadd.f32 %v2563_v60, %v2559_v37  ;;  %v9421_v26 = vld [vmem:[#allocation18_spill] sm:$0xff]  ;;  %v9422_v37 = vld [vmem:[#allocation20_spill] sm:$0xff] }
 0x7b6   :  { %v9420_v40 = vstv %s7581_s28  ;;  %v2660_v29 = vmul.f32 %v2659_v51, %v2464_v30  ;;  %v2665_v39 = vstv %s7877_s22  ;;  %v2179_v25 = vadd.f32 %v9421_v26, %v7753_v15  ;;  %s8373_s28 = sld [smem:[#allocation7]]  ;;  %s8530_s22 = sld [smem:[#allocation7 + $0x105]] }
 0x7b7   :  { %v7881_v24 = vpop.permute.xlu0 %2451  ;;  %v2152_v45 = vpop.permute.xlu1 %2151  ;;  %v2571_v59 = vadd.f32 %v2569_v62, %v2565_v49  ;;  %v2339_v13 = vadd.f32 %v7786_v35, %v7828_v3  ;;  %v2199_v60 = vadd.f32 %v9422_v37, %v7778_v22  ;;  %v2219_v62 = vadd.f32 %v7561_v19, %v2212_v27 }
 0x7b8   :  { %v2159_v9 = vadd.f32 %v7567_v41, %v2152_v45  ;;  %v2654_v41 = vmul.f32 %v2653_v5, %v2444_v36  ;;  %v2650_v45 = vadd.f32 %v2648_v56, %v2644_v38  ;;  %v2359_v56 = vadd.f32 %v7769_v34, %v7776_v18 }
 0x7b9   :  { %vm2181_vm10 = vcmp.ge.f32.partialorder %v2179_v25, 0.0  ;;  %v2343_v3 = vmul.f32 0.2, %v2339_v13  ;;  %vm2341_vm11 = vcmp.ge.f32.partialorder %v2339_v13, 0.0  ;;  %vm2201_vm13 = vcmp.ge.f32.partialorder %v2199_v60, 0.0 }
 0x7ba   :  { %vm2161_vm8 = vcmp.ge.f32.partialorder %v2159_v9, 0.0  ;;  %v2163_v11 = vmul.f32 0.2, %v2159_v9  ;;  %v2656_v36 = vadd.f32 %v2654_v41, %v2650_v45  ;;  %v2203_v41 = vmul.f32 0.2, %v2199_v60 }
 0x7bb   :  { %v2363_v19 = vmul.f32 0.2, %v2359_v56  ;;  %v2379_v27 = vadd.f32 %v7792_v14, %v7826_v42  ;;  %vm2361_vm1 = vcmp.ge.f32.partialorder %v2359_v56, 0.0  ;;  %vm2221_vm4 = vcmp.ge.f32.partialorder %v2219_v62, 0.0 }
 0x7bc   :  { %v2165_v52 = vsel %vm2161_vm8, %v2159_v9, %v2163_v11  ;;  %v2468_v7 = vpop.permute.xlu0 %2467  ;;  %v2232_v17 = vpop.permute.xlu1 %2231  ;;  %v2662_v38 = vadd.f32 %v2660_v29, %v2656_v36  ;;  %v2205_v14 = vsel %vm2201_vm13, %v2199_v60, %v2203_v41  ;;  %v9438_v21 = vmov 0.0|0.0  }
 0x7bd   :  { %v2478_v20 = vadd.f32 %v7894_v32, %v2468_v7  ;;  %v2575_v23 = vmul.f32 %v9420_v40, %v2165_v52  ;;  %v2239_v34 = vadd.f32 %v7575_v48, %v2232_v17  ;;  %v2183_v52 = vmul.f32 0.2, %v2179_v25 }
 0x7be   :  { %v2223_v7 = vmul.f32 0.2, %v2219_v62  ;;  %v2345_v48 = vsel %vm2341_vm11, %v2339_v13, %v2343_v3  ;;  %v2399_v17 = vadd.f32 %v7800_v61, %v7845_v1  ;;  %v2365_v45 = vsel %vm2361_vm1, %v2359_v56, %v2363_v19 }
 0x7bf   :  { %vm2480_vm9 = vcmp.ge.f32.partialorder %v2478_v20, 0.0  ;;  %v2482_v9 = vmul.f32 0.2, %v2478_v20  ;;  %v2577_v54 = vadd.f32 %v2575_v23, %v2571_v59  ;;  %v2243_v42 = vmul.f32 0.2, %v2239_v34 }
 0x7c0   :  { %v2383_v29 = vmul.f32 0.2, %v2379_v27  ;;  %vm2241_vm5 = vcmp.ge.f32.partialorder %v2239_v34, 0.0  ;;  %vm2381_vm6 = vcmp.ge.f32.partialorder %v2379_v27, 0.0  ;;  %v9423_v59 = vstv %s7788_s5  ;;  %s9479_s5 = sld [smem:[#allocation42_spill]] }
 0x7c1   :  { %v2484_v11 = vsel %vm2480_vm9, %v2478_v20, %v2482_v9  ;;  %v2252_v30 = vpop.permute.xlu1 %2251  ;;  %v7915_v15 = vsel %vm7745_vm12, %v2577_v54, -1e+30  ;;  %v2627_v26 = vmul.f32 %v9423_v59, %v2345_v48  ;;  %v2225_v13 = vsel %vm2221_vm4, %v2219_v62, %v2223_v7 }
 0x7c2   :  { %v2666_v35 = vmul.f32 %v2665_v39, %v2484_v11  ;;  %v2701_v22 = vsel %vm1181_vm2, %v7915_v15, -inf  ;;  %v2259_v49 = vadd.f32 %v7579_v16, %v2252_v30  ;;  %v2185_v16 = vsel %vm2181_vm10, %v2179_v25, %v2183_v52 }
 0x7c3   :  { %2702 = vmax.xlane.f32.xlu1 %v2701_v22  ;;  %v9424_v1 = vstv %s7529_s23  ;;  %v2403_v37 = vmul.f32 0.2, %v2399_v17  ;;  %v9425_v25 = vstv %s7759_s25  ;;  %vm2401_vm9 = vcmp.ge.f32.partialorder %v2399_v17, 0.0  ;;  %s8292_s23 = sld [smem:[#allocation7 + $0x84]]  ;;  %s8636_s25 = sld [smem:[#allocation7 + $0x87]] }
 0x7c4   :  { %v2668_v18 = vadd.f32 %v2666_v35, %v2662_v38  ;;  %v2263_v61 = vmul.f32 0.2, %v2259_v49  ;;  %v2585_v9 = vmul.f32 %v9424_v1, %v2205_v14  ;;  %vm2261_vm8 = vcmp.ge.f32.partialorder %v2259_v49, 0.0 }
 0x7c5   :  { %v2631_v36 = vmul.f32 %v9425_v25, %v2365_v45  ;;  %v2279_v56 = vadd.f32 %v7593_v53, %v7866_v6  ;;  %v2245_v11 = vsel %vm2241_vm5, %v2239_v34, %v2243_v42  ;;  %v9426_v30 = vstv %s7525_s21  ;;  %s8276_s21 = sld [smem:[#allocation7 + $0x83]] }
 0x7c6   :  { %v2412_v20 = vpop.permute.xlu1 %2411  ;;  %v7927_v40 = vsel %vm7610_vm7, %v2668_v18, -1e+30  ;;  %v2581_v38 = vmul.f32 %v9426_v30, %v2185_v16  ;;  %v2385_v62 = vsel %vm2381_vm6, %v2379_v27, %v2383_v29  ;;  %v9427_v35 = vstv %s7563_s13  ;;  %s8361_s13 = sld [smem:[#allocation7 + $0x1]] }
 0x7c7   :  { %v2710_v23 = vsel %vm1181_vm2, %v7927_v40, -inf  ;;  %v2419_v60 = vadd.f32 %v7809_v31, %v2412_v20  ;;  %v2591_v3 = vmul.f32 %v9427_v35, %v2225_v13  ;;  %v2633_v41 = vadd.f32 %v2631_v36, %v2627_v26 }
 0x7c8   :  { %2711 = vmax.xlane.f32.xlu0 %v2710_v23  ;;  %v2265_v31 = vsel %vm2261_vm8, %v2259_v49, %v2263_v61  ;;  %v2587_v18 = vadd.f32 %v2585_v9, %v2581_v38  ;;  %v2405_v52 = vsel %vm2401_vm9, %v2399_v17, %v2403_v37  ;;  %v9428_v19 = vstv %s7585_s29  ;;  %s8377_s29 = sld [smem:[#allocation7 + $0x182]] }
 0x7c9   :  { %v2597_v7 = vmul.f32 %v9428_v19, %v2245_v11  ;;  %v2423_v20 = vmul.f32 0.2, %v2419_v60  ;;  %v9429_v48 = vstv %s7794_s1  ;;  %vm2281_vm10 = vcmp.ge.f32.partialorder %v2279_v56, 0.0  ;;  %s8483_s1 = sld [smem:[#allocation7 + $0x101]] }
 0x7ca   :  { %v2637_v23 = vmul.f32 %v9429_v48, %v2385_v62  ;;  %v2283_v53 = vmul.f32 0.2, %v2279_v56  ;;  %vm2421_vm11 = vcmp.ge.f32.partialorder %v2419_v60, 0.0  ;;  %v2593_v34 = vadd.f32 %v2591_v3, %v2587_v18 }
 0x7cb   :  { %v2432_v54 = vpop.permute.xlu1 %2431  ;;  %v9430_v27 = vstv %s7608_s3  ;;  %v9431_v49 = vstv %s7802_s26  ;;  %v2459_v45 = vadd.f32 %v7824_v33, %v7881_v24  ;;  %v2425_v59 = vsel %vm2421_vm11, %v2419_v60, %v2423_v20  ;;  %s8381_s3 = sld [smem:[#allocation7 + $0x2]]  ;;  %s8491_s26 = sld [smem:[#allocation7 + $0x100]] }
 0x7cc   :  { %v2439_v22 = vadd.f32 %v7815_v57, %v2432_v54  ;;  %v2603_v14 = vmul.f32 %v9430_v27, %v2265_v31  ;;  %v2639_v16 = vadd.f32 %v2637_v23, %v2633_v41  ;;  %v2643_v17 = vmul.f32 %v9431_v49, %v2405_v52 }
 0x7cd   :  { %v2599_v29 = vadd.f32 %v2597_v7, %v2593_v34  ;;  %v2285_v13 = vsel %vm2281_vm10, %v2279_v56, %v2283_v53  ;;  %v9432_v37 = vstv %s7847_s2  ;;  %v9433_v33 = vstv %s7616_s0  ;;  %s8405_s0 = sld [smem:[#allocation7 + $0x3]]  ;;  %s8500_s2 = sld [smem:[#allocation7 + $0x102]] }
 0x7ce   :  { %v2443_v42 = vmul.f32 0.2, %v2439_v22  ;;  %vm2441_vm13 = vcmp.ge.f32.partialorder %v2439_v22, 0.0  ;;  %v2649_v54 = vmul.f32 %v9432_v37, %v2425_v59  ;;  %v2645_v36 = vadd.f32 %v2643_v17, %v2639_v16 }
 0x7cf   :  { %v2605_v61 = vadd.f32 %v2603_v14, %v2599_v29  ;;  %v2609_v24 = vmul.f32 %v9433_v33, %v2285_v13  ;;  %v2463_v11 = vmul.f32 0.2, %v2459_v45  ;;  %v9434_v30 = vstv %s7708_s9  ;;  %s8445_s9 = sld [smem:[#allocation7 + $0x6]] }
 0x7d0   :  { %v2292_v6 = vpop.permute.xlu1 %2291  ;;  %v2445_v1 = vsel %vm2441_vm13, %v2439_v22, %v2443_v42  ;;  %vm2461_vm4 = vcmp.ge.f32.partialorder %v2459_v45, 0.0  ;;  %v2651_v35 = vadd.f32 %v2649_v54, %v2645_v36  ;;  %v9435_v18 = vstv %s7714_s24  ;;  %s9530_s24 = sld [smem:[#allocation52_spill]] }
 0x7d1   :  { %v2299_v57 = vadd.f32 %v7589_v2, %v2292_v6  ;;  %v2655_v60 = vmul.f32 %v2653_v5, %v2445_v1  ;;  %v2611_v62 = vadd.f32 %v2609_v24, %v2605_v61  ;;  %v2465_v41 = vsel %vm2461_vm4, %v2459_v45, %v2463_v11 }
 0x7d2   :  { %v2661_v48 = vmul.f32 %v2659_v51, %v2465_v41 }
 0x7d3   :  { %vm2301_vm1 = vcmp.ge.f32.partialorder %v2299_v57, 0.0  ;;  %v2303_v26 = vmul.f32 0.2, %v2299_v57  ;;  %v2657_v19 = vadd.f32 %v2655_v60, %v2651_v35 }
 0x7d5   :  { %v2305_v9 = vsel %vm2301_vm1, %v2299_v57, %v2303_v26  ;;  %v2312_v2 = vpop.permute.xlu1 %2311  ;;  %v2663_v6 = vadd.f32 %v2661_v48, %v2657_v19  ;;  %v9436_v57 = vld [vmem:[#allocation23_spill] sm:$0xff] }
 0x7d6   :  { %v2319_v25 = vadd.f32 %v7601_v0, %v2312_v2  ;;  %v2615_v38 = vmul.f32 %v9434_v30, %v2305_v9 }
 0x7d8   :  { %vm2321_vm5 = vcmp.ge.f32.partialorder %v2319_v25, 0.0  ;;  %v2323_v56 = vmul.f32 0.2, %v2319_v25  ;;  %v2617_v31 = vadd.f32 %v2615_v38, %v2611_v62 }
 0x7da   :  { %v2325_v3 = vsel %vm2321_vm5, %v2319_v25, %v2323_v56  ;;  %v2472_v22 = vpop.permute.xlu1 %2471 }
 0x7db   :  { %v2479_v0 = vadd.f32 %v7894_v32, %v2472_v22  ;;  %v2621_v52 = vmul.f32 %v9435_v18, %v2325_v3 }
 0x7dd   :  { %vm2481_vm6 = vcmp.ge.f32.partialorder %v2479_v0, 0.0  ;;  %v2483_v7 = vmul.f32 0.2, %v2479_v0  ;;  %v2623_v20 = vadd.f32 %v2621_v52, %v2617_v31 }
 0x7df   :  { %v2485_v5 = vsel %vm2481_vm6, %v2479_v0, %v2483_v7  ;;  %v2689_v23 = vsel %vm7745_vm12, %v2623_v20, -1e+30 }
 0x7e0   :  { %v2707_v53 = vsel %vm1181_vm2, %v2689_v23, -inf  ;;  %v2667_v34 = vmul.f32 %v2665_v39, %v2485_v5 }
 0x7e1   :  { %2708 = vmax.xlane.f32.xlu1 %v2707_v53 }
 0x7e2   :  { %v2669_v32 = vadd.f32 %v2667_v34, %v2663_v6 }
 0x7e4   :  { %v2691_v27 = vsel %vm7745_vm12, %v2669_v32, -1e+30 }
 0x7e5   :  { %v2713_v14 = vsel %vm1181_vm2, %v2691_v27, -inf }
 0x7e6   :  { %2714 = vmax.xlane.f32.xlu1 %v2713_v14 }
 0x80c   :  { %v2694_v42 = vpop.xlane.xlu1 %2693 }
 0x80d   :  { %v2716_v51 = vsub.f32 %v9436_v57, %v2694_v42 }
 0x80f   :  { %v2724_v16 = vmul.f32 1.442695, %v2716_v51 }
 0x811   :  { %5945 = vpow2.f32 %v2724_v16 }
 0x81b   :  { %v5946_v49 = vpop.eup %5945 }
 0x81c   :  { %v7985_v17 = vsel %vm7610_vm7, %v5946_v49, 0.0 }
 0x81d   :  { %v2748_v39 = vsel %vm1181_vm2, %v7985_v17, 0.0 }
 0x81e   :  { %2749 = vadd.xlane.f32.xlu0 %v2748_v39  ;;  %v9439_v39 = vld [vmem:[#allocation36_spill] sm:$0xff] }
 0x82d   :  { %v2697_v45 = vpop.xlane.xlu0 %2696 }
 0x82e   :  { %v2717_v29 = vsub.f32 %v7763_v10, %v2697_v45  ;;  %v9440_v45 = vmov 0.0  }
 0x830   :  { %v2726_v59 = vmul.f32 1.442695, %v2717_v29 }
 0x831   :  { %v2700_v26 = vpop.xlane.xlu0 %2699 }
 0x832   :  { %5947 = vpow2.f32 %v2726_v59  ;;  %v2718_v13 = vsub.f32 %v7782_v63, %v2700_v26 }
 0x834   :  { %v2728_v61 = vmul.f32 1.442695, %v2718_v13 }
 0x835   :  { %v2706_v1 = vpop.xlane.xlu0 %2705 }
 0x836   :  { %5949 = vpow2.f32 %v2728_v61  ;;  %v2720_v9 = vsub.f32 %v7819_v50, %v2706_v1 }
 0x838   :  { %v2732_v2 = vmul.f32 1.442695, %v2720_v9 }
 0x83a   :  { %5951 = vpow2.f32 %v2732_v2 }
 0x83c   :  { %v5948_v37 = vpop.eup %5947 }
 0x83d   :  { %v2741_v54 = vsel %vm7745_vm12, %v5948_v37, 0.0 }
 0x83e   :  { %v2751_v25 = vsel %vm1181_vm2, %v2741_v54, 0.0 }
 0x83f   :  { %2752 = vadd.xlane.f32.xlu1 %v2751_v25 }
 0x840   :  { %v5950_v10 = vpop.eup %5949 }
 0x841   :  { %v2742_v36 = vsel %vm7610_vm7, %v5950_v10, 0.0 }
 0x842   :  { %v2754_v63 = vsel %vm1181_vm2, %v2742_v36, 0.0 }
 0x843   :  { %2755 = vadd.xlane.f32.xlu0 %v2754_v63 }
 0x844   :  { %v5952_v33 = vpop.eup %5951 }
 0x845   :  { %v8000_v50 = vsel %vm7610_vm7, %v5952_v33, 0.0 }
 0x846   :  { %v2760_v24 = vsel %vm1181_vm2, %v8000_v50, 0.0 }
 0x847   :  { %2761 = vadd.xlane.f32.xlu0 %v2760_v24 }
 0x850   :  { %v2703_v11 = vpop.xlane.xlu1 %2702 }
 0x851   :  { %v2719_v30 = vsub.f32 %v7915_v15, %v2703_v11 }
 0x853   :  { %v2730_v38 = vmul.f32 1.442695, %v2719_v30 }
 0x855   :  { %v2712_v60 = vpop.xlane.xlu0 %2711  ;;  %5953 = vpow2.f32 %v2730_v38 }
 0x856   :  { %v2722_v56 = vsub.f32 %v7927_v40, %v2712_v60 }
 0x858   :  { %v2736_v62 = vmul.f32 1.442695, %v2722_v56 }
 0x85a   :  { %5955 = vpow2.f32 %v2736_v62 }
 0x85f   :  { %v5954_v35 = vpop.eup %5953 }
 0x860   :  { %v2743_v3 = vsel %vm7745_vm12, %v5954_v35, 0.0 }
 0x861   :  { %v2757_v22 = vsel %vm1181_vm2, %v2743_v3, 0.0 }
 0x862   :  { %2758 = vadd.xlane.f32.xlu1 %v2757_v22 }
 0x864   :  { %v5956_v41 = vpop.eup %5955 }
 0x865   :  { %v8011_v0 = vsel %vm7610_vm7, %v5956_v41, 0.0 }
 0x866   :  { %v2766_v15 = vsel %vm1181_vm2, %v8011_v0, 0.0 }
 0x867   :  { %2767 = vadd.xlane.f32.xlu0 %v2766_v15 }
 0x86e   :  { %v2709_v31 = vpop.xlane.xlu1 %2708 }
 0x86f   :  { %v2721_v40 = vsub.f32 %v2689_v23, %v2709_v31  ;;  %v9442_v31 = vld [vmem:[#allocation11_spill] sm:$0xff] }
 0x871   :  { %v2734_v18 = vmul.f32 1.442695, %v2721_v40  ;;  %v3148_v40 = vld [vmem:[%s8994_s12 + $0x20] sm:$0xff] }
 0x873   :  { %5957 = vpow2.f32 %v2734_v18  ;;  %v2715_v52 = vpop.xlane.xlu1 %2714  ;;  %v3144_v18 = vld [vmem:[%s8994_s12] sm:$0xff] }
 0x874   :  { %v2723_v19 = vsub.f32 %v2691_v27, %v2715_v52  ;;  %v3151_v52 = vld [vmem:[%s8994_s12 + $0x38] sm:$0xff] }
 0x876   :  { %v2738_v7 = vmul.f32 1.442695, %v2723_v19  ;;  %v3145_v19 = vld [vmem:[%s8994_s12 + $0x8] sm:$0xff] }
 0x878   :  { %5959 = vpow2.f32 %v2738_v7  ;;  %v3146_v7 = vld [vmem:[%s8994_s12 + $0x10] sm:$0xff] }
 0x87d   :  { %v5958_v20 = vpop.eup %5957  ;;  %3174 = vperm.xlu0 %5838, %v3148_v40  }
 0x87e   :  { %v2745_v48 = vsel %vm7745_vm12, %v5958_v20, 0.0  ;;  %v3147_v20 = vld [vmem:[%s8994_s12 + $0x18] sm:$0xff] }
 0x87f   :  { %v2763_v55 = vsel %vm1181_vm2, %v2745_v48, 0.0 }
 0x880   :  { %2764 = vadd.xlane.f32.xlu1 %v2763_v55 }
 0x881   :  { %3154 = vperm.xlu0 %5838, %v3144_v18  }
 0x882   :  { %v5960_v5 = vpop.eup %5959 }
 0x883   :  { %v2747_v53 = vsel %vm7745_vm12, %v5960_v5, 0.0 }
 0x884   :  { %v2769_v6 = vsel %vm1181_vm2, %v2747_v53, 0.0 }
 0x885   :  { %2770 = vadd.xlane.f32.xlu1 %v2769_v6  ;;  %3159 = vperm.xlu0 %5838, %v3145_v19  }
 0x8ab   :  { %v2750_v23 = vpop.xlane.xlu0 %2749 }
 0x8ac   :  { %v2772_v34 = vmax.f32 %v2750_v23, 1e-30 }
 0x8ae   :  { %5961 = vrcp.f32 %v2772_v34 }
 0x8b8   :  { %v5962_v14 = vpop.eup %5961 }
 0x8b9   :  { %v2781_v57 = vmul.f32 %v5962_v14, %v7985_v17 }
 0x8cc   :  { %v2753_v32 = vpop.xlane.xlu1 %2752 }
 0x8cd   :  { %v2773_v27 = vmax.f32 %v2753_v32, 1e-30 }
 0x8cf   :  { %5963 = vrcp.f32 %v2773_v27 }
 0x8d0   :  { %v2756_v29 = vpop.xlane.xlu0 %2755 }
 0x8d1   :  { %v2774_v59 = vmax.f32 %v2756_v29, 1e-30 }
 0x8d3   :  { %5965 = vrcp.f32 %v2774_v59 }
 0x8d4   :  { %v2762_v37 = vpop.xlane.xlu0 %2761 }
 0x8d5   :  { %v2776_v25 = vmax.f32 %v2762_v37, 1e-30 }
 0x8d9   :  { %v5964_v42 = vpop.eup %5963 }
 0x8da   :  { %v2783_v51 = vmul.f32 %v5964_v42, %v2741_v54  ;;  %v9441_v54 = vld [vmem:[#allocation22_spill] sm:$0xff] }
 0x8dc   :  { %v5618_v16 = vpack.c.bf16 %v2783_v51, %v2781_v57 }
 0x8dd   :  { %v5966_v17 = vpop.eup %5965 }
 0x8de   :  { %5620 = vmatpush3.bf16.xpose.msk.msra.mxu1 %vm7131_vm14, %v5618_v16  ;;  %v2785_v1 = vmul.f32 %v5966_v17, %v2742_v36 }
 0x8df   :  { %5621 = vmatprep.subr.bf16.mxu1 %v9438_v21 }
 0x8e5   :  { %5482 = vmatmul.mubr.msk.f32.vlgmr.msra.gmra.mrb[6].mxu1 %vm1181_vm2, %v9439_v39 }
 0x8e6   :  { %5488 = vmatprep.mubr.msk.f32.mxu1 %vm6101_vm3, %v9440_v45 }
 0x8ef   :  { %v2759_v26 = vpop.xlane.xlu1 %2758 }
 0x8f0   :  { %v2775_v13 = vmax.f32 %v2759_v26, 1e-30 }
 0x8f2   :  { %5967 = vrcp.f32 %v2775_v13 }
 0x8f3   :  { %5969 = vrcp.f32 %v2776_v25 }
 0x8f4   :  { %v2768_v10 = vpop.xlane.xlu0 %2767 }
 0x8f5   :  { %v2778_v36 = vmax.f32 %v2768_v10, 1e-30 }
 0x8fc   :  { %v5968_v61 = vpop.eup %5967 }
 0x8fd   :  { %v2787_v9 = vmul.f32 %v5968_v61, %v2743_v3  ;;  %v5970_v30 = vpop.eup %5969 }
 0x8fe   :  { %v2789_v60 = vmul.f32 %v5970_v30, %v8000_v50  ;;  %v3136_v50 = vld [vmem:[%s8993_s11] sm:$0xff] }
 0x8ff   :  { %v5622_v2 = vpack.c.bf16 %v2787_v9, %v2785_v1  ;;  %v3140_v30 = vld [vmem:[%s8993_s11 + $0x20] sm:$0xff] }
 0x901   :  { %5624 = vmatpush3.bf16.xpose.msk.msra.mxu1 %vm7131_vm14, %v5622_v2 }
 0x902   :  { %5629 = vmatprep.subr.bf16.mxu1 %v9438_v21 }
 0x908   :  { %5489 = vmatmul.mubr.msk.f32.vlgmr.msra.gmra.mrb[8].mxu1 %vm1181_vm2, %v9441_v54 }
 0x909   :  { %5502 = vmatprep.mubr.msk.f32.mxu1 %vm6101_vm3, %v9440_v45 }
 0x90d   :  { %v2765_v63 = vpop.xlane.xlu1 %2764 }
 0x90e   :  { %v2777_v33 = vmax.f32 %v2765_v63, 1e-30 }
 0x910   :  { %5971 = vrcp.f32 %v2777_v33 }
 0x911   :  { %5973 = vrcp.f32 %v2778_v36  ;;  %v3137_v36 = vld [vmem:[%s8993_s11 + $0x8] sm:$0xff] }
 0x912   :  { %v2771_v24 = vpop.xlane.xlu1 %2770 }
 0x913   :  { %v2779_v11 = vmax.f32 %v2771_v24, 1e-30  ;;  %v3138_v24 = vld [vmem:[%s8993_s11 + $0x10] sm:$0xff] }
 0x915   :  { %5975 = vrcp.f32 %v2779_v11  ;;  %v3139_v11 = vld [vmem:[%s8993_s11 + $0x18] sm:$0xff] }
 0x91a   :  { %v5972_v38 = vpop.eup %5971 }
 0x91b   :  { %v2791_v56 = vmul.f32 %v5972_v38, %v2745_v48  ;;  %v5974_v62 = vpop.eup %5973  ;;  %v3141_v38 = vld [vmem:[%s8993_s11 + $0x28] sm:$0xff] }
 0x91c   :  { %v2793_v22 = vmul.f32 %v5974_v62, %v8011_v0  ;;  %v3149_v0 = vld [vmem:[%s8994_s12 + $0x28] sm:$0xff] }
 0x91d   :  { %v5626_v35 = vpack.c.bf16 %v2791_v56, %v2789_v60  ;;  %3179 = vperm.xlu1 %5839, %v3149_v0   ;;  %v3142_v60 = vld [vmem:[%s8993_s11 + $0x30] sm:$0xff]  ;;  %v3143_v56 = vld [vmem:[%s8993_s11 + $0x38] sm:$0xff]  ;;  %s8246_s11 = sld [smem:[#allocation7 + $0x80]] }
 0x91f   :  { %v5976_v3 = vpop.eup %5975  ;;  %5628 = vmatpush3.bf16.xpose.msk.msra.mxu0 %vm7131_vm14, %v5626_v35 }
 0x920   :  { %v2795_v41 = vmul.f32 %v5976_v3, %v2747_v53 }
 0x922   :  { %v5630_v15 = vpack.c.bf16 %v2795_v41, %v2793_v22 }
 0x924   :  { %5632 = vmatpush3.bf16.xpose.msk.msra.mxu1 %vm7131_vm14, %v5630_v15 }
 0x925   :  { %5641 = vmatprep.subr.bf16.mxu1 %v9438_v21 }
 0x926   :  { %5496 = vmatmul.mubr.msk.f32.vlgmr.msra.gmra.mrb[18].mxu0 %vm1181_vm2, %v9442_v31  ;;  %v3175_v31 = vpop.permute.xlu0 %3174 }
 0x927   :  { %5513 = vmatprep.mubr.msk.f32.mxu0 %vm1682_vm15, %v3136_v50 }
 0x92b   :  { %5503 = vmatmul.mubr.msk.f32.vlgmr.msra.gmra.mrb[10].mxu1 %vm1181_vm2, %v7751_v12  ;;  %v3150_v12 = vld [vmem:[%s8994_s12 + $0x30] sm:$0xff]  ;;  %s8460_s12 = sld [smem:[#allocation7 + $0x7]] }
 0x92c   :  { %5529 = vmatprep.mubr.msk.f32.mxu1 %vm6101_vm3, %v9440_v45  ;;  %3184 = vperm.xlu1 %5839, %v3150_v12  }
 0x930   :  { %3189 = vperm.xlu1 %5839, %v3151_v52  }
 0x934   :  { %3164 = vperm.xlu1 %5839, %v3146_v7  }
 0x938   :  { %3169 = vperm.xlu1 %5839, %v3147_v20  }
 0x99c   :  { %v3180_v41 = vpop.permute.xlu1 %3179 }
 0x9ab   :  { %v3185_v52 = vpop.permute.xlu1 %3184 }
 0x9af   :  { %v3190_v7 = vpop.permute.xlu1 %3189 }
 0x9b8   :  { %v2871_v48 = vpop.f32.mrb[6].mxu1 }
 0x9b9   :  { %v5483_v55 = vpop.f32.mrb[7].mxu1  ;;  %v3116_v5 = vmin.f32 %v2871_v48, 0.0  ;;  %vm3112_vm7 = vcmp.gt.f32.partialorder %v2871_v48, 0.0 }
 0x9ba   :  { %v8117_v55 = vpop.permute.xlu1 %3164 }
 0x9bb   :  { %v3120_v53 = vmul.f32 1.442695, %v3116_v5 }
 0x9bd   :  { %5977 = vpow2.f32 %v3120_v53 }
 0x9be   :  { %v8119_v5 = vpop.permute.xlu1 %3169 }
 0x9c7   :  { %v5978_v27 = vpop.eup %5977 }
 0x9c8   :  { %v5254_v14 = vadd.f32 -1.0, %v5978_v27  ;;  %v9448_v27 = vmov 10  }
 0x9ca   :  { %v3132_v51 = vsel %vm3112_vm7, %v2871_v48, %v5254_v14  ;;  %v9443_v48 = vmov 3   ;;  %v9449_v14 = vmov 4  }
 0x9db   :  { %v2950_v6 = vpop.f32.mrb[8].mxu1 }
 0x9dc   :  { %v3117_v23 = vmin.f32 %v2950_v6, 0.0  ;;  %v5490_v34 = vpop.f32.mrb[9].mxu1  ;;  %vm3113_vm12 = vcmp.gt.f32.partialorder %v2950_v6, 0.0 }
 0x9dd   :  { %v9446_v34 = vmov 9  }
 0x9de   :  { %v3122_v32 = vmul.f32 1.442695, %v3117_v23  ;;  %v9445_v23 = vmov 1  }
 0x9e0   :  { %5979 = vpow2.f32 %v3122_v32  ;;  %v9447_v32 = vmov 2  }
 0x9ea   :  { %v5980_v42 = vpop.eup %5979 }
 0x9eb   :  { %v5255_v57 = vadd.f32 -1.0, %v5980_v42  ;;  %v9450_v42 = vmov 11  }
 0x9ed   :  { %v3133_v16 = vsel %vm3113_vm12, %v2950_v6, %v5255_v57  ;;  %v9444_v6 = vmov 8   ;;  %v9451_v57 = vmov 5  }
 0x9ee   :  { %v5633_v39 = vpack.c.bf16 %v3133_v16, %v3132_v51  ;;  %v9452_v51 = vmov 12   ;;  %v9453_v16 = vmov 6  }
 0x9f0   :  { %5634 = vmatprep.subr.bf16.mxu0 %v5633_v39 }
 0x9f1   :  { %5636 = vmatpush3.bf16.msra.mxu0 %v5633_v39  ;;  %v9454_v39 = vmov 16  }
 0x9f9   :  { %v3029_v29 = vpop.f32.mrb[18].mxu0 }
 0x9fa   :  { %v3118_v59 = vmin.f32 %v3029_v29, 0.0  ;;  %v5497_v26 = vpop.f32.mrb[19].mxu0  ;;  %vm3114_vm8 = vcmp.gt.f32.partialorder %v3029_v29, 0.0 }
 0x9fb   :  { %v9457_v26 = vmov 13  }
 0x9fc   :  { %v3124_v13 = vmul.f32 1.442695, %v3118_v59  ;;  %v9456_v59 = vmov 17  }
 0x9fe   :  { %v3108_v17 = vpop.f32.mrb[10].mxu1  ;;  %5981 = vpow2.f32 %v3124_v13  ;;  %v9458_v13 = vmov 25  }
 0x9ff   :  { %v3119_v61 = vmin.f32 %v3108_v17, 0.0  ;;  %v5504_v1 = vpop.f32.mrb[11].mxu1  ;;  %vm3115_vm9 = vcmp.gt.f32.partialorder %v3108_v17, 0.0 }
 0xa00   :  { %v9461_v1 = vmov 18  }
 0xa01   :  { %v3126_v9 = vmul.f32 1.442695, %v3119_v61  ;;  %v9460_v61 = vmov 14  }
 0xa03   :  { %5983 = vpow2.f32 %v3126_v9  ;;  %v9462_v9 = vmov 26  }
 0xa08   :  { %v5982_v2 = vpop.eup %5981 }
 0xa09   :  { %v5256_v37 = vadd.f32 -1.0, %v5982_v2  ;;  %v9463_v2 = vmov 19  }
 0xa0b   :  { %v3134_v10 = vsel %vm3114_vm8, %v3029_v29, %v5256_v37  ;;  %v9455_v29 = vmov 7   ;;  %v9464_v37 = vmov 15  }
 0xa0d   :  { %v5984_v54 = vpop.eup %5983 }
 0xa0e   :  { %v5257_v25 = vadd.f32 -1.0, %v5984_v54  ;;  %v9465_v54 = vmov 28  }
 0xa10   :  { %v3135_v63 = vsel %vm3115_vm9, %v3108_v17, %v5257_v25  ;;  %v9459_v17 = vmov 24   ;;  %v9466_v25 = vmov 27  }
 0xa11   :  { %v5637_v33 = vpack.c.bf16 %v3135_v63, %v3134_v10  ;;  %v9467_v10 = vmov 22  }
 0xa13   :  { %5638 = vmatprep.subr.bf16.mxu0 %v5637_v33 }
 0xa14   :  { %5640 = vmatpush3.bf16.msra.mxu0 %v5637_v33  ;;  %v9468_v33 = vmov 20  }
 0xa15   :  { %5649 = vmatprep.subr.bf16.mxu0 %v9438_v21 }
 0xa17   :  { %5514 = vmatmul.mubr.msk.f32.vlgmr.msra.gmra.mrb[20].mxu0 %vm1682_vm15, %v3137_v36  ;;  %v9469_v36 = vmov 21  }
 0xa18   :  { %5516 = vmatprep.mubr.msk.f32.mxu0 %vm1682_vm15, %v3138_v24  ;;  %v9470_v24 = vmov 29  }
 0xa1b   :  { %5517 = vmatmul.mubr.msk.f32.gmra.mrb[22].mxu0 %vm1682_vm15, %v3139_v11  ;;  %v9471_v11 = vmov 30  }
 0xa1c   :  { %5519 = vmatprep.mubr.msk.f32.mxu0 %vm1682_vm15, %v3140_v30  ;;  %v9472_v30 = vmov 23  }
 0xa1f   :  { %5520 = vmatmul.mubr.msk.f32.gmra.mrb[24].mxu0 %vm1682_vm15, %v3141_v38  ;;  %v8219_v38 = vpop.permute.xlu0 %3154 }
 0xa20   :  { %5522 = vmatprep.mubr.msk.f32.mxu0 %vm1682_vm15, %v3142_v60 }
 0xa23   :  { %5523 = vmatmul.mubr.msk.f32.gmra.mrb[26].mxu0 %vm1682_vm15, %v3143_v56  ;;  %v3160_v60 = vpop.permute.xlu0 %3159 }
 0xa24   :  { %5543 = vmatprep.mubr.msk.f32.mxu0 %vm6101_vm3, %v9440_v45 }
 0xaea   :  { %v8108_v62 = vpop.f32.mrb[20].mxu0 }
 0xaeb   :  { %v8110_v35 = vpop.f32.mrb[21].mxu0  ;;  %v8230_v56 = vadd.f32 %v8108_v62, %v3160_v60 }
 0xaed   :  { %9473 = vst [vmem:[#allocation12_spill] sm:$0xff] %v8230_v56 }
 0xaee   :  { %v8112_v3 = vpop.f32.mrb[22].mxu0 }
 0xaef   :  { %v8114_v22 = vpop.f32.mrb[23].mxu0 }
 0xaf2   :  { %v5521_v15 = vpop.f32.mrb[24].mxu0 }
 0xaf3   :  { %v3302_v50 = vpop.f32.mrb[25].mxu0  ;;  %v3308_v18 = vadd.f32 %v5521_v15, %v3180_v41 }
 0xaf4   :  { %v3303_v0 = vadd.f32 %v3302_v50, %v3175_v31  ;;  %v8242_v31 = vrot.slane %v8230_v56, %v9302_v44 }
 0xaf6   :  { %v5524_v40 = vpop.f32.mrb[26].mxu0  ;;  %3321 = vxpose.xlu1.b32.start [1/4] (short) (narrow) %v3303_v0, 16 }
 0xaf7   :  { %v3312_v12 = vpop.f32.mrb[27].mxu0  ;;  %v3318_v20 = vadd.f32 %v5524_v40, %v3190_v7  ;;  %v9474_v40 = vmov 31  }
 0xaf8   :  { %v3313_v19 = vadd.f32 %v3312_v12, %v3185_v52  ;;  %v8257_v12 = vrot.slane %v8230_v56, %v9305_v28 }
 0xafa   :  { %3322 = vxpose.xlu1.b32.cont [2/4] (short) (narrow) %v3308_v18, 16 }
 0xafe   :  { %3323 = vxpose.xlu1.b32.cont [3/4] (short) (narrow) %v3313_v19, 16 }
 0xb02   :  { %3324 = vxpose.xlu1.b32.end [4/4] (short) (narrow) %v3318_v20, 16  ;;  %v8269_v20 = vrot.slane %v8230_v56, %v9308_v43 }
 0xb20   :  { %5842 = vset.pattern.permute.xlu1 %v9443_v48 }
 0xb76   :  { %v8121_v53 = vpop.trf.xlu1 }
 0xb77   :  { %3416 = vperm.xlu1 %5842, %v8121_v53   ;;  %3355 = vperm.xlu0 %5838, %v8121_v53  }
 0xb7a   :  { %v8173_v63 = vpop.trf.xlu1 }
 0xb7b   :  { %5845 = vset.pattern.permute.xlu1 %v9444_v6  ;;  %5840 = vset.pattern.permute.xlu0 %v9445_v23 }
 0xb7c   :  { %3516 = vperm.xlu1 %5845, %v8121_v53   ;;  %3376 = vperm.xlu0 %5840, %v8121_v53  }
 0xb80   :  { %5846 = vset.pattern.permute.xlu1 %v9446_v34  ;;  %5841 = vset.pattern.permute.xlu0 %v9447_v32 }
 0xb81   :  { %3536 = vperm.xlu1 %5846, %v8121_v53   ;;  %3396 = vperm.xlu0 %5841, %v8121_v53  }
 0xb85   :  { %5848 = vset.pattern.permute.xlu1 %v9448_v27  ;;  %5843 = vset.pattern.permute.xlu0 %v9449_v14 }
 0xb86   :  { %3556 = vperm.xlu1 %5848, %v8121_v53   ;;  %3436 = vperm.xlu0 %5843, %v8121_v53  }
 0xb8a   :  { %5850 = vset.pattern.permute.xlu1 %v9450_v42  ;;  %5844 = vset.pattern.permute.xlu0 %v9451_v57 }
 0xb8b   :  { %3576 = vperm.xlu1 %5850, %v8121_v53   ;;  %3456 = vperm.xlu0 %5844, %v8121_v53  }
 0xb8f   :  { %5851 = vset.pattern.permute.xlu1 %v9452_v51  ;;  %5847 = vset.pattern.permute.xlu0 %v9453_v16 }
 0xb90   :  { %3596 = vperm.xlu1 %5851, %v8121_v53   ;;  %3476 = vperm.xlu0 %5847, %v8121_v53  }
 0xb94   :  { %5853 = vset.pattern.permute.xlu1 %v9454_v39  ;;  %5849 = vset.pattern.permute.xlu0 %v9455_v29 }
 0xb95   :  { %3676 = vperm.xlu1 %5853, %v8121_v53   ;;  %3496 = vperm.xlu0 %5849, %v8121_v53  }
 0xb99   :  { %5854 = vset.pattern.permute.xlu1 %v9456_v59  ;;  %5852 = vset.pattern.permute.xlu0 %v9457_v26 }
 0xb9a   :  { %3696 = vperm.xlu1 %5854, %v8121_v53   ;;  %3616 = vperm.xlu0 %5852, %v8121_v53  }
 0xb9e   :  { %5856 = vset.pattern.permute.xlu1 %v9458_v13  ;;  %5855 = vset.pattern.permute.xlu0 %v9459_v17 }
 0xb9f   :  { %3856 = vperm.xlu1 %5856, %v8121_v53   ;;  %3836 = vperm.xlu0 %5855, %v8121_v53  }
 0xba3   :  { %5857 = vset.pattern.permute.xlu1 %v9460_v61  ;;  %5858 = vset.pattern.permute.xlu0 %v9461_v1 }
 0xba4   :  { %3636 = vperm.xlu1 %5857, %v8121_v53   ;;  %3716 = vperm.xlu0 %5858, %v8121_v53  }
 0xba8   :  { %5859 = vset.pattern.permute.xlu1 %v9462_v9  ;;  %5861 = vset.pattern.permute.xlu0 %v9463_v2 }
 0xba9   :  { %3876 = vperm.xlu1 %5859, %v8121_v53   ;;  %3736 = vperm.xlu0 %5861, %v8121_v53  }
 0xbad   :  { %5860 = vset.pattern.permute.xlu1 %v9464_v37  ;;  %5864 = vset.pattern.permute.xlu0 %v9465_v54 }
 0xbae   :  { %3656 = vperm.xlu1 %5860, %v8121_v53   ;;  %3916 = vperm.xlu0 %5864, %v8121_v53  }
 0xbb2   :  { %5862 = vset.pattern.permute.xlu1 %v9466_v25  ;;  %5867 = vset.pattern.permute.xlu0 %v9467_v10 }
 0xbb3   :  { %3896 = vperm.xlu1 %5862, %v8121_v53   ;;  %3796 = vperm.xlu0 %5867, %v8121_v53  }
 0xbb7   :  { %5863 = vset.pattern.permute.xlu1 %v9468_v33  ;;  %5870 = vset.pattern.permute.xlu0 %v9250_v8 }
 0xbb8   :  { %3756 = vperm.xlu1 %5863, %v8121_v53   ;;  %3360 = vperm.xlu0 %5870, %v8173_v63  }
 0xbbc   :  { %5865 = vset.pattern.permute.xlu1 %v9469_v36  ;;  %5871 = vset.pattern.permute.xlu0 %v9445_v23 }
 0xbbd   :  { %3776 = vperm.xlu1 %5865, %v8121_v53   ;;  %3380 = vperm.xlu0 %5871, %v8173_v63  }
 0xbc1   :  { %5866 = vset.pattern.permute.xlu1 %v9470_v24  ;;  %5872 = vset.pattern.permute.xlu0 %v9447_v32 }
 0xbc2   :  { %3936 = vperm.xlu1 %5866, %v8121_v53   ;;  %3400 = vperm.xlu0 %5872, %v8173_v63  }
 0xbc6   :  { %5868 = vset.pattern.permute.xlu1 %v9471_v11  ;;  %5873 = vset.pattern.permute.xlu0 %v9443_v48  ;;  %v9168_v48 = vstv %s8246_s11 }
 0xbc7   :  { %3956 = vperm.xlu1 %5868, %v8121_v53   ;;  %3420 = vperm.xlu0 %5873, %v8173_v63  }
 0xbcb   :  { %5869 = vset.pattern.permute.xlu1 %v9472_v30  ;;  %5874 = vset.pattern.permute.xlu0 %v9449_v14 }
 0xbcc   :  { %3816 = vperm.xlu1 %5869, %v8121_v53   ;;  %3440 = vperm.xlu0 %5874, %v8173_v63  }
 0xbd0   :  { %5875 = vset.pattern.permute.xlu1 %v9451_v57  ;;  %5876 = vset.pattern.permute.xlu0 %v9444_v6  ;;  %v9170_v6 = vstv %s8249_s17 }
 0xbd1   :  { %3460 = vperm.xlu1 %5875, %v8173_v63   ;;  %3520 = vperm.xlu0 %5876, %v8173_v63  }
 0xbd5   :  { %5877 = vset.pattern.permute.xlu1 %v9446_v34  ;;  %5879 = vset.pattern.permute.xlu0 %v9448_v27 }
 0xbd6   :  { %3540 = vperm.xlu1 %5877, %v8173_v63   ;;  %3560 = vperm.xlu0 %5879, %v8173_v63  }
 0xbda   :  { %5878 = vset.pattern.permute.xlu1 %v9453_v16  ;;  %5881 = vset.pattern.permute.xlu0 %v9450_v42  ;;  %v9167_v16 = vstv %s8262_s19 }
 0xbdb   :  { %3480 = vperm.xlu1 %5878, %v8173_v63   ;;  %3580 = vperm.xlu0 %5881, %v8173_v63  }
 0xbdf   :  { %5880 = vset.pattern.permute.xlu1 %v9455_v29  ;;  %5884 = vset.pattern.permute.xlu0 %v9454_v39  ;;  %v8287_v29 = vrot.slane %v8230_v56, %v9309_v46 }
 0xbe0   :  { %3500 = vperm.xlu1 %5880, %v8173_v63   ;;  %3680 = vperm.xlu0 %5884, %v8173_v63  }
 0xbe4   :  { %5882 = vset.pattern.permute.xlu1 %v9452_v51  ;;  %5887 = vset.pattern.permute.xlu0 %v9458_v13 }
 0xbe5   :  { %3600 = vperm.xlu1 %5882, %v8173_v63   ;;  %3860 = vperm.xlu0 %5887, %v8173_v63  }
 0xbe9   :  { %5883 = vset.pattern.permute.xlu1 %v9457_v26  ;;  %5890 = vset.pattern.permute.xlu0 %v9462_v9  ;;  %v9166_v9 = vstv %s8276_s21 }
 0xbea   :  { %3620 = vperm.xlu1 %5883, %v8173_v63   ;;  %3880 = vperm.xlu0 %5890, %v8173_v63  }
 0xbee   :  { %5885 = vset.pattern.permute.xlu1 %v9456_v59  ;;  %5893 = vset.pattern.permute.xlu0 %v9466_v25 }
 0xbef   :  { %3700 = vperm.xlu1 %5885, %v8173_v63   ;;  %3900 = vperm.xlu0 %5893, %v8173_v63  }
 0xbf3   :  { %5886 = vset.pattern.permute.xlu1 %v9459_v17  ;;  %5896 = vset.pattern.permute.xlu0 %v9469_v36 }
 0xbf4   :  { %3840 = vperm.xlu1 %5886, %v8173_v63   ;;  %3780 = vperm.xlu0 %5896, %v8173_v63  }
 0xbf6   :  { %v8232_v41 = vpop.permute.xlu0 %3355  ;;  %v8234_v15 = vpop.permute.xlu1 %3416 }
 0xbf8   :  { %5888 = vset.pattern.permute.xlu1 %v9460_v61  ;;  %5899 = vset.pattern.permute.xlu0 %v9471_v11 }
 0xbf9   :  { %3640 = vperm.xlu1 %5888, %v8173_v63   ;;  %3960 = vperm.xlu0 %5899, %v8173_v63  }
 0xbfb   :  { %v8244_v50 = vpop.permute.xlu0 %3376  ;;  %v3517_v62 = vpop.permute.xlu1 %3516 }
 0xbfc   :  { %v3527_v0 = vadd.f32 %v8242_v31, %v3517_v62 }
 0xbfd   :  { %5889 = vset.pattern.permute.xlu1 %v9461_v1  ;;  %5900 = vset.pattern.permute.xlu0 %v9474_v40 }
 0xbfe   :  { %3720 = vperm.xlu1 %5889, %v8173_v63   ;;  %3976 = vperm.xlu0 %5900, %v8121_v53   ;;  %v3531_v18 = vmul.f32 0.2, %v3527_v0  ;;  %vm3529_vm10 = vcmp.ge.f32.partialorder %v3527_v0, 0.0 }
 0xc00   :  { %v8259_v52 = vpop.permute.xlu0 %3396  ;;  %v3537_v19 = vpop.permute.xlu1 %3536  ;;  %v3533_v53 = vsel %vm3529_vm10, %v3527_v0, %v3531_v18  ;;  %v9165_v0 = vstv %s8292_s23 }
 0xc01   :  { %v3547_v7 = vadd.f32 %v8257_v12, %v3537_v19  ;;  %v4043_v42 = vmul.f32 %v9168_v48, %v3533_v53 }
 0xc02   :  { %5891 = vset.pattern.permute.xlu1 %v9464_v37  ;;  %5904 = vset.pattern.permute.xlu0 %v9250_v8  ;;  %v8301_v37 = vrot.slane %v8230_v56, %v9402_v47 }
 0xc03   :  { %vm3549_vm11 = vcmp.ge.f32.partialorder %v3547_v7, 0.0  ;;  %3660 = vperm.xlu1 %5891, %v8173_v63   ;;  %v3551_v23 = vmul.f32 0.2, %v3547_v7 }
 0xc05   :  { %v8273_v34 = vpop.permute.xlu0 %3436  ;;  %v3557_v32 = vpop.permute.xlu1 %3556  ;;  %v3553_v27 = vsel %vm3549_vm11, %v3547_v7, %v3551_v23 }
 0xc06   :  { %v3567_v14 = vadd.f32 %v8269_v20, %v3557_v32  ;;  %v4047_v57 = vmul.f32 %v9170_v6, %v3553_v27 }
 0xc07   :  { %5892 = vset.pattern.permute.xlu1 %v9463_v2 }
 0xc08   :  { %vm3569_vm13 = vcmp.ge.f32.partialorder %v3567_v14, 0.0  ;;  %3740 = vperm.xlu1 %5892, %v8173_v63   ;;  %v4049_v51 = vadd.f32 %v4047_v57, %v4043_v42  ;;  %v3571_v39 = vmul.f32 0.2, %v3567_v14 }
 0xc0a   :  { %v8289_v59 = vpop.permute.xlu0 %3456  ;;  %v3577_v26 = vpop.permute.xlu1 %3576  ;;  %v3573_v13 = vsel %vm3569_vm13, %v3567_v14, %v3571_v39 }
 0xc0b   :  { %v3587_v17 = vadd.f32 %v8287_v29, %v3577_v26  ;;  %v4053_v61 = vmul.f32 %v9167_v16, %v3573_v13  ;;  %v9163_v26 = vstv %s8331_s20 }
 0xc0c   :  { %5894 = vset.pattern.permute.xlu1 %v9468_v33 }
 0xc0d   :  { %vm3589_vm1 = vcmp.ge.f32.partialorder %v3587_v17, 0.0  ;;  %3760 = vperm.xlu1 %5894, %v8173_v63   ;;  %v4055_v1 = vadd.f32 %v4053_v61, %v4049_v51  ;;  %v3591_v2 = vmul.f32 0.2, %v3587_v17 }
 0xc0f   :  { %v8303_v25 = vpop.permute.xlu0 %3476  ;;  %v3597_v36 = vpop.permute.xlu1 %3596  ;;  %v3593_v11 = vsel %vm3589_vm1, %v3587_v17, %v3591_v2 }
 0xc10   :  { %v3607_v60 = vadd.f32 %v8301_v37, %v3597_v36  ;;  %v4059_v33 = vmul.f32 %v9166_v9, %v3593_v11 }
 0xc11   :  { %5895 = vset.pattern.permute.xlu1 %v9465_v54  ;;  %v8323_v54 = vadd.f32 %v8112_v3, %v8119_v5 }
 0xc12   :  { %vm3609_vm4 = vcmp.ge.f32.partialorder %v3607_v60, 0.0  ;;  %3920 = vperm.xlu1 %5895, %v8173_v63   ;;  %v4061_v62 = vadd.f32 %v4059_v33, %v4055_v1  ;;  %v3611_v18 = vmul.f32 0.2, %v3607_v60 }
 0xc13   :  { %v8341_v3 = vrot.slane %v8323_v54, %v9302_v44  ;;  %v8345_v5 = vrot.slane %v8323_v54, %v9305_v28 }
 0xc14   :  { %v8311_v19 = vpop.permute.xlu0 %3496  ;;  %v8313_v7 = vpop.permute.xlu1 %3676  ;;  %v3613_v53 = vsel %vm3609_vm4, %v3607_v60, %v3611_v18 }
 0xc15   :  { %v4065_v23 = vmul.f32 %v9165_v0, %v3613_v53 }
 0xc16   :  { %5897 = vset.pattern.permute.xlu1 %v9470_v24  ;;  %v8337_v24 = vadd.f32 %v8110_v35, %v8219_v38  ;;  %v9164_v38 = vstv %s8329_s7 }
 0xc17   :  { %3940 = vperm.xlu1 %5897, %v8173_v63   ;;  %v8319_v32 = vadd.f32 %v4065_v23, %v4061_v62  ;;  %v8391_v23 = vrot.slane %v8323_v54, %v9308_v43 }
 0xc18   :  { %9475 = vst [vmem:[#allocation26_spill] sm:$0xff] %v8337_v24  ;;  %v8352_v35 = vrot.slane %v8337_v24, %v9305_v28  ;;  %v8359_v17 = vrot.slane %v8337_v24, %v9302_v44  ;;  %v8367_v61 = vrot.slane %v8337_v24, %v9308_v43  ;;  %v8451_v48 = vrot.slane %v8337_v24, %v9419_v4 }
 0xc19   :  { %v8325_v27 = vpop.permute.xlu0 %3616  ;;  %v8327_v14 = vpop.permute.xlu1 %3696  ;;  %9476 = vst [vmem:[#allocation29_spill] sm:$0xff] %v8391_v23 }
 0xc1a   :  { %v3367_v33 = vadd.f32 %v8359_v17, %v8232_v41 }
 0xc1b   :  { %5898 = vset.pattern.permute.xlu1 %v9467_v10 }
 0xc1c   :  { %3800 = vperm.xlu1 %5898, %v8173_v63   ;;  %vm3369_vm12 = vcmp.ge.f32.partialorder %v3367_v33, 0.0 }
 0xc1e   :  { %v3837_v42 = vpop.permute.xlu0 %3836  ;;  %v3857_v57 = vpop.permute.xlu1 %3856 }
 0xc1f   :  { %v3847_v51 = vadd.f32 %v8341_v3, %v3837_v42  ;;  %v3867_v10 = vadd.f32 %v8345_v5, %v3857_v57  ;;  %v8397_v57 = vrot.slane %v8337_v24, %v9309_v46 }
 0xc20   :  { %5901 = vset.pattern.permute.xlu1 %v9472_v30  ;;  %v3387_v30 = vadd.f32 %v8352_v35, %v8244_v50  ;;  %v3407_v50 = vadd.f32 %v8367_v61, %v8259_v52  ;;  %v3371_v52 = vmul.f32 0.2, %v3367_v33 }
 0xc21   :  { %vm3849_vm5 = vcmp.ge.f32.partialorder %v3847_v51, 0.0  ;;  %v3851_v39 = vmul.f32 0.2, %v3847_v51  ;;  %3820 = vperm.xlu1 %5901, %v8173_v63   ;;  %vm3869_vm6 = vcmp.ge.f32.partialorder %v3867_v10, 0.0  ;;  %v3871_v13 = vmul.f32 0.2, %v3867_v10 }
 0xc22   :  { %v3391_v18 = vmul.f32 0.2, %v3387_v30  ;;  %vm3389_vm7 = vcmp.ge.f32.partialorder %v3387_v30, 0.0  ;;  %vm3409_vm8 = vcmp.ge.f32.partialorder %v3407_v50, 0.0 }
 0xc23   :  { %v3853_v1 = vsel %vm3849_vm5, %v3847_v51, %v3851_v39  ;;  %v8369_v2 = vpop.permute.xlu0 %3716  ;;  %v8371_v36 = vpop.permute.xlu1 %3636  ;;  %v3873_v60 = vsel %vm3869_vm6, %v3867_v10, %v3871_v13  ;;  %v8402_v51 = vrot.slane %v8337_v24, %v9402_v47  ;;  %v3427_v10 = vadd.f32 %v8397_v57, %v8234_v15 }
 0xc24   :  { %v4135_v11 = vmul.f32 %v9164_v38, %v3853_v1  ;;  %v4139_v62 = vmul.f32 %v9163_v26, %v3873_v60  ;;  %v9173_v39 = vstv %s8361_s13  ;;  %v3393_v13 = vsel %vm3389_vm7, %v3387_v30, %v3391_v18 }
 0xc25   :  { %5902 = vset.pattern.permute.xlu1 %v9474_v40  ;;  %v3411_v40 = vmul.f32 0.2, %v3407_v50  ;;  %v9172_v1 = vstv %s8373_s28  ;;  %v9169_v60 = vstv %s8377_s29  ;;  %v9171_v26 = vstv %s8381_s3 }
 0xc26   :  { %3980 = vperm.xlu1 %5902, %v8173_v63   ;;  %v4141_v53 = vadd.f32 %v4139_v62, %v4135_v11  ;;  %v8413_v11 = vrot.slane %v8337_v24, %v9403_v58  ;;  %v3447_v15 = vadd.f32 %v8402_v51, %v8273_v34  ;;  %v4001_v0 = vmul.f32 %v9173_v39, %v3393_v13 }
 0xc27   :  { %v3413_v38 = vsel %vm3409_vm8, %v3407_v50, %v3411_v40  ;;  %v3431_v16 = vmul.f32 0.2, %v3427_v10  ;;  %v8439_v40 = vadd.f32 %v8114_v22, %v8117_v55  ;;  %vm3429_vm10 = vcmp.ge.f32.partialorder %v3427_v10, 0.0 }
 0xc28   :  { %v8393_v41 = vpop.permute.xlu0 %3736  ;;  %v3877_v42 = vpop.permute.xlu1 %3876  ;;  %vm3449_vm11 = vcmp.ge.f32.partialorder %v3447_v15, 0.0 }
 0xc29   :  { %v3887_v63 = vadd.f32 %v8391_v23, %v3877_v42  ;;  %v3373_v42 = vsel %vm3369_vm12, %v3367_v33, %v3371_v52  ;;  %v3467_v33 = vadd.f32 %v8413_v11, %v8289_v59  ;;  %v9477_v52 = vld [vmem:[#allocation24_spill] sm:$0xff]  ;;  %9478 = vst [vmem:[#allocation37_spill] sm:$0xff] %v8439_v40  ;;  %v9189_v23 = vstv %s8512_s6 }
 0xc2a   :  { %5903 = vset.pattern.permute.xlu1 %v9250_v8  ;;  %v8433_v50 = vrot.slane %v8337_v24, %v9477_v52  ;;  %v3997_v13 = vmul.f32 %v9172_v1, %v3373_v42  ;;  %v9174_v42 = vstv %s8405_s0 }
 0xc2b   :  { %vm3889_vm9 = vcmp.ge.f32.partialorder %v3887_v63, 0.0  ;;  %v3891_v62 = vmul.f32 0.2, %v3887_v63  ;;  %v3471_v6 = vmul.f32 0.2, %v3467_v33  ;;  %vm3469_vm13 = vcmp.ge.f32.partialorder %v3467_v33, 0.0 }
 0xc2c   :  { %v3487_v59 = vadd.f32 %v8433_v50, %v8303_v25  ;;  %v4003_v22 = vadd.f32 %v4001_v0, %v3997_v13  ;;  %v3507_v25 = vadd.f32 %v8451_v48, %v8311_v19  ;;  %v8466_v0 = vrot.slane %v8439_v40, %v9302_v44 }
 0xc2d   :  { %v8421_v30 = vpop.permute.xlu0 %3916  ;;  %v8423_v18 = vpop.permute.xlu1 %3656  ;;  %v3893_v9 = vsel %vm3889_vm9, %v3887_v63, %v3891_v62  ;;  %v4007_v63 = vmul.f32 %v9171_v26, %v3413_v38  ;;  %v3451_v62 = vmul.f32 0.2, %v3447_v15  ;;  %v3473_v1 = vsel %vm3469_vm13, %v3467_v33, %v3471_v6 }
 0xc2e   :  { %v4145_v34 = vmul.f32 %v9169_v60, %v3893_v9  ;;  %v3433_v60 = vsel %vm3429_vm10, %v3427_v10, %v3431_v16  ;;  %v3491_v16 = vmul.f32 0.2, %v3487_v59  ;;  %v8474_v10 = vrot.slane %v8439_v40, %v9305_v28 }
 0xc2f   :  { %v4009_v26 = vadd.f32 %v4007_v63, %v4003_v22  ;;  %v3453_v13 = vsel %vm3449_vm11, %v3447_v15, %v3451_v62  ;;  %v4013_v19 = vmul.f32 %v9174_v42, %v3433_v60  ;;  %v9177_v63 = vstv %s8427_s30 }
 0xc30   :  { %v8453_v9 = vadd.f32 %v4145_v34, %v4141_v53  ;;  %v4179_v53 = vld [vmem:[%s9479_s5] sm:$0x3]  ;;  %v9175_v34 = vstv %s8417_s4  ;;  %vm3489_vm1 = vcmp.ge.f32.partialorder %v3487_v59, 0.0  ;;  %v8481_v22 = vrot.slane %v8439_v40, %v9308_v43 }
 0xc31   :  { %v3511_v39 = vmul.f32 0.2, %v3507_v25  ;;  %v3707_v15 = vadd.f32 %v8474_v10, %v8327_v14  ;;  %vm4181_vm4 = vnez %v4179_v53  ;;  %v4015_v60 = vadd.f32 %v4013_v19, %v4009_v26 }
 0xc32   :  { %v8455_v55 = vpop.permute.xlu0 %3796  ;;  %v8457_v38 = vpop.permute.xlu1 %3896  ;;  %v4019_v42 = vmul.f32 %v9175_v34, %v3453_v13  ;;  %vm3509_vm5 = vcmp.ge.f32.partialorder %v3507_v25, 0.0  ;;  %v8495_v43 = vrot.slane %v8439_v40, %v9309_v46  ;;  %v9179_v6 = vstv %s8445_s9 }
 0xc33   :  { %v3493_v33 = vsel %vm3489_vm1, %v3487_v59, %v3491_v16  ;;  %v3687_v14 = vadd.f32 %v8466_v0, %v8313_v7  ;;  %v3727_v26 = vadd.f32 %v8481_v22, %v8369_v2  ;;  %v4025_v53 = vmul.f32 %v9177_v63, %v3473_v1 }
 0xc34   :  { %9480 = vst [vmem:[#allocation39_spill] sm:$0xff] %v8495_v43  ;;  %v8508_v13 = vrot.slane %v8439_v40, %v9402_v47  ;;  %v4183_v19 = vsel %vm4181_vm4, 16843009, %v9250_v8  ;;  %v3513_v44 = vsel %vm3509_vm5, %v3507_v25, %v3511_v39  ;;  %v3711_v59 = vmul.f32 0.2, %v3707_v15 }
 0xc35   :  { %v3747_v7 = vadd.f32 %v8495_v43, %v8393_v41  ;;  %v4021_v16 = vadd.f32 %v4019_v42, %v4015_v60  ;;  %v4031_v2 = vmul.f32 %v9179_v6, %v3493_v33  ;;  %vm3709_vm6 = vcmp.ge.f32.partialorder %v3707_v15, 0.0 }
 0xc36   :  { %v8522_v63 = vrot.slane %v8439_v40, %v9403_v58  ;;  %v3691_v25 = vmul.f32 0.2, %v3687_v14  ;;  %v3731_v34 = vmul.f32 0.2, %v3727_v26  ;;  %v4185_v45 = vunpack.c.0.s8 %v4183_v19 }
 0xc37   :  { %v8487_v62 = vpop.permute.xlu0 %3360  ;;  %v3757_v28 = vpop.permute.xlu1 %3756  ;;  %v4027_v42 = vadd.f32 %v4025_v53, %v4021_v16  ;;  %v9481_v60 = vstv %s8460_s12  ;;  %vm3689_vm7 = vcmp.ge.f32.partialorder %v3687_v14, 0.0  ;;  %vm3729_vm12 = vcmp.ge.f32.partialorder %v3727_v26, 0.0 }
 0xc38   :  { %v3767_v41 = vadd.f32 %v8508_v13, %v3757_v28  ;;  %v4037_v33 = vmul.f32 %v9481_v60, %v3513_v44  ;;  %v9185_v6 = vstv %s8483_s1  ;;  %v3713_v24 = vsel %vm3709_vm6, %v3707_v15, %v3711_v59 }
 0xc39   :  { %v3751_v21 = vmul.f32 0.2, %v3747_v7  ;;  %vm3749_vm8 = vcmp.ge.f32.partialorder %v3747_v7, 0.0  ;;  %v4033_v43 = vadd.f32 %v4031_v2, %v4027_v42  ;;  %v3693_v28 = vsel %vm3689_vm7, %v3687_v14, %v3691_v25 }
 0xc3a   :  { %v9186_v53 = vstv %s8500_s2  ;;  %v3733_v19 = vsel %vm3729_vm12, %v3727_v26, %v3731_v34  ;;  %v3771_v44 = vmul.f32 0.2, %v3767_v41  ;;  %v4093_v15 = vmul.f32 %v9185_v6, %v3713_v24 }
 0xc3b   :  { %v8541_v59 = vrot.slane %v8439_v40, %v9477_v52  ;;  %vm3769_vm9 = vcmp.ge.f32.partialorder %v3767_v41, 0.0  ;;  %v3753_v2 = vsel %vm3749_vm8, %v3747_v7, %v3751_v21  ;;  %vm8544_vm10 = vcmp.ne.s32.totalorder %v4185_v45, 0 }
 0xc3c   :  { %v8518_v1 = vpop.permute.xlu0 %3380  ;;  %v3777_v39 = vpop.permute.xlu1 %3776  ;;  %v9485_v26 = vstv %s8491_s26  ;;  %v4099_v24 = vmul.f32 %v9186_v53, %v3733_v19  ;;  %v4105_v45 = vmul.f32 %v9189_v23, %v3753_v2  ;;  %v9192_v19 = vstv %s8530_s22 }
 0xc3d   :  { %v3787_v49 = vadd.f32 %v8522_v63, %v3777_v39  ;;  %9482 = vst [vmem:[#allocation28_spill] sm:$0xff] %v8541_v59  ;;  %v4039_v39 = vadd.f32 %v4037_v33, %v4033_v43  ;;  %v4089_v25 = vmul.f32 %v9485_v26, %v3693_v28  ;;  %v3807_v42 = vadd.f32 %v8541_v59, %v8455_v55 }
 0xc3e   :  { %v9188_v43 = vstv %s8524_s16  ;;  %v3773_v33 = vsel %vm3769_vm9, %v3767_v41, %v3771_v44 }
 0xc3f   :  { %v3791_v14 = vmul.f32 0.2, %v3787_v49  ;;  %vm3789_vm11 = vcmp.ge.f32.partialorder %v3787_v49, 0.0  ;;  %v4095_v21 = vadd.f32 %v4093_v15, %v4089_v25  ;;  %v8563_v28 = vsel %vm8544_vm10, %v4039_v39, -1e+30 }
 0xc40   :  { %v4111_v55 = vmul.f32 %v9188_v43, %v3773_v33  ;;  %v3811_v59 = vmul.f32 0.2, %v3807_v42  ;;  %v4201_v41 = vsel %vm1181_vm2, %v8563_v28, -inf  ;;  %vm3809_vm13 = vcmp.ge.f32.partialorder %v3807_v42, 0.0 }
 0xc41   :  { %v3401_v16 = vpop.permute.xlu0 %3400  ;;  %v8535_v60 = vpop.permute.xlu1 %3936  ;;  %v3793_v26 = vsel %vm3789_vm11, %v3787_v49, %v3791_v14  ;;  %v4101_v53 = vadd.f32 %v4099_v24, %v4095_v21  ;;  %v8576_v39 = vrot.slane %v8439_v40, %v9419_v4  ;;  %v9191_v24 = vstv %s8552_s8 }
 0xc42   :  { %v4117_v15 = vmul.f32 %v9192_v19, %v3793_v26  ;;  %v3813_v33 = vsel %vm3809_vm13, %v3807_v42, %v3811_v59  ;;  %v3408_v26 = vadd.f32 %v8367_v61, %v3401_v16  ;;  %v8596_v61 = vrot.slane %v8230_v56, %v9403_v58 }
 0xc43   :  { %v4107_v44 = vadd.f32 %v4105_v45, %v4101_v53  ;;  %v3388_v53 = vadd.f32 %v8352_v35, %v8518_v1  ;;  %v3368_v45 = vadd.f32 %v8359_v17, %v8487_v62  ;;  %v4123_v23 = vmul.f32 %v9191_v24, %v3813_v33 }
 0xc44   :  { %vm3410_vm6 = vcmp.ge.f32.partialorder %v3408_v26, 0.0  ;;  %v9491_v19 = vstv %s8417_s4  ;;  %s8737_s4 = sld [smem:[#allocation7 + $0x186]] }
 0xc45   :  { %v4113_v14 = vadd.f32 %v4111_v55, %v4107_v44  ;;  %vm3390_vm4 = vcmp.ge.f32.partialorder %v3388_v53, 0.0  ;;  %vm3370_vm5 = vcmp.ge.f32.partialorder %v3368_v45, 0.0 }
 0xc46   :  { %v3421_v7 = vpop.permute.xlu0 %3420  ;;  %v8559_v6 = vpop.permute.xlu1 %3956 }
 0xc47   :  { %v4119_v21 = vadd.f32 %v4117_v15, %v4113_v14  ;;  %v3428_v59 = vadd.f32 %v8397_v57, %v3421_v7  ;;  %v3372_v15 = vmul.f32 0.2, %v3368_v45  ;;  %v3412_v14 = vmul.f32 0.2, %v3408_v26 }
 0xc49   :  { %v4125_v1 = vadd.f32 %v4123_v23, %v4119_v21  ;;  %v3432_v33 = vmul.f32 0.2, %v3428_v59  ;;  %v3627_v23 = vadd.f32 %v8596_v61, %v8325_v27  ;;  %vm3430_vm7 = vcmp.ge.f32.partialorder %v3428_v59, 0.0 }
 0xc4a   :  { %4202 = vmax.xlane.f32.xlu1 %v4201_v41  ;;  %v9190_v41 = vstv %s8566_s27  ;;  %v8617_v21 = vrot.slane %v8230_v56, %v9419_v4  ;;  %v9487_v27 = vstv %s8361_s13 }
 0xc4b   :  { %v3441_v49 = vpop.permute.xlu0 %3440  ;;  %v3817_v2 = vpop.permute.xlu1 %3816  ;;  %vm3629_vm9 = vcmp.ge.f32.partialorder %v3627_v23, 0.0 }
 0xc4c   :  { %v3827_v25 = vadd.f32 %v8576_v39, %v3817_v2  ;;  %v3392_v2 = vmul.f32 0.2, %v3388_v53  ;;  %v3448_v17 = vadd.f32 %v8402_v51, %v3441_v49  ;;  %v8607_v51 = vrot.slane %v8230_v56, %v9477_v52 }
 0xc4d   :  { %v3374_v49 = vsel %vm3370_vm5, %v3368_v45, %v3372_v15  ;;  %v9489_v15 = vstv %s8381_s3  ;;  %s8684_s3 = sld [smem:[#allocation7 + $0x184]] }
 0xc4e   :  { %vm3829_vm1 = vcmp.ge.f32.partialorder %v3827_v25, 0.0  ;;  %v3831_v43 = vmul.f32 0.2, %v3827_v25  ;;  %v3394_v16 = vsel %vm3390_vm4, %v3388_v53, %v3392_v2  ;;  %v3452_v53 = vmul.f32 0.2, %v3448_v17 }
 0xc4f   :  { %vm3450_vm12 = vcmp.ge.f32.partialorder %v3448_v17, 0.0  ;;  %v3647_v2 = vadd.f32 %v8607_v51, %v8371_v36  ;;  %v4180_v36 = vld [vmem:[%s9479_s5 + $0x2] sm:$0x3]  ;;  %s9526_s5 = sld [smem:[#allocation54_spill]] }
 0xc50   :  { %v8588_v55 = vpop.permute.xlu0 %3520  ;;  %v3461_v44 = vpop.permute.xlu1 %3460  ;;  %v3833_v42 = vsel %vm3829_vm1, %v3827_v25, %v3831_v43  ;;  %v3414_v25 = vsel %vm3410_vm6, %v3408_v26, %v3412_v14  ;;  %vm4182_vm13 = vnez %v4180_v36 }
 0xc51   :  { %v4129_v35 = vmul.f32 %v9190_v41, %v3833_v42  ;;  %v3468_v57 = vadd.f32 %v8413_v11, %v3461_v44  ;;  %v4002_v44 = vmul.f32 %v9487_v27, %v3394_v16  ;;  %v3434_v42 = vsel %vm3430_vm7, %v3428_v59, %v3432_v33 }
 0xc52   :  { %v4008_v14 = vmul.f32 %v9489_v15, %v3414_v25  ;;  %v3631_v59 = vmul.f32 0.2, %v3627_v23  ;;  %v3667_v33 = vadd.f32 %v8617_v21, %v8423_v18  ;;  %v3651_v15 = vmul.f32 0.2, %v3647_v2 }
 0xc53   :  { %v4131_v62 = vadd.f32 %v4129_v35, %v4125_v1  ;;  %v3472_v45 = vmul.f32 0.2, %v3468_v57  ;;  %v9488_v35 = vstv %s8373_s28  ;;  %vm3470_vm8 = vcmp.ge.f32.partialorder %v3468_v57, 0.0  ;;  %s8674_s28 = sld [smem:[#allocation7 + $0x183]] }
 0xc54   :  { %v3998_v1 = vmul.f32 %v9488_v35, %v3374_v49  ;;  %v3454_v49 = vsel %vm3450_vm12, %v3448_v17, %v3452_v53  ;;  %vm3649_vm1 = vcmp.ge.f32.partialorder %v3647_v2, 0.0  ;;  %v4070_v17 = vstv %s8609_s15  ;;  %s9529_s15 = sld [smem:[#allocation51_spill]] }
 0xc55   :  { %v8599_v43 = vpop.permute.xlu0 %3560  ;;  %v8601_v7 = vpop.permute.xlu1 %3540  ;;  %v8613_v11 = vsel %vm8544_vm10, %v4131_v62, -1e+30  ;;  %v3474_v41 = vsel %vm3470_vm8, %v3468_v57, %v3472_v45  ;;  %v4020_v40 = vmul.f32 %v9491_v19, %v3454_v49  ;;  %v3633_v53 = vsel %vm3629_vm9, %v3627_v23, %v3631_v59 }
 0xc56   :  { %9486 = vst [vmem:[#allocation32_spill] sm:$0xff] %v8613_v11  ;;  %v4213_v26 = vsel %vm1181_vm2, %v8613_v11, -inf  ;;  %v4004_v27 = vadd.f32 %v4002_v44, %v3998_v1  ;;  %vm3669_vm4 = vcmp.ge.f32.partialorder %v3667_v33, 0.0  ;;  %v9492_v45 = vstv %s8427_s30  ;;  %s9525_s30 = sld [smem:[#allocation53_spill]] }
 0xc57   :  { %4214 = vmax.xlane.f32.xlu1 %v4213_v26  ;;  %v9490_v26 = vstv %s8405_s0  ;;  %v4026_v1 = vmul.f32 %v9492_v45, %v3474_v41  ;;  %v4184_v19 = vsel %vm4182_vm13, 16843009, %v9250_v8  ;;  %v4071_v23 = vmul.f32 %v4070_v17, %v3633_v53  ;;  %s8686_s0 = sld [smem:[#allocation7 + $0x185]] }
 0xc58   :  { %v4014_v35 = vmul.f32 %v9490_v26, %v3434_v42  ;;  %v4010_v24 = vadd.f32 %v4008_v14, %v4004_v27  ;;  %v4076_v27 = vstv %s8621_s10  ;;  %v3653_v26 = vsel %vm3649_vm1, %v3647_v2, %v3651_v15 }
 0xc59   :  { %v9493_v49 = vstv %s8445_s9  ;;  %v4082_v11 = vstv %s8636_s25  ;;  %v4186_v36 = vunpack.c.0.s8 %v4184_v19  ;;  %v8667_v8 = vrot.slane %v8323_v54, %v9309_v46 }
 0xc5a   :  { %v8631_v62 = vpop.permute.xlu0 %3580  ;;  %v3481_v16 = vpop.permute.xlu1 %3480  ;;  %v4016_v57 = vadd.f32 %v4014_v35, %v4010_v24  ;;  %v9494_v53 = vstv %s8460_s12  ;;  %v9518_v45 = vmov 0.0|0.0  }
 0xc5b   :  { %v3488_v25 = vadd.f32 %v8433_v50, %v3481_v16  ;;  %v3671_v50 = vmul.f32 0.2, %v3667_v33  ;;  %vm8678_vm6 = vcmp.ne.s32.totalorder %v4186_v36, 0 }
 0xc5c   :  { %v4022_v59 = vadd.f32 %v4020_v40, %v4016_v57  ;;  %v4073_v40 = vadd.f32 %v4071_v23, %v8319_v32  ;;  %v8700_v23 = vrot.slane %v8323_v54, %v9402_v47 }
 0xc5d   :  { %vm3490_vm11 = vcmp.ge.f32.partialorder %v3488_v25, 0.0  ;;  %v3492_v18 = vmul.f32 0.2, %v3488_v25  ;;  %v3673_v24 = vsel %vm3669_vm4, %v3667_v33, %v3671_v50  ;;  %v3907_v50 = vadd.f32 %v8667_v8, %v8457_v38 }
 0xc5f   :  { %v8647_v44 = vpop.permute.xlu0 %3680  ;;  %v3501_v42 = vpop.permute.xlu1 %3500  ;;  %v3494_v16 = vsel %vm3490_vm11, %v3488_v25, %v3492_v18  ;;  %v4077_v25 = vmul.f32 %v4076_v27, %v3653_v26  ;;  %v4083_v18 = vmul.f32 %v4082_v11, %v3673_v24  ;;  %vm3909_vm7 = vcmp.ge.f32.partialorder %v3907_v50, 0.0 }
 0xc60   :  { %v3508_v14 = vadd.f32 %v8451_v48, %v3501_v42  ;;  %v4032_v56 = vmul.f32 %v9493_v49, %v3494_v16  ;;  %v4028_v48 = vadd.f32 %v4026_v1, %v4022_v59  ;;  %v3528_v26 = vadd.f32 %v8242_v31, %v8588_v55 }
 0xc61   :  { %v4079_v46 = vadd.f32 %v4077_v25, %v4073_v40  ;;  %v8712_v31 = vrot.slane %v8323_v54, %v9403_v58  ;;  %v8716_v55 = vrot.slane %v8323_v54, %v9477_v52  ;;  %v3927_v49 = vadd.f32 %v8700_v23, %v8421_v30 }
 0xc62   :  { %vm3510_vm5 = vcmp.ge.f32.partialorder %v3508_v14, 0.0  ;;  %v3512_v41 = vmul.f32 0.2, %v3508_v14  ;;  %v4034_v33 = vadd.f32 %v4032_v56, %v4028_v48  ;;  %v3548_v56 = vadd.f32 %v8257_v12, %v8601_v7 }
 0xc63   :  { %v4085_v32 = vadd.f32 %v4083_v18, %v4079_v46  ;;  %v4150_v24 = vstv %s8674_s28  ;;  %v3947_v25 = vadd.f32 %v8712_v31, %v8535_v60  ;;  %v3532_v48 = vmul.f32 0.2, %v3528_v26 }
 0xc64   :  { %v8663_v35 = vpop.permute.xlu0 %3860  ;;  %v3601_v2 = vpop.permute.xlu1 %3600  ;;  %v3514_v15 = vsel %vm3510_vm5, %v3508_v14, %v3512_v41  ;;  %v3911_v14 = vmul.f32 0.2, %v3907_v50  ;;  %v3552_v47 = vmul.f32 0.2, %v3548_v56  ;;  %vm3550_vm12 = vcmp.ge.f32.partialorder %v3548_v56, 0.0 }
 0xc65   :  { %v4038_v42 = vmul.f32 %v9494_v53, %v3514_v15  ;;  %v8708_v7 = vsel %vm8544_vm10, %v4085_v32, -1e+30  ;;  %v3568_v58 = vadd.f32 %v8269_v20, %v8599_v43  ;;  %v4156_v52 = vstv %s8684_s3  ;;  %s9532_s3 = sld [smem:[#allocation55_spill]] }
 0xc66   :  { %v3913_v41 = vsel %vm3909_vm7, %v3907_v50, %v3911_v14  ;;  %v4207_v36 = vsel %vm1181_vm2, %v8708_v7, -inf  ;;  %vm3530_vm8 = vcmp.ge.f32.partialorder %v3528_v26, 0.0  ;;  %v4162_v15 = vstv %s8686_s0 }
 0xc67   :  { %v4040_v57 = vadd.f32 %v4038_v42, %v4034_v33  ;;  %v3967_v30 = vadd.f32 %v8716_v55, %v8559_v6  ;;  %v3554_v40 = vsel %vm3550_vm12, %v3548_v56, %v3552_v47  ;;  %v3588_v18 = vadd.f32 %v8287_v29, %v8631_v62 }
 0xc68   :  { %vm3929_vm9 = vcmp.ge.f32.partialorder %v3927_v49, 0.0  ;;  %v3931_v20 = vmul.f32 0.2, %v3927_v49  ;;  %v4151_v43 = vmul.f32 %v4150_v24, %v3913_v41  ;;  %v3951_v33 = vmul.f32 0.2, %v3947_v25 }
 0xc69   :  { %v8682_v1 = vpop.permute.xlu0 %3880  ;;  %v3621_v16 = vpop.permute.xlu1 %3620  ;;  %v8692_v38 = vsel %vm8678_vm6, %v4040_v57, -1e+30  ;;  %v3534_v50 = vsel %vm3530_vm8, %v3528_v26, %v3532_v48  ;;  %v3572_v57 = vmul.f32 0.2, %v3568_v58  ;;  %v3608_v6 = vadd.f32 %v8301_v37, %v3601_v2 }
 0xc6a   :  { %v4204_v19 = vsel %vm1181_vm2, %v8692_v38, -inf  ;;  %vm3570_vm11 = vcmp.ge.f32.partialorder %v3568_v58, 0.0  ;;  %v9497_v46 = vstv %s8249_s17  ;;  %vm3949_vm1 = vcmp.ge.f32.partialorder %v3947_v25, 0.0  ;;  %s8748_s17 = sld [smem:[#allocation7 + $0x187]] }
 0xc6b   :  { %4205 = vmax.xlane.f32.xlu0 %v4204_v19  ;;  %v4048_v29 = vmul.f32 %v9497_v46, %v3554_v40  ;;  %vm3969_vm4 = vcmp.ge.f32.partialorder %v3967_v30, 0.0  ;;  %v3592_v32 = vmul.f32 0.2, %v3588_v18  ;;  %v3628_v56 = vadd.f32 %v8596_v61, %v3621_v16 }
 0xc6c   :  { %v3971_v14 = vmul.f32 0.2, %v3967_v30  ;;  %v9498_v19 = vstv %s8246_s11  ;;  %vm3590_vm5 = vcmp.ge.f32.partialorder %v3588_v18, 0.0  ;;  %v3574_v2 = vsel %vm3570_vm11, %v3568_v58, %v3572_v57 }
 0xc6d   :  { %v4044_v47 = vmul.f32 %v9498_v19, %v3534_v50  ;;  %v3612_v41 = vmul.f32 0.2, %v3608_v6  ;;  %v9499_v48 = vstv %s8530_s22  ;;  %v3933_v16 = vsel %vm3929_vm9, %v3927_v49, %v3931_v20  ;;  %s9528_s22 = sld [smem:[#allocation49_spill]] }
 0xc6e   :  { %v8702_v59 = vpop.permute.xlu0 %3900  ;;  %v8704_v12 = vpop.permute.xlu1 %3700  ;;  %v3953_v40 = vsel %vm3949_vm1, %v3947_v25, %v3951_v33  ;;  %vm3610_vm7 = vcmp.ge.f32.partialorder %v3608_v6, 0.0  ;;  %v3594_v50 = vsel %vm3590_vm5, %v3588_v18, %v3592_v32  ;;  %v3632_v46 = vmul.f32 0.2, %v3628_v56 }
 0xc6f   :  { %4208 = vmax.xlane.f32.xlu0 %v4207_v36  ;;  %v8760_v58 = vrot.slane %v8323_v54, %v9419_v4  ;;  %v4168_v57 = vstv %s8737_s4  ;;  %vm3630_vm12 = vcmp.ge.f32.partialorder %v3628_v56, 0.0  ;;  %v4157_v25 = vmul.f32 %v4156_v52, %v3933_v16 }
 0xc70   :  { %v4163_v20 = vmul.f32 %v4162_v15, %v3953_v40 }
 0xc73   :  { %v3781_v60 = vpop.permute.xlu0 %3780  ;;  %v8733_v53 = vpop.permute.xlu1 %3840 }
 0xc74   :  { %v3788_v42 = vadd.f32 %v8522_v63, %v3781_v60  ;;  %v4050_v60 = vadd.f32 %v4048_v29, %v4044_v47  ;;  %v9501_v29 = vstv %s8276_s21  ;;  %v3634_v47 = vsel %vm3630_vm12, %v3628_v56, %v3632_v46 }
 0xc75   :  { %v4060_v32 = vmul.f32 %v9501_v29, %v3594_v50  ;;  %v4072_v40 = vmul.f32 %v4070_v17, %v3634_v47  ;;  %v3708_v29 = vadd.f32 %v8474_v10, %v8704_v12 }
 0xc76   :  { %vm3790_vm13 = vcmp.ge.f32.partialorder %v3788_v42, 0.0  ;;  %v3792_v62 = vmul.f32 0.2, %v3788_v42 }
 0xc77   :  { %v3712_v10 = vmul.f32 0.2, %v3708_v29 }
 0xc78   :  { %v3794_v63 = vsel %vm3790_vm13, %v3788_v42, %v3792_v62  ;;  %v8746_v26 = vpop.permute.xlu0 %3960  ;;  %v3641_v37 = vpop.permute.xlu1 %3640  ;;  %v4153_v42 = vadd.f32 %v4151_v43, %v8453_v9  ;;  %v3973_v62 = vsel %vm3969_vm4, %v3967_v30, %v3971_v14  ;;  %v3614_v9 = vsel %vm3610_vm7, %v3608_v6, %v3612_v41 }
 0xc79   :  { %v8752_v36 = vmul.f32 %v9499_v48, %v3794_v63  ;;  %v3648_v61 = vadd.f32 %v8607_v51, %v3641_v37  ;;  %v9500_v51 = vstv %s8262_s19  ;;  %v4169_v19 = vmul.f32 %v4168_v57, %v3973_v62 }
 0xc7a   :  { %v4054_v49 = vmul.f32 %v9500_v51, %v3574_v2  ;;  %v4159_v14 = vadd.f32 %v4157_v25, %v4153_v42  ;;  %v9502_v63 = vstv %s8292_s23  ;;  %v4174_v2 = vstv %s8748_s17 }
 0xc7b   :  { %v3652_v18 = vmul.f32 0.2, %v3648_v61  ;;  %vm3650_vm8 = vcmp.ge.f32.partialorder %v3648_v61, 0.0  ;;  %v4066_v37 = vmul.f32 %v9502_v63, %v3614_v9  ;;  %vm3710_vm4 = vcmp.ge.f32.partialorder %v3708_v29, 0.0 }
 0xc7c   :  { %v4056_v4 = vadd.f32 %v4054_v49, %v4050_v60  ;;  %v4165_v41 = vadd.f32 %v4163_v20, %v4159_v14 }
 0xc7d   :  { %v3977_v43 = vpop.permute.xlu0 %3976  ;;  %v3721_v33 = vpop.permute.xlu1 %3720  ;;  %v3654_v48 = vsel %vm3650_vm8, %v3648_v61, %v3652_v18 }
 0xc7e   :  { %v3987_v30 = vadd.f32 %v8760_v58, %v3977_v43  ;;  %v4062_v16 = vadd.f32 %v4060_v32, %v4056_v4  ;;  %v4171_v62 = vadd.f32 %v4169_v19, %v4165_v41  ;;  %v4078_v56 = vmul.f32 %v4076_v27, %v3654_v48 }
 0xc7f   :  { %v3688_v27 = vadd.f32 %v8466_v0, %v8647_v44  ;;  %v3868_v32 = vadd.f32 %v8345_v5, %v8663_v35  ;;  %v3728_v19 = vadd.f32 %v8481_v22, %v3721_v33  ;;  %v9503_v44 = vld [vmem:[#allocation39_spill] sm:$0xff]  ;;  %v9504_v35 = vld [vmem:[#allocation29_spill] sm:$0xff] }
 0xc80   :  { %vm3989_vm9 = vcmp.ge.f32.partialorder %v3987_v30, 0.0  ;;  %v3991_v6 = vmul.f32 0.2, %v3987_v30  ;;  %v4068_v49 = vadd.f32 %v4066_v37, %v4062_v16  ;;  %v3714_v37 = vsel %vm3710_vm4, %v3708_v29, %v3712_v10 }
 0xc81   :  { %vm3690_vm13 = vcmp.ge.f32.partialorder %v3688_v27, 0.0  ;;  %v3692_v0 = vmul.f32 0.2, %v3688_v27  ;;  %vm3870_vm1 = vcmp.ge.f32.partialorder %v3868_v32, 0.0  ;;  %v3872_v5 = vmul.f32 0.2, %v3868_v32 }
 0xc82   :  { %v3993_v60 = vsel %vm3989_vm9, %v3987_v30, %v3991_v6  ;;  %v3661_v50 = vpop.permute.xlu1 %3660  ;;  %v4074_v9 = vadd.f32 %v4072_v40, %v4068_v49  ;;  %v3848_v30 = vadd.f32 %v8341_v3, %v8733_v53  ;;  %v3888_v53 = vadd.f32 %v9504_v35, %v8682_v1 }
 0xc83   :  { %v4175_v51 = vmul.f32 %v4174_v2, %v3993_v60  ;;  %v3668_v42 = vadd.f32 %v8617_v21, %v3661_v50  ;;  %v3732_v63 = vmul.f32 0.2, %v3728_v19  ;;  %vm3730_vm7 = vcmp.ge.f32.partialorder %v3728_v19, 0.0 }
 0xc84   :  { %v4080_v21 = vadd.f32 %v4078_v56, %v4074_v9  ;;  %v3852_v3 = vmul.f32 0.2, %v3848_v30  ;;  %vm3850_vm5 = vcmp.ge.f32.partialorder %v3848_v30, 0.0  ;;  %v3694_v41 = vsel %vm3690_vm13, %v3688_v27, %v3692_v0 }
 0xc85   :  { %vm3670_vm11 = vcmp.ge.f32.partialorder %v3668_v42, 0.0  ;;  %v3672_v46 = vmul.f32 0.2, %v3668_v42  ;;  %v4177_v25 = vadd.f32 %v4175_v51, %v4171_v62  ;;  %v3874_v48 = vsel %vm3870_vm1, %v3868_v32, %v3872_v5 }
 0xc86   :  { %v3854_v16 = vsel %vm3850_vm5, %v3848_v30, %v3852_v3  ;;  %v3892_v40 = vmul.f32 0.2, %v3888_v53  ;;  %v3908_v1 = vadd.f32 %v8667_v8, %v8702_v59  ;;  %v3734_v60 = vsel %vm3730_vm7, %v3728_v19, %v3732_v63 }
 0xc87   :  { %v3674_v20 = vsel %vm3670_vm11, %v3668_v42, %v3672_v46  ;;  %v3741_v61 = vpop.permute.xlu1 %3740  ;;  %v8787_v18 = vsel %vm8544_vm10, %v4177_v25, -1e+30  ;;  %vm3890_vm8 = vcmp.ge.f32.partialorder %v3888_v53, 0.0  ;;  %v9506_v49 = vstv %s8329_s7  ;;  %s9523_s7 = sld [smem:[#allocation48_spill]] }
 0xc88   :  { %v4084_v17 = vmul.f32 %v4082_v11, %v3674_v20  ;;  %v4219_v43 = vsel %vm1181_vm2, %v8787_v18, -inf  ;;  %v3748_v12 = vadd.f32 %v9503_v44, %v3741_v61  ;;  %v4136_v56 = vmul.f32 %v9506_v49, %v3854_v16 }
 0xc89   :  { %4220 = vmax.xlane.f32.xlu1 %v4219_v43  ;;  %v9507_v25 = vstv %s8491_s26  ;;  %v9508_v20 = vstv %s8500_s2  ;;  %v9509_v59 = vstv %s8331_s20  ;;  %v3894_v43 = vsel %vm3890_vm8, %v3888_v53, %v3892_v40  ;;  %s9527_s2 = sld [smem:[#allocation50_spill]] }
 0xc8a   :  { %v4086_v4 = vadd.f32 %v4084_v17, %v4080_v21  ;;  %v3752_v6 = vmul.f32 0.2, %v3748_v12  ;;  %vm3750_vm12 = vcmp.ge.f32.partialorder %v3748_v12, 0.0  ;;  %v4090_v9 = vmul.f32 %v9507_v25, %v3694_v41 }
 0xc8b   :  { %v4100_v61 = vmul.f32 %v9508_v20, %v3734_v60  ;;  %v4140_v17 = vmul.f32 %v9509_v59, %v3874_v48  ;;  %v3912_v21 = vmul.f32 0.2, %v3908_v1  ;;  %vm3910_vm11 = vcmp.ge.f32.partialorder %v3908_v1, 0.0 }
 0xc8c   :  { %v3761_v14 = vpop.permute.xlu1 %3760  ;;  %v8803_v11 = vsel %vm8678_vm6, %v4086_v4, -1e+30  ;;  %v3754_v46 = vsel %vm3750_vm12, %v3748_v12, %v3752_v6  ;;  %v9513_v12 = vstv %s8377_s29  ;;  %v3968_v35 = vadd.f32 %v8716_v55, %v8746_v26 }
 0xc8d   :  { %v4210_v47 = vsel %vm1181_vm2, %v8803_v11, -inf  ;;  %v3768_v22 = vadd.f32 %v8508_v13, %v3761_v14  ;;  %v9505_v13 = vstv %s8483_s1  ;;  %v4142_v30 = vadd.f32 %v4140_v17, %v4136_v56 }
 0xc8e   :  { %4211 = vmax.xlane.f32.xlu0 %v4210_v47  ;;  %v4094_v51 = vmul.f32 %v9505_v13, %v3714_v37  ;;  %v9511_v47 = vstv %s8524_s16  ;;  %v4146_v5 = vmul.f32 %v9513_v12, %v3894_v43  ;;  %v3914_v3 = vsel %vm3910_vm11, %v3908_v1, %v3912_v21 }
 0xc8f   :  { %v3772_v50 = vmul.f32 0.2, %v3768_v22  ;;  %vm3770_vm9 = vcmp.ge.f32.partialorder %v3768_v22, 0.0  ;;  %v4152_v16 = vmul.f32 %v4150_v24, %v3914_v3  ;;  %vm3970_vm5 = vcmp.ge.f32.partialorder %v3968_v35, 0.0 }
 0xc90   :  { %v4096_v27 = vadd.f32 %v4094_v51, %v4090_v9  ;;  %v3972_v55 = vmul.f32 0.2, %v3968_v35  ;;  %v9514_v26 = vstv %s8552_s8 }
 0xc91   :  { %v3921_v33 = vpop.permute.xlu1 %3920  ;;  %v3774_v4 = vsel %vm3770_vm9, %v3768_v22, %v3772_v50 }
 0xc92   :  { %v3928_v42 = vadd.f32 %v8700_v23, %v3921_v33  ;;  %v9510_v23 = vstv %s8512_s6  ;;  %v4102_v19 = vadd.f32 %v4100_v61, %v4096_v27  ;;  %v4112_v0 = vmul.f32 %v9511_v47, %v3774_v4 }
 0xc93   :  { %v4106_v29 = vmul.f32 %v9510_v23, %v3754_v46  ;;  %v4148_v33 = vadd.f32 %v4146_v5, %v4142_v30  ;;  %v3974_v56 = vsel %vm3970_vm5, %v3968_v35, %v3972_v55 }
 0xc94   :  { %v3932_v32 = vmul.f32 0.2, %v3928_v42  ;;  %vm3930_vm13 = vcmp.ge.f32.partialorder %v3928_v42, 0.0 }
 0xc95   :  { %v4108_v53 = vadd.f32 %v4106_v29, %v4102_v19  ;;  %v4154_v50 = vadd.f32 %v4152_v16, %v4148_v33 }
 0xc96   :  { %v3941_v62 = vpop.permute.xlu1 %3940  ;;  %v3934_v63 = vsel %vm3930_vm13, %v3928_v42, %v3932_v32 }
 0xc97   :  { %v3948_v8 = vadd.f32 %v8712_v31, %v3941_v62  ;;  %v9512_v31 = vld [vmem:[#allocation28_spill] sm:$0xff]  ;;  %v4114_v37 = vadd.f32 %v4112_v0, %v4108_v53  ;;  %v4158_v40 = vmul.f32 %v4156_v52, %v3934_v63  ;;  %v9515_v52 = vstv %s8566_s27 }
 0xc99   :  { %v3952_v10 = vmul.f32 0.2, %v3948_v8  ;;  %vm3950_vm1 = vcmp.ge.f32.partialorder %v3948_v8, 0.0  ;;  %v4120_v42 = vadd.f32 %v8752_v36, %v4114_v37  ;;  %v4160_v62 = vadd.f32 %v4158_v40, %v4154_v50 }
 0xc9b   :  { %v3801_v14 = vpop.permute.xlu1 %3800  ;;  %v3954_v6 = vsel %vm3950_vm1, %v3948_v8, %v3952_v10 }
 0xc9c   :  { %v3808_v44 = vadd.f32 %v9512_v31, %v3801_v14  ;;  %v4164_v13 = vmul.f32 %v4162_v15, %v3954_v6  ;;  %v4170_v15 = vmul.f32 %v4168_v57, %v3974_v56  ;;  %v9516_v14 = vld [vmem:[#allocation32_spill] sm:$0xff] }
 0xc9e   :  { %vm3810_vm4 = vcmp.ge.f32.partialorder %v3808_v44, 0.0  ;;  %v3812_v22 = vmul.f32 0.2, %v3808_v44  ;;  %v4166_v9 = vadd.f32 %v4164_v13, %v4160_v62 }
 0xca0   :  { %v3814_v41 = vsel %vm3810_vm4, %v3808_v44, %v3812_v22  ;;  %v3821_v48 = vpop.permute.xlu1 %3820  ;;  %v4172_v43 = vadd.f32 %v4170_v15, %v4166_v9 }
 0xca1   :  { %v3828_v1 = vadd.f32 %v8576_v39, %v3821_v48  ;;  %v4124_v60 = vmul.f32 %v9514_v26, %v3814_v41 }
 0xca3   :  { %vm3830_vm7 = vcmp.ge.f32.partialorder %v3828_v1, 0.0  ;;  %v3832_v51 = vmul.f32 0.2, %v3828_v1  ;;  %v4126_v25 = vadd.f32 %v4124_v60, %v4120_v42 }
 0xca5   :  { %v3834_v49 = vsel %vm3830_vm7, %v3828_v1, %v3832_v51  ;;  %v3981_v24 = vpop.permute.xlu1 %3980 }
 0xca6   :  { %v4130_v46 = vmul.f32 %v9515_v52, %v3834_v49  ;;  %v3988_v39 = vadd.f32 %v8760_v58, %v3981_v24 }
 0xca8   :  { %vm3990_vm12 = vcmp.ge.f32.partialorder %v3988_v39, 0.0  ;;  %v3992_v20 = vmul.f32 0.2, %v3988_v39  ;;  %v4132_v61 = vadd.f32 %v4130_v46, %v4126_v25 }
 0xcaa   :  { %v3994_v8 = vsel %vm3990_vm12, %v3988_v39, %v3992_v20  ;;  %v4198_v59 = vsel %vm8678_vm6, %v4132_v61, -1e+30 }
 0xcab   :  { %v4176_v36 = vmul.f32 %v4174_v2, %v3994_v8  ;;  %v4216_v17 = vsel %vm1181_vm2, %v4198_v59, -inf }
 0xcac   :  { %4217 = vmax.xlane.f32.xlu0 %v4216_v17 }
 0xcad   :  { %v4178_v21 = vadd.f32 %v4176_v36, %v4172_v43 }
 0xcaf   :  { %v4200_v58 = vsel %vm8678_vm6, %v4178_v21, -1e+30  ;;  %v9519_v21 = vld [vmem:[#allocation26_spill] sm:$0xff] }
 0xcb0   :  { %v4222_v4 = vsel %vm1181_vm2, %v4200_v58, -inf }
 0xcb1   :  { %4223 = vmax.xlane.f32.xlu0 %v4222_v4  ;;  %v9520_v4 = vmov 0.0  }
 0xcd7   :  { %v4203_v27 = vpop.xlane.xlu1 %4202 }
 0xcd8   :  { %v4225_v57 = vsub.f32 %v8563_v28, %v4203_v27 }
 0xcda   :  { %v4233_v23 = vmul.f32 1.442695, %v4225_v57 }
 0xcdc   :  { %5985 = vpow2.f32 %v4233_v23 }
 0xce4   :  { %v4215_v30 = vpop.xlane.xlu1 %4214 }
 0xce5   :  { %v4229_v19 = vsub.f32 %v9516_v14, %v4215_v30 }
 0xce6   :  { %v5986_v29 = vpop.eup %5985 }
 0xce7   :  { %v8862_v2 = vsel %vm8544_vm10, %v5986_v29, 0.0  ;;  %v4241_v31 = vmul.f32 1.442695, %v4229_v19 }
 0xce8   :  { %v4257_v32 = vsel %vm1181_vm2, %v8862_v2, 0.0 }
 0xce9   :  { %4258 = vadd.xlane.f32.xlu1 %v4257_v32 }
 0xcf8   :  { %v4206_v47 = vpop.xlane.xlu0 %4205 }
 0xcf9   :  { %v4226_v0 = vsub.f32 %v8692_v38, %v4206_v47  ;;  %v9521_v47 = vld [vmem:[#allocation12_spill] sm:$0xff] }
 0xcfb   :  { %v4235_v10 = vmul.f32 1.442695, %v4226_v0 }
 0xcfc   :  { %v4209_v28 = vpop.xlane.xlu0 %4208 }
 0xcfd   :  { %5987 = vpow2.f32 %v4235_v10  ;;  %v4227_v44 = vsub.f32 %v8708_v7, %v4209_v28 }
 0xcfe   :  { %5989 = vpow2.f32 %v4241_v31 }
 0xcff   :  { %v4237_v12 = vmul.f32 1.442695, %v4227_v44 }
 0xd01   :  { %5991 = vpow2.f32 %v4237_v12 }
 0xd07   :  { %v5988_v5 = vpop.eup %5987 }
 0xd08   :  { %v4250_v3 = vsel %vm8678_vm6, %v5988_v5, 0.0  ;;  %v5990_v53 = vpop.eup %5989 }
 0xd09   :  { %v4260_v35 = vsel %vm1181_vm2, %v4250_v3, 0.0  ;;  %v8877_v7 = vsel %vm8544_vm10, %v5990_v53, 0.0 }
 0xd0a   :  { %4261 = vadd.xlane.f32.xlu0 %v4260_v35  ;;  %v4269_v33 = vsel %vm1181_vm2, %v8877_v7, 0.0 }
 0xd0b   :  { %v5992_v63 = vpop.eup %5991 }
 0xd0c   :  { %v4251_v38 = vsel %vm8544_vm10, %v5992_v63, 0.0 }
 0xd0d   :  { %v4263_v22 = vsel %vm1181_vm2, %v4251_v38, 0.0 }
 0xd0e   :  { %4264 = vadd.xlane.f32.xlu1 %v4263_v22 }
 0xd12   :  { %4270 = vadd.xlane.f32.xlu1 %v4269_v33 }
 0xd16   :  { %v4221_v37 = vpop.xlane.xlu1 %4220 }
 0xd17   :  { %v4231_v6 = vsub.f32 %v8787_v18, %v4221_v37 }
 0xd19   :  { %v4245_v41 = vmul.f32 1.442695, %v4231_v6 }
 0xd1b   :  { %5993 = vpow2.f32 %v4245_v41  ;;  %v4212_v48 = vpop.xlane.xlu0 %4211 }
 0xd1c   :  { %v4228_v16 = vsub.f32 %v8803_v11, %v4212_v48  ;;  %v9522_v48 = vld [vmem:[#allocation37_spill] sm:$0xff] }
 0xd1e   :  { %v4239_v40 = vmul.f32 1.442695, %v4228_v16  ;;  %v4976_v16 = vld [vmem:[%s9000_s18] sm:$0xff] }
 0xd20   :  { %5995 = vpow2.f32 %v4239_v40  ;;  %v5057_v40 = vld [vmem:[#allocation2] sm:$0x1] }
 0xd25   :  { %v5994_v1 = vpop.eup %5993 }
 0xd26   :  { %v8885_v55 = vsel %vm8544_vm10, %v5994_v1, 0.0 }
 0xd27   :  { %v4275_v26 = vsel %vm1181_vm2, %v8885_v55, 0.0 }
 0xd28   :  { %4276 = vadd.xlane.f32.xlu1 %v4275_v26 }
 0xd2a   :  { %v5996_v60 = vpop.eup %5995 }
 0xd2b   :  { %v4252_v18 = vsel %vm8678_vm6, %v5996_v60, 0.0 }
 0xd2c   :  { %v4266_v50 = vsel %vm1181_vm2, %v4252_v18, 0.0 }
 0xd2d   :  { %4267 = vadd.xlane.f32.xlu0 %v4266_v50 }
 0xd39   :  { %v4218_v13 = vpop.xlane.xlu0 %4217 }
 0xd3a   :  { %v4230_v11 = vsub.f32 %v4198_v59, %v4218_v13 }
 0xd3c   :  { %v4243_v51 = vmul.f32 1.442695, %v4230_v11 }
 0xd3e   :  { %5997 = vpow2.f32 %v4243_v51  ;;  %v4224_v42 = vpop.xlane.xlu0 %4223 }
 0xd3f   :  { %v4232_v62 = vsub.f32 %v4200_v58, %v4224_v42 }
 0xd41   :  { %v4247_v34 = vmul.f32 1.442695, %v4232_v62 }
 0xd43   :  { %5999 = vpow2.f32 %v4247_v34 }
 0xd48   :  { %v5998_v49 = vpop.eup %5997 }
 0xd49   :  { %v4254_v24 = vsel %vm8678_vm6, %v5998_v49, 0.0 }
 0xd4a   :  { %v4272_v56 = vsel %vm1181_vm2, %v4254_v24, 0.0 }
 0xd4b   :  { %4273 = vadd.xlane.f32.xlu0 %v4272_v56 }
 0xd4d   :  { %v6000_v52 = vpop.eup %5999 }
 0xd4e   :  { %v4256_v46 = vsel %vm8678_vm6, %v6000_v52, 0.0 }
 0xd4f   :  { %v4278_v39 = vsel %vm1181_vm2, %v4256_v46, 0.0 }
 0xd50   :  { %4279 = vadd.xlane.f32.xlu0 %v4278_v39 }
 0xd76   :  { %v4259_v25 = vpop.xlane.xlu1 %4258 }
 0xd77   :  { %v4281_v9 = vmax.f32 %v4259_v25, 1e-30 }
 0xd79   :  { %6001 = vrcp.f32 %v4281_v9 }
 0xd83   :  { %v6002_v15 = vpop.eup %6001 }
 0xd84   :  { %v4290_v59 = vmul.f32 %v6002_v15, %v8862_v2 }
 0xd97   :  { %v4262_v20 = vpop.xlane.xlu0 %4261 }
 0xd98   :  { %v4282_v61 = vmax.f32 %v4262_v20, 1e-30 }
 0xd9a   :  { %6003 = vrcp.f32 %v4282_v61 }
 0xd9b   :  { %v4265_v58 = vpop.xlane.xlu1 %4264 }
 0xd9c   :  { %v4283_v27 = vmax.f32 %v4265_v58, 1e-30  ;;  %v4645_v58 = vld [vmem:[%s9523_s7] sm:$0xff] }
 0xd9e   :  { %6005 = vrcp.f32 %v4283_v27  ;;  %v9524_v27 = vld [vmem:[#allocation13_spill] sm:$0xff] }
 0xd9f   :  { %v4271_v19 = vpop.xlane.xlu1 %4270 }
 0xda0   :  { %v4285_v0 = vmax.f32 %v4271_v19, 1e-30  ;;  %v4895_v19 = vld [vmem:[%s9527_s2] sm:$0xff] }
 0xda1   :  { %4898 = vperm.xlu0 %5904, %v4895_v19  }
 0xda4   :  { %v6004_v8 = vpop.eup %6003 }
 0xda5   :  { %v4292_v36 = vmul.f32 %v6004_v8, %v4250_v3 }
 0xda7   :  { %v5642_v17 = vpack.c.bf16 %v4292_v36, %v4290_v59 }
 0xda8   :  { %v6006_v29 = vpop.eup %6005 }
 0xda9   :  { %5644 = vmatpush3.bf16.xpose.msk.msra.mxu1 %vm7131_vm14, %v5642_v17  ;;  %v4294_v32 = vmul.f32 %v6006_v29, %v4251_v38  ;;  %v5317_v29 = vld [vmem:[%s9526_s5] ss:$0 sm:$0xff] }
 0xdaa   :  { %5645 = vmatprep.subr.bf16.mxu1 %v9518_v45  ;;  %vm4744_vm13 = vcmp.eq.s32.totalorder %v9524_v27, %v5317_v29 }
 0xdb0   :  { %5530 = vmatmul.mubr.msk.f32.vlgmr.msra.gmra.mrb[12].mxu1 %vm1181_vm2, %v9519_v21 }
 0xdb1   :  { %5536 = vmatprep.mubr.msk.f32.mxu1 %vm6101_vm3, %v9520_v4 }
 0xdb5   :  { %v4277_v10 = vpop.xlane.xlu1 %4276 }
 0xdb6   :  { %v4287_v44 = vmax.f32 %v4277_v10, 1e-30 }
 0xdba   :  { %v4268_v57 = vpop.xlane.xlu0 %4267 }
 0xdbb   :  { %v4284_v23 = vmax.f32 %v4268_v57, 1e-30  ;;  %v4727_v57 = vadd.s32 8, %v9524_v27 }
 0xdbd   :  { %6007 = vrcp.f32 %v4284_v23  ;;  %v5314_v23 = vld [vmem:[%s9525_s30] ss:$0 sm:$0xff]  ;;  %vm4745_vm1 = vcmp.eq.s32.totalorder %v4727_v57, %v5317_v29 }
 0xdbe   :  { %6009 = vrcp.f32 %v4285_v0  ;;  %vm4733_vm9 = vcmp.eq.s32.totalorder %v9524_v27, %v5314_v23  ;;  %vm4734_vm11 = vcmp.eq.s32.totalorder %v4727_v57, %v5314_v23  ;;  %vm5667_vm4 = vmpackc.low %vm4745_vm1, %vm4744_vm13 }
 0xdc7   :  { %v6008_v2 = vpop.eup %6007 }
 0xdc8   :  { %v4296_v30 = vmul.f32 %v6008_v2, %v4252_v18  ;;  %v6010_v3 = vpop.eup %6009 }
 0xdc9   :  { %v4298_v53 = vmul.f32 %v6010_v3, %v8877_v7  ;;  %v4646_v7 = vld [vmem:[%s8996_s14] sm:$0xff] }
 0xdca   :  { %v5646_v14 = vpack.c.bf16 %v4296_v30, %v4294_v32  ;;  %4649 = vperm.xlu1 %5903, %v4646_v7  }
 0xdcc   :  { %5648 = vmatpush3.bf16.xpose.msk.msra.mxu1 %vm7131_vm14, %v5646_v14 }
 0xdcd   :  { %5653 = vmatprep.subr.bf16.mxu1 %v9518_v45 }
 0xdce   :  { %4979 = vperm.xlu1 %5903, %v4976_v16  }
 0xdd2   :  { %5060 = vperm.xlu1 %5903, %v5057_v40  }
 0xdd3   :  { %5537 = vmatmul.mubr.msk.f32.vlgmr.msra.gmra.mrb[14].mxu1 %vm1181_vm2, %v9521_v47 }
 0xdd4   :  { %5550 = vmatprep.mubr.msk.f32.mxu1 %vm6101_vm3, %v9520_v4 }
 0xdd8   :  { %v4274_v31 = vpop.xlane.xlu0 %4273 }
 0xdd9   :  { %v4286_v28 = vmax.f32 %v4274_v31, 1e-30 }
 0xddb   :  { %6011 = vrcp.f32 %v4286_v28 }
 0xddc   :  { %6013 = vrcp.f32 %v4287_v44  ;;  %v4894_v44 = vld [vmem:[%s9528_s22] sm:$0xff] }
 0xddd   :  { %v4280_v12 = vpop.xlane.xlu0 %4279 }
 0xdde   :  { %v4288_v5 = vmax.f32 %v4280_v12, 1e-30 }
 0xde0   :  { %6015 = vrcp.f32 %v4288_v5 }
 0xde5   :  { %v6012_v35 = vpop.eup %6011 }
 0xde6   :  { %v4300_v63 = vmul.f32 %v6012_v35, %v4254_v24  ;;  %v6014_v38 = vpop.eup %6013 }
 0xde7   :  { %v4302_v37 = vmul.f32 %v6014_v38, %v8885_v55 }
 0xde8   :  { %v5650_v22 = vpack.c.bf16 %v4300_v63, %v4298_v53  ;;  %v4975_v63 = vld [vmem:[%s9529_s15] sm:$0xff] }
 0xdea   :  { %v6016_v33 = vpop.eup %6015  ;;  %5652 = vmatpush3.bf16.xpose.msk.msra.mxu0 %vm7131_vm14, %v5650_v22 }
 0xdeb   :  { %v4304_v6 = vmul.f32 %v6016_v33, %v4256_v46  ;;  %5657 = vmatprep.subr.bf16.mxu0 %v9518_v45 }
 0xded   :  { %v5654_v41 = vpack.c.bf16 %v4304_v6, %v4302_v37 }
 0xdef   :  { %5656 = vmatpush3.bf16.xpose.msk.msra.mxu1 %vm7131_vm14, %v5654_v41 }
 0xdf0   :  { %5663 = vmatprep.subr.bf16.mxu1 %v9518_v45 }
 0xdf1   :  { %5544 = vmatmul.mubr.msk.f32.vlgmr.msra.gmra.mrb[28].mxu0 %vm1181_vm2, %v9522_v48  ;;  %v9531_v48 = vld [vmem:[#allocation30_spill] sm:$0xff] }
 0xdf2   :  { %5561 = vmatprep.mubr.msk.f32.mxu0 %vm6101_vm3, %v9520_v4 }
 0xdf6   :  { %5551 = vmatmul.mubr.msk.f32.vlgmr.msra.gmra.mrb[16].mxu1 %vm1181_vm2, %v8323_v54 }
 0xdf7   :  { %5568 = vmatprep.mubr.msk.f32.mxu1 %vm6101_vm3, %v9520_v4 }
 0xe20   :  { %v4899_v12 = vpop.permute.xlu0 %4898 }
 0xe49   :  { %v4650_v2 = vpop.permute.xlu1 %4649 }
 0xe4d   :  { %v4980_v38 = vpop.permute.xlu1 %4979 }
 0xe51   :  { %v5061_v41 = vpop.permute.xlu1 %5060 }
 0xe52   :  { %v5066_v7 = vrot.slane %v5061_v41, %v9531_v48 }
 0xe83   :  { %v4380_v1 = vpop.f32.mrb[12].mxu1 }
 0xe84   :  { %v5531_v55 = vpop.f32.mrb[13].mxu1  ;;  %v4625_v26 = vmin.f32 %v4380_v1, 0.0  ;;  %vm4621_vm14 = vcmp.gt.f32.partialorder %v4380_v1, 0.0 }
 0xe86   :  { %v4629_v60 = vmul.f32 1.442695, %v4625_v26 }
 0xe88   :  { %6017 = vpow2.f32 %v4629_v60 }
 0xe92   :  { %v6018_v11 = vpop.eup %6017 }
 0xe93   :  { %v5309_v51 = vadd.f32 -1.0, %v6018_v11 }
 0xe95   :  { %v4641_v34 = vsel %vm4621_vm14, %v4380_v1, %v5309_v51 }
 0xea6   :  { %v4459_v54 = vpop.f32.mrb[14].mxu1 }
 0xea7   :  { %v4626_v18 = vmin.f32 %v4459_v54, 0.0  ;;  %v5538_v50 = vpop.f32.mrb[15].mxu1  ;;  %vm4622_vm10 = vcmp.gt.f32.partialorder %v4459_v54, 0.0 }
 0xea9   :  { %v4631_v13 = vmul.f32 1.442695, %v4626_v18 }
 0xeab   :  { %6019 = vpow2.f32 %v4631_v13 }
 0xeb5   :  { %v6020_v42 = vpop.eup %6019 }
 0xeb6   :  { %v5310_v62 = vadd.f32 -1.0, %v6020_v42 }
 0xeb8   :  { %v4642_v49 = vsel %vm4622_vm10, %v4459_v54, %v5310_v62 }
 0xeb9   :  { %v5658_v24 = vpack.c.bf16 %v4642_v49, %v4641_v34 }
 0xebb   :  { %5659 = vmatpush3.bf16.msra.mxu0 %v5658_v24 }
 0xebc   :  { %5660 = vmatprep.subr.bf16.mxu0 %v9518_v45 }
 0xec4   :  { %v4538_v56 = vpop.f32.mrb[28].mxu0 }
 0xec5   :  { %v4627_v52 = vmin.f32 %v4538_v56, 0.0  ;;  %v5545_v46 = vpop.f32.mrb[29].mxu0  ;;  %vm4623_vm6 = vcmp.gt.f32.partialorder %v4538_v56, 0.0 }
 0xec7   :  { %v4633_v39 = vmul.f32 1.442695, %v4627_v52 }
 0xec9   :  { %v4617_v25 = vpop.f32.mrb[16].mxu1  ;;  %6021 = vpow2.f32 %v4633_v39 }
 0xeca   :  { %v4628_v9 = vmin.f32 %v4617_v25, 0.0  ;;  %v5552_v20 = vpop.f32.mrb[17].mxu1  ;;  %vm4624_vm8 = vcmp.gt.f32.partialorder %v4617_v25, 0.0 }
 0xecc   :  { %v4635_v61 = vmul.f32 1.442695, %v4628_v9 }
 0xece   :  { %6023 = vpow2.f32 %v4635_v61 }
 0xed3   :  { %v6022_v15 = vpop.eup %6021 }
 0xed4   :  { %v5311_v8 = vadd.f32 -1.0, %v6022_v15 }
 0xed6   :  { %v4643_v17 = vsel %vm4623_vm6, %v4538_v56, %v5311_v8 }
 0xed8   :  { %v6024_v59 = vpop.eup %6023 }
 0xed9   :  { %v5312_v36 = vadd.f32 -1.0, %v6024_v59 }
 0xedb   :  { %v4644_v43 = vsel %vm4624_vm8, %v4617_v25, %v5312_v36 }
 0xedc   :  { %v5661_v21 = vpack.c.bf16 %v4644_v43, %v4643_v17 }
 0xede   :  { %5662 = vmatpush3.bf16.msra.mxu0 %v5661_v21 }
 0xedf   :  { %5666 = vmatprep.subr.bf16.mxu0 %v9518_v45  ;;  %v6103_v45 = vmov 1.0|1.0  }
 0xee1   :  { %5562 = vmatmul.mubr.msk.f32.vlgmr.msra.gmra.mrb[30].mxu0 %vm1682_vm15, %v4645_v58  ;;  %vm5664_vm15 = vmpackc.low %vm4734_vm11, %vm4733_vm9 }
 0xee2   :  { %5575 = vmatprep.mubr.msk.f32.mxu0 %vm6101_vm3, %v9520_v4  ;;  %5665 = vmatpush3.bf16.msk.msra.mxu1 %vm5664_vm15, %v6103_v45 }
 0xee3   :  { %5668 = vmatpush3.bf16.msk.msra.mxu0 %vm5667_vm4, %v6103_v45  ;;  %5578 = vmatprep.subr.mxu1 %v9520_v4 }
 0xee4   :  { %5583 = vmatprep.subr.mxu0 %v9520_v4 }
 0xfb4   :  { %v4721_v32 = vpop.f32.mrb[30].mxu0 }
 0xfb5   :  { %v4722_v30 = vadd.f32 %v4721_v32, %v4650_v2  ;;  %v5563_v14 = vpop.f32.mrb[31].mxu0 }
 0xfb7   :  { %5569 = vmatmul.mubr.msk.f32.vlgmr.msra.gmra.mrb[18].mxu1 %vm1181_vm2, %v4722_v30  ;;  %5576 = vmatmul.mubr.msk.f32.vlgmr.msra.gmra.mrb[32].mxu0 %vm1181_vm2, %v4722_v30  ;;  %vm5140_vm2 = vcmask 122880  }
 0xfb8   :  { %5580 = vmatprep.mubr.msk.f32.mxu1 %vm6101_vm3, %v9520_v4  ;;  %5585 = vmatprep.mubr.msk.f32.mxu0 %vm6101_vm3, %v9520_v4 }
0x108a   :  { %v4819_v47 = vpop.f32.mrb[18].mxu1  ;;  %v4889_v0 = vpop.f32.mrb[32].mxu0 }
0x108b   :  { %v4893_v10 = vmul.f32 %v4889_v0, %v4819_v47  ;;  %v5570_v31 = vpop.f32.mrb[19].mxu1  ;;  %v5577_v28 = vpop.f32.mrb[33].mxu0 }
0x108d   :  { %5579 = vmatpush3.msra.mxu1 %v4893_v10 }
0x108e   :  { %5581 = vmatmul.mubr.msk.f32.vlgmr.msra.gmra.mrb[20].mxu1 %vm171_vm0, %v4894_v44  ;;  %5588 = vmatprep.subr.mxu1 %v9520_v4 }
0x108f   :  { %5590 = vmatprep.mubr.msk.f32.mxu1 %vm6101_vm3, %v9520_v4  ;;  %v5056_v4 = vld [vmem:[%s9530_s24] sm:$0x1] }
0x1161   :  { %v4970_v5 = vpop.f32.mrb[20].mxu1 }
0x1162   :  { %v4971_v3 = vadd.f32 %v4970_v5, %v4899_v12  ;;  %v5582_v35 = vpop.f32.mrb[21].mxu1 }
0x1164   :  { %v4974_v53 = vmax.f32 %v4971_v3, 0.0 }
0x1166   :  { %5584 = vmatpush3.msra.mxu0 %v4974_v53 }
0x1167   :  { %5586 = vmatmul.mubr.msk.f32.vlgmr.msra.gmra.mrb[34].mxu0 %vm171_vm0, %v4975_v63 }
0x123a   :  { %v5051_v22 = vpop.f32.mrb[34].mxu0 }
0x123b   :  { %v5052_v33 = vadd.f32 %v5051_v22, %v4980_v38  ;;  %v5587_v37 = vpop.f32.mrb[35].mxu0 }
0x123d   :  { %v5055_v6 = vmax.f32 %v5052_v33, 0.0 }
0x123f   :  { %5589 = vmatpush3.msra.mxu1 %v5055_v6 }
0x1240   :  { %5591 = vmatmul.mubr.msk.f32.vlgmr.msra.gmra.mrb[22].mxu1 %vm171_vm0, %v5056_v4 }
0x1313   :  { %v5136_v16 = vpop.f32.mrb[22].mxu1 }
0x1314   :  { %v5137_v40 = vadd.f32 %v5136_v16, %v5066_v7  ;;  %v5592_v1 = vpop.f32.mrb[23].mxu1 }
0x1316   :  { %5141 = vst.msk [vmem:[%s9532_s3] sm:$0x1] %vm5140_vm2, %v5137_v40 }
0x1317   :  { %5146 = vsyncpa [#allocation4], 1 }
0x1318   :  { %5147 = vsyncpa [#allocation6], 1 }

</bundles_post_ra>
